<compile_context>
chip_gen: v6e
topology: v6e:2x2x1
jax: 0.10.0
libtpu: 0.0.40
codegen_flags: <defaults>
</compile_context>

<pallas_src>
import math

import jax
import jax.numpy as jnp
import numpy as np
from jax.experimental import pallas as pl
from jax.experimental.pallas import tpu as pltpu


# ----------------------------------------------------------------------------
# Pallas kernel: one grid step = one chunk of Tc time steps for the whole batch.
# ----------------------------------------------------------------------------
def _stfgrn_kernel(x_ref, h0_ref, sup_ref, wg_ref, wc_ref, bg_ref, bc_ref, e_ref,
                   out_ref, state_ref):
    c = pl.program_id(0)                      # time-chunk index (sequential)
    t_chunk = x_ref.shape[0]
    kn, n = sup_ref.shape                     # ((K-1)*N, N)
    km1 = kn // n                             # number of non-identity supports
    bn, hidden = state_ref.shape
    batch = bn // n
    emb = e_ref.shape[-1]

    # Load the initial hidden state at the very first chunk.  Correctness relies on
    # the grid running sequentially ("arbitrary"): the recurrent state persists in
    # the VMEM scratch across grid steps.
    @pl.when(c == 0)
    def _():
        state_ref[...] = h0_ref[...].astype(jnp.float32)

    # Grid-invariant operands: loaded once per chunk, hoisted out of the time loop.
    sup = sup_ref[...].astype(jnp.float32)            # [(K-1)*N, N]
    wg = wg_ref[...].astype(jnp.float32)              # [EMB*K*F, 2H]
    wc = wc_ref[...].astype(jnp.float32)              # [EMB*K*F, H]
    bg = bg_ref[...].astype(jnp.float32)              # [B*N, 2H]
    bc = bc_ref[...].astype(jnp.float32)              # [B*N, H]
    e_cols = [e_ref[:, d:d + 1].astype(jnp.float32) for d in range(emb)]  # EMB x [B*N,1]

    def graph_conv_all(feat):
        # All K-1 non-identity supports at once: one [(K-1)*N, N] x [N, F] MXU
        # matmul per batch element (rows of `feat` are batch-major (b, n)).
        per_b = [jnp.dot(sup, feat[b * n:(b + 1) * n, :],
                         preferred_element_type=jnp.float32)
                 for b in range(batch)]                                    # [(K-1)*N, F]
        return [jnp.concatenate([pb[k * n:(k + 1) * n, :] for pb in per_b], axis=0)
                for k in range(km1)]                                       # (K-1) x [B*N, F]

    def pooled_gcn(g_per_k, w, b):
        # out[(b,n), o] = sum_{d,k,f} E[n,d] * g_k[(b,n), f] * pool[(d,k,f), o]
        # Build Q with lanes in (d, k, f) order (matches the plain reshape of the
        # [EMB, K, F, O] pool) and hit the MXU once with the flattened pool.
        gcat = jnp.concatenate(g_per_k, axis=1)                            # [B*N, K*F]
        q = jnp.concatenate([gcat * ec for ec in e_cols], axis=1)          # [B*N, EMB*K*F]
        return jnp.dot(q, w, preferred_element_type=jnp.float32) + b

    h = state_ref[...]                                                     # [B*N, H]
    # Static unrolled time loop (equivalent to lax.fori_loop(..., unroll=True)):
    # Tc is small, indices are static, and the carry stays live in vregs.
    for j in range(t_chunk):
        x_t = x_ref[j].astype(jnp.float32)                                 # [B*N, Din]

        # ---- fused gate GCN: [z | r] = sigmoid(GCN([x, h])) -----------------
        cat_xh = jnp.concatenate([x_t, h], axis=1)                         # k == 0: identity
        zr = jax.nn.sigmoid(pooled_gcn([cat_xh] + graph_conv_all(cat_xh), wg, bg))
        z = zr[:, :hidden]
        r = zr[:, hidden:]

        # ---- candidate GCN: hc = tanh(GCN([x, z*h])) ------------------------
        cat_xzh = jnp.concatenate([x_t, z * h], axis=1)
        hc = jnp.tanh(pooled_gcn([cat_xzh] + graph_conv_all(cat_xzh), wc, bc))

        h = r * h + (1.0 - r) * hc
        # Accumulate Tc steps in the resident output block; HBM writeback happens
        # once per chunk as a single contiguous DMA.
        out_ref[j] = h.astype(out_ref.dtype)

    state_ref[...] = h


# ----------------------------------------------------------------------------
# Glue: supports + flattened embedding pools (plain JAX), then run the kernel.
# ----------------------------------------------------------------------------
def _build_supports(adj, node_embeddings, cheb_k, dtype):
    nnode = node_embeddings.shape[0]
    e = node_embeddings
    a_adp = jax.nn.softmax(jax.nn.relu(e @ e.T), axis=1)
    support_set = [jnp.eye(nnode, dtype=dtype), a_adp.astype(dtype)]
    if cheb_k >= 3:
        support_set.append(adj.astype(dtype))
    for _ in range(3, cheb_k):
        support_set.append(2.0 * a_adp @ support_set[-1] - support_set[-2])
    return jnp.stack(support_set[:cheb_k], axis=0)                         # [K, N, N]


def stfgrn_forward(x, init_state, adj, node_embeddings, params, cheb_k):
    B, T, N, Din = x.shape
    H = init_state.shape[-1]
    EMB = node_embeddings.shape[-1]
    F = Din + H
    K = cheb_k
    assert x.shape[2] == N and x.shape[3] == Din
    assert K >= 2, "need at least the identity + adaptive supports"

    supports = _build_supports(adj, node_embeddings, K, jnp.float32)       # [K, N, N]
    sup_stk = supports[1:].reshape((K - 1) * N, N)                         # non-identity, stacked

    # Flatten the embedding-indexed pools to [(d, k, f), o] (natural row order of
    # the [EMB, K, F, O] parameter) so the per-node contraction is one shared MXU
    # matmul inside the kernel.
    wg_flat = params['wpool_gate'].reshape(EMB * K * F, 2 * H)
    wc_flat = params['wpool_cand'].reshape(EMB * K * F, H)
    bg = jnp.tile(node_embeddings @ params['bpool_gate'], (B, 1))          # [B*N, 2H]
    bc = jnp.tile(node_embeddings @ params['bpool_cand'], (B, 1))          # [B*N, H]
    e_bn = jnp.tile(node_embeddings, (B, 1))                               # [B*N, EMB]

    # Row-stacked (batch-major) node layout: one time step handles the whole batch.
    x_steps = jnp.transpose(x, (1, 0, 2, 3)).reshape(T, B * N, Din)
    h0 = init_state.reshape(B * N, H)

    t_chunk = math.gcd(T, 4)                  # Tc steps per grid step / per writeback
    grid = (T // t_chunk,)

    def const(shape):
        # Grid-invariant operand: fetched once, stays resident.  All of these are
        # O(EMB)-sized pools or O(B*N) vectors — tiny even under v7x's 64 MiB VMEM.
        return pl.BlockSpec(shape, lambda c: (0,) * len(shape))

    out = pl.pallas_call(
        _stfgrn_kernel,
        out_shape=jax.ShapeDtypeStruct((T, B * N, H), x.dtype),
        grid=grid,
        in_specs=[
            pl.BlockSpec((t_chunk, B * N, Din), lambda c: (c, 0, 0)),      # x chunk
            const((B * N, H)),                                             # init state
            const(((K - 1) * N, N)),                                       # stacked supports
            const((EMB * K * F, 2 * H)),                                   # gate pool
            const((EMB * K * F, H)),                                       # cand pool
            const((B * N, 2 * H)),                                         # gate bias (tiled)
            const((B * N, H)),                                             # cand bias (tiled)
            const((B * N, EMB)),                                           # node embeddings
        ],
        out_specs=pl.BlockSpec((t_chunk, B * N, H), lambda c: (c, 0, 0)),
        scratch_shapes=[pltpu.VMEM((B * N, H), jnp.float32)],              # recurrent h
        compiler_params=pltpu.CompilerParams(
            # Recurrence over time: the grid must run sequentially.
            dimension_semantics=("arbitrary",),
            vmem_limit_bytes=32 * 1024 * 1024),
    )(x_steps, h0, sup_stk, wg_flat, wc_flat, bg, bc, e_bn)

    out = jnp.transpose(out.reshape(T, B, N, H), (1, 0, 2, 3))             # [B, T, N, H]
    output_hidden = [out[:, -1]]              # matches PyTorch: list with last state
    return out, output_hidden                 # (current_inputs, output_hidden)


# ----------------------------------------------------------------------------
# Pure-JAX reference (same math, einsum form) for a sanity check.
# ----------------------------------------------------------------------------
def stfgrn_reference(x, init_state, adj, node_embeddings, params, cheb_k):
    B, T, N, Din = x.shape
    H = init_state.shape[-1]
    e = node_embeddings
    supports = _build_supports(adj, e, cheb_k, x.dtype)

    wg = jnp.einsum('nd,dkio->nkio', e, params['wpool_gate'])
    wc = jnp.einsum('nd,dkio->nkio', e, params['wpool_cand'])
    bg = e @ params['bpool_gate']
    bcand = e @ params['bpool_cand']

    def gcn(inp, w, b):
        xg = jnp.einsum('knm,bmc->bnkc', supports, inp)
        return jnp.einsum('bnki,nkio->bno', xg, w) + b

    h = init_state
    outs = []
    for t in range(T):
        xt = x[:, t]
        xs = jnp.concatenate([xt, h], axis=-1)
        zr = jax.nn.sigmoid(gcn(xs, wg, bg))
        z, r = zr[..., :H], zr[..., H:]
        cand = jnp.concatenate([xt, z * h], axis=-1)
        hc = jnp.tanh(gcn(cand, wc, bcand))
        h = r * h + (1.0 - r) * hc
        outs.append(h)
    return jnp.stack(outs, axis=1), [h]


if __name__ == "__main__":
    # Small shapes consistent with the module.
    B, T, N, Din, H, CHEB_K, EMB = 2, 8, 16, 4, 32, 3, 8

    key = jax.random.PRNGKey(0)
    k_x, k_e, k_a, k_wg, k_bg, k_wc, k_bc = jax.random.split(key, 7)

    x = jax.random.normal(k_x, (B, T, N, Din), dtype=jnp.float32)
    init_state = jnp.zeros((B, N, H), dtype=jnp.float32)          # init_hidden()
    node_embeddings = jax.random.normal(k_e, (N, EMB), dtype=jnp.float32) * 0.5
    adj_raw = jax.random.uniform(k_a, (N, N), dtype=jnp.float32)
    adj = adj_raw / adj_raw.sum(axis=1, keepdims=True)

    params = {
        "wpool_gate": jax.random.normal(k_wg, (EMB, CHEB_K, Din + H, 2 * H),
                                        dtype=jnp.float32) * 0.1,
        "bpool_gate": jax.random.normal(k_bg, (EMB, 2 * H), dtype=jnp.float32) * 0.1,
        "wpool_cand": jax.random.normal(k_wc, (EMB, CHEB_K, Din + H, H),
                                        dtype=jnp.float32) * 0.1,
        "bpool_cand": jax.random.normal(k_bc, (EMB, H), dtype=jnp.float32) * 0.1,
    }

    out_states, out_hidden = stfgrn_forward(
        x, init_state, adj, node_embeddings, params, CHEB_K)
    out_states = jax.block_until_ready(out_states)
    last_state = jax.block_until_ready(out_hidden[0])

    assert out_states.shape == (B, T, N, H)
    assert last_state.shape == (B, N, H)

    ref_states, ref_hidden = stfgrn_reference(
        x, init_state, adj, node_embeddings, params, CHEB_K)
    np.testing.assert_allclose(np.asarray(out_states), np.asarray(ref_states),
                               rtol=2e-2, atol=2e-2)
    np.testing.assert_allclose(np.asarray(last_state), np.asarray(ref_hidden[0]),
                               rtol=2e-2, atol=2e-2)

    print("KERNEL_OK")
</pallas_src>

<mosaic_0001>
module attributes {stable_mosaic.version = 11 : i64} {
  func.func @_stfgrn_kernel(%arg0: i32, %arg1: memref<4x32x4xf32, #tpu.memory_space<vmem>>, %arg2: memref<32x32xf32, #tpu.memory_space<vmem>>, %arg3: memref<32x16xf32, #tpu.memory_space<vmem>>, %arg4: memref<864x64xf32, #tpu.memory_space<vmem>>, %arg5: memref<864x32xf32, #tpu.memory_space<vmem>>, %arg6: memref<32x64xf32, #tpu.memory_space<vmem>>, %arg7: memref<32x32xf32, #tpu.memory_space<vmem>>, %arg8: memref<32x8xf32, #tpu.memory_space<vmem>>, %arg9: memref<4x32x32xf32, #tpu.memory_space<vmem>>, %arg10: memref<32x32xf32, #tpu.memory_space<vmem>>) attributes {dimension_semantics = [#tpu.dimension_semantics<arbitrary>], iteration_bounds = array<i64: 2>, scalar_prefetch = 0 : i64, scratch_operands = 1 : i64, tpu.core_type = #tpu.core_type<tc>, window_params = [{transform_indices = @transform_0, window_bounds = array<i64: 4, 32, 4>}, {pipeline_mode = #tpu.pipeline_mode<synchronous>, transform_indices = @transform_1, window_bounds = array<i64: 32, 32>}, {pipeline_mode = #tpu.pipeline_mode<synchronous>, transform_indices = @transform_2, window_bounds = array<i64: 32, 16>}, {pipeline_mode = #tpu.pipeline_mode<synchronous>, transform_indices = @transform_3, window_bounds = array<i64: 864, 64>}, {pipeline_mode = #tpu.pipeline_mode<synchronous>, transform_indices = @transform_4, window_bounds = array<i64: 864, 32>}, {pipeline_mode = #tpu.pipeline_mode<synchronous>, transform_indices = @transform_5, window_bounds = array<i64: 32, 64>}, {pipeline_mode = #tpu.pipeline_mode<synchronous>, transform_indices = @transform_6, window_bounds = array<i64: 32, 32>}, {pipeline_mode = #tpu.pipeline_mode<synchronous>, transform_indices = @transform_7, window_bounds = array<i64: 32, 8>}, {transform_indices = @transform_8, window_bounds = array<i64: 4, 32, 32>}]} {
    %c0_i32 = arith.constant 0 : i32
    %0 = arith.cmpi eq, %arg0, %c0_i32 : i32
    %1 = arith.extui %0 : i1 to i32
    %c0_i32_0 = arith.constant 0 : i32
    %2 = arith.cmpi ne, %1, %c0_i32_0 : i32
    scf.if %2 {
      %c0_78 = arith.constant 0 : index
      %c0_79 = arith.constant 0 : index
      %342 = vector.load %arg2[%c0_78, %c0_79] : memref<32x32xf32, #tpu.memory_space<vmem>>, vector<32x32xf32>
      %c0_80 = arith.constant 0 : index
      %c0_81 = arith.constant 0 : index
      %343 = vector.load %arg10[%c0_80, %c0_81] : memref<32x32xf32, #tpu.memory_space<vmem>>, vector<32x32xf32>
      tpu.vector_store %arg10[%c0_80, %c0_81], %342 {strides = array<i32>} : memref<32x32xf32, #tpu.memory_space<vmem>>, vector<32x32xf32>,
    } else {
    }
    %c0 = arith.constant 0 : index
    %c0_1 = arith.constant 0 : index
    %3 = vector.load %arg3[%c0, %c0_1] : memref<32x16xf32, #tpu.memory_space<vmem>>, vector<32x16xf32>
    %c0_2 = arith.constant 0 : index
    %c0_3 = arith.constant 0 : index
    %4 = vector.load %arg4[%c0_2, %c0_3] : memref<864x64xf32, #tpu.memory_space<vmem>>, vector<864x64xf32>
    %c0_4 = arith.constant 0 : index
    %c0_5 = arith.constant 0 : index
    %5 = vector.load %arg5[%c0_4, %c0_5] : memref<864x32xf32, #tpu.memory_space<vmem>>, vector<864x32xf32>
    %c0_6 = arith.constant 0 : index
    %c0_7 = arith.constant 0 : index
    %6 = vector.load %arg6[%c0_6, %c0_7] : memref<32x64xf32, #tpu.memory_space<vmem>>, vector<32x64xf32>
    %c0_8 = arith.constant 0 : index
    %c0_9 = arith.constant 0 : index
    %7 = vector.load %arg7[%c0_8, %c0_9] : memref<32x32xf32, #tpu.memory_space<vmem>>, vector<32x32xf32>
    %c0_10 = arith.constant 0 : index
    %c0_11 = arith.constant 0 : index
    %8 = vector.load %arg8[%c0_10, %c0_11] : memref<32x8xf32, #tpu.memory_space<vmem>>, vector<32x1xf32>
    %c0_12 = arith.constant 0 : index
    %c1 = arith.constant 1 : index
    %9 = vector.load %arg8[%c0_12, %c1] : memref<32x8xf32, #tpu.memory_space<vmem>>, vector<32x1xf32>
    %c0_13 = arith.constant 0 : index
    %c2 = arith.constant 2 : index
    %10 = vector.load %arg8[%c0_13, %c2] : memref<32x8xf32, #tpu.memory_space<vmem>>, vector<32x1xf32>
    %c0_14 = arith.constant 0 : index
    %c3 = arith.constant 3 : index
    %11 = vector.load %arg8[%c0_14, %c3] : memref<32x8xf32, #tpu.memory_space<vmem>>, vector<32x1xf32>
    %c0_15 = arith.constant 0 : index
    %c4 = arith.constant 4 : index
    %12 = vector.load %arg8[%c0_15, %c4] : memref<32x8xf32, #tpu.memory_space<vmem>>, vector<32x1xf32>
    %c0_16 = arith.constant 0 : index
    %c5 = arith.constant 5 : index
    %13 = vector.load %arg8[%c0_16, %c5] : memref<32x8xf32, #tpu.memory_space<vmem>>, vector<32x1xf32>
    %c0_17 = arith.constant 0 : index
    %c6 = arith.constant 6 : index
    %14 = vector.load %arg8[%c0_17, %c6] : memref<32x8xf32, #tpu.memory_space<vmem>>, vector<32x1xf32>
    %c0_18 = arith.constant 0 : index
    %c7 = arith.constant 7 : index
    %15 = vector.load %arg8[%c0_18, %c7] : memref<32x8xf32, #tpu.memory_space<vmem>>, vector<32x1xf32>
    %c0_19 = arith.constant 0 : index
    %c0_20 = arith.constant 0 : index
    %16 = vector.load %arg10[%c0_19, %c0_20] : memref<32x32xf32, #tpu.memory_space<vmem>>, vector<32x32xf32>
    %c0_21 = arith.constant 0 : index
    %c0_22 = arith.constant 0 : index
    %c0_23 = arith.constant 0 : index
    %17 = vector.load %arg1[%c0_21, %c0_22, %c0_23] : memref<4x32x4xf32, #tpu.memory_space<vmem>>, vector<1x32x4xf32>
    %18 = vector.shape_cast %17 : vector<1x32x4xf32> to vector<32x4xf32>
    %19 = tpu.concatenate %18, %16 in 1 : vector<32x4xf32>, vector<32x32xf32> -> vector<32x36xf32>
    %20 = vector.extract_strided_slice %19 {offsets = [0, 0], sizes = [16, 36], strides = [1, 1]} : vector<32x36xf32> to vector<16x36xf32>
    %cst = arith.constant dense<0.000000e+00> : vector<32x36xf32>
    %21 = tpu.matmul %3, %20, %cst {dimension_numbers = #tpu.dot_dimension_numbers<[1], [0], [0], [1], [0, 0, 1, 1], [], []>} : vector<32x16xf32>, vector<16x36xf32>, vector<32x36xf32> -> vector<32x36xf32>
    %22 = vector.extract_strided_slice %19 {offsets = [16, 0], sizes = [16, 36], strides = [1, 1]} : vector<32x36xf32> to vector<16x36xf32>
    %cst_24 = arith.constant dense<0.000000e+00> : vector<32x36xf32>
    %23 = tpu.matmul %3, %22, %cst_24 {dimension_numbers = #tpu.dot_dimension_numbers<[1], [0], [0], [1], [0, 0, 1, 1], [], []>} : vector<32x16xf32>, vector<16x36xf32>, vector<32x36xf32> -> vector<32x36xf32>
    %24 = vector.extract_strided_slice %21 {offsets = [0, 0], sizes = [16, 36], strides = [1, 1]} : vector<32x36xf32> to vector<16x36xf32>
    %25 = vector.extract_strided_slice %23 {offsets = [0, 0], sizes = [16, 36], strides = [1, 1]} : vector<32x36xf32> to vector<16x36xf32>
    %26 = tpu.concatenate %24, %25 in 0 : vector<16x36xf32>, vector<16x36xf32> -> vector<32x36xf32>
    %27 = vector.extract_strided_slice %21 {offsets = [16, 0], sizes = [16, 36], strides = [1, 1]} : vector<32x36xf32> to vector<16x36xf32>
    %28 = vector.extract_strided_slice %23 {offsets = [16, 0], sizes = [16, 36], strides = [1, 1]} : vector<32x36xf32> to vector<16x36xf32>
    %29 = tpu.concatenate %27, %28 in 0 : vector<16x36xf32>, vector<16x36xf32> -> vector<32x36xf32>
    %30 = tpu.concatenate %19, %26, %29 in 1 : vector<32x36xf32>, vector<32x36xf32>, vector<32x36xf32> -> vector<32x108xf32>
    %31 = vector.broadcast %8 : vector<32x1xf32> to vector<32x108xf32>
    %32 = arith.mulf %30, %31 : vector<32x108xf32>
    %33 = vector.broadcast %9 : vector<32x1xf32> to vector<32x108xf32>
    %34 = arith.mulf %30, %33 : vector<32x108xf32>
    %35 = vector.broadcast %10 : vector<32x1xf32> to vector<32x108xf32>
    %36 = arith.mulf %30, %35 : vector<32x108xf32>
    %37 = vector.broadcast %11 : vector<32x1xf32> to vector<32x108xf32>
    %38 = arith.mulf %30, %37 : vector<32x108xf32>
    %39 = vector.broadcast %12 : vector<32x1xf32> to vector<32x108xf32>
    %40 = arith.mulf %30, %39 : vector<32x108xf32>
    %41 = vector.broadcast %13 : vector<32x1xf32> to vector<32x108xf32>
    %42 = arith.mulf %30, %41 : vector<32x108xf32>
    %43 = vector.broadcast %14 : vector<32x1xf32> to vector<32x108xf32>
    %44 = arith.mulf %30, %43 : vector<32x108xf32>
    %45 = vector.broadcast %15 : vector<32x1xf32> to vector<32x108xf32>
    %46 = arith.mulf %30, %45 : vector<32x108xf32>
    %47 = tpu.concatenate %32, %34, %36, %38, %40, %42, %44, %46 in 1 : vector<32x108xf32>, vector<32x108xf32>, vector<32x108xf32>, vector<32x108xf32>, vector<32x108xf32>, vector<32x108xf32>, vector<32x108xf32>, vector<32x108xf32> -> vector<32x864xf32>
    %cst_25 = arith.constant dense<0.000000e+00> : vector<32x64xf32>
    %48 = tpu.matmul %47, %4, %cst_25 {dimension_numbers = #tpu.dot_dimension_numbers<[1], [0], [0], [1], [0, 0, 1, 1], [], []>} : vector<32x864xf32>, vector<864x64xf32>, vector<32x64xf32> -> vector<32x64xf32>
    %49 = arith.addf %48, %6 : vector<32x64xf32>
    %50 = arith.negf %49 : vector<32x64xf32>
    %51 = math.exp %50 : vector<32x64xf32>
    %cst_26 = arith.constant 1.000000e+00 : f32
    %52 = vector.broadcast %cst_26 : f32 to vector<32x64xf32>
    %53 = arith.addf %52, %51 : vector<32x64xf32>
    %54 = arith.divf %52, %53 : vector<32x64xf32>
    %55 = vector.extract_strided_slice %54 {offsets = [0, 0], sizes = [32, 32], strides = [1, 1]} : vector<32x64xf32> to vector<32x32xf32>
    %56 = vector.extract_strided_slice %54 {offsets = [0, 32], sizes = [32, 32], strides = [1, 1]} : vector<32x64xf32> to vector<32x32xf32>
    %57 = arith.mulf %55, %16 : vector<32x32xf32>
    %58 = tpu.concatenate %18, %57 in 1 : vector<32x4xf32>, vector<32x32xf32> -> vector<32x36xf32>
    %59 = vector.extract_strided_slice %58 {offsets = [0, 0], sizes = [16, 36], strides = [1, 1]} : vector<32x36xf32> to vector<16x36xf32>
    %cst_27 = arith.constant dense<0.000000e+00> : vector<32x36xf32>
    %60 = tpu.matmul %3, %59, %cst_27 {dimension_numbers = #tpu.dot_dimension_numbers<[1], [0], [0], [1], [0, 0, 1, 1], [], []>} : vector<32x16xf32>, vector<16x36xf32>, vector<32x36xf32> -> vector<32x36xf32>
    %61 = vector.extract_strided_slice %58 {offsets = [16, 0], sizes = [16, 36], strides = [1, 1]} : vector<32x36xf32> to vector<16x36xf32>
    %cst_28 = arith.constant dense<0.000000e+00> : vector<32x36xf32>
    %62 = tpu.matmul %3, %61, %cst_28 {dimension_numbers = #tpu.dot_dimension_numbers<[1], [0], [0], [1], [0, 0, 1, 1], [], []>} : vector<32x16xf32>, vector<16x36xf32>, vector<32x36xf32> -> vector<32x36xf32>
    %63 = vector.extract_strided_slice %60 {offsets = [0, 0], sizes = [16, 36], strides = [1, 1]} : vector<32x36xf32> to vector<16x36xf32>
    %64 = vector.extract_strided_slice %62 {offsets = [0, 0], sizes = [16, 36], strides = [1, 1]} : vector<32x36xf32> to vector<16x36xf32>
    %65 = tpu.concatenate %63, %64 in 0 : vector<16x36xf32>, vector<16x36xf32> -> vector<32x36xf32>
    %66 = vector.extract_strided_slice %60 {offsets = [16, 0], sizes = [16, 36], strides = [1, 1]} : vector<32x36xf32> to vector<16x36xf32>
    %67 = vector.extract_strided_slice %62 {offsets = [16, 0], sizes = [16, 36], strides = [1, 1]} : vector<32x36xf32> to vector<16x36xf32>
    %68 = tpu.concatenate %66, %67 in 0 : vector<16x36xf32>, vector<16x36xf32> -> vector<32x36xf32>
    %69 = tpu.concatenate %58, %65, %68 in 1 : vector<32x36xf32>, vector<32x36xf32>, vector<32x36xf32> -> vector<32x108xf32>
    %70 = vector.broadcast %8 : vector<32x1xf32> to vector<32x108xf32>
    %71 = arith.mulf %69, %70 : vector<32x108xf32>
    %72 = vector.broadcast %9 : vector<32x1xf32> to vector<32x108xf32>
    %73 = arith.mulf %69, %72 : vector<32x108xf32>
    %74 = vector.broadcast %10 : vector<32x1xf32> to vector<32x108xf32>
    %75 = arith.mulf %69, %74 : vector<32x108xf32>
    %76 = vector.broadcast %11 : vector<32x1xf32> to vector<32x108xf32>
    %77 = arith.mulf %69, %76 : vector<32x108xf32>
    %78 = vector.broadcast %12 : vector<32x1xf32> to vector<32x108xf32>
    %79 = arith.mulf %69, %78 : vector<32x108xf32>
    %80 = vector.broadcast %13 : vector<32x1xf32> to vector<32x108xf32>
    %81 = arith.mulf %69, %80 : vector<32x108xf32>
    %82 = vector.broadcast %14 : vector<32x1xf32> to vector<32x108xf32>
    %83 = arith.mulf %69, %82 : vector<32x108xf32>
    %84 = vector.broadcast %15 : vector<32x1xf32> to vector<32x108xf32>
    %85 = arith.mulf %69, %84 : vector<32x108xf32>
    %86 = tpu.concatenate %71, %73, %75, %77, %79, %81, %83, %85 in 1 : vector<32x108xf32>, vector<32x108xf32>, vector<32x108xf32>, vector<32x108xf32>, vector<32x108xf32>, vector<32x108xf32>, vector<32x108xf32>, vector<32x108xf32> -> vector<32x864xf32>
    %cst_29 = arith.constant dense<0.000000e+00> : vector<32x32xf32>
    %87 = tpu.matmul %86, %5, %cst_29 {dimension_numbers = #tpu.dot_dimension_numbers<[1], [0], [0], [1], [0, 0, 1, 1], [], []>} : vector<32x864xf32>, vector<864x32xf32>, vector<32x32xf32> -> vector<32x32xf32>
    %88 = arith.addf %87, %7 : vector<32x32xf32>
    %89 = math.tanh %88 : vector<32x32xf32>
    %90 = arith.mulf %56, %16 : vector<32x32xf32>
    %cst_30 = arith.constant 1.000000e+00 : f32
    %91 = vector.broadcast %cst_30 : f32 to vector<32x32xf32>
    %92 = arith.subf %91, %56 : vector<32x32xf32>
    %93 = arith.mulf %92, %89 : vector<32x32xf32>
    %94 = arith.addf %90, %93 : vector<32x32xf32>
    %c0_31 = arith.constant 0 : index
    %c0_32 = arith.constant 0 : index
    %c0_33 = arith.constant 0 : index
    %95 = vector.load %arg9[%c0_31, %c0_32, %c0_33] : memref<4x32x32xf32, #tpu.memory_space<vmem>>, vector<1x32x32xf32>
    %96 = vector.shape_cast %95 : vector<1x32x32xf32> to vector<32x32xf32>
    %97 = vector.shape_cast %94 : vector<32x32xf32> to vector<1x32x32xf32>
    tpu.vector_store %arg9[%c0_31, %c0_32, %c0_33], %97 {strides = array<i32>} : memref<4x32x32xf32, #tpu.memory_space<vmem>>, vector<1x32x32xf32>,
    %c1_34 = arith.constant 1 : index
    %c0_35 = arith.constant 0 : index
    %c0_36 = arith.constant 0 : index
    %98 = vector.load %arg1[%c1_34, %c0_35, %c0_36] : memref<4x32x4xf32, #tpu.memory_space<vmem>>, vector<1x32x4xf32>
    %99 = vector.shape_cast %98 : vector<1x32x4xf32> to vector<32x4xf32>
    %100 = tpu.concatenate %99, %94 in 1 : vector<32x4xf32>, vector<32x32xf32> -> vector<32x36xf32>
    %101 = vector.extract_strided_slice %100 {offsets = [0, 0], sizes = [16, 36], strides = [1, 1]} : vector<32x36xf32> to vector<16x36xf32>
    %cst_37 = arith.constant dense<0.000000e+00> : vector<32x36xf32>
    %102 = tpu.matmul %3, %101, %cst_37 {dimension_numbers = #tpu.dot_dimension_numbers<[1], [0], [0], [1], [0, 0, 1, 1], [], []>} : vector<32x16xf32>, vector<16x36xf32>, vector<32x36xf32> -> vector<32x36xf32>
    %103 = vector.extract_strided_slice %100 {offsets = [16, 0], sizes = [16, 36], strides = [1, 1]} : vector<32x36xf32> to vector<16x36xf32>
    %cst_38 = arith.constant dense<0.000000e+00> : vector<32x36xf32>
    %104 = tpu.matmul %3, %103, %cst_38 {dimension_numbers = #tpu.dot_dimension_numbers<[1], [0], [0], [1], [0, 0, 1, 1], [], []>} : vector<32x16xf32>, vector<16x36xf32>, vector<32x36xf32> -> vector<32x36xf32>
    %105 = vector.extract_strided_slice %102 {offsets = [0, 0], sizes = [16, 36], strides = [1, 1]} : vector<32x36xf32> to vector<16x36xf32>
    %106 = vector.extract_strided_slice %104 {offsets = [0, 0], sizes = [16, 36], strides = [1, 1]} : vector<32x36xf32> to vector<16x36xf32>
    %107 = tpu.concatenate %105, %106 in 0 : vector<16x36xf32>, vector<16x36xf32> -> vector<32x36xf32>
    %108 = vector.extract_strided_slice %102 {offsets = [16, 0], sizes = [16, 36], strides = [1, 1]} : vector<32x36xf32> to vector<16x36xf32>
    %109 = vector.extract_strided_slice %104 {offsets = [16, 0], sizes = [16, 36], strides = [1, 1]} : vector<32x36xf32> to vector<16x36xf32>
    %110 = tpu.concatenate %108, %109 in 0 : vector<16x36xf32>, vector<16x36xf32> -> vector<32x36xf32>
    %111 = tpu.concatenate %100, %107, %110 in 1 : vector<32x36xf32>, vector<32x36xf32>, vector<32x36xf32> -> vector<32x108xf32>
    %112 = vector.broadcast %8 : vector<32x1xf32> to vector<32x108xf32>
    %113 = arith.mulf %111, %112 : vector<32x108xf32>
    %114 = vector.broadcast %9 : vector<32x1xf32> to vector<32x108xf32>
    %115 = arith.mulf %111, %114 : vector<32x108xf32>
    %116 = vector.broadcast %10 : vector<32x1xf32> to vector<32x108xf32>
    %117 = arith.mulf %111, %116 : vector<32x108xf32>
    %118 = vector.broadcast %11 : vector<32x1xf32> to vector<32x108xf32>
    %119 = arith.mulf %111, %118 : vector<32x108xf32>
    %120 = vector.broadcast %12 : vector<32x1xf32> to vector<32x108xf32>
    %121 = arith.mulf %111, %120 : vector<32x108xf32>
    %122 = vector.broadcast %13 : vector<32x1xf32> to vector<32x108xf32>
    %123 = arith.mulf %111, %122 : vector<32x108xf32>
    %124 = vector.broadcast %14 : vector<32x1xf32> to vector<32x108xf32>
    %125 = arith.mulf %111, %124 : vector<32x108xf32>
    %126 = vector.broadcast %15 : vector<32x1xf32> to vector<32x108xf32>
    %127 = arith.mulf %111, %126 : vector<32x108xf32>
    %128 = tpu.concatenate %113, %115, %117, %119, %121, %123, %125, %127 in 1 : vector<32x108xf32>, vector<32x108xf32>, vector<32x108xf32>, vector<32x108xf32>, vector<32x108xf32>, vector<32x108xf32>, vector<32x108xf32>, vector<32x108xf32> -> vector<32x864xf32>
    %cst_39 = arith.constant dense<0.000000e+00> : vector<32x64xf32>
    %129 = tpu.matmul %128, %4, %cst_39 {dimension_numbers = #tpu.dot_dimension_numbers<[1], [0], [0], [1], [0, 0, 1, 1], [], []>} : vector<32x864xf32>, vector<864x64xf32>, vector<32x64xf32> -> vector<32x64xf32>
    %130 = arith.addf %129, %6 : vector<32x64xf32>
    %131 = arith.negf %130 : vector<32x64xf32>
    %132 = math.exp %131 : vector<32x64xf32>
    %cst_40 = arith.constant 1.000000e+00 : f32
    %133 = vector.broadcast %cst_40 : f32 to vector<32x64xf32>
    %134 = arith.addf %133, %132 : vector<32x64xf32>
    %135 = arith.divf %133, %134 : vector<32x64xf32>
    %136 = vector.extract_strided_slice %135 {offsets = [0, 0], sizes = [32, 32], strides = [1, 1]} : vector<32x64xf32> to vector<32x32xf32>
    %137 = vector.extract_strided_slice %135 {offsets = [0, 32], sizes = [32, 32], strides = [1, 1]} : vector<32x64xf32> to vector<32x32xf32>
    %138 = arith.mulf %136, %94 : vector<32x32xf32>
    %139 = tpu.concatenate %99, %138 in 1 : vector<32x4xf32>, vector<32x32xf32> -> vector<32x36xf32>
    %140 = vector.extract_strided_slice %139 {offsets = [0, 0], sizes = [16, 36], strides = [1, 1]} : vector<32x36xf32> to vector<16x36xf32>
    %cst_41 = arith.constant dense<0.000000e+00> : vector<32x36xf32>
    %141 = tpu.matmul %3, %140, %cst_41 {dimension_numbers = #tpu.dot_dimension_numbers<[1], [0], [0], [1], [0, 0, 1, 1], [], []>} : vector<32x16xf32>, vector<16x36xf32>, vector<32x36xf32> -> vector<32x36xf32>
    %142 = vector.extract_strided_slice %139 {offsets = [16, 0], sizes = [16, 36], strides = [1, 1]} : vector<32x36xf32> to vector<16x36xf32>
    %cst_42 = arith.constant dense<0.000000e+00> : vector<32x36xf32>
    %143 = tpu.matmul %3, %142, %cst_42 {dimension_numbers = #tpu.dot_dimension_numbers<[1], [0], [0], [1], [0, 0, 1, 1], [], []>} : vector<32x16xf32>, vector<16x36xf32>, vector<32x36xf32> -> vector<32x36xf32>
    %144 = vector.extract_strided_slice %141 {offsets = [0, 0], sizes = [16, 36], strides = [1, 1]} : vector<32x36xf32> to vector<16x36xf32>
    %145 = vector.extract_strided_slice %143 {offsets = [0, 0], sizes = [16, 36], strides = [1, 1]} : vector<32x36xf32> to vector<16x36xf32>
    %146 = tpu.concatenate %144, %145 in 0 : vector<16x36xf32>, vector<16x36xf32> -> vector<32x36xf32>
    %147 = vector.extract_strided_slice %141 {offsets = [16, 0], sizes = [16, 36], strides = [1, 1]} : vector<32x36xf32> to vector<16x36xf32>
    %148 = vector.extract_strided_slice %143 {offsets = [16, 0], sizes = [16, 36], strides = [1, 1]} : vector<32x36xf32> to vector<16x36xf32>
    %149 = tpu.concatenate %147, %148 in 0 : vector<16x36xf32>, vector<16x36xf32> -> vector<32x36xf32>
    %150 = tpu.concatenate %139, %146, %149 in 1 : vector<32x36xf32>, vector<32x36xf32>, vector<32x36xf32> -> vector<32x108xf32>
    %151 = vector.broadcast %8 : vector<32x1xf32> to vector<32x108xf32>
    %152 = arith.mulf %150, %151 : vector<32x108xf32>
    %153 = vector.broadcast %9 : vector<32x1xf32> to vector<32x108xf32>
    %154 = arith.mulf %150, %153 : vector<32x108xf32>
    %155 = vector.broadcast %10 : vector<32x1xf32> to vector<32x108xf32>
    %156 = arith.mulf %150, %155 : vector<32x108xf32>
    %157 = vector.broadcast %11 : vector<32x1xf32> to vector<32x108xf32>
    %158 = arith.mulf %150, %157 : vector<32x108xf32>
    %159 = vector.broadcast %12 : vector<32x1xf32> to vector<32x108xf32>
    %160 = arith.mulf %150, %159 : vector<32x108xf32>
    %161 = vector.broadcast %13 : vector<32x1xf32> to vector<32x108xf32>
    %162 = arith.mulf %150, %161 : vector<32x108xf32>
    %163 = vector.broadcast %14 : vector<32x1xf32> to vector<32x108xf32>
    %164 = arith.mulf %150, %163 : vector<32x108xf32>
    %165 = vector.broadcast %15 : vector<32x1xf32> to vector<32x108xf32>
    %166 = arith.mulf %150, %165 : vector<32x108xf32>
    %167 = tpu.concatenate %152, %154, %156, %158, %160, %162, %164, %166 in 1 : vector<32x108xf32>, vector<32x108xf32>, vector<32x108xf32>, vector<32x108xf32>, vector<32x108xf32>, vector<32x108xf32>, vector<32x108xf32>, vector<32x108xf32> -> vector<32x864xf32>
    %cst_43 = arith.constant dense<0.000000e+00> : vector<32x32xf32>
    %168 = tpu.matmul %167, %5, %cst_43 {dimension_numbers = #tpu.dot_dimension_numbers<[1], [0], [0], [1], [0, 0, 1, 1], [], []>} : vector<32x864xf32>, vector<864x32xf32>, vector<32x32xf32> -> vector<32x32xf32>
    %169 = arith.addf %168, %7 : vector<32x32xf32>
    %170 = math.tanh %169 : vector<32x32xf32>
    %171 = arith.mulf %137, %94 : vector<32x32xf32>
    %cst_44 = arith.constant 1.000000e+00 : f32
    %172 = vector.broadcast %cst_44 : f32 to vector<32x32xf32>
    %173 = arith.subf %172, %137 : vector<32x32xf32>
    %174 = arith.mulf %173, %170 : vector<32x32xf32>
    %175 = arith.addf %171, %174 : vector<32x32xf32>
    %c1_45 = arith.constant 1 : index
    %c0_46 = arith.constant 0 : index
    %c0_47 = arith.constant 0 : index
    %176 = vector.load %arg9[%c1_45, %c0_46, %c0_47] : memref<4x32x32xf32, #tpu.memory_space<vmem>>, vector<1x32x32xf32>
    %177 = vector.shape_cast %176 : vector<1x32x32xf32> to vector<32x32xf32>
    %178 = vector.shape_cast %175 : vector<32x32xf32> to vector<1x32x32xf32>
    tpu.vector_store %arg9[%c1_45, %c0_46, %c0_47], %178 {strides = array<i32>} : memref<4x32x32xf32, #tpu.memory_space<vmem>>, vector<1x32x32xf32>,
    %c2_48 = arith.constant 2 : index
    %c0_49 = arith.constant 0 : index
    %c0_50 = arith.constant 0 : index
    %179 = vector.load %arg1[%c2_48, %c0_49, %c0_50] : memref<4x32x4xf32, #tpu.memory_space<vmem>>, vector<1x32x4xf32>
    %180 = vector.shape_cast %179 : vector<1x32x4xf32> to vector<32x4xf32>
    %181 = tpu.concatenate %180, %175 in 1 : vector<32x4xf32>, vector<32x32xf32> -> vector<32x36xf32>
    %182 = vector.extract_strided_slice %181 {offsets = [0, 0], sizes = [16, 36], strides = [1, 1]} : vector<32x36xf32> to vector<16x36xf32>
    %cst_51 = arith.constant dense<0.000000e+00> : vector<32x36xf32>
    %183 = tpu.matmul %3, %182, %cst_51 {dimension_numbers = #tpu.dot_dimension_numbers<[1], [0], [0], [1], [0, 0, 1, 1], [], []>} : vector<32x16xf32>, vector<16x36xf32>, vector<32x36xf32> -> vector<32x36xf32>
    %184 = vector.extract_strided_slice %181 {offsets = [16, 0], sizes = [16, 36], strides = [1, 1]} : vector<32x36xf32> to vector<16x36xf32>
    %cst_52 = arith.constant dense<0.000000e+00> : vector<32x36xf32>
    %185 = tpu.matmul %3, %184, %cst_52 {dimension_numbers = #tpu.dot_dimension_numbers<[1], [0], [0], [1], [0, 0, 1, 1], [], []>} : vector<32x16xf32>, vector<16x36xf32>, vector<32x36xf32> -> vector<32x36xf32>
    %186 = vector.extract_strided_slice %183 {offsets = [0, 0], sizes = [16, 36], strides = [1, 1]} : vector<32x36xf32> to vector<16x36xf32>
    %187 = vector.extract_strided_slice %185 {offsets = [0, 0], sizes = [16, 36], strides = [1, 1]} : vector<32x36xf32> to vector<16x36xf32>
    %188 = tpu.concatenate %186, %187 in 0 : vector<16x36xf32>, vector<16x36xf32> -> vector<32x36xf32>
    %189 = vector.extract_strided_slice %183 {offsets = [16, 0], sizes = [16, 36], strides = [1, 1]} : vector<32x36xf32> to vector<16x36xf32>
    %190 = vector.extract_strided_slice %185 {offsets = [16, 0], sizes = [16, 36], strides = [1, 1]} : vector<32x36xf32> to vector<16x36xf32>
    %191 = tpu.concatenate %189, %190 in 0 : vector<16x36xf32>, vector<16x36xf32> -> vector<32x36xf32>
    %192 = tpu.concatenate %181, %188, %191 in 1 : vector<32x36xf32>, vector<32x36xf32>, vector<32x36xf32> -> vector<32x108xf32>
    %193 = vector.broadcast %8 : vector<32x1xf32> to vector<32x108xf32>
    %194 = arith.mulf %192, %193 : vector<32x108xf32>
    %195 = vector.broadcast %9 : vector<32x1xf32> to vector<32x108xf32>
    %196 = arith.mulf %192, %195 : vector<32x108xf32>
    %197 = vector.broadcast %10 : vector<32x1xf32> to vector<32x108xf32>
    %198 = arith.mulf %192, %197 : vector<32x108xf32>
    %199 = vector.broadcast %11 : vector<32x1xf32> to vector<32x108xf32>
    %200 = arith.mulf %192, %199 : vector<32x108xf32>
    %201 = vector.broadcast %12 : vector<32x1xf32> to vector<32x108xf32>
    %202 = arith.mulf %192, %201 : vector<32x108xf32>
    %203 = vector.broadcast %13 : vector<32x1xf32> to vector<32x108xf32>
    %204 = arith.mulf %192, %203 : vector<32x108xf32>
    %205 = vector.broadcast %14 : vector<32x1xf32> to vector<32x108xf32>
    %206 = arith.mulf %192, %205 : vector<32x108xf32>
    %207 = vector.broadcast %15 : vector<32x1xf32> to vector<32x108xf32>
    %208 = arith.mulf %192, %207 : vector<32x108xf32>
    %209 = tpu.concatenate %194, %196, %198, %200, %202, %204, %206, %208 in 1 : vector<32x108xf32>, vector<32x108xf32>, vector<32x108xf32>, vector<32x108xf32>, vector<32x108xf32>, vector<32x108xf32>, vector<32x108xf32>, vector<32x108xf32> -> vector<32x864xf32>
    %cst_53 = arith.constant dense<0.000000e+00> : vector<32x64xf32>
    %210 = tpu.matmul %209, %4, %cst_53 {dimension_numbers = #tpu.dot_dimension_numbers<[1], [0], [0], [1], [0, 0, 1, 1], [], []>} : vector<32x864xf32>, vector<864x64xf32>, vector<32x64xf32> -> vector<32x64xf32>
    %211 = arith.addf %210, %6 : vector<32x64xf32>
    %212 = arith.negf %211 : vector<32x64xf32>
    %213 = math.exp %212 : vector<32x64xf32>
    %cst_54 = arith.constant 1.000000e+00 : f32
    %214 = vector.broadcast %cst_54 : f32 to vector<32x64xf32>
    %215 = arith.addf %214, %213 : vector<32x64xf32>
    %216 = arith.divf %214, %215 : vector<32x64xf32>
    %217 = vector.extract_strided_slice %216 {offsets = [0, 0], sizes = [32, 32], strides = [1, 1]} : vector<32x64xf32> to vector<32x32xf32>
    %218 = vector.extract_strided_slice %216 {offsets = [0, 32], sizes = [32, 32], strides = [1, 1]} : vector<32x64xf32> to vector<32x32xf32>
    %219 = arith.mulf %217, %175 : vector<32x32xf32>
    %220 = tpu.concatenate %180, %219 in 1 : vector<32x4xf32>, vector<32x32xf32> -> vector<32x36xf32>
    %221 = vector.extract_strided_slice %220 {offsets = [0, 0], sizes = [16, 36], strides = [1, 1]} : vector<32x36xf32> to vector<16x36xf32>
    %cst_55 = arith.constant dense<0.000000e+00> : vector<32x36xf32>
    %222 = tpu.matmul %3, %221, %cst_55 {dimension_numbers = #tpu.dot_dimension_numbers<[1], [0], [0], [1], [0, 0, 1, 1], [], []>} : vector<32x16xf32>, vector<16x36xf32>, vector<32x36xf32> -> vector<32x36xf32>
    %223 = vector.extract_strided_slice %220 {offsets = [16, 0], sizes = [16, 36], strides = [1, 1]} : vector<32x36xf32> to vector<16x36xf32>
    %cst_56 = arith.constant dense<0.000000e+00> : vector<32x36xf32>
    %224 = tpu.matmul %3, %223, %cst_56 {dimension_numbers = #tpu.dot_dimension_numbers<[1], [0], [0], [1], [0, 0, 1, 1], [], []>} : vector<32x16xf32>, vector<16x36xf32>, vector<32x36xf32> -> vector<32x36xf32>
    %225 = vector.extract_strided_slice %222 {offsets = [0, 0], sizes = [16, 36], strides = [1, 1]} : vector<32x36xf32> to vector<16x36xf32>
    %226 = vector.extract_strided_slice %224 {offsets = [0, 0], sizes = [16, 36], strides = [1, 1]} : vector<32x36xf32> to vector<16x36xf32>
    %227 = tpu.concatenate %225, %226 in 0 : vector<16x36xf32>, vector<16x36xf32> -> vector<32x36xf32>
    %228 = vector.extract_strided_slice %222 {offsets = [16, 0], sizes = [16, 36], strides = [1, 1]} : vector<32x36xf32> to vector<16x36xf32>
    %229 = vector.extract_strided_slice %224 {offsets = [16, 0], sizes = [16, 36], strides = [1, 1]} : vector<32x36xf32> to vector<16x36xf32>
    %230 = tpu.concatenate %228, %229 in 0 : vector<16x36xf32>, vector<16x36xf32> -> vector<32x36xf32>
    %231 = tpu.concatenate %220, %227, %230 in 1 : vector<32x36xf32>, vector<32x36xf32>, vector<32x36xf32> -> vector<32x108xf32>
    %232 = vector.broadcast %8 : vector<32x1xf32> to vector<32x108xf32>
    %233 = arith.mulf %231, %232 : vector<32x108xf32>
    %234 = vector.broadcast %9 : vector<32x1xf32> to vector<32x108xf32>
    %235 = arith.mulf %231, %234 : vector<32x108xf32>
    %236 = vector.broadcast %10 : vector<32x1xf32> to vector<32x108xf32>
    %237 = arith.mulf %231, %236 : vector<32x108xf32>
    %238 = vector.broadcast %11 : vector<32x1xf32> to vector<32x108xf32>
    %239 = arith.mulf %231, %238 : vector<32x108xf32>
    %240 = vector.broadcast %12 : vector<32x1xf32> to vector<32x108xf32>
    %241 = arith.mulf %231, %240 : vector<32x108xf32>
    %242 = vector.broadcast %13 : vector<32x1xf32> to vector<32x108xf32>
    %243 = arith.mulf %231, %242 : vector<32x108xf32>
    %244 = vector.broadcast %14 : vector<32x1xf32> to vector<32x108xf32>
    %245 = arith.mulf %231, %244 : vector<32x108xf32>
    %246 = vector.broadcast %15 : vector<32x1xf32> to vector<32x108xf32>
    %247 = arith.mulf %231, %246 : vector<32x108xf32>
    %248 = tpu.concatenate %233, %235, %237, %239, %241, %243, %245, %247 in 1 : vector<32x108xf32>, vector<32x108xf32>, vector<32x108xf32>, vector<32x108xf32>, vector<32x108xf32>, vector<32x108xf32>, vector<32x108xf32>, vector<32x108xf32> -> vector<32x864xf32>
    %cst_57 = arith.constant dense<0.000000e+00> : vector<32x32xf32>
    %249 = tpu.matmul %248, %5, %cst_57 {dimension_numbers = #tpu.dot_dimension_numbers<[1], [0], [0], [1], [0, 0, 1, 1], [], []>} : vector<32x864xf32>, vector<864x32xf32>, vector<32x32xf32> -> vector<32x32xf32>
    %250 = arith.addf %249, %7 : vector<32x32xf32>
    %251 = math.tanh %250 : vector<32x32xf32>
    %252 = arith.mulf %218, %175 : vector<32x32xf32>
    %cst_58 = arith.constant 1.000000e+00 : f32
    %253 = vector.broadcast %cst_58 : f32 to vector<32x32xf32>
    %254 = arith.subf %253, %218 : vector<32x32xf32>
    %255 = arith.mulf %254, %251 : vector<32x32xf32>
    %256 = arith.addf %252, %255 : vector<32x32xf32>
    %c2_59 = arith.constant 2 : index
    %c0_60 = arith.constant 0 : index
    %c0_61 = arith.constant 0 : index
    %257 = vector.load %arg9[%c2_59, %c0_60, %c0_61] : memref<4x32x32xf32, #tpu.memory_space<vmem>>, vector<1x32x32xf32>
    %258 = vector.shape_cast %257 : vector<1x32x32xf32> to vector<32x32xf32>
    %259 = vector.shape_cast %256 : vector<32x32xf32> to vector<1x32x32xf32>
    tpu.vector_store %arg9[%c2_59, %c0_60, %c0_61], %259 {strides = array<i32>} : memref<4x32x32xf32, #tpu.memory_space<vmem>>, vector<1x32x32xf32>,
    %c3_62 = arith.constant 3 : index
    %c0_63 = arith.constant 0 : index
    %c0_64 = arith.constant 0 : index
    %260 = vector.load %arg1[%c3_62, %c0_63, %c0_64] : memref<4x32x4xf32, #tpu.memory_space<vmem>>, vector<1x32x4xf32>
    %261 = vector.shape_cast %260 : vector<1x32x4xf32> to vector<32x4xf32>
    %262 = tpu.concatenate %261, %256 in 1 : vector<32x4xf32>, vector<32x32xf32> -> vector<32x36xf32>
    %263 = vector.extract_strided_slice %262 {offsets = [0, 0], sizes = [16, 36], strides = [1, 1]} : vector<32x36xf32> to vector<16x36xf32>
    %cst_65 = arith.constant dense<0.000000e+00> : vector<32x36xf32>
    %264 = tpu.matmul %3, %263, %cst_65 {dimension_numbers = #tpu.dot_dimension_numbers<[1], [0], [0], [1], [0, 0, 1, 1], [], []>} : vector<32x16xf32>, vector<16x36xf32>, vector<32x36xf32> -> vector<32x36xf32>
    %265 = vector.extract_strided_slice %262 {offsets = [16, 0], sizes = [16, 36], strides = [1, 1]} : vector<32x36xf32> to vector<16x36xf32>
    %cst_66 = arith.constant dense<0.000000e+00> : vector<32x36xf32>
    %266 = tpu.matmul %3, %265, %cst_66 {dimension_numbers = #tpu.dot_dimension_numbers<[1], [0], [0], [1], [0, 0, 1, 1], [], []>} : vector<32x16xf32>, vector<16x36xf32>, vector<32x36xf32> -> vector<32x36xf32>
    %267 = vector.extract_strided_slice %264 {offsets = [0, 0], sizes = [16, 36], strides = [1, 1]} : vector<32x36xf32> to vector<16x36xf32>
    %268 = vector.extract_strided_slice %266 {offsets = [0, 0], sizes = [16, 36], strides = [1, 1]} : vector<32x36xf32> to vector<16x36xf32>
    %269 = tpu.concatenate %267, %268 in 0 : vector<16x36xf32>, vector<16x36xf32> -> vector<32x36xf32>
    %270 = vector.extract_strided_slice %264 {offsets = [16, 0], sizes = [16, 36], strides = [1, 1]} : vector<32x36xf32> to vector<16x36xf32>
    %271 = vector.extract_strided_slice %266 {offsets = [16, 0], sizes = [16, 36], strides = [1, 1]} : vector<32x36xf32> to vector<16x36xf32>
    %272 = tpu.concatenate %270, %271 in 0 : vector<16x36xf32>, vector<16x36xf32> -> vector<32x36xf32>
    %273 = tpu.concatenate %262, %269, %272 in 1 : vector<32x36xf32>, vector<32x36xf32>, vector<32x36xf32> -> vector<32x108xf32>
    %274 = vector.broadcast %8 : vector<32x1xf32> to vector<32x108xf32>
    %275 = arith.mulf %273, %274 : vector<32x108xf32>
    %276 = vector.broadcast %9 : vector<32x1xf32> to vector<32x108xf32>
    %277 = arith.mulf %273, %276 : vector<32x108xf32>
    %278 = vector.broadcast %10 : vector<32x1xf32> to vector<32x108xf32>
    %279 = arith.mulf %273, %278 : vector<32x108xf32>
    %280 = vector.broadcast %11 : vector<32x1xf32> to vector<32x108xf32>
    %281 = arith.mulf %273, %280 : vector<32x108xf32>
    %282 = vector.broadcast %12 : vector<32x1xf32> to vector<32x108xf32>
    %283 = arith.mulf %273, %282 : vector<32x108xf32>
    %284 = vector.broadcast %13 : vector<32x1xf32> to vector<32x108xf32>
    %285 = arith.mulf %273, %284 : vector<32x108xf32>
    %286 = vector.broadcast %14 : vector<32x1xf32> to vector<32x108xf32>
    %287 = arith.mulf %273, %286 : vector<32x108xf32>
    %288 = vector.broadcast %15 : vector<32x1xf32> to vector<32x108xf32>
    %289 = arith.mulf %273, %288 : vector<32x108xf32>
    %290 = tpu.concatenate %275, %277, %279, %281, %283, %285, %287, %289 in 1 : vector<32x108xf32>, vector<32x108xf32>, vector<32x108xf32>, vector<32x108xf32>, vector<32x108xf32>, vector<32x108xf32>, vector<32x108xf32>, vector<32x108xf32> -> vector<32x864xf32>
    %cst_67 = arith.constant dense<0.000000e+00> : vector<32x64xf32>
    %291 = tpu.matmul %290, %4, %cst_67 {dimension_numbers = #tpu.dot_dimension_numbers<[1], [0], [0], [1], [0, 0, 1, 1], [], []>} : vector<32x864xf32>, vector<864x64xf32>, vector<32x64xf32> -> vector<32x64xf32>
    %292 = arith.addf %291, %6 : vector<32x64xf32>
    %293 = arith.negf %292 : vector<32x64xf32>
    %294 = math.exp %293 : vector<32x64xf32>
    %cst_68 = arith.constant 1.000000e+00 : f32
    %295 = vector.broadcast %cst_68 : f32 to vector<32x64xf32>
    %296 = arith.addf %295, %294 : vector<32x64xf32>
    %297 = arith.divf %295, %296 : vector<32x64xf32>
    %298 = vector.extract_strided_slice %297 {offsets = [0, 0], sizes = [32, 32], strides = [1, 1]} : vector<32x64xf32> to vector<32x32xf32>
    %299 = vector.extract_strided_slice %297 {offsets = [0, 32], sizes = [32, 32], strides = [1, 1]} : vector<32x64xf32> to vector<32x32xf32>
    %300 = arith.mulf %298, %256 : vector<32x32xf32>
    %301 = tpu.concatenate %261, %300 in 1 : vector<32x4xf32>, vector<32x32xf32> -> vector<32x36xf32>
    %302 = vector.extract_strided_slice %301 {offsets = [0, 0], sizes = [16, 36], strides = [1, 1]} : vector<32x36xf32> to vector<16x36xf32>
    %cst_69 = arith.constant dense<0.000000e+00> : vector<32x36xf32>
    %303 = tpu.matmul %3, %302, %cst_69 {dimension_numbers = #tpu.dot_dimension_numbers<[1], [0], [0], [1], [0, 0, 1, 1], [], []>} : vector<32x16xf32>, vector<16x36xf32>, vector<32x36xf32> -> vector<32x36xf32>
    %304 = vector.extract_strided_slice %301 {offsets = [16, 0], sizes = [16, 36], strides = [1, 1]} : vector<32x36xf32> to vector<16x36xf32>
    %cst_70 = arith.constant dense<0.000000e+00> : vector<32x36xf32>
    %305 = tpu.matmul %3, %304, %cst_70 {dimension_numbers = #tpu.dot_dimension_numbers<[1], [0], [0], [1], [0, 0, 1, 1], [], []>} : vector<32x16xf32>, vector<16x36xf32>, vector<32x36xf32> -> vector<32x36xf32>
    %306 = vector.extract_strided_slice %303 {offsets = [0, 0], sizes = [16, 36], strides = [1, 1]} : vector<32x36xf32> to vector<16x36xf32>
    %307 = vector.extract_strided_slice %305 {offsets = [0, 0], sizes = [16, 36], strides = [1, 1]} : vector<32x36xf32> to vector<16x36xf32>
    %308 = tpu.concatenate %306, %307 in 0 : vector<16x36xf32>, vector<16x36xf32> -> vector<32x36xf32>
    %309 = vector.extract_strided_slice %303 {offsets = [16, 0], sizes = [16, 36], strides = [1, 1]} : vector<32x36xf32> to vector<16x36xf32>
    %310 = vector.extract_strided_slice %305 {offsets = [16, 0], sizes = [16, 36], strides = [1, 1]} : vector<32x36xf32> to vector<16x36xf32>
    %311 = tpu.concatenate %309, %310 in 0 : vector<16x36xf32>, vector<16x36xf32> -> vector<32x36xf32>
    %312 = tpu.concatenate %301, %308, %311 in 1 : vector<32x36xf32>, vector<32x36xf32>, vector<32x36xf32> -> vector<32x108xf32>
    %313 = vector.broadcast %8 : vector<32x1xf32> to vector<32x108xf32>
    %314 = arith.mulf %312, %313 : vector<32x108xf32>
    %315 = vector.broadcast %9 : vector<32x1xf32> to vector<32x108xf32>
    %316 = arith.mulf %312, %315 : vector<32x108xf32>
    %317 = vector.broadcast %10 : vector<32x1xf32> to vector<32x108xf32>
    %318 = arith.mulf %312, %317 : vector<32x108xf32>
    %319 = vector.broadcast %11 : vector<32x1xf32> to vector<32x108xf32>
    %320 = arith.mulf %312, %319 : vector<32x108xf32>
    %321 = vector.broadcast %12 : vector<32x1xf32> to vector<32x108xf32>
    %322 = arith.mulf %312, %321 : vector<32x108xf32>
    %323 = vector.broadcast %13 : vector<32x1xf32> to vector<32x108xf32>
    %324 = arith.mulf %312, %323 : vector<32x108xf32>
    %325 = vector.broadcast %14 : vector<32x1xf32> to vector<32x108xf32>
    %326 = arith.mulf %312, %325 : vector<32x108xf32>
    %327 = vector.broadcast %15 : vector<32x1xf32> to vector<32x108xf32>
    %328 = arith.mulf %312, %327 : vector<32x108xf32>
    %329 = tpu.concatenate %314, %316, %318, %320, %322, %324, %326, %328 in 1 : vector<32x108xf32>, vector<32x108xf32>, vector<32x108xf32>, vector<32x108xf32>, vector<32x108xf32>, vector<32x108xf32>, vector<32x108xf32>, vector<32x108xf32> -> vector<32x864xf32>
    %cst_71 = arith.constant dense<0.000000e+00> : vector<32x32xf32>
    %330 = tpu.matmul %329, %5, %cst_71 {dimension_numbers = #tpu.dot_dimension_numbers<[1], [0], [0], [1], [0, 0, 1, 1], [], []>} : vector<32x864xf32>, vector<864x32xf32>, vector<32x32xf32> -> vector<32x32xf32>
    %331 = arith.addf %330, %7 : vector<32x32xf32>
    %332 = math.tanh %331 : vector<32x32xf32>
    %333 = arith.mulf %299, %256 : vector<32x32xf32>
    %cst_72 = arith.constant 1.000000e+00 : f32
    %334 = vector.broadcast %cst_72 : f32 to vector<32x32xf32>
    %335 = arith.subf %334, %299 : vector<32x32xf32>
    %336 = arith.mulf %335, %332 : vector<32x32xf32>
    %337 = arith.addf %333, %336 : vector<32x32xf32>
    %c3_73 = arith.constant 3 : index
    %c0_74 = arith.constant 0 : index
    %c0_75 = arith.constant 0 : index
    %338 = vector.load %arg9[%c3_73, %c0_74, %c0_75] : memref<4x32x32xf32, #tpu.memory_space<vmem>>, vector<1x32x32xf32>
    %339 = vector.shape_cast %338 : vector<1x32x32xf32> to vector<32x32xf32>
    %340 = vector.shape_cast %337 : vector<32x32xf32> to vector<1x32x32xf32>
    tpu.vector_store %arg9[%c3_73, %c0_74, %c0_75], %340 {strides = array<i32>} : memref<4x32x32xf32, #tpu.memory_space<vmem>>, vector<1x32x32xf32>,
    %c0_76 = arith.constant 0 : index
    %c0_77 = arith.constant 0 : index
    %341 = vector.load %arg10[%c0_76, %c0_77] : memref<32x32xf32, #tpu.memory_space<vmem>>, vector<32x32xf32>
    tpu.vector_store %arg10[%c0_76, %c0_77], %337 {strides = array<i32>} : memref<32x32xf32, #tpu.memory_space<vmem>>, vector<32x32xf32>,
    return
  }
  func.func @transform_0(%arg0: i32) -> (i32, i32, i32) {
    %c0_i32 = arith.constant 0 : i32
    %c0_i32_0 = arith.constant 0 : i32
    %c0_i32_1 = arith.constant 0 : i32
    return %arg0, %c0_i32, %c0_i32_0 : i32, i32, i32
  }
  func.func @transform_1(%arg0: i32) -> (i32, i32) {
    %c0_i32 = arith.constant 0 : i32
    %c0_i32_0 = arith.constant 0 : i32
    %c0_i32_1 = arith.constant 0 : i32
    return %c0_i32, %c0_i32_0 : i32, i32
  }
  func.func @transform_2(%arg0: i32) -> (i32, i32) {
    %c0_i32 = arith.constant 0 : i32
    %c0_i32_0 = arith.constant 0 : i32
    %c0_i32_1 = arith.constant 0 : i32
    return %c0_i32, %c0_i32_0 : i32, i32
  }
  func.func @transform_3(%arg0: i32) -> (i32, i32) {
    %c0_i32 = arith.constant 0 : i32
    %c0_i32_0 = arith.constant 0 : i32
    %c0_i32_1 = arith.constant 0 : i32
    return %c0_i32, %c0_i32_0 : i32, i32
  }
  func.func @transform_4(%arg0: i32) -> (i32, i32) {
    %c0_i32 = arith.constant 0 : i32
    %c0_i32_0 = arith.constant 0 : i32
    %c0_i32_1 = arith.constant 0 : i32
    return %c0_i32, %c0_i32_0 : i32, i32
  }
  func.func @transform_5(%arg0: i32) -> (i32, i32) {
    %c0_i32 = arith.constant 0 : i32
    %c0_i32_0 = arith.constant 0 : i32
    %c0_i32_1 = arith.constant 0 : i32
    return %c0_i32, %c0_i32_0 : i32, i32
  }
  func.func @transform_6(%arg0: i32) -> (i32, i32) {
    %c0_i32 = arith.constant 0 : i32
    %c0_i32_0 = arith.constant 0 : i32
    %c0_i32_1 = arith.constant 0 : i32
    return %c0_i32, %c0_i32_0 : i32, i32
  }
  func.func @transform_7(%arg0: i32) -> (i32, i32) {
    %c0_i32 = arith.constant 0 : i32
    %c0_i32_0 = arith.constant 0 : i32
    %c0_i32_1 = arith.constant 0 : i32
    return %c0_i32, %c0_i32_0 : i32, i32
  }
  func.func @transform_8(%arg0: i32) -> (i32, i32, i32) {
    %c0_i32 = arith.constant 0 : i32
    %c0_i32_0 = arith.constant 0 : i32
    %c0_i32_1 = arith.constant 0 : i32
    return %arg0, %c0_i32, %c0_i32_0 : i32, i32, i32
  }
}

</mosaic_0001>

<bundles_post_ra>
// kernel: tpu_custom_call.1
= control target key start
LH: loop header
LB: loop body
LE: loop exit
PB: predicated region body
PF: predicated region fallthrough
CT: control target
= control target key end

     0   :  { %s15544_s0 = inlined_call_operand.vmem [shape: f32[8,32,4], index: 0, kind: input, shape index: {}]   ;;  %s15545_s1 = inlined_call_operand.vmem [shape: f32[32,32], index: 1, kind: input, shape index: {}]   ;;  %s15546_s2 = inlined_call_operand.vmem [shape: f32[32,16], index: 2, kind: input, shape index: {}]   ;;  %s15547_s3 = inlined_call_operand.vmem [shape: f32[864,64], index: 3, kind: input, shape index: {}]   ;;  %s15548_s4 = inlined_call_operand.vmem [shape: f32[864,32], index: 4, kind: input, shape index: {}]   ;;  %s15549_s5 = inlined_call_operand.vmem [shape: f32[32,64], index: 5, kind: input, shape index: {}]   ;;  %s15550_s6 = inlined_call_operand.vmem [shape: f32[32,32], index: 6, kind: input, shape index: {}]   ;;  %s15551_s7 = inlined_call_operand.vmem [shape: f32[32,8], index: 7, kind: input, shape index: {}]   ;;  %s15552_s8 = inlined_call_operand.hbm [shape: f32[8,32,32], index: 8, kind: output, shape index: {}]  }
   0x1   :  { %15648 = sst [smem:[#allocation32_spill]] %s15544_s0 }
   0x2   :  { %15649 = sst [smem:[#allocation33_spill]] %s15545_s1 }
   0x3   :  { %15650 = sst [smem:[#allocation34_spill]] %s15551_s7 }
   0x4   :  { %15651 = sst [smem:[#allocation35_spill]] %s15552_s8 }
   0x5   :  { %13 = vsyncpa [#allocation4], 0 }
   0x6   :  { %15 = vsyncpa [#allocation4 + $0x1], 0  ;;  %s10305_s27 = smov 0   ;;  %s10307_s28 = smov 0  }
   0x7   :  { %s10309_s29 = smov 0   ;;  %s10311_s30 = smov 0  }
   0x8 LB: > { %15652 = sst [smem:[#allocation6_spill]] %s10223_s27  ;;  %s10326_s9 = sadd.s32 4294967295, %s10235_s30   ;;  %s10235_s30 = sphi %s10311_s30, %s15782_s30   ;;  %s10231_s29 = sphi %s10309_s29, %s15785_s29   ;;  %s10227_s28 = sphi %s10307_s28, %s15784_s28   ;;  %s10223_s27 = sphi %s10305_s27, %s15783_s27  }
   0x9   : > { %15653 = sst [smem:[#allocation7_spill]] %s10227_s28  ;;  %s7155_s10 = sadd.s32 4294967294, %s10235_s30  }
   0xa   : > { %15654 = sst [smem:[#allocation8_spill]] %s10231_s29  ;;  %s10330_s11 = sadd.s32 1, %s10235_s30  }
   0xb   : > { %15655 = sst [smem:[#allocation9_spill]] %s10235_s30  ;;  %s201_s12 = sadd.s32 1, %s10231_s29 }
   0xc   : > { %15656 = sst [smem:[#allocation10_spill]] %s10330_s11  ;;  %s198_s13 = ssub.s32 %s10235_s30, %s10330_s11 }
   0xd   : > { %p211_p0 = scmp.ne.s32.totalorder %s10231_s29, %s10227_s28  ;;  %p199_p1 = scmp.eq.s32.totalorder %s198_s13, 0 }
   0xe   : > { %p212_p2 = scmp.eq.s32.totalorder %s10326_s9, 1  ;;  %p217_p3 = scmp.ne.s32.totalorder %s10227_s28, %s10223_s27 }
   0xf   : > { %p218_p4 = scmp.eq.s32.totalorder %s7155_s10, 1  ;;  %p7158_p7 = scmp.ge.s32.totalorder %s10235_s30, 1 }
  0x10   : > { %s10341_s14 = scalar_select %p199_p1, %s10231_s29, %s201_s12  }
  0x11   : > { %p10343_p5 = por %p212_p2, %p211_p0  ;;  %p10347_p6 = por %p218_p4, %p217_p3 }
  0x12   : > { %15657 = sst [smem:[#allocation11_spill]] %s10341_s14  ;;  %p267_p8 = scmp.lt.s32.totalorder %s10235_s30, 3 }
  0x13   : > { %s15658_s15 = scalar_select %p10343_p5, 1, 0 }
  0x14   : > { %s15660_s16 = scalar_select %p10347_p6, 1, 0 }
  0x15   : > { %15659 = sst [smem:[#allocation12_spill]] %s15658_s15  ;;  %p268_p9 = pnand %p7158_p7, %p267_p8 }
  0x16   : > { %15661 = sst [smem:[#allocation13_spill]] %s15660_s16 }
  0x17   : > { %271 = sbr.rel (%p268_p9) target bundleno = 7234 (0x1c42), region = 52 }
  0x1c   : > { %s15553_s17 = sand.u32 1, %s10227_s28   ;;  %s7160_s18 = sshll.u32 %s10326_s9, 2 }
  0x1d   : > { %s7159_s19 = sshll.u32 %s15553_s17, 7  ;;  %p303_p10 = scmp.lt.s32.totalorder %s7160_s18, 7 }
  0x1e   : > { %s15662_s0 = sld [smem:[#allocation32_spill]]  ;;  %s10362_s24 = scalar_lea.vmem [#allocation3], %s7159_s19 }
  0x1f   : > { %s15787_s18 = smov (!%p303_p10, %s7160_s18), 7  ;;  %p7163_p11 = scmp.ne.s32.totalorder %s10326_s9, 0 }
  0x20   : > { %s7306_s20 = sshll.u32 %s15787_s18, 5  ;;  %s15663_s1 = sld [smem:[#allocation33_spill]] (!%p7163_p11) }
  0x21   : > { %313 = sbr.rel (%p7163_p11) target bundleno = 41 (0x29), region = 56 }
  0x24   : > { %s10360_s23 = scalar_lea.vmem %s15662_s0, %s7306_s20 }
  0x26   : > { %v314_v0 = vld [vmem:[%s15663_s1] sm:$0xff]  ;;  %vm318_vm0 = vcmask 261120   ;;  %v315_v1 = vld [vmem:[%s15663_s1 + $0x8] sm:$0xff]  ;;  %v316_v2 = vld [vmem:[%s15663_s1 + $0x10] sm:$0xff] }
  0x27   : > { %319 = vst.msk [vmem:[#allocation2] sm:$0xff] %vm318_vm0, %v314_v0  ;;  %320 = vst.msk [vmem:[#allocation2 + $0x8] sm:$0xff] %vm318_vm0, %v315_v1  ;;  %v317_v3 = vld [vmem:[%s15663_s1 + $0x18] sm:$0xff] }
  0x28   : > { %321 = vst.msk [vmem:[#allocation2 + $0x10] sm:$0xff] %vm318_vm0, %v316_v2  ;;  %322 = vst.msk [vmem:[#allocation2 + $0x18] sm:$0xff] %vm318_vm0, %v317_v3 }
  0x29 PF: > { %vm584_vm1 = vcmask 130048   ;;  %s15558_s21 = smov 4   ;;  %v323_v8 = vld [vmem:[%s15546_s2] sm:$0xff]  ;;  %v10238_v9 = vmov 2   ;;  %v10239_v10 = vmov 4   ;;  %s15664_s7 = sld [smem:[#allocation34_spill]] }
  0x2a   : > { %9050 = vset.pattern.permute.xlu1 %v10238_v9  ;;  %8593 = vmatprep.mubr.msk.f32.mxu0 %vm584_vm1, %v323_v8  ;;  %v10240_v12 = vmov 3   ;;  %v10241_v13 = vmov 1   ;;  %v560_v17 = vld [vmem:[%s10360_s23 + $0x8] sm:$0xff]  ;;  %vm579_vm2 = vcmask 31744   ;;  %v562_v18 = vld [vmem:[%s10360_s23 + $0x18] sm:$0xff]  ;;  %v559_v23 = vld [vmem:[%s10360_s23] sm:$0xff] }
  0x2b   : > { %8603 = vmatprep.mubr.msk.f32.mxu1 %vm584_vm1, %v323_v8  ;;  %9052 = vset.pattern.permute.xlu0 %v10239_v10  ;;  %v561_v24 = vld [vmem:[%s10360_s23 + $0x10] sm:$0xff]  ;;  %v324_v28 = vld [vmem:[%s15546_s2 + $0x8] sm:$0xff]  ;;  %v326_v31 = vld [vmem:[%s15546_s2 + $0x18] sm:$0xff]  ;;  %s15556_s19 = smov 36   ;;  %s15554_s20 = smov 72   ;;  %v10244_v39 = vmov 6  }
  0x2c   : > { %v325_v30 = vld [vmem:[%s15546_s2 + $0x10] sm:$0xff]  ;;  %v10245_v40 = vmov 5   ;;  %v10246_v42 = vmov 7   ;;  %v10247_v43 = vmov 0   ;;  %v358_v44 = vld [vmem:[%s15547_s3 + $0xf8] sm:$0xff]  ;;  %v356_v48 = vld [vmem:[%s15547_s3 + $0xe8] sm:$0xff] }
  0x2d   : > { %v342_v45 = vld [vmem:[%s15547_s3 + $0x78] sm:$0xff]  ;;  %v357_v46 = vld [vmem:[%s15547_s3 + $0xf0] sm:$0xff]  ;;  %v340_v49 = vld [vmem:[%s15547_s3 + $0x68] sm:$0xff]  ;;  %vm804_vm3 = vcmask 588800   ;;  %vm799_vm4 = vcmask 293888   ;;  %s15572_s22 = smov 88  }
  0x2e   : > { %v556_v4 = vld [vmem:[#allocation2 + $0x8] sm:$0xff]  ;;  %v555_v6 = vld [vmem:[#allocation2] sm:$0xff]  ;;  %v341_v47 = vld [vmem:[%s15547_s3 + $0x70] sm:$0xff]  ;;  %s15560_s10 = smov 108   ;;  %s15568_s26 = smov 68   ;;  %vm1090_vm5 = vcmask 719872  }
  0x2f   : > { %v558_v5 = vld [vmem:[#allocation2 + $0x18] sm:$0xff]  ;;  %569 = vrot.lane.b32.xlu0 %v556_v4, %s15558_s21  ;;  %v557_v7 = vld [vmem:[#allocation2 + $0x10] sm:$0xff]  ;;  %v10390_v11 = vld [vmem:[%s15664_s7] sm:$0xff]  ;;  %s15570_s12 = smov 48   ;;  %s15562_s18 = smov 116   ;;  %vm1085_vm6 = vcmask 883712  }
  0x30   : > { %573 = vrot.lane.b32.xlu1 %v558_v5, %s15558_s21  ;;  %v10400_v14 = vld [vmem:[%s15664_s7 + $0x8] sm:$0xff]  ;;  %v10405_v15 = vld [vmem:[%s15664_s7 + $0x10] sm:$0xff]  ;;  %v10414_v16 = vld [vmem:[%s15664_s7 + $0x18] sm:$0xff]  ;;  %s15566_s25 = smov 8   ;;  %vm1100_vm7 = vcmask 392192   ;;  %vm1095_vm8 = vcmask 556032  }
  0x31   : > { %v355_v50 = vld [vmem:[%s15547_s3 + $0xe0] sm:$0xff]  ;;  %v354_v53 = vld [vmem:[%s15547_s3 + $0xd8] sm:$0xff]  ;;  %v353_v56 = vld [vmem:[%s15547_s3 + $0xd0] sm:$0xff]  ;;  %vm1110_vm9 = vcmask 64512   ;;  %vm1115_vm10 = vcmask 949248   ;;  %vm1105_vm11 = vcmask 228352  }
  0x32   : > { %v339_v52 = vld [vmem:[%s15547_s3 + $0x60] sm:$0xff]  ;;  %v338_v54 = vld [vmem:[%s15547_s3 + $0x58] sm:$0xff]  ;;  %v337_v57 = vld [vmem:[%s15547_s3 + $0x50] sm:$0xff]  ;;  %vm1120_vm12 = vcmask 785408   ;;  %s15681_s17 = smov 72   ;;  %s15682_s13 = smov 88  }
  0x33   : > { %567 = vrot.lane.b32.xlu0 %v555_v6, %s15558_s21  ;;  %v390_v55 = vld [vmem:[%s15547_s3 + $0x1f8] sm:$0xff]  ;;  %v352_v58 = vld [vmem:[%s15547_s3 + $0xc8] sm:$0xff]  ;;  %v351_v61 = vld [vmem:[%s15547_s3 + $0xc0] sm:$0xff]  ;;  %s15686_s0 = smov 28   ;;  %s15582_s1 = smov 32   ;;  %vm2311_vm13 = vcmask 261120  }
  0x34   : > { %571 = vrot.lane.b32.xlu1 %v557_v7, %s15558_s21  ;;  %v336_v60 = vld [vmem:[%s15547_s3 + $0x48] sm:$0xff]  ;;  %v335_v62 = vld [vmem:[%s15547_s3 + $0x40] sm:$0xff]  ;;  %v350_v63 = vld [vmem:[%s15547_s3 + $0xb8] sm:$0xff]  ;;  %s15680_s21 = smov 36   ;;  %s15693_s30 = smov 32  }
  0x35   : > { %v334_v0 = vld [vmem:[%s15547_s3 + $0x38] sm:$0xff]  ;;  %v349_v1 = vld [vmem:[%s15547_s3 + $0xb0] sm:$0xff]  ;;  %v348_v4 = vld [vmem:[%s15547_s3 + $0xa8] sm:$0xff]  ;;  %s15597_s11 = smov 100   ;;  %s15600_s27 = smov 96  }
  0x36   : > { %v333_v3 = vld [vmem:[%s15547_s3 + $0x30] sm:$0xff]  ;;  %v332_v5 = vld [vmem:[%s15547_s3 + $0x28] sm:$0xff]  ;;  %s15722_s29 = smov 100   ;;  %s15727_s15 = smov 96  }
  0x37   : > { %894 = vperm.xlu0 %9052, %v10390_v11   ;;  %s7093_s16 = sshll.u32 %s10362_s24, 4  ;;  %s15496_s16 = int_to_ptr.vmem [resolvable:$true] %s7093_s16 }
  0x38   : > { %854 = vperm.xlu1 %9050, %v10390_v11  }
  0x3b   : > { %9053 = vset.pattern.permute.xlu0 %v10241_v13 }
  0x3c   : > { %9051 = vset.pattern.permute.xlu1 %v10240_v12  ;;  %834 = vperm.xlu0 %9053, %v10390_v11  }
  0x3d   : > { %874 = vperm.xlu1 %9051, %v10390_v11  }
  0x40   : > { %842 = vperm.xlu0 %9053, %v10405_v15  }
  0x41   : > { %9054 = vset.pattern.permute.xlu1 %v10241_v13 }
  0x42   : > { %838 = vperm.xlu1 %9054, %v10400_v14  }
  0x44   : > { %9057 = vset.pattern.permute.xlu0 %v10238_v9 }
  0x46   : > { %9055 = vset.pattern.permute.xlu1 %v10238_v9 }
  0x47   : > { %858 = vperm.xlu1 %9055, %v10400_v14  }
  0x4b   : > { %862 = vperm.xlu1 %9055, %v10405_v15  }
  0x4f   : > { %9056 = vset.pattern.permute.xlu1 %v10241_v13  ;;  %v374_v13 = vld [vmem:[%s15547_s3 + $0x178] sm:$0xff] }
  0x50   : > { %846 = vperm.xlu1 %9056, %v10414_v16  }
  0x54   : > { %9058 = vset.pattern.permute.xlu1 %v10240_v12 }
  0xa1   : > { %v570_v19 = vpop.permute.xlu0 %569 }
  0xa2   : > { %v574_v20 = vpop.permute.xlu1 %573  ;;  %v10421_v21 = vsel %vm579_vm2, %v560_v17, %v570_v19  ;;  %v331_v17 = vld [vmem:[%s15547_s3 + $0x20] sm:$0xff]  ;;  %v346_v19 = vld [vmem:[%s15547_s3 + $0x98] sm:$0xff] }
  0xa3   : > { %v10424_v22 = vsel %vm579_vm2, %v562_v18, %v574_v20  ;;  %8589 = vmatprep.subr.mxu0 %v10421_v21  ;;  %v389_v18 = vld [vmem:[%s15547_s3 + $0x1f0] sm:$0xff] }
  0xa4   : > { %8599 = vmatprep.subr.mxu1 %v10424_v22  ;;  %8590 = vmatpush3.msra.mxu0 %v10421_v21  ;;  %v373_v20 = vld [vmem:[%s15547_s3 + $0x170] sm:$0xff] }
  0xa5   : > { %8600 = vmatpush3.msra.mxu1 %v10424_v22  ;;  %v568_v25 = vpop.permute.xlu0 %567 }
  0xa6   : > { %v572_v26 = vpop.permute.xlu1 %571  ;;  %v10433_v27 = vsel %vm579_vm2, %v559_v23, %v568_v25  ;;  %v330_v23 = vld [vmem:[%s15547_s3 + $0x18] sm:$0xff]  ;;  %v345_v25 = vld [vmem:[%s15547_s3 + $0x90] sm:$0xff] }
  0xa7   : > { %v10439_v29 = vsel %vm579_vm2, %v561_v24, %v572_v26  ;;  %8591 = vmatprep.subr.mxu0 %v10433_v27  ;;  %v388_v24 = vld [vmem:[%s15547_s3 + $0x1e8] sm:$0xff] }
  0xa8   : > { %8601 = vmatprep.subr.mxu1 %v10439_v29  ;;  %8592 = vmatpush3.msra.mxu0 %v10433_v27  ;;  %v372_v26 = vld [vmem:[%s15547_s3 + $0x168] sm:$0xff] }
  0xa9   : > { %8602 = vmatpush3.msra.mxu1 %v10439_v29  ;;  %8594 = vmatmul.mubr.msk.f32.vlgmr.msra.gmra.mxu0 %vm584_vm1, %v324_v28 }
  0xaa   : > { %8604 = vmatmul.mubr.msk.f32.vlgmr.msra.gmra.mxu1 %vm584_vm1, %v324_v28  ;;  %8596 = vmatprep.mubr.msk.f32.mxu0 %vm584_vm1, %v325_v30  ;;  %v329_v28 = vld [vmem:[%s15547_s3 + $0x10] sm:$0xff] }
  0xab   : > { %8606 = vmatprep.mubr.msk.f32.mxu1 %vm584_vm1, %v325_v30  ;;  %7321 = vmatprep.subr.mxu0 %v358_v44  ;;  %v387_v30 = vld [vmem:[%s15547_s3 + $0x1e0] sm:$0xff] }
  0xac   : > { %7322 = vmatpush3.msra.mxu0 %v342_v45  ;;  %7365 = vmatprep.subr.mxu1 %v390_v55  ;;  %v369_v45 = vld [vmem:[%s15547_s3 + $0x150] sm:$0xff]  ;;  %v366_v55 = vld [vmem:[%s15547_s3 + $0x138] sm:$0xff] }
  0xad   : > { %8597 = vmatmul.mubr.msk.f32.gmra.mxu0 %vm584_vm1, %v326_v31  ;;  %7323 = vmatprep.subr.mxu0 %v357_v46 }
  0xae   : > { %8607 = vmatmul.mubr.msk.f32.gmra.mxu1 %vm584_vm1, %v326_v31  ;;  %7324 = vmatpush3.msra.mxu0 %v341_v47  ;;  %v384_v47 = vld [vmem:[%s15547_s3 + $0x1c8] sm:$0xff] }
  0xaf   : > { %7325 = vmatprep.subr.mxu0 %v356_v48  ;;  %7366 = vmatpush3.msra.mxu1 %v374_v13  ;;  %v422_v13 = vld [vmem:[%s15547_s3 + $0x2f8] sm:$0xff] }
  0xb0   : > { %7326 = vmatpush3.msra.mxu0 %v340_v49  ;;  %7367 = vmatprep.subr.mxu1 %v389_v18  ;;  %v383_v49 = vld [vmem:[%s15547_s3 + $0x1c0] sm:$0xff] }
  0xb1   : > { %7327 = vmatprep.subr.mxu0 %v355_v50  ;;  %7368 = vmatpush3.msra.mxu1 %v373_v20  ;;  %v367_v50 = vld [vmem:[%s15547_s3 + $0x140] sm:$0xff] }
  0xb2   : > { %7328 = vmatpush3.msra.mxu0 %v339_v52  ;;  %v10568_v6 = vpop.permute.xlu0 %894  ;;  %7369 = vmatprep.subr.mxu1 %v388_v24  ;;  %v382_v52 = vld [vmem:[%s15547_s3 + $0x1b8] sm:$0xff]  ;;  %v375_v24 = vld [vmem:[%s15547_s3 + $0x180] sm:$0xff] }
  0xb3   : > { %v10514_v51 = vpop.permute.xlu1 %854  ;;  %7329 = vmatprep.subr.mxu0 %v354_v53  ;;  %7370 = vmatpush3.msra.mxu1 %v372_v26 }
  0xb4   : > { %7330 = vmatpush3.msra.mxu0 %v338_v54  ;;  %7371 = vmatprep.subr.mxu1 %v387_v30 }
  0xb5   : > { %7331 = vmatprep.subr.mxu0 %v353_v56 }
  0xb6   : > { %7332 = vmatpush3.msra.mxu0 %v337_v57  ;;  %v381_v57 = vld [vmem:[%s15547_s3 + $0x1b0] sm:$0xff] }
  0xb7   : > { %7333 = vmatprep.subr.mxu0 %v352_v58  ;;  %v10572_v8 = vpop.permute.xlu0 %834 }
  0xb8   : > { %v10537_v59 = vpop.permute.xlu1 %874  ;;  %7334 = vmatpush3.msra.mxu0 %v336_v60 }
  0xb9   : > { %7335 = vmatprep.subr.mxu0 %v351_v61  ;;  %v365_v61 = vld [vmem:[%s15547_s3 + $0x130] sm:$0xff] }
  0xba   : > { %7336 = vmatpush3.msra.mxu0 %v335_v62  ;;  %v380_v62 = vld [vmem:[%s15547_s3 + $0x1a8] sm:$0xff] }
  0xbb   : > { %7337 = vmatprep.subr.mxu0 %v350_v63  ;;  %v364_v63 = vld [vmem:[%s15547_s3 + $0x128] sm:$0xff] }
  0xbc   : > { %7338 = vmatpush3.msra.mxu0 %v334_v0  ;;  %v379_v0 = vld [vmem:[%s15547_s3 + $0x1a0] sm:$0xff] }
  0xbd   : > { %v10557_v2 = vpop.permute.xlu1 %838  ;;  %7339 = vmatprep.subr.mxu0 %v349_v1 }
  0xbe   : > { %7340 = vmatpush3.msra.mxu0 %v333_v3  ;;  %v378_v3 = vld [vmem:[%s15547_s3 + $0x198] sm:$0xff] }
  0xbf   : > { %7341 = vmatprep.subr.mxu0 %v348_v4  ;;  %v362_v4 = vld [vmem:[%s15547_s3 + $0x118] sm:$0xff] }
  0xc0   : > { %7342 = vmatpush3.msra.mxu0 %v332_v5  ;;  %v377_v5 = vld [vmem:[%s15547_s3 + $0x190] sm:$0xff] }
  0xc2   : > { %v10570_v7 = vpop.permute.xlu1 %858 }
  0xc6   : > { %v10574_v9 = vpop.permute.xlu1 %862 }
 0x169   : > { %v8595_v32 = vpop.f32.mrf.mxu0 }
 0x16a   : > { %773 = vrot.lane.b32.xlu0 %v8595_v32, %s15556_s19  ;;  %v8605_v34 = vpop.f32.mrf.mxu1 }
 0x16b   : > { %v663_v33 = vpop.f32.mrf.mxu0 }
 0x16c   : > { %771 = vrot.lane.b32.xlu1 %v663_v33, %s15556_s19  ;;  %v748_v36 = vpop.f32.mrf.mxu1  ;;  %v344_v33 = vld [vmem:[%s15547_s3 + $0x88] sm:$0xff] }
 0x16d   : > { %v8598_v35 = vpop.f32.mrf.mxu0 }
 0x16e   : > { %v8608_v38 = vpop.f32.mrf.mxu1 }
 0x16f   : > { %v673_v37 = vpop.f32.mrf.mxu0 }
 0x170   : > { %775 = vrot.lane.b32.xlu1 %v748_v36, %s15556_s19  ;;  %787 = vrot.lane.b32.xlu0 %v673_v37, %s15554_s20  ;;  %v758_v41 = vpop.f32.mrf.mxu1  ;;  %v386_v36 = vld [vmem:[%s15547_s3 + $0x1d8] sm:$0xff]  ;;  %v343_v37 = vld [vmem:[%s15547_s3 + $0x80] sm:$0xff] }
 0x174   : > { %789 = vrot.lane.b32.xlu1 %v8598_v35, %s15554_s20  ;;  %866 = vperm.xlu0 %9057, %v10414_v16   ;;  %v328_v35 = vld [vmem:[%s15547_s3 + $0x8] sm:$0xff] }
 0x178   : > { %878 = vperm.xlu1 %9058, %v10400_v14   ;;  %777 = vrot.lane.b32.xlu0 %v8605_v34, %s15556_s19  ;;  %v371_v34 = vld [vmem:[%s15547_s3 + $0x160] sm:$0xff]  ;;  %s15687_s19 = smov 116  }
 0x179   : > { %9062 = vset.pattern.permute.xlu0 %v10240_v12  ;;  %7372 = vmatpush3.msra.mxu1 %v371_v34 }
 0x17a   : > { %7373 = vmatprep.subr.mxu1 %v386_v36 }
 0x17c   : > { %9059 = vset.pattern.permute.xlu1 %v10239_v10  ;;  %882 = vperm.xlu0 %9062, %v10405_v15  }
 0x17d   : > { %898 = vperm.xlu1 %9059, %v10400_v14  }
 0x180   : > { %9063 = vset.pattern.permute.xlu0 %v10244_v39 }
 0x181   : > { %9060 = vset.pattern.permute.xlu1 %v10245_v40  ;;  %934 = vperm.xlu0 %9063, %v10390_v11  }
 0x182   : > { %914 = vperm.xlu1 %9060, %v10390_v11  }
 0x185   : > { %791 = vrot.lane.b32.xlu0 %v758_v41, %s15554_s20 }
 0x186   : > { %793 = vrot.lane.b32.xlu1 %v8608_v38, %s15554_s20  ;;  %v370_v38 = vld [vmem:[%s15547_s3 + $0x158] sm:$0xff]  ;;  %s15564_s20 = smov 28  }
 0x187   : > { %9061 = vset.pattern.permute.xlu1 %v10246_v42  ;;  %7374 = vmatpush3.msra.mxu1 %v370_v38 }
 0x189   : > { %938 = vperm.xlu0 %9063, %v10400_v14  }
 0x18a   : > { %954 = vperm.xlu1 %9061, %v10390_v11  }
 0x18d   : > { %9068 = vset.pattern.permute.xlu0 %v10239_v10 }
 0x18e   : > { %9064 = vset.pattern.permute.xlu1 %v10239_v10  ;;  %906 = vperm.xlu0 %9068, %v10414_v16   ;;  %v10576_v10 = vpop.permute.xlu0 %842 }
 0x18f   : > { %902 = vperm.xlu1 %9064, %v10405_v15  }
 0x192   : > { %9071 = vset.pattern.permute.xlu0 %v10246_v42 }
 0x193   : > { %9065 = vset.pattern.permute.xlu1 %v10245_v40  ;;  %962 = vperm.xlu0 %9071, %v10405_v15  }
 0x194   : > { %918 = vperm.xlu1 %9065, %v10400_v14  }
 0x197   : > { %966 = vperm.xlu0 %9071, %v10414_v16  }
 0x198   : > { %9066 = vset.pattern.permute.xlu1 %v10246_v42 }
 0x199   : > { %958 = vperm.xlu1 %9066, %v10400_v14  }
 0x19b   : > { %9080 = vset.pattern.permute.xlu0 %v10247_v43 }
 0x19d   : > { %9067 = vset.pattern.permute.xlu1 %v10240_v12  ;;  %v347_v12 = vld [vmem:[%s15547_s3 + $0xa0] sm:$0xff] }
 0x19e   : > { %886 = vperm.xlu1 %9067, %v10414_v16   ;;  %7343 = vmatprep.subr.mxu0 %v347_v12  ;;  %v361_v12 = vld [vmem:[%s15547_s3 + $0x110] sm:$0xff] }
 0x19f   : > { %7344 = vmatpush3.msra.mxu0 %v331_v17 }
 0x1a0   : > { %7345 = vmatprep.subr.mxu0 %v346_v19 }
 0x1a1   : > { %7346 = vmatpush3.msra.mxu0 %v330_v23  ;;  %v360_v23 = vld [vmem:[%s15547_s3 + $0x108] sm:$0xff] }
 0x1a2   : > { %9069 = vset.pattern.permute.xlu1 %v10245_v40  ;;  %7347 = vmatprep.subr.mxu0 %v345_v25 }
 0x1a3   : > { %922 = vperm.xlu1 %9069, %v10405_v15   ;;  %7348 = vmatpush3.msra.mxu0 %v329_v28 }
 0x1a4   : > { %7349 = vmatprep.subr.mxu0 %v344_v33 }
 0x1a5   : > { %7350 = vmatpush3.msra.mxu0 %v328_v35 }
 0x1a6   : > { %7351 = vmatprep.subr.mxu0 %v343_v37 }
 0x1a7   : > { %9070 = vset.pattern.permute.xlu1 %v10244_v39 }
 0x1a8   : > { %942 = vperm.xlu1 %9070, %v10405_v15  }
 0x1ac   : > { %9072 = vset.pattern.permute.xlu1 %v10245_v40  ;;  %v385_v40 = vld [vmem:[%s15547_s3 + $0x1d0] sm:$0xff] }
 0x1ad   : > { %926 = vperm.xlu1 %9072, %v10414_v16   ;;  %7375 = vmatprep.subr.mxu1 %v385_v40 }
 0x1ae   : > { %7376 = vmatpush3.msra.mxu1 %v369_v45 }
 0x1af   : > { %7377 = vmatprep.subr.mxu1 %v384_v47 }
 0x1b1   : > { %9073 = vset.pattern.permute.xlu1 %v10244_v39  ;;  %v327_v39 = vld [vmem:[%s15547_s3] sm:$0xff] }
 0x1b2   : > { %946 = vperm.xlu1 %9073, %v10414_v16   ;;  %7352 = vmatpush3.msra.mxu0 %v327_v39 }
 0x1b3   : > { %7409 = vmatprep.subr.mxu0 %v422_v13 }
 0x1b6   : > { %9074 = vset.pattern.permute.xlu1 %v10247_v43 }
 0x1b7   : > { %811 = vperm.xlu1 %9074, %v10390_v11   ;;  %v10578_v11 = vpop.permute.xlu1 %846 }
 0x1dc   : > { %v774_v31 = vpop.permute.xlu0 %773 }
 0x1dd   : > { %v801_v53 = vsel %vm799_vm4, %v10421_v21, %v774_v31 }
 0x1de   : > { %v772_v32 = vpop.permute.xlu1 %771 }
 0x1df   : > { %v800_v41 = vsel %vm799_vm4, %v10433_v27, %v772_v32  ;;  %v368_v27 = vld [vmem:[%s15547_s3 + $0x148] sm:$0xff] }
 0x1e0   : > { %7378 = vmatpush3.msra.mxu1 %v368_v27 }
 0x1e1   : > { %7379 = vmatprep.subr.mxu1 %v383_v49 }
 0x1e2   : > { %v10642_v43 = vpop.permute.xlu1 %775  ;;  %v788_v44 = vpop.permute.xlu0 %787  ;;  %7380 = vmatpush3.msra.mxu1 %v367_v50 }
 0x1e3   : > { %v10648_v46 = vsel %vm804_vm3, %v800_v41, %v788_v44  ;;  %7381 = vmatprep.subr.mxu1 %v382_v52  ;;  %v802_v35 = vsel %vm799_vm4, %v10439_v29, %v10642_v43  ;;  %v10770_v29 = vld [vmem:[%s15547_s3 + $0x358] sm:$0xff] }
 0x1e4   : > { %v869_v48 = vmul.f32 %v10514_v51, %v10648_v46  ;;  %v849_v21 = vmul.f32 %v10572_v8, %v10648_v46  ;;  %7382 = vmatpush3.msra.mxu1 %v366_v55  ;;  %v889_v19 = vmul.f32 %v10537_v59, %v10648_v46  ;;  %v909_v30 = vmul.f32 %v10568_v6, %v10648_v46 }
 0x1e5   : > { %7383 = vmatprep.subr.mxu1 %v381_v57 }
 0x1e6   : > { %v790_v54 = vpop.permute.xlu1 %789  ;;  %993 = vrot.lane.b32.xlu1 %v869_v48, %s15572_s22  ;;  %7384 = vmatpush3.msra.mxu1 %v365_v61 }
 0x1e7   : > { %v10674_v56 = vsel %vm804_vm3, %v801_v53, %v790_v54  ;;  %7385 = vmatprep.subr.mxu1 %v380_v62 }
 0x1e8   : > { %v850_v58 = vmul.f32 %v10557_v2, %v10674_v56  ;;  %7386 = vmatpush3.msra.mxu1 %v364_v63  ;;  %v870_v40 = vmul.f32 %v10570_v7, %v10674_v56 }
 0x1e9   : > { %7387 = vmatprep.subr.mxu1 %v379_v0 }
 0x1ea   : > { %821 = vperm.xlu1 %9074, %v10405_v15   ;;  %v9075_v60 = vpack.i.bf16 %v850_v58, %v849_v21  ;;  %v363_v15 = vld [vmem:[%s15547_s3 + $0x120] sm:$0xff] }
 0x1eb   : > { %7388 = vmatpush3.msra.mxu1 %v363_v15 }
 0x1ec   : > { %9076 = vrot.lane.b32.xlu0 %v9075_v60, %s15560_s10  ;;  %7389 = vmatprep.subr.mxu1 %v378_v3  ;;  %s15666_s10 = smov 108  }
 0x1ed   : > { %7390 = vmatpush3.msra.mxu1 %v362_v4 }
 0x1ee   : > { %7391 = vmatprep.subr.mxu1 %v377_v5 }
 0x1ef   : > { %v10700_v1 = vpop.permute.xlu0 %866  ;;  %7392 = vmatpush3.msra.mxu1 %v361_v12 }
 0x1f0   : > { %816 = vperm.xlu0 %9080, %v10400_v14   ;;  %v376_v14 = vld [vmem:[%s15547_s3 + $0x188] sm:$0xff] }
 0x1f1   : > { %7393 = vmatprep.subr.mxu1 %v376_v14 }
 0x1f2   : > { %7394 = vmatpush3.msra.mxu1 %v360_v23 }
 0x1f3   : > { %v10718_v17 = vpop.permute.xlu1 %878  ;;  %v778_v18 = vpop.permute.xlu0 %777  ;;  %7395 = vmatprep.subr.mxu1 %v375_v24 }
 0x1f4   : > { %826 = vperm.xlu0 %9080, %v10414_v16   ;;  %v890_v20 = vmul.f32 %v10718_v17, %v10674_v56  ;;  %v359_v16 = vld [vmem:[%s15547_s3 + $0x100] sm:$0xff] }
 0x1f5   : > { %7396 = vmatpush3.msra.mxu1 %v359_v16 }
 0x1f6   : > { %v9081_v25 = vpack.i.bf16 %v890_v20, %v889_v19  ;;  %8609 = vmatprep.subr.mxu1 %v10770_v29 }
 0x1f7   : > { %v10737_v26 = vpop.permute.xlu0 %882 }
 0x1f8   : > { %15665 = vst [vmem:[#allocation14_spill] sm:$0xff] %v10737_v26  ;;  %v10739_v28 = vpop.permute.xlu1 %898  ;;  %9082 = vrot.lane.b32.xlu1 %v9081_v25, %s15568_s26  ;;  %9381 = vset.pattern.permute.xlu0 %v10246_v42  ;;  %v803_v42 = vsel %vm799_vm4, %v10424_v22, %v778_v18 }
 0x1f9   : > { %v910_v31 = vmul.f32 %v10739_v28, %v10674_v56 }
 0x1fb   : > { %v9086_v32 = vpack.i.bf16 %v910_v31, %v909_v30 }
 0x1fc   : > { %v10747_v33 = vpop.permute.xlu0 %934 }
 0x1fd   : > { %v10749_v34 = vpop.permute.xlu1 %914  ;;  %9087 = vrot.lane.b32.xlu0 %v9086_v32, %s15570_s12  ;;  %v949_v60 = vmul.f32 %v10747_v33, %v10648_v46 }
 0x1fe   : > { %v929_v50 = vmul.f32 %v10749_v34, %v10648_v46 }
 0x200   : > { %v792_v36 = vpop.permute.xlu0 %791 }
 0x201   : > { %v10758_v37 = vsel %vm804_vm3, %v802_v35, %v792_v36  ;;  %v794_v38 = vpop.permute.xlu1 %793 }
 0x202   : > { %v10761_v39 = vsel %vm804_vm3, %v803_v42, %v794_v38  ;;  %v871_v41 = vmul.f32 %v10574_v9, %v10758_v37  ;;  %v851_v44 = vmul.f32 %v10576_v10, %v10758_v37  ;;  %v891_v0 = vmul.f32 %v10737_v26, %v10758_v37 }
 0x203   : > { %v872_v22 = vmul.f32 %v10700_v1, %v10761_v39  ;;  %v852_v45 = vmul.f32 %v10578_v11, %v10761_v39 }
 0x204   : > { %v9091_v43 = vpack.i.bf16 %v871_v41, %v870_v40  ;;  %v10792_v53 = vpop.permute.xlu0 %938 }
 0x205   : > { %v10779_v47 = vpop.permute.xlu1 %954  ;;  %999 = vrot.lane.b32.xlu0 %v872_v22, %s15572_s22  ;;  %v9096_v27 = vpack.i.bf16 %v852_v45, %v851_v44  ;;  %v950_v21 = vmul.f32 %v10792_v53, %v10674_v56  ;;  %v406_v22 = vld [vmem:[%s15547_s3 + $0x278] sm:$0xff]  ;;  %v405_v44 = vld [vmem:[%s15547_s3 + $0x270] sm:$0xff]  ;;  %v404_v45 = vld [vmem:[%s15547_s3 + $0x268] sm:$0xff] }
 0x206   : > { %9092 = vrot.lane.b32.xlu1 %v9091_v43, %s15572_s22  ;;  %v969_v58 = vmul.f32 %v10779_v47, %v10648_v46  ;;  %v421_v43 = vld [vmem:[%s15547_s3 + $0x2f0] sm:$0xff] }
 0x207   : > { %v9106_v62 = vpack.i.bf16 %v950_v21, %v949_v60  ;;  %v417_v21 = vld [vmem:[%s15547_s3 + $0x2d0] sm:$0xff] }
 0x208   : > { %v401_v60 = vld [vmem:[%s15547_s3 + $0x250] sm:$0xff] }
 0x209   : > { %v10815_v15 = vpop.permute.xlu0 %906 }
 0x20a   : > { %v10783_v48 = vpop.permute.xlu1 %902  ;;  %9097 = vrot.lane.b32.xlu1 %v9096_v27, %s15666_s10  ;;  %15668 = vst [vmem:[#allocation16_spill] sm:$0xff] %v10815_v15  ;;  %v912_v5 = vmul.f32 %v10815_v15, %v10761_v39  ;;  %v419_v27 = vld [vmem:[%s15547_s3 + $0x2e0] sm:$0xff] }
 0x20b   : > { %v911_v63 = vmul.f32 %v10783_v48, %v10758_v37 }
 0x20e   : > { %v10837_v20 = vpop.permute.xlu0 %962 }
 0x20f   : > { %v10786_v49 = vpop.permute.xlu1 %918  ;;  %15672 = vst [vmem:[#allocation20_spill] sm:$0xff] %v10837_v20  ;;  %v971_v25 = vmul.f32 %v10837_v20, %v10758_v37 }
 0x210   : > { %v930_v52 = vmul.f32 %v10786_v49, %v10674_v56 }
 0x212   : > { %v9101_v54 = vpack.i.bf16 %v930_v52, %v929_v50  ;;  %v10846_v30 = vpop.permute.xlu0 %966  ;;  %v403_v50 = vld [vmem:[%s15547_s3 + $0x260] sm:$0xff]  ;;  %v418_v52 = vld [vmem:[%s15547_s3 + $0x2d8] sm:$0xff] }
 0x213   : > { %15674 = vst [vmem:[#allocation22_spill] sm:$0xff] %v10846_v30  ;;  %v972_v31 = vmul.f32 %v10846_v30, %v10761_v39 }
 0x214   : > { %v10794_v55 = vpop.permute.xlu1 %958  ;;  %9102 = vrot.lane.b32.xlu1 %v9101_v54, %s15564_s20  ;;  %v402_v54 = vld [vmem:[%s15547_s3 + $0x258] sm:$0xff] }
 0x215   : > { %v970_v57 = vmul.f32 %v10794_v55, %v10674_v56 }
 0x217   : > { %1075 = vrot.lane.b32.xlu0 %v970_v57, %s15562_s18 }
 0x218   : > { %1073 = vrot.lane.b32.xlu1 %v969_v58, %s15562_s18 }
 0x219   : > { %v10807_v61 = vpop.permute.xlu1 %886 }
 0x21a   : > { %15667 = vst [vmem:[#allocation15_spill] sm:$0xff] %v10807_v61  ;;  %v892_v4 = vmul.f32 %v10807_v61, %v10761_v39 }
 0x21b   : > { %9107 = vrot.lane.b32.xlu0 %v9106_v62, %s15566_s25  ;;  %v416_v62 = vld [vmem:[%s15547_s3 + $0x2c8] sm:$0xff] }
 0x21c   : > { %1029 = vrot.lane.b32.xlu1 %v911_v63, %s15570_s12  ;;  %v400_v63 = vld [vmem:[%s15547_s3 + $0x248] sm:$0xff] }
 0x21e   : > { %v10817_v3 = vpop.permute.xlu1 %922 }
 0x21f   : > { %15669 = vst [vmem:[#allocation17_spill] sm:$0xff] %v10817_v3  ;;  %1013 = vrot.lane.b32.xlu0 %v891_v0, %s15568_s26  ;;  %v931_v14 = vmul.f32 %v10817_v3, %v10758_v37  ;;  %v415_v0 = vld [vmem:[%s15547_s3 + $0x2c0] sm:$0xff] }
 0x220   : > { %1015 = vrot.lane.b32.xlu1 %v892_v4, %s15568_s26  ;;  %s15684_s26 = smov 68  }
 0x223   : > { %v10825_v12 = vpop.permute.xlu1 %942  ;;  %1031 = vrot.lane.b32.xlu0 %v912_v5, %s15570_s12  ;;  %v399_v5 = vld [vmem:[%s15547_s3 + $0x240] sm:$0xff]  ;;  %s15685_s12 = smov 8  }
 0x224   : > { %15670 = vst [vmem:[#allocation18_spill] sm:$0xff] %v10825_v12  ;;  %v951_v13 = vmul.f32 %v10825_v12, %v10758_v37 }
 0x227   : > { %1061 = vrot.lane.b32.xlu0 %v951_v13, %s15566_s25 }
 0x228   : > { %v10831_v18 = vpop.permute.xlu1 %926 }
 0x229   : > { %15671 = vst [vmem:[#allocation19_spill] sm:$0xff] %v10831_v18  ;;  %v932_v19 = vmul.f32 %v10831_v18, %v10761_v39 }
 0x22b   : > { %v9111_v23 = vpack.i.bf16 %v932_v19, %v931_v14  ;;  %v414_v14 = vld [vmem:[%s15547_s3 + $0x2b8] sm:$0xff] }
 0x22c   : > { %v398_v19 = vld [vmem:[%s15547_s3 + $0x238] sm:$0xff] }
 0x22d   : > { %v10839_v24 = vpop.permute.xlu1 %946  ;;  %9112 = vrot.lane.b32.xlu1 %v9111_v23, %s15564_s20  ;;  %v413_v23 = vld [vmem:[%s15547_s3 + $0x2b0] sm:$0xff]  ;;  %s15679_s20 = smov 4  }
 0x22e   : > { %15673 = vst [vmem:[#allocation21_spill] sm:$0xff] %v10839_v24  ;;  %v952_v16 = vmul.f32 %v10839_v24, %v10761_v39 }
 0x230   : > { %1063 = vrot.lane.b32.xlu0 %v952_v16, %s15566_s25  ;;  %s10175_s25 = scalar_lea.vmem %s15496_s16, 2048 }
 0x231   : > { %1077 = vrot.lane.b32.xlu1 %v971_v25, %s15562_s18  ;;  %p10176_p12 = scmp.ne.s32.totalorder %s15496_s16, %s10175_s25 }
 0x232   : > { %v10853_v32 = vpop.permute.xlu1 %811 }
 0x233   : > { %15675 = vst [vmem:[#allocation23_spill] sm:$0xff] %v10853_v32  ;;  %v829_v42 = vmul.f32 %v10853_v32, %v10648_v46  ;;  %v420_v46 = vld [vmem:[%s15547_s3 + $0x2e8] sm:$0xff]  ;;  %p10177_p13 = pnand %p10176_p12, %p10343_p5 }
 0x235   : > { %1079 = vrot.lane.b32.xlu1 %v972_v31, %s15562_s18  ;;  %v397_v31 = vld [vmem:[%s15547_s3 + $0x230] sm:$0xff]  ;;  %s15683_s18 = smov 48   ;;  %p10178_p0 = pneg %p10177_p13 }
 0x258   : > { %v994_v38 = vpop.permute.xlu1 %993 }
 0x25e   : > { %v10855_v35 = vpop.permute.xlu0 %9076 }
 0x25f   : > { %v9078_v36 = vunpack.i.l.bf16 %v10855_v35 }
 0x261   : > { %v1091_v40 = vsel %vm1090_vm5, %v9078_v36, %v994_v38  ;;  %v1086_v41 = vsel %vm1085_vm6, %v829_v42, %v9078_v36 }
 0x262   : > { %1193 = vmatprep.mubr.f32.mxu0 %v1091_v40  ;;  %v412_v40 = vld [vmem:[%s15547_s3 + $0x2a8] sm:$0xff] }
 0x263   : > { %1194 = vmatmul.mubr.f32.vlgmr.msra.gmra.mxu0 %v1086_v41  ;;  %v396_v41 = vld [vmem:[%s15547_s3 + $0x228] sm:$0xff] }
 0x264   : > { %7410 = vmatpush3.msra.mxu0 %v406_v22 }
 0x265   : > { %7411 = vmatprep.subr.mxu0 %v421_v43  ;;  %v10889_v57 = vpop.permute.xlu1 %821 }
 0x266   : > { %7412 = vmatpush3.msra.mxu0 %v405_v44  ;;  %15676 = vst [vmem:[#allocation24_spill] sm:$0xff] %v10889_v57 }
 0x267   : > { %7413 = vmatprep.subr.mxu0 %v420_v46  ;;  %v433_v46 = vld [vmem:[%s15547_s3 + $0x350] sm:$0xff] }
 0x268   : > { %7414 = vmatpush3.msra.mxu0 %v404_v45  ;;  %v411_v45 = vld [vmem:[%s15547_s3 + $0x2a0] sm:$0xff] }
 0x269   : > { %7415 = vmatprep.subr.mxu0 %v419_v27 }
 0x26a   : > { %7416 = vmatpush3.msra.mxu0 %v403_v50  ;;  %v9083_v13 = vpop.permute.xlu1 %9082 }
 0x26b   : > { %v10894_v58 = vpop.permute.xlu0 %816  ;;  %7417 = vmatprep.subr.mxu0 %v418_v52  ;;  %v9084_v16 = vunpack.i.l.bf16 %v9083_v13  ;;  %v9085_v22 = vunpack.i.h.bf16 %v9083_v13 }
 0x26c   : > { %15677 = vst [vmem:[#allocation25_spill] sm:$0xff] %v10894_v58  ;;  %7418 = vmatpush3.msra.mxu0 %v402_v54  ;;  %v830_v52 = vmul.f32 %v10894_v58, %v10674_v56  ;;  %v9079_v54 = vunpack.i.h.bf16 %v10855_v35  ;;  %v410_v35 = vld [vmem:[%s15547_s3 + $0x298] sm:$0xff] }
 0x26d   : > { %7419 = vmatprep.subr.mxu0 %v417_v21  ;;  %v1096_v44 = vsel %vm1095_vm8, %v994_v38, %v9084_v16  ;;  %v395_v38 = vld [vmem:[%s15547_s3 + $0x220] sm:$0xff] }
 0x26e   : > { %7420 = vmatpush3.msra.mxu0 %v401_v60  ;;  %v432_v60 = vld [vmem:[%s15547_s3 + $0x348] sm:$0xff] }
 0x26f   : > { %v10908_v4 = vpop.permute.xlu0 %826  ;;  %7421 = vmatprep.subr.mxu0 %v416_v62 }
 0x270   : > { %15678 = vst [vmem:[#allocation26_spill] sm:$0xff] %v10908_v4  ;;  %7422 = vmatpush3.msra.mxu0 %v400_v63 }
 0x271   : > { %7423 = vmatprep.subr.mxu0 %v415_v0  ;;  %v431_v0 = vld [vmem:[%s15547_s3 + $0x340] sm:$0xff] }
 0x272   : > { %7424 = vmatpush3.msra.mxu0 %v399_v5 }
 0x273   : > { %v10922_v25 = vpop.permute.xlu0 %9087  ;;  %7425 = vmatprep.subr.mxu0 %v414_v14 }
 0x274   : > { %v9090_v36 = vunpack.i.h.bf16 %v10922_v25  ;;  %v9089_v42 = vunpack.i.l.bf16 %v10922_v25  ;;  %7426 = vmatpush3.msra.mxu0 %v398_v19  ;;  %v831_v19 = vmul.f32 %v10889_v57, %v10758_v37  ;;  %v409_v37 = vld [vmem:[%s15547_s3 + $0x290] sm:$0xff] }
 0x275   : > { %7427 = vmatprep.subr.mxu0 %v413_v23  ;;  %v430_v23 = vld [vmem:[%s15547_s3 + $0x338] sm:$0xff] }
 0x276   : > { %v1101_v43 = vsel %vm1100_vm7, %v9084_v16, %v9089_v42  ;;  %7428 = vmatpush3.msra.mxu0 %v397_v31  ;;  %v1102_v50 = vsel %vm1100_vm7, %v9085_v22, %v9090_v36 }
 0x277   : > { %1278 = vmatprep.mubr.f32.mxu1 %v1101_v43  ;;  %7429 = vmatprep.subr.mxu0 %v412_v40  ;;  %v394_v40 = vld [vmem:[%s15547_s3 + $0x218] sm:$0xff]  ;;  %v393_v43 = vld [vmem:[%s15547_s3 + $0x210] sm:$0xff] }
 0x278   : > { %v10945_v27 = vpop.permute.xlu1 %9092  ;;  %1279 = vmatmul.mubr.f32.vlgmr.msra.gmra.mxu1 %v1096_v44  ;;  %7430 = vmatpush3.msra.mxu0 %v396_v41  ;;  %v10983_v41 = vpop.permute.xlu0 %999  ;;  %v429_v44 = vld [vmem:[%s15547_s3 + $0x330] sm:$0xff] }
 0x279   : > { %v9094_v21 = vunpack.i.l.bf16 %v10945_v27  ;;  %1283 = vmatprep.mubr.f32.mxu1 %v1102_v50  ;;  %8610 = vmatpush3.msra.mxu1 %v10770_v29  ;;  %v1087_v29 = vsel %vm1085_vm6, %v830_v52, %v9079_v54  ;;  %v9095_v5 = vunpack.i.h.bf16 %v10945_v27  ;;  %v392_v50 = vld [vmem:[%s15547_s3 + $0x208] sm:$0xff] }
 0x27a   : > { %8611 = vmatprep.subr.mxu1 %v433_v46  ;;  %7431 = vmatprep.subr.mxu0 %v411_v45  ;;  %v408_v45 = vld [vmem:[%s15547_s3 + $0x288] sm:$0xff] }
 0x27b   : > { %v1092_v56 = vsel %vm1090_vm5, %v9079_v54, %v9094_v21  ;;  %v1097_v62 = vsel %vm1095_vm8, %v9094_v21, %v9085_v22  ;;  %8612 = vmatpush3.msra.mxu1 %v433_v46  ;;  %7432 = vmatpush3.msra.mxu0 %v395_v38  ;;  %v832_v46 = vmul.f32 %v10908_v4, %v10761_v39  ;;  %v428_v38 = vld [vmem:[%s15547_s3 + $0x328] sm:$0xff]  ;;  %v407_v39 = vld [vmem:[%s15547_s3 + $0x280] sm:$0xff] }
 0x27c   : > { %v9098_v63 = vpop.permute.xlu1 %9097  ;;  %1198 = vmatprep.mubr.f32.mxu0 %v1092_v56  ;;  %1284 = vmatmul.mubr.f32.gmra.mxu1 %v1097_v62  ;;  %v391_v54 = vld [vmem:[%s15547_s3 + $0x200] sm:$0xff]  ;;  %v426_v56 = vld [vmem:[%s15547_s3 + $0x318] sm:$0xff] }
 0x27d   : > { %v9100_v13 = vunpack.i.h.bf16 %v9098_v63  ;;  %v9099_v14 = vunpack.i.l.bf16 %v9098_v63  ;;  %1199 = vmatmul.mubr.f32.gmra.mxu0 %v1087_v29  ;;  %8613 = vmatprep.subr.mxu1 %v432_v60  ;;  %v425_v63 = vld [vmem:[%s15547_s3 + $0x310] sm:$0xff]  ;;  %v424_v29 = vld [vmem:[%s15547_s3 + $0x308] sm:$0xff] }
 0x27e   : > { %8614 = vmatpush3.msra.mxu1 %v432_v60  ;;  %7433 = vmatprep.subr.mxu0 %v410_v35  ;;  %v427_v60 = vld [vmem:[%s15547_s3 + $0x320] sm:$0xff] }
 0x27f   : > { %v1093_v16 = vsel %vm1090_vm5, %v9099_v14, %v9095_v5  ;;  %v1088_v31 = vsel %vm1085_vm6, %v831_v19, %v9099_v14  ;;  %8615 = vmatprep.subr.mxu1 %v431_v0  ;;  %v1094_v22 = vsel %vm1090_vm5, %v9100_v13, %v10983_v41  ;;  %7434 = vmatpush3.msra.mxu0 %v394_v40 }
 0x280   : > { %1203 = vmatprep.mubr.f32.mxu0 %v1093_v16  ;;  %8616 = vmatpush3.msra.mxu1 %v431_v0  ;;  %v1089_v52 = vsel %vm1085_vm6, %v832_v46, %v9100_v13 }
 0x281   : > { %1204 = vmatmul.mubr.f32.gmra.mxu0 %v1088_v31  ;;  %8617 = vmatprep.subr.mxu1 %v430_v23  ;;  %v423_v31 = vld [vmem:[%s15547_s3 + $0x300] sm:$0xff] }
 0x282   : > { %1208 = vmatprep.mubr.f32.mxu0 %v1094_v22  ;;  %7435 = vmatprep.subr.mxu0 %v409_v37 }
 0x283   : > { %8618 = vmatpush3.msra.mxu1 %v430_v23  ;;  %7436 = vmatpush3.msra.mxu0 %v393_v43 }
 0x284   : > { %8619 = vmatprep.subr.mxu1 %v429_v44  ;;  %7437 = vmatprep.subr.mxu0 %v408_v45 }
 0x285   : > { %1209 = vmatmul.mubr.f32.gmra.mxu0 %v1089_v52  ;;  %8620 = vmatpush3.msra.mxu1 %v429_v44 }
 0x286   : > { %v9103_v21 = vpop.permute.xlu1 %9102  ;;  %7438 = vmatpush3.msra.mxu0 %v392_v50  ;;  %8621 = vmatprep.subr.mxu1 %v428_v38 }
 0x287   : > { %7439 = vmatprep.subr.mxu0 %v407_v39  ;;  %8622 = vmatpush3.msra.mxu1 %v428_v38  ;;  %v9105_v13 = vunpack.i.h.bf16 %v9103_v21  ;;  %v9104_v14 = vunpack.i.l.bf16 %v9103_v21 }
 0x288   : > { %7440 = vmatpush3.msra.mxu0 %v391_v54  ;;  %8623 = vmatprep.subr.mxu1 %v427_v60 }
 0x289   : > { %v1076_v62 = vpop.permute.xlu0 %1075  ;;  %8624 = vmatpush3.msra.mxu1 %v427_v60  ;;  %v1106_v46 = vsel %vm1105_vm11, %v9089_v42, %v9104_v14  ;;  %v1107_v54 = vsel %vm1105_vm11, %v9090_v36, %v9105_v13 }
 0x28a   : > { %v1074_v35 = vpop.permute.xlu1 %1073  ;;  %8625 = vmatprep.subr.mxu1 %v426_v56 }
 0x28b   : > { %8626 = vmatpush3.msra.mxu1 %v426_v56 }
 0x28c   : > { %8627 = vmatprep.subr.mxu1 %v425_v63 }
 0x28d   : > { %v9108_v0 = vpop.permute.xlu0 %9107  ;;  %8628 = vmatpush3.msra.mxu1 %v425_v63 }
 0x28e   : > { %v9110_v19 = vunpack.i.h.bf16 %v9108_v0  ;;  %v9109_v23 = vunpack.i.l.bf16 %v9108_v0  ;;  %v1030_v16 = vpop.permute.xlu1 %1029  ;;  %8629 = vmatprep.subr.mxu1 %v424_v29 }
 0x28f   : > { %8630 = vmatpush3.msra.mxu1 %v424_v29 }
 0x290   : > { %v1111_v40 = vsel %vm1110_vm9, %v9104_v14, %v9109_v23  ;;  %v1112_v37 = vsel %vm1110_vm9, %v9105_v13, %v9110_v19  ;;  %8631 = vmatprep.subr.mxu1 %v423_v31  ;;  %v11059_v13 = vld [vmem:[%s15546_s2] sm:$0xff] }
 0x291   : > { %v1014_v22 = vpop.permute.xlu0 %1013  ;;  %v1116_v43 = vsel %vm1115_vm10, %v1111_v40, %v1074_v35  ;;  %8632 = vmatpush3.msra.mxu1 %v423_v31  ;;  %v1117_v50 = vsel %vm1115_vm10, %v1112_v37, %v1076_v62 }
 0x292   : > { %1363 = vmatprep.mubr.f32.mxu0 %v1116_v43  ;;  %v1103_v44 = vsel %vm1100_vm7, %v1014_v22, %v1030_v16  ;;  %v1098_v45 = vsel %vm1095_vm8, %v9095_v5, %v1014_v22  ;;  %v1016_v52 = vpop.permute.xlu1 %1015 }
 0x293   : > { %1288 = vmatprep.mubr.f32.mxu1 %v1103_v44  ;;  %1364 = vmatmul.mubr.f32.vlgmr.msra.gmra.mxu0 %v1106_v46  ;;  %v1099_v42 = vsel %vm1095_vm8, %v10983_v41, %v1016_v52 }
 0x294   : > { %1289 = vmatmul.mubr.f32.gmra.mxu1 %v1098_v45  ;;  %1368 = vmatprep.mubr.f32.mxu0 %v1117_v50 }
 0x295   : > { %v1032_v38 = vpop.permute.xlu0 %1031 }
 0x296   : > { %v1104_v39 = vsel %vm1100_vm7, %v1016_v52, %v1032_v38  ;;  %v544_v52 = vld [vmem:[%s15549_s5 + $0x8] sm:$0xff] }
 0x297   : > { %1293 = vmatprep.mubr.f32.mxu1 %v1104_v39  ;;  %1369 = vmatmul.mubr.f32.gmra.mxu0 %v1107_v54 }
 0x298   : > { %1294 = vmatmul.mubr.f32.gmra.mxu1 %v1099_v42 }
 0x299   : > { %8633 = vmatprep.mubr.msk.f32.mxu1 %vm1120_vm12, %v1074_v35  ;;  %v1062_v5 = vpop.permute.xlu0 %1061 }
 0x29c   : > { %8634 = vmatmul.mubr.msk.f32.vlgmr.msra.gmra.mxu1 %vm1120_vm12, %v1076_v62 }
 0x29f   : > { %v9113_v27 = vpop.permute.xlu1 %9112 }
 0x2a0   : > { %v9114_v21 = vunpack.i.l.bf16 %v9113_v27  ;;  %v9115_v56 = vunpack.i.h.bf16 %v9113_v27  ;;  %v543_v27 = vld [vmem:[%s15549_s5] sm:$0xff] }
 0x2a2   : > { %v1113_v60 = vsel %vm1110_vm9, %v9114_v21, %v1062_v5  ;;  %v1064_v63 = vpop.permute.xlu0 %1063  ;;  %v1108_v41 = vsel %vm1105_vm11, %v1030_v16, %v9114_v21  ;;  %v1109_v0 = vsel %vm1105_vm11, %v1032_v38, %v9115_v56 }
 0x2a3   : > { %v1078_v25 = vpop.permute.xlu1 %1077  ;;  %v1114_v35 = vsel %vm1110_vm9, %v9115_v56, %v1064_v63 }
 0x2a4   : > { %8636 = vmatprep.mubr.msk.f32.mxu1 %vm1120_vm12, %v1078_v25  ;;  %v1118_v36 = vsel %vm1115_vm10, %v1113_v60, %v1078_v25 }
 0x2a5   : > { %1373 = vmatprep.mubr.f32.mxu0 %v1118_v36 }
 0x2a6   : > { %1374 = vmatmul.mubr.f32.gmra.mxu0 %v1108_v41 }
 0x2a7   : > { %v1080_v29 = vpop.permute.xlu1 %1079 }
 0x2a8   : > { %8637 = vmatmul.mubr.msk.f32.gmra.mxu1 %vm1120_vm12, %v1080_v29  ;;  %v1119_v62 = vsel %vm1115_vm10, %v1114_v35, %v1080_v29 }
 0x2a9   : > { %1378 = vmatprep.mubr.f32.mxu0 %v1119_v62  ;;  %8643 = vmatprep.mubr.msk.f32.mxu1 %vm584_vm1, %v11059_v13 }
 0x2aa   : > { %1379 = vmatmul.mubr.f32.gmra.mxu0 %v1109_v0 }
 0x323   : > { %v7353_v14 = vpop.f32.mrf.mxu0 }
 0x325   : > { %v7354_v19 = vpop.f32.mrf.mxu0 }
 0x326   : > { %v7355_v54 = vadd.f32 %v7354_v19, %v7353_v14 }
 0x328   : > { %v1196_v36 = vadd.f32 %v7355_v54, %v543_v27  ;;  %v546_v54 = vld [vmem:[%s15549_s5 + $0x18] sm:$0xff] }
 0x338   : > { %v7397_v40 = vpop.f32.mrf.mxu1 }
 0x33a   : > { %v7398_v22 = vpop.f32.mrf.mxu1 }
 0x33b   : > { %v7399_v60 = vadd.f32 %v7398_v22, %v7397_v40  ;;  %v545_v22 = vld [vmem:[%s15549_s5 + $0x10] sm:$0xff] }
 0x33c   : > { %v7400_v44 = vpop.f32.mrf.mxu1 }
 0x33d   : > { %v7356_v23 = vpop.f32.mrf.mxu0 }
 0x33e   : > { %v7401_v45 = vpop.f32.mrf.mxu1 }
 0x33f   : > { %v7357_v16 = vpop.f32.mrf.mxu0  ;;  %v7402_v25 = vadd.f32 %v7401_v45, %v7400_v44 }
 0x340   : > { %v7358_v50 = vadd.f32 %v7357_v16, %v7356_v23  ;;  %v1281_v23 = vadd.f32 %v7399_v60, %v1196_v36 }
 0x341   : > { %v7359_v31 = vpop.f32.mrf.mxu0 }
 0x342   : > { %v1201_v5 = vadd.f32 %v7358_v50, %v544_v52 }
 0x343   : > { %v7360_v37 = vpop.f32.mrf.mxu0 }
 0x344   : > { %v1286_v0 = vadd.f32 %v7402_v25, %v1201_v5  ;;  %v7361_v40 = vadd.f32 %v7360_v37, %v7359_v31 }
 0x345   : > { %v7362_v43 = vpop.f32.mrf.mxu0 }
 0x346   : > { %v1206_v52 = vadd.f32 %v7361_v40, %v545_v22 }
 0x347   : > { %v7363_v46 = vpop.f32.mrf.mxu0 }
 0x353   : > { %v7441_v38 = vpop.f32.mrf.mxu0 }
 0x354   : > { %v7403_v39 = vpop.f32.mrf.mxu1 }
 0x355   : > { %v7442_v42 = vpop.f32.mrf.mxu0 }
 0x356   : > { %v7404_v21 = vpop.f32.mrf.mxu1  ;;  %v7443_v41 = vadd.f32 %v7442_v42, %v7441_v38  ;;  %v7364_v38 = vadd.f32 %v7363_v46, %v7362_v43 }
 0x357   : > { %v7444_v56 = vpop.f32.mrf.mxu0  ;;  %v7405_v44 = vadd.f32 %v7404_v21, %v7403_v39 }
 0x358   : > { %v7406_v63 = vpop.f32.mrf.mxu1  ;;  %v1366_v19 = vadd.f32 %v7443_v41, %v1281_v23  ;;  %v1211_v31 = vadd.f32 %v7364_v38, %v546_v54 }
 0x359   : > { %v7445_v35 = vpop.f32.mrf.mxu0 }
 0x35a   : > { %v7446_v29 = vadd.f32 %v7445_v35, %v7444_v56  ;;  %v7407_v62 = vpop.f32.mrf.mxu1 }
 0x35c   : > { %v1371_v16 = vadd.f32 %v7446_v29, %v1286_v0  ;;  %v8635_v14 = vpop.f32.mrf.mxu1 }
 0x35e   : > { %v1456_v4 = vadd.f32 %v8635_v14, %v1371_v16  ;;  %v1450_v57 = vpop.f32.mrf.mxu1  ;;  %v11079_v14 = vld [vmem:[#allocation2 + $0x8] sm:$0xff] }
 0x35f   : > { %v1451_v58 = vadd.f32 %v1450_v57, %v1366_v19  ;;  %v1291_v57 = vadd.f32 %v7405_v44, %v1206_v52  ;;  %v11091_v52 = vld [vmem:[#allocation2 + $0x10] sm:$0xff] }
 0x360   : > { %v7177_v32 = vmul.f32 -1.442695, %v1456_v4  ;;  %v7408_v4 = vadd.f32 %v7407_v62, %v7406_v63 }
 0x361   : > { %v7176_v50 = vmul.f32 -1.442695, %v1451_v58 }
 0x362   : > { %9382 = vpow2.f32 %v7177_v32  ;;  %v1296_v56 = vadd.f32 %v7408_v4, %v1211_v31  ;;  %v9484_v31 = vld [vmem:[%s10360_s23] sm:$0xff] }
 0x363   : > { %9384 = vpow2.f32 %v7176_v50  ;;  %v11083_v50 = vld [vmem:[#allocation2] sm:$0xff] }
 0x366   : > { %v7447_v45 = vpop.f32.mrf.mxu0 }
 0x368   : > { %v7448_v42 = vpop.f32.mrf.mxu0  ;;  %v8638_v27 = vpop.f32.mrf.mxu1 }
 0x369   : > { %v7449_v58 = vadd.f32 %v7448_v42, %v7447_v45  ;;  %v11098_v42 = vld [vmem:[#allocation2 + $0x18] sm:$0xff] }
 0x36a   : > { %v7450_v32 = vpop.f32.mrf.mxu0  ;;  %v1460_v5 = vpop.f32.mrf.mxu1 }
 0x36b   : > { %v1376_v37 = vadd.f32 %v7449_v58, %v1291_v57  ;;  %v9483_v58 = vld [vmem:[%s10360_s23 + $0x8] sm:$0xff] }
 0x36c   : > { %v7451_v60 = vpop.f32.mrf.mxu0 }
 0x36d   : > { %v1461_v25 = vadd.f32 %v1460_v5, %v1376_v37  ;;  %v7452_v39 = vadd.f32 %v7451_v60, %v7450_v32  ;;  %v9485_v5 = vld [vmem:[%s15546_s2 + $0x8] sm:$0xff]  ;;  %v9486_v60 = vld [vmem:[%s15546_s2 + $0x10] sm:$0xff] }
 0x36f   : > { %v9383_v21 = vpop.eup %9382  ;;  %v7178_v36 = vmul.f32 -1.442695, %v1461_v25  ;;  %v1381_v43 = vadd.f32 %v7452_v39, %v1296_v56  ;;  %v9487_v56 = vld [vmem:[%s15546_s2 + $0x18] sm:$0xff] }
 0x370   : > { %v9385_v46 = vpop.eup %9384  ;;  %v1482_v41 = vadd.f32 1.0, %v9383_v21  ;;  %v9488_v21 = vld [vmem:[%s10360_s23 + $0x18] sm:$0xff] }
 0x371   : > { %v1481_v35 = vadd.f32 1.0, %v9385_v46  ;;  %9386 = vpow2.f32 %v7178_v36  ;;  %v1466_v29 = vadd.f32 %v8638_v27, %v1381_v43  ;;  %v9489_v43 = vld [vmem:[%s10360_s23 + $0x10] sm:$0xff] }
 0x372   : > { %9388 = vrcp.f32 %v1482_v41 }
 0x373   : > { %9390 = vrcp.f32 %v1481_v35  ;;  %v7179_v63 = vmul.f32 -1.442695, %v1466_v29 }
 0x375   : > { %9392 = vpow2.f32 %v7179_v63 }
 0x37e   : > { %v9387_v62 = vpop.eup %9386 }
 0x37f   : > { %v11075_v0 = vpop.eup %9388  ;;  %v1483_v23 = vadd.f32 1.0, %v9387_v62 }
 0x380   : > { %v11077_v16 = vpop.eup %9390  ;;  %v1494_v19 = vmul.f32 %v11079_v14, %v11075_v0 }
 0x381   : > { %9394 = vrcp.f32 %v1483_v23  ;;  %v1493_v40 = vmul.f32 %v11083_v50, %v11077_v16 }
 0x382   : > { %v9393_v22 = vpop.eup %9392  ;;  %1503 = vrot.lane.b32.xlu0 %v1494_v19, %s15679_s20 }
 0x383   : > { %v1484_v44 = vadd.f32 1.0, %v9393_v22  ;;  %1501 = vrot.lane.b32.xlu1 %v1493_v40, %s15679_s20  ;;  %v466_v40 = vld [vmem:[%s15548_s4 + $0xf8] sm:$0xff] }
 0x384   : > { %v450_v22 = vld [vmem:[%s15548_s4 + $0x78] sm:$0xff]  ;;  %7481 = vmatprep.subr.mxu0 %v466_v40  ;;  %v493_v40 = vld [vmem:[%s15548_s4 + $0x1d0] sm:$0xff] }
 0x385   : > { %9396 = vrcp.f32 %v1484_v44  ;;  %v465_v44 = vld [vmem:[%s15548_s4 + $0xf0] sm:$0xff]  ;;  %7482 = vmatpush3.msra.mxu0 %v450_v22  ;;  %v459_v22 = vld [vmem:[%s15548_s4 + $0xc0] sm:$0xff] }
 0x386   : > { %7483 = vmatprep.subr.mxu0 %v465_v44  ;;  %v477_v44 = vld [vmem:[%s15548_s4 + $0x150] sm:$0xff] }
 0x38e   : > { %v11089_v45 = vpop.eup %9394 }
 0x38f   : > { %v1495_v38 = vmul.f32 %v11091_v52, %v11089_v45 }
 0x391   : > { %1505 = vrot.lane.b32.xlu1 %v1495_v38, %s15679_s20  ;;  %v449_v38 = vld [vmem:[%s15548_s4 + $0x70] sm:$0xff] }
 0x392   : > { %v11096_v54 = vpop.eup %9396  ;;  %7484 = vmatpush3.msra.mxu0 %v449_v38  ;;  %v443_v38 = vld [vmem:[%s15548_s4 + $0x40] sm:$0xff] }
 0x393   : > { %v1496_v27 = vmul.f32 %v11098_v42, %v11096_v54 }
 0x395   : > { %1507 = vrot.lane.b32.xlu0 %v1496_v27, %s15679_s20  ;;  %v464_v27 = vld [vmem:[%s15548_s4 + $0xe8] sm:$0xff] }
 0x396   : > { %7485 = vmatprep.subr.mxu0 %v464_v27  ;;  %v492_v27 = vld [vmem:[%s15548_s4 + $0x1c8] sm:$0xff] }
 0x3f4   : > { %v1504_v57 = vpop.permute.xlu0 %1503 }
 0x3f5   : > { %v1502_v4 = vpop.permute.xlu1 %1501  ;;  %v11105_v32 = vsel %vm579_vm2, %v9483_v58, %v1504_v57  ;;  %v448_v57 = vld [vmem:[%s15548_s4 + $0x68] sm:$0xff]  ;;  %v482_v58 = vld [vmem:[%s15548_s4 + $0x178] sm:$0xff] }
 0x3f6   : > { %8639 = vmatprep.subr.mxu1 %v11105_v32  ;;  %v11110_v37 = vsel %vm579_vm2, %v9484_v31, %v1502_v4  ;;  %v498_v4 = vld [vmem:[%s15548_s4 + $0x1f8] sm:$0xff]  ;;  %v463_v31 = vld [vmem:[%s15548_s4 + $0xe0] sm:$0xff]  ;;  %7486 = vmatpush3.msra.mxu0 %v448_v57 }
 0x3f7   : > { %8640 = vmatpush3.msra.mxu1 %v11105_v32  ;;  %7487 = vmatprep.subr.mxu0 %v463_v31  ;;  %v458_v57 = vld [vmem:[%s15548_s4 + $0xb8] sm:$0xff]  ;;  %v491_v31 = vld [vmem:[%s15548_s4 + $0x1c0] sm:$0xff] }
 0x3f8   : > { %8641 = vmatprep.subr.mxu1 %v11110_v37 }
 0x3f9   : > { %8642 = vmatpush3.msra.mxu1 %v11110_v37 }
 0x3fa   : > { %8644 = vmatmul.mubr.msk.f32.vlgmr.msra.gmra.mxu1 %vm584_vm1, %v9485_v5 }
 0x3fb   : > { %8646 = vmatprep.mubr.msk.f32.mxu1 %vm584_vm1, %v9486_v60 }
 0x3fe   : > { %8647 = vmatmul.mubr.msk.f32.gmra.mxu1 %vm584_vm1, %v9487_v56 }
 0x3ff   : > { %8653 = vmatprep.mubr.msk.f32.mxu1 %vm584_vm1, %v11059_v13 }
 0x403   : > { %v1506_v25 = vpop.permute.xlu1 %1505 }
 0x404   : > { %v11137_v46 = vsel %vm579_vm2, %v9489_v43, %v1506_v25  ;;  %v496_v25 = vld [vmem:[%s15548_s4 + $0x1e8] sm:$0xff]  ;;  %v446_v43 = vld [vmem:[%s15548_s4 + $0x58] sm:$0xff] }
 0x407   : > { %v1508_v39 = vpop.permute.xlu0 %1507 }
 0x408   : > { %v11131_v36 = vsel %vm579_vm2, %v9488_v21, %v1508_v39  ;;  %v462_v39 = vld [vmem:[%s15548_s4 + $0xd8] sm:$0xff]  ;;  %v480_v21 = vld [vmem:[%s15548_s4 + $0x168] sm:$0xff] }
 0x409   : > { %8649 = vmatprep.subr.mxu1 %v11131_v36 }
 0x40a   : > { %8650 = vmatpush3.msra.mxu1 %v11131_v36 }
 0x40b   : > { %8651 = vmatprep.subr.mxu1 %v11137_v46 }
 0x40c   : > { %8652 = vmatpush3.msra.mxu1 %v11137_v46 }
 0x40d   : > { %8654 = vmatmul.mubr.msk.f32.vlgmr.msra.gmra.mxu1 %vm584_vm1, %v9485_v5  ;;  %7525 = vmatprep.subr.mxu1 %v498_v4  ;;  %v497_v5 = vld [vmem:[%s15548_s4 + $0x1f0] sm:$0xff]  ;;  %v476_v4 = vld [vmem:[%s15548_s4 + $0x148] sm:$0xff] }
 0x40e   : > { %8656 = vmatprep.mubr.msk.f32.mxu1 %vm584_vm1, %v9486_v60  ;;  %v447_v60 = vld [vmem:[%s15548_s4 + $0x60] sm:$0xff]  ;;  %7526 = vmatpush3.msra.mxu1 %v482_v58  ;;  %v442_v58 = vld [vmem:[%s15548_s4 + $0x38] sm:$0xff] }
 0x40f   : > { %7527 = vmatprep.subr.mxu1 %v497_v5  ;;  %7488 = vmatpush3.msra.mxu0 %v447_v60  ;;  %v457_v5 = vld [vmem:[%s15548_s4 + $0xb0] sm:$0xff]  ;;  %v475_v60 = vld [vmem:[%s15548_s4 + $0x140] sm:$0xff] }
 0x410   : > { %7489 = vmatprep.subr.mxu0 %v462_v39  ;;  %v456_v39 = vld [vmem:[%s15548_s4 + $0xa8] sm:$0xff] }
 0x411   : > { %8657 = vmatmul.mubr.msk.f32.gmra.mxu1 %vm584_vm1, %v9487_v56  ;;  %v481_v56 = vld [vmem:[%s15548_s4 + $0x170] sm:$0xff]  ;;  %7490 = vmatpush3.msra.mxu0 %v446_v43  ;;  %v440_v43 = vld [vmem:[%s15548_s4 + $0x28] sm:$0xff] }
 0x412   : > { %7528 = vmatpush3.msra.mxu1 %v481_v56  ;;  %v441_v56 = vld [vmem:[%s15548_s4 + $0x30] sm:$0xff] }
 0x413   : > { %7529 = vmatprep.subr.mxu1 %v496_v25  ;;  %v490_v25 = vld [vmem:[%s15548_s4 + $0x1b8] sm:$0xff] }
 0x414   : > { %7530 = vmatpush3.msra.mxu1 %v480_v21  ;;  %v474_v21 = vld [vmem:[%s15548_s4 + $0x138] sm:$0xff] }
 0x4ba   : > { %v8645_v13 = vpop.f32.mrf.mxu1 }
 0x4bc   : > { %v1583_v41 = vpop.f32.mrf.mxu1 }
 0x4bd   : > { %1691 = vrot.lane.b32.xlu0 %v1583_v41, %s15680_s21  ;;  %v461_v41 = vld [vmem:[%s15548_s4 + $0xd0] sm:$0xff] }
 0x4be   : > { %v8648_v35 = vpop.f32.mrf.mxu1  ;;  %7491 = vmatprep.subr.mxu0 %v461_v41  ;;  %v455_v41 = vld [vmem:[%s15548_s4 + $0xa0] sm:$0xff] }
 0x4c0   : > { %v1593_v29 = vpop.f32.mrf.mxu1 }
 0x4c1   : > { %1693 = vrot.lane.b32.xlu0 %v8645_v13, %s15680_s21  ;;  %1707 = vrot.lane.b32.xlu1 %v1593_v29, %s15681_s17  ;;  %v495_v13 = vld [vmem:[%s15548_s4 + $0x1e0] sm:$0xff]  ;;  %v445_v29 = vld [vmem:[%s15548_s4 + $0x50] sm:$0xff] }
 0x4c2   : > { %7531 = vmatprep.subr.mxu1 %v495_v13  ;;  %7492 = vmatpush3.msra.mxu0 %v445_v29  ;;  %v489_v13 = vld [vmem:[%s15548_s4 + $0x1b0] sm:$0xff]  ;;  %v439_v29 = vld [vmem:[%s15548_s4 + $0x20] sm:$0xff] }
 0x4c5   : > { %1709 = vrot.lane.b32.xlu1 %v8648_v35, %s15681_s17  ;;  %v479_v35 = vld [vmem:[%s15548_s4 + $0x160] sm:$0xff] }
 0x4c6   : > { %7532 = vmatpush3.msra.mxu1 %v479_v35  ;;  %v473_v35 = vld [vmem:[%s15548_s4 + $0x130] sm:$0xff] }
 0x4cd   : > { %v8655_v63 = vpop.f32.mrf.mxu1 }
 0x4cf   : > { %v1668_v62 = vpop.f32.mrf.mxu1 }
 0x4d0   : > { %1695 = vrot.lane.b32.xlu0 %v1668_v62, %s15680_s21  ;;  %v460_v62 = vld [vmem:[%s15548_s4 + $0xc8] sm:$0xff] }
 0x4d1   : > { %v8658_v23 = vpop.f32.mrf.mxu1  ;;  %7493 = vmatprep.subr.mxu0 %v460_v62  ;;  %v454_v62 = vld [vmem:[%s15548_s4 + $0x98] sm:$0xff] }
 0x4d3   : > { %v1678_v19 = vpop.f32.mrf.mxu1 }
 0x4d4   : > { %1697 = vrot.lane.b32.xlu0 %v8655_v63, %s15680_s21  ;;  %1711 = vrot.lane.b32.xlu1 %v1678_v19, %s15681_s17  ;;  %v494_v63 = vld [vmem:[%s15548_s4 + $0x1d8] sm:$0xff]  ;;  %v444_v19 = vld [vmem:[%s15548_s4 + $0x48] sm:$0xff] }
 0x4d5   : > { %7533 = vmatprep.subr.mxu1 %v494_v63  ;;  %7494 = vmatpush3.msra.mxu0 %v444_v19  ;;  %v488_v63 = vld [vmem:[%s15548_s4 + $0x1a8] sm:$0xff]  ;;  %v438_v19 = vld [vmem:[%s15548_s4 + $0x18] sm:$0xff] }
 0x4d6   : > { %7495 = vmatprep.subr.mxu0 %v459_v22  ;;  %v437_v22 = vld [vmem:[%s15548_s4 + $0x10] sm:$0xff] }
 0x4d7   : > { %7496 = vmatpush3.msra.mxu0 %v443_v38  ;;  %v436_v38 = vld [vmem:[%s15548_s4 + $0x8] sm:$0xff] }
 0x4d8   : > { %1713 = vrot.lane.b32.xlu1 %v8658_v23, %s15681_s17  ;;  %v478_v23 = vld [vmem:[%s15548_s4 + $0x158] sm:$0xff]  ;;  %7497 = vmatprep.subr.mxu0 %v458_v57  ;;  %v487_v57 = vld [vmem:[%s15548_s4 + $0x1a0] sm:$0xff] }
 0x4d9   : > { %7534 = vmatpush3.msra.mxu1 %v478_v23  ;;  %7498 = vmatpush3.msra.mxu0 %v442_v58  ;;  %v472_v23 = vld [vmem:[%s15548_s4 + $0x128] sm:$0xff]  ;;  %v471_v58 = vld [vmem:[%s15548_s4 + $0x120] sm:$0xff] }
 0x4da   : > { %7535 = vmatprep.subr.mxu1 %v493_v40  ;;  %7499 = vmatprep.subr.mxu0 %v457_v5  ;;  %v453_v40 = vld [vmem:[%s15548_s4 + $0x90] sm:$0xff]  ;;  %v470_v5 = vld [vmem:[%s15548_s4 + $0x118] sm:$0xff] }
 0x4db   : > { %7536 = vmatpush3.msra.mxu1 %v477_v44  ;;  %7500 = vmatpush3.msra.mxu0 %v441_v56  ;;  %v452_v44 = vld [vmem:[%s15548_s4 + $0x88] sm:$0xff]  ;;  %v469_v56 = vld [vmem:[%s15548_s4 + $0x110] sm:$0xff] }
 0x4dc   : > { %7537 = vmatprep.subr.mxu1 %v492_v27  ;;  %7501 = vmatprep.subr.mxu0 %v456_v39  ;;  %v451_v27 = vld [vmem:[%s15548_s4 + $0x80] sm:$0xff] }
 0x4dd   : > { %7538 = vmatpush3.msra.mxu1 %v476_v4  ;;  %7502 = vmatpush3.msra.mxu0 %v440_v43  ;;  %v435_v4 = vld [vmem:[%s15548_s4] sm:$0xff]  ;;  %v468_v43 = vld [vmem:[%s15548_s4 + $0x108] sm:$0xff] }
 0x4de   : > { %7539 = vmatprep.subr.mxu1 %v491_v31  ;;  %7503 = vmatprep.subr.mxu0 %v455_v41  ;;  %v486_v31 = vld [vmem:[%s15548_s4 + $0x198] sm:$0xff]  ;;  %v467_v41 = vld [vmem:[%s15548_s4 + $0x100] sm:$0xff] }
 0x4df   : > { %7540 = vmatpush3.msra.mxu1 %v475_v60  ;;  %7504 = vmatpush3.msra.mxu0 %v439_v29  ;;  %v485_v60 = vld [vmem:[%s15548_s4 + $0x190] sm:$0xff] }
 0x4e0   : > { %7541 = vmatprep.subr.mxu1 %v490_v25  ;;  %7505 = vmatprep.subr.mxu0 %v454_v62  ;;  %v530_v25 = vld [vmem:[%s15548_s4 + $0x2f8] sm:$0xff] }
 0x4e1   : > { %7542 = vmatpush3.msra.mxu1 %v474_v21  ;;  %7506 = vmatpush3.msra.mxu0 %v438_v19  ;;  %v484_v21 = vld [vmem:[%s15548_s4 + $0x188] sm:$0xff] }
 0x4e2   : > { %7543 = vmatprep.subr.mxu1 %v489_v13  ;;  %7507 = vmatprep.subr.mxu0 %v453_v40  ;;  %v483_v13 = vld [vmem:[%s15548_s4 + $0x180] sm:$0xff] }
 0x4e3   : > { %7544 = vmatpush3.msra.mxu1 %v473_v35  ;;  %7508 = vmatpush3.msra.mxu0 %v437_v22 }
 0x4e4   : > { %7545 = vmatprep.subr.mxu1 %v488_v63  ;;  %7509 = vmatprep.subr.mxu0 %v452_v44 }
 0x4e5   : > { %7546 = vmatpush3.msra.mxu1 %v472_v23  ;;  %7510 = vmatpush3.msra.mxu0 %v436_v38 }
 0x4e6   : > { %7511 = vmatprep.subr.mxu0 %v451_v27  ;;  %7547 = vmatprep.subr.mxu1 %v487_v57 }
 0x4e7   : > { %7512 = vmatpush3.msra.mxu0 %v435_v4  ;;  %7548 = vmatpush3.msra.mxu1 %v471_v58  ;;  %v11376_v58 = vld [vmem:[%s15548_s4 + $0x358] sm:$0xff] }
 0x4e8   : > { %7549 = vmatprep.subr.mxu1 %v486_v31  ;;  %7569 = vmatprep.subr.mxu0 %v530_v25 }
 0x4e9   : > { %7550 = vmatpush3.msra.mxu1 %v470_v5 }
 0x4ea   : > { %7551 = vmatprep.subr.mxu1 %v485_v60 }
 0x4eb   : > { %7552 = vmatpush3.msra.mxu1 %v469_v56 }
 0x4ec   : > { %7553 = vmatprep.subr.mxu1 %v484_v21 }
 0x4ed   : > { %7554 = vmatpush3.msra.mxu1 %v468_v43 }
 0x4ee   : > { %7555 = vmatprep.subr.mxu1 %v483_v13 }
 0x4ef   : > { %7556 = vmatpush3.msra.mxu1 %v467_v41 }
 0x4f0   : > { %8659 = vmatprep.subr.mxu1 %v11376_v58 }
 0x52f   : > { %v1692_v39 = vpop.permute.xlu0 %1691 }
 0x530   : > { %v1719_v35 = vsel %vm799_vm4, %v11110_v37, %v1692_v39 }
 0x533   : > { %v1708_v29 = vpop.permute.xlu1 %1707  ;;  %v1694_v63 = vpop.permute.xlu0 %1693 }
 0x534   : > { %v11350_v62 = vsel %vm804_vm3, %v1719_v35, %v1708_v29  ;;  %v1720_v40 = vsel %vm799_vm4, %v11105_v32, %v1694_v63 }
 0x535   : > { %v1735_v23 = vmul.f32 %v11350_v62, %v10514_v51  ;;  %v1731_v19 = vmul.f32 %v11350_v62, %v10572_v8  ;;  %v1743_v44 = vmul.f32 %v11350_v62, %v10568_v6  ;;  %v1739_v27 = vmul.f32 %v11350_v62, %v10537_v59 }
 0x537   : > { %1779 = vrot.lane.b32.xlu1 %v1735_v23, %s15682_s13  ;;  %1763 = vrot.lane.b32.xlu0 %v1731_v19, %s15666_s10  ;;  %v1710_v37 = vpop.permute.xlu1 %1709 }
 0x538   : > { %v11361_v22 = vsel %vm804_vm3, %v1720_v40, %v1710_v37  ;;  %v1751_v37 = vmul.f32 %v11350_v62, %v10747_v33 }
 0x539   : > { %v1744_v38 = vmul.f32 %v11361_v22, %v10739_v28  ;;  %v1740_v32 = vmul.f32 %v11361_v22, %v10718_v17  ;;  %v1736_v39 = vmul.f32 %v11361_v22, %v10570_v7  ;;  %v1732_v43 = vmul.f32 %v11361_v22, %v10557_v2 }
 0x53a   : > { %v1752_v40 = vmul.f32 %v11361_v22, %v10792_v53 }
 0x53b   : > { %v9121_v57 = vpack.i.bf16 %v1744_v38, %v1743_v44  ;;  %v9116_v4 = vpack.i.bf16 %v1740_v32, %v1739_v27  ;;  %v1747_v44 = vmul.f32 %v11350_v62, %v10749_v34  ;;  %v1756_v32 = vmul.f32 %v11361_v22, %v10794_v55 }
 0x53c   : > { %v9141_v38 = vpack.i.bf16 %v1752_v40, %v1751_v37 }
 0x53d   : > { %9122 = vrot.lane.b32.xlu1 %v9121_v57, %s15683_s18  ;;  %9117 = vrot.lane.b32.xlu0 %v9116_v4, %s15684_s26  ;;  %v1755_v57 = vmul.f32 %v11350_v62, %v10779_v47 }
 0x542   : > { %v1696_v31 = vpop.permute.xlu0 %1695 }
 0x543   : > { %v1721_v5 = vsel %vm799_vm4, %v11137_v46, %v1696_v31 }
 0x546   : > { %v1712_v60 = vpop.permute.xlu1 %1711  ;;  %v1698_v56 = vpop.permute.xlu0 %1697 }
 0x547   : > { %v11382_v25 = vsel %vm804_vm3, %v1721_v5, %v1712_v60  ;;  %v1722_v46 = vsel %vm799_vm4, %v11131_v36, %v1698_v56  ;;  %v1748_v36 = vmul.f32 %v11361_v22, %v10786_v49 }
 0x548   : > { %v1737_v21 = vmul.f32 %v11382_v25, %v10574_v9  ;;  %v1733_v13 = vmul.f32 %v11382_v25, %v10576_v10  ;;  %v1741_v4 = vmul.f32 %v11382_v25, %v10737_v26  ;;  %v1745_v31 = vmul.f32 %v11382_v25, %v10783_v48 }
 0x549   : > { %v9136_v27 = vpack.i.bf16 %v1748_v36, %v1747_v44  ;;  %v514_v36 = vld [vmem:[%s15548_s4 + $0x278] sm:$0xff] }
 0x54a   : > { %v1714_v41 = vpop.permute.xlu1 %1713  ;;  %v9131_v35 = vpack.i.bf16 %v1737_v21, %v1736_v39  ;;  %v9126_v29 = vpack.i.bf16 %v1733_v13, %v1732_v43  ;;  %v1749_v39 = vmul.f32 %v11382_v25, %v10817_v3  ;;  %v1753_v21 = vmul.f32 %v11382_v25, %v10825_v12 }
 0x54b   : > { %v11395_v63 = vsel %vm804_vm3, %v1722_v46, %v1714_v41  ;;  %v1757_v46 = vmul.f32 %v11382_v25, %v10837_v20 }
 0x54c   : > { %9132 = vrot.lane.b32.xlu1 %v9131_v35, %s15682_s13  ;;  %9127 = vrot.lane.b32.xlu0 %v9126_v29, %s15666_s10  ;;  %v1738_v23 = vmul.f32 %v11395_v63, %v10700_v1  ;;  %v1734_v19 = vmul.f32 %v11395_v63, %v10578_v11  ;;  %v1746_v5 = vmul.f32 %v11395_v63, %v10815_v15  ;;  %v15688_v35 = vld [vmem:[#allocation23_spill] sm:$0xff] }
 0x54d   : > { %v1742_v60 = vmul.f32 %v11395_v63, %v10807_v61  ;;  %v1750_v56 = vmul.f32 %v11395_v63, %v10831_v18  ;;  %v1754_v13 = vmul.f32 %v11395_v63, %v10839_v24  ;;  %v1758_v41 = vmul.f32 %v11395_v63, %v10846_v30 }
 0x54e   : > { %v1727_v29 = vmul.f32 %v11350_v62, %v15688_v35  ;;  %v512_v62 = vld [vmem:[%s15548_s4 + $0x268] sm:$0xff] }
 0x54f   : > { %v9146_v43 = vpack.i.bf16 %v1750_v56, %v1749_v39  ;;  %v510_v39 = vld [vmem:[%s15548_s4 + $0x258] sm:$0xff] }
 0x550   : > { %1785 = vrot.lane.b32.xlu1 %v1738_v23, %s15682_s13  ;;  %1769 = vrot.lane.b32.xlu0 %v1734_v19, %s15666_s10 }
 0x554   : > { %9142 = vrot.lane.b32.xlu1 %v9141_v38, %s15685_s12  ;;  %9137 = vrot.lane.b32.xlu0 %v9136_v27, %s15686_s0  ;;  %v527_v38 = vld [vmem:[%s15548_s4 + $0x2e0] sm:$0xff] }
 0x558   : > { %1861 = vrot.lane.b32.xlu1 %v1756_v32, %s15687_s19  ;;  %1859 = vrot.lane.b32.xlu0 %v1755_v57, %s15687_s19 }
 0x55c   : > { %1799 = vrot.lane.b32.xlu1 %v1741_v4, %s15684_s26  ;;  %1815 = vrot.lane.b32.xlu0 %v1745_v31, %s15683_s18  ;;  %v511_v31 = vld [vmem:[%s15548_s4 + $0x260] sm:$0xff] }
 0x560   : > { %1817 = vrot.lane.b32.xlu1 %v1746_v5, %s15683_s18  ;;  %1801 = vrot.lane.b32.xlu0 %v1742_v60, %s15684_s26  ;;  %v526_v5 = vld [vmem:[%s15548_s4 + $0x2d8] sm:$0xff] }
 0x564   : > { %1847 = vrot.lane.b32.xlu1 %v1753_v21, %s15685_s12  ;;  %9147 = vrot.lane.b32.xlu0 %v9146_v43, %s15686_s0  ;;  %v525_v21 = vld [vmem:[%s15548_s4 + $0x2d0] sm:$0xff] }
 0x568   : > { %1849 = vrot.lane.b32.xlu1 %v1754_v13, %s15685_s12  ;;  %1863 = vrot.lane.b32.xlu0 %v1757_v46, %s15687_s19  ;;  %v509_v13 = vld [vmem:[%s15548_s4 + $0x250] sm:$0xff] }
 0x569   : > { %v541_v46 = vld [vmem:[%s15548_s4 + $0x350] sm:$0xff] }
 0x56c   : > { %2253 = vrot.lane.b32.xlu1 %v11079_v14, %s15582_s1  ;;  %1865 = vrot.lane.b32.xlu0 %v1758_v41, %s15687_s19  ;;  %v524_v41 = vld [vmem:[%s15548_s4 + $0x2c8] sm:$0xff] }
 0x570   : > { %2251 = vrot.lane.b32.xlu1 %v11083_v50, %s15582_s1  ;;  %v529_v50 = vld [vmem:[%s15548_s4 + $0x2f0] sm:$0xff] }
 0x574   : > { %2257 = vrot.lane.b32.xlu1 %v11098_v42, %s15582_s1  ;;  %v528_v42 = vld [vmem:[%s15548_s4 + $0x2e8] sm:$0xff] }
 0x578   : > { %2255 = vrot.lane.b32.xlu1 %v11091_v52, %s15582_s1  ;;  %v513_v52 = vld [vmem:[%s15548_s4 + $0x270] sm:$0xff] }
 0x5a9   : > { %v1764_v23 = vpop.permute.xlu0 %1763  ;;  %v1780_v19 = vpop.permute.xlu1 %1779 }
 0x5aa   : > { %v1871_v40 = vsel %vm1085_vm6, %v1727_v29, %v1764_v23  ;;  %v1875_v14 = vsel %vm1090_vm5, %v1764_v23, %v1780_v19  ;;  %v508_v29 = vld [vmem:[%s15548_s4 + $0x248] sm:$0xff] }
 0x5ab   : > { %1971 = vmatprep.mubr.f32.mxu0 %v1875_v14  ;;  %v540_v23 = vld [vmem:[%s15548_s4 + $0x348] sm:$0xff]  ;;  %v522_v14 = vld [vmem:[%s15548_s4 + $0x2b8] sm:$0xff] }
 0x5ac   : > { %1972 = vmatmul.mubr.f32.vlgmr.msra.gmra.mxu0 %v1871_v40  ;;  %v507_v40 = vld [vmem:[%s15548_s4 + $0x240] sm:$0xff] }
 0x5ad   : > { %7570 = vmatpush3.msra.mxu0 %v514_v36  ;;  %v506_v36 = vld [vmem:[%s15548_s4 + $0x238] sm:$0xff] }
 0x5ae   : > { %7571 = vmatprep.subr.mxu0 %v529_v50  ;;  %v538_v50 = vld [vmem:[%s15548_s4 + $0x338] sm:$0xff] }
 0x5af   : > { %v11477_v37 = vpop.permute.xlu0 %9117  ;;  %v11479_v44 = vpop.permute.xlu1 %9122  ;;  %7572 = vmatpush3.msra.mxu0 %v513_v52  ;;  %v521_v52 = vld [vmem:[%s15548_s4 + $0x2b0] sm:$0xff] }
 0x5b0   : > { %v9120_v27 = vunpack.i.h.bf16 %v11477_v37  ;;  %v9119_v32 = vunpack.i.l.bf16 %v11477_v37  ;;  %v9125_v57 = vunpack.i.h.bf16 %v11479_v44  ;;  %v9124_v4 = vunpack.i.l.bf16 %v11479_v44  ;;  %7573 = vmatprep.subr.mxu0 %v528_v42  ;;  %v505_v42 = vld [vmem:[%s15548_s4 + $0x230] sm:$0xff]  ;;  %v536_v37 = vld [vmem:[%s15548_s4 + $0x328] sm:$0xff] }
 0x5b1   : > { %7574 = vmatpush3.msra.mxu0 %v512_v62  ;;  %v537_v62 = vld [vmem:[%s15548_s4 + $0x330] sm:$0xff] }
 0x5b2   : > { %v1883_v60 = vsel %vm1100_vm7, %v9119_v32, %v9124_v4  ;;  %v1879_v56 = vsel %vm1095_vm8, %v1780_v19, %v9119_v32  ;;  %7575 = vmatprep.subr.mxu0 %v527_v38  ;;  %v1884_v43 = vsel %vm1100_vm7, %v9120_v27, %v9125_v57  ;;  %v523_v19 = vld [vmem:[%s15548_s4 + $0x2c0] sm:$0xff]  ;;  %v520_v38 = vld [vmem:[%s15548_s4 + $0x2a8] sm:$0xff] }
 0x5b3   : > { %2056 = vmatprep.mubr.f32.mxu1 %v1883_v60  ;;  %7576 = vmatpush3.msra.mxu0 %v511_v31 }
 0x5b4   : > { %2057 = vmatmul.mubr.f32.vlgmr.msra.gmra.mxu1 %v1879_v56  ;;  %7577 = vmatprep.subr.mxu0 %v526_v5  ;;  %v15689_v5 = vld [vmem:[#allocation25_spill] sm:$0xff]  ;;  %v504_v56 = vld [vmem:[%s15548_s4 + $0x228] sm:$0xff] }
 0x5b5   : > { %2061 = vmatprep.mubr.f32.mxu1 %v1884_v43  ;;  %7578 = vmatpush3.msra.mxu0 %v510_v39  ;;  %v1728_v60 = vmul.f32 %v11361_v22, %v15689_v5 }
 0x5b6   : > { %7579 = vmatprep.subr.mxu0 %v525_v21  ;;  %8660 = vmatpush3.msra.mxu1 %v11376_v58  ;;  %v539_v58 = vld [vmem:[%s15548_s4 + $0x340] sm:$0xff] }
 0x5b7   : > { %7580 = vmatpush3.msra.mxu0 %v509_v13  ;;  %8661 = vmatprep.subr.mxu1 %v541_v46 }
 0x5b8   : > { %7581 = vmatprep.subr.mxu0 %v524_v41  ;;  %8662 = vmatpush3.msra.mxu1 %v541_v46  ;;  %v519_v46 = vld [vmem:[%s15548_s4 + $0x2a0] sm:$0xff] }
 0x5b9   : > { %7582 = vmatpush3.msra.mxu0 %v508_v29  ;;  %8663 = vmatprep.subr.mxu1 %v540_v23 }
 0x5ba   : > { %7583 = vmatprep.subr.mxu0 %v523_v19  ;;  %8664 = vmatpush3.msra.mxu1 %v540_v23  ;;  %v503_v23 = vld [vmem:[%s15548_s4 + $0x220] sm:$0xff] }
 0x5bb   : > { %7584 = vmatpush3.msra.mxu0 %v507_v40  ;;  %8665 = vmatprep.subr.mxu1 %v539_v58 }
 0x5bc   : > { %7585 = vmatprep.subr.mxu0 %v522_v14  ;;  %8666 = vmatpush3.msra.mxu1 %v539_v58  ;;  %v518_v58 = vld [vmem:[%s15548_s4 + $0x298] sm:$0xff] }
 0x5bd   : > { %7586 = vmatpush3.msra.mxu0 %v506_v36  ;;  %8667 = vmatprep.subr.mxu1 %v538_v50  ;;  %v502_v14 = vld [vmem:[%s15548_s4 + $0x218] sm:$0xff]  ;;  %v15690_v36 = vld [vmem:[#allocation24_spill] sm:$0xff] }
 0x5be   : > { %v9128_v32 = vpop.permute.xlu0 %9127  ;;  %v11555_v31 = vpop.permute.xlu1 %9132  ;;  %7587 = vmatprep.subr.mxu0 %v521_v52  ;;  %8668 = vmatpush3.msra.mxu1 %v538_v50  ;;  %v1729_v50 = vmul.f32 %v11382_v25, %v15690_v36  ;;  %v517_v52 = vld [vmem:[%s15548_s4 + $0x290] sm:$0xff]  ;;  %v535_v25 = vld [vmem:[%s15548_s4 + $0x320] sm:$0xff] }
 0x5bf   : > { %v9130_v39 = vunpack.i.h.bf16 %v9128_v32  ;;  %v9129_v21 = vunpack.i.l.bf16 %v9128_v32  ;;  %v9135_v43 = vunpack.i.h.bf16 %v11555_v31  ;;  %v9134_v13 = vunpack.i.l.bf16 %v11555_v31  ;;  %7588 = vmatpush3.msra.mxu0 %v505_v42  ;;  %8669 = vmatprep.subr.mxu1 %v537_v62  ;;  %v501_v42 = vld [vmem:[%s15548_s4 + $0x210] sm:$0xff]  ;;  %v531_v31 = vld [vmem:[%s15548_s4 + $0x300] sm:$0xff] }
 0x5c0   : > { %7589 = vmatprep.subr.mxu0 %v520_v38  ;;  %8670 = vmatpush3.msra.mxu1 %v537_v62 }
 0x5c1   : > { %v1876_v22 = vsel %vm1090_vm5, %v9129_v21, %v9134_v13  ;;  %v1880_v41 = vsel %vm1095_vm8, %v9134_v13, %v9120_v27  ;;  %v1872_v29 = vsel %vm1085_vm6, %v1728_v60, %v9129_v21  ;;  %7590 = vmatpush3.msra.mxu0 %v504_v56  ;;  %v1877_v27 = vsel %vm1090_vm5, %v9130_v39, %v9135_v43  ;;  %v516_v60 = vld [vmem:[%s15548_s4 + $0x288] sm:$0xff] }
 0x5c2   : > { %v1770_v19 = vpop.permute.xlu0 %1769  ;;  %v11575_v40 = vpop.permute.xlu1 %1785  ;;  %1976 = vmatprep.mubr.f32.mxu0 %v1876_v22  ;;  %2062 = vmatmul.mubr.f32.gmra.mxu1 %v1880_v41  ;;  %v1873_v32 = vsel %vm1085_vm6, %v1729_v50, %v9130_v39  ;;  %v500_v39 = vld [vmem:[%s15548_s4 + $0x208] sm:$0xff]  ;;  %v15691_v41 = vld [vmem:[#allocation26_spill] sm:$0xff] }
 0x5c3   : > { %1977 = vmatmul.mubr.f32.gmra.mxu0 %v1872_v29  ;;  %7591 = vmatprep.subr.mxu0 %v519_v46  ;;  %v1878_v13 = vsel %vm1090_vm5, %v1770_v19, %v11575_v40  ;;  %v1730_v29 = vmul.f32 %v11395_v63, %v15691_v41  ;;  %v534_v63 = vld [vmem:[%s15548_s4 + $0x318] sm:$0xff] }
 0x5c4   : > { %1981 = vmatprep.mubr.f32.mxu0 %v1877_v27  ;;  %7592 = vmatpush3.msra.mxu0 %v503_v23  ;;  %v515_v23 = vld [vmem:[%s15548_s4 + $0x280] sm:$0xff] }
 0x5c5   : > { %7593 = vmatprep.subr.mxu0 %v518_v58  ;;  %8671 = vmatprep.subr.mxu1 %v536_v37  ;;  %v1874_v50 = vsel %vm1085_vm6, %v1730_v29, %v1770_v19 }
 0x5c6   : > { %v9138_v62 = vpop.permute.xlu0 %9137  ;;  %v9143_v38 = vpop.permute.xlu1 %9142  ;;  %7594 = vmatpush3.msra.mxu0 %v502_v14  ;;  %8672 = vmatpush3.msra.mxu1 %v536_v37  ;;  %v499_v37 = vld [vmem:[%s15548_s4 + $0x200] sm:$0xff] }
 0x5c7   : > { %v9139_v56 = vunpack.i.l.bf16 %v9138_v62  ;;  %v9144_v21 = vunpack.i.l.bf16 %v9143_v38  ;;  %1982 = vmatmul.mubr.f32.gmra.mxu0 %v1873_v32  ;;  %7595 = vmatprep.subr.mxu0 %v517_v52  ;;  %v9140_v46 = vunpack.i.h.bf16 %v9138_v62  ;;  %v9145_v22 = vunpack.i.h.bf16 %v9143_v38  ;;  %v533_v62 = vld [vmem:[%s15548_s4 + $0x310] sm:$0xff] }
 0x5c8   : > { %1986 = vmatprep.mubr.f32.mxu0 %v1878_v13  ;;  %7596 = vmatpush3.msra.mxu0 %v501_v42  ;;  %v532_v13 = vld [vmem:[%s15548_s4 + $0x308] sm:$0xff] }
 0x5c9   : > { %7597 = vmatprep.subr.mxu0 %v516_v60  ;;  %v1891_v58 = vsel %vm1110_vm9, %v9139_v56, %v9144_v21  ;;  %8673 = vmatprep.subr.mxu1 %v535_v25  ;;  %v1892_v42 = vsel %vm1110_vm9, %v9140_v46, %v9145_v22  ;;  %v1887_v32 = vsel %vm1105_vm11, %v9124_v4, %v9139_v56 }
 0x5ca   : > { %v1860_v27 = vpop.permute.xlu0 %1859  ;;  %v1862_v14 = vpop.permute.xlu1 %1861  ;;  %7598 = vmatpush3.msra.mxu0 %v500_v39  ;;  %8674 = vmatpush3.msra.mxu1 %v535_v25  ;;  %v1888_v56 = vsel %vm1105_vm11, %v9125_v57, %v9140_v46 }
 0x5cb   : > { %1987 = vmatmul.mubr.f32.gmra.mxu0 %v1874_v50  ;;  %v1895_v52 = vsel %vm1115_vm10, %v1891_v58, %v1860_v27  ;;  %7599 = vmatprep.subr.mxu0 %v515_v23  ;;  %v1896_v25 = vsel %vm1115_vm10, %v1892_v42, %v1862_v14  ;;  %v11660_v42 = vld [vmem:[%s15546_s2] sm:$0xff] }
 0x5cc   : > { %2141 = vmatprep.mubr.f32.mxu0 %v1895_v52  ;;  %7600 = vmatpush3.msra.mxu0 %v499_v37  ;;  %15692 = vst [vmem:[#allocation27_spill] sm:$0xff] %v11660_v42 }
 0x5cd   : > { %8675 = vmatprep.subr.mxu1 %v534_v63 }
 0x5ce   : > { %v1816_v19 = vpop.permute.xlu0 %1815  ;;  %v1800_v38 = vpop.permute.xlu1 %1799  ;;  %8676 = vmatpush3.msra.mxu1 %v534_v63 }
 0x5cf   : > { %2142 = vmatmul.mubr.f32.vlgmr.msra.gmra.mxu0 %v1887_v32  ;;  %v1885_v60 = vsel %vm1100_vm7, %v1800_v38, %v1816_v19  ;;  %v1881_v21 = vsel %vm1095_vm8, %v9135_v43, %v1800_v38  ;;  %8677 = vmatprep.subr.mxu1 %v533_v62 }
 0x5d0   : > { %2066 = vmatprep.mubr.f32.mxu1 %v1885_v60  ;;  %2146 = vmatprep.mubr.f32.mxu0 %v1896_v25 }
 0x5d1   : > { %2067 = vmatmul.mubr.f32.gmra.mxu1 %v1881_v21 }
 0x5d2   : > { %v1802_v39 = vpop.permute.xlu0 %1801  ;;  %v1818_v4 = vpop.permute.xlu1 %1817  ;;  %8678 = vmatpush3.msra.mxu1 %v533_v62 }
 0x5d3   : > { %2147 = vmatmul.mubr.f32.gmra.mxu0 %v1888_v56  ;;  %v1886_v43 = vsel %vm1100_vm7, %v1802_v39, %v1818_v4  ;;  %v1882_v22 = vsel %vm1095_vm8, %v11575_v40, %v1802_v39  ;;  %8679 = vmatprep.subr.mxu1 %v532_v13 }
 0x5d4   : > { %2071 = vmatprep.mubr.f32.mxu1 %v1886_v43  ;;  %8680 = vmatpush3.msra.mxu1 %v532_v13 }
 0x5d5   : > { %2072 = vmatmul.mubr.f32.gmra.mxu1 %v1882_v22  ;;  %8681 = vmatprep.subr.mxu1 %v531_v31  ;;  %v548_v22 = vld [vmem:[%s15550_s6 + $0x8] sm:$0xff] }
 0x5d6   : > { %v9148_v29 = vpop.permute.xlu0 %9147  ;;  %v1848_v44 = vpop.permute.xlu1 %1847  ;;  %8683 = vmatprep.mubr.msk.f32.mxu1 %vm1120_vm12, %v1860_v27  ;;  %8682 = vmatpush3.msra.mxu1 %v531_v31 }
 0x5d7   : > { %v9149_v57 = vunpack.i.l.bf16 %v9148_v29  ;;  %v9150_v37 = vunpack.i.h.bf16 %v9148_v29 }
 0x5d9   : > { %v1893_v46 = vsel %vm1110_vm9, %v9149_v57, %v1848_v44  ;;  %8684 = vmatmul.mubr.msk.f32.vlgmr.msra.gmra.mxu1 %vm1120_vm12, %v1862_v14  ;;  %v1889_v50 = vsel %vm1105_vm11, %v1816_v19, %v9149_v57  ;;  %v1890_v14 = vsel %vm1105_vm11, %v1818_v4, %v9150_v37 }
 0x5da   : > { %v1864_v23 = vpop.permute.xlu0 %1863  ;;  %v1850_v58 = vpop.permute.xlu1 %1849 }
 0x5db   : > { %8686 = vmatprep.mubr.msk.f32.mxu1 %vm1120_vm12, %v1864_v23  ;;  %v1897_v40 = vsel %vm1115_vm10, %v1893_v46, %v1864_v23  ;;  %v1894_v63 = vsel %vm1110_vm9, %v9150_v37, %v1850_v58  ;;  %v547_v58 = vld [vmem:[%s15550_s6] sm:$0xff] }
 0x5dc   : > { %2151 = vmatprep.mubr.f32.mxu0 %v1897_v40 }
 0x5dd   : > { %2152 = vmatmul.mubr.f32.gmra.mxu0 %v1889_v50 }
 0x5de   : > { %v1866_v27 = vpop.permute.xlu0 %1865 }
 0x5df   : > { %8687 = vmatmul.mubr.msk.f32.gmra.mxu1 %vm1120_vm12, %v1866_v27  ;;  %v1898_v52 = vsel %vm1115_vm10, %v1894_v63, %v1866_v27 }
 0x5e0   : > { %2156 = vmatprep.mubr.f32.mxu0 %v1898_v52  ;;  %8693 = vmatprep.mubr.msk.f32.mxu1 %vm584_vm1, %v11660_v42 }
 0x5e1   : > { %2157 = vmatmul.mubr.f32.gmra.mxu0 %v1890_v14 }
 0x5e2   : > { %8703 = vmatprep.mubr.msk.f32.mxu0 %vm584_vm1, %v11660_v42 }
 0x66c   : > { %v7513_v62 = vpop.f32.mrf.mxu0 }
 0x66e   : > { %v7514_v19 = vpop.f32.mrf.mxu0 }
 0x66f   : > { %v7515_v46 = vadd.f32 %v7514_v19, %v7513_v62 }
 0x671   : > { %v1974_v14 = vadd.f32 %v7515_v46, %v547_v58 }
 0x674   : > { %v7557_v32 = vpop.f32.mrf.mxu1 }
 0x676   : > { %v7558_v21 = vpop.f32.mrf.mxu1 }
 0x677   : > { %v7559_v50 = vadd.f32 %v7558_v21, %v7557_v32  ;;  %v549_v32 = vld [vmem:[%s15550_s6 + $0x10] sm:$0xff]  ;;  %v550_v21 = vld [vmem:[%s15550_s6 + $0x18] sm:$0xff] }
 0x679   : > { %v2059_v36 = vadd.f32 %v7559_v50, %v1974_v14 }
 0x682   : > { %v7560_v39 = vpop.f32.mrf.mxu1 }
 0x683   : > { %v7516_v38 = vpop.f32.mrf.mxu0 }
 0x684   : > { %v7561_v43 = vpop.f32.mrf.mxu1 }
 0x685   : > { %v7517_v60 = vpop.f32.mrf.mxu0  ;;  %v7562_v63 = vadd.f32 %v7561_v43, %v7560_v39 }
 0x686   : > { %v7518_v31 = vadd.f32 %v7517_v60, %v7516_v38 }
 0x687   : > { %v7519_v25 = vpop.f32.mrf.mxu0 }
 0x688   : > { %v1979_v23 = vadd.f32 %v7518_v31, %v548_v22 }
 0x689   : > { %v7520_v13 = vpop.f32.mrf.mxu0 }
 0x68a   : > { %v2064_v42 = vadd.f32 %v7562_v63, %v1979_v23  ;;  %v7521_v20 = vadd.f32 %v7520_v13, %v7519_v25 }
 0x68b   : > { %v7522_v4 = vpop.f32.mrf.mxu0 }
 0x68d   : > { %v7523_v56 = vpop.f32.mrf.mxu0 }
 0x68e   : > { %v7524_v24 = vadd.f32 %v7523_v56, %v7522_v4 }
 0x68f   : > { %v7601_v29 = vpop.f32.mrf.mxu0 }
 0x691   : > { %v7563_v44 = vpop.f32.mrf.mxu1  ;;  %v7602_v57 = vpop.f32.mrf.mxu0 }
 0x692   : > { %v7603_v38 = vadd.f32 %v7602_v57, %v7601_v29 }
 0x693   : > { %v7564_v40 = vpop.f32.mrf.mxu1  ;;  %v7604_v37 = vpop.f32.mrf.mxu0 }
 0x694   : > { %v2144_v19 = vadd.f32 %v7603_v38, %v2059_v36  ;;  %v7565_v43 = vadd.f32 %v7564_v40, %v7563_v44  ;;  %v1989_v36 = vadd.f32 %v7524_v24, %v550_v21  ;;  %v2268_v44 = vsub.f32 1.0, %v11075_v0 }
 0x695   : > { %v7566_v27 = vpop.f32.mrf.mxu1  ;;  %v7605_v52 = vpop.f32.mrf.mxu0 }
 0x696   : > { %v7606_v60 = vadd.f32 %v7605_v52, %v7604_v37 }
 0x697   : > { %v7567_v41 = vpop.f32.mrf.mxu1 }
 0x698   : > { %v2149_v5 = vadd.f32 %v7606_v60, %v2064_v42  ;;  %v7568_v42 = vadd.f32 %v7567_v41, %v7566_v27  ;;  %v2267_v60 = vsub.f32 1.0, %v11077_v16 }
 0x699   : > { %v8685_v35 = vpop.f32.mrf.mxu1 }
 0x69a   : > { %v2234_v62 = vadd.f32 %v8685_v35, %v2149_v5  ;;  %v1984_v5 = vadd.f32 %v7521_v20, %v549_v32  ;;  %v2074_v25 = vadd.f32 %v7568_v42, %v1989_v36  ;;  %v2270_v32 = vsub.f32 1.0, %v11096_v54 }
 0x69b   : > { %v2228_v31 = vpop.f32.mrf.mxu1 }
 0x69c   : > { %9398 = vtanh.f32 %v2234_v62  ;;  %v2229_v22 = vadd.f32 %v2228_v31, %v2144_v19  ;;  %v2069_v46 = vadd.f32 %v7565_v43, %v1984_v5 }
 0x69d   : > { %v7607_v30 = vpop.f32.mrf.mxu0 }
 0x69e   : > { %9400 = vtanh.f32 %v2229_v22 }
 0x69f   : > { %v7608_v39 = vpop.f32.mrf.mxu0  ;;  %v8688_v4 = vpop.f32.mrf.mxu1 }
 0x6a0   : > { %v7609_v29 = vadd.f32 %v7608_v39, %v7607_v30  ;;  %v2254_v30 = vpop.permute.xlu1 %2253 }
 0x6a1   : > { %v7610_v35 = vpop.f32.mrf.mxu0  ;;  %v2238_v50 = vpop.f32.mrf.mxu1  ;;  %v2264_v27 = vmul.f32 %v11075_v0, %v2254_v30  ;;  %v9499_v30 = vld [vmem:[%s15547_s3 + $0x68] sm:$0xff] }
 0x6a2   : > { %v2154_v56 = vadd.f32 %v7609_v29, %v2069_v46  ;;  %v11707_v46 = vld [vmem:[%s10360_s23 + $0x28] sm:$0xff] }
 0x6a3   : > { %v7611_v57 = vpop.f32.mrf.mxu0 }
 0x6a4   : > { %v7612_v13 = vadd.f32 %v7611_v57, %v7610_v35  ;;  %v2239_v63 = vadd.f32 %v2238_v50, %v2154_v56  ;;  %v2252_v14 = vpop.permute.xlu1 %2251  ;;  %v2269_v35 = vsub.f32 1.0, %v11089_v45  ;;  %v11727_v56 = vld [vmem:[%s15546_s2 + $0x8] sm:$0xff]  ;;  %v9495_v50 = vld [vmem:[%s15547_s3 + $0xf0] sm:$0xff] }
 0x6a5   : > { %v2263_v19 = vmul.f32 %v11077_v16, %v2252_v14  ;;  %v11778_v14 = vld [vmem:[%s10360_s23 + $0x30] sm:$0xff] }
 0x6a6   : > { %v2159_v23 = vadd.f32 %v7612_v13, %v2074_v25  ;;  %v11715_v13 = vld [vmem:[%s10360_s23 + $0x20] sm:$0xff] }
 0x6a8   : > { %v2244_v58 = vadd.f32 %v8688_v4, %v2159_v23  ;;  %v2258_v0 = vpop.permute.xlu1 %2257  ;;  %v9492_v23 = vld [vmem:[%s15547_s3 + $0xf8] sm:$0xff] }
 0x6a9   : > { %v9399_v37 = vpop.eup %9398  ;;  %v2266_v39 = vmul.f32 %v11096_v54, %v2258_v0 }
 0x6aa   : > { %9402 = vtanh.f32 %v2244_v58  ;;  %2277 = vrot.lane.b32.xlu0 %v9399_v37, %s15693_s30  ;;  %v11737_v58 = vld [vmem:[%s15546_s2 + $0x10] sm:$0xff]  ;;  %v9494_v37 = vld [vmem:[%s15547_s3 + $0x78] sm:$0xff] }
 0x6ab   : > { %v9401_v41 = vpop.eup %9400  ;;  %9404 = vtanh.f32 %v2239_v63  ;;  %v9496_v63 = vld [vmem:[%s15547_s3 + $0x70] sm:$0xff] }
 0x6ac   : > { %v2256_v16 = vpop.permute.xlu1 %2255 }
 0x6ad   : > { %v2265_v36 = vmul.f32 %v11089_v45, %v2256_v16  ;;  %v9509_v16 = vld [vmem:[%s15547_s3 + $0x178] sm:$0xff] }
 0x6ae   : > { %2275 = vrot.lane.b32.xlu0 %v9401_v41, %s15693_s30  ;;  %v11753_v41 = vld [vmem:[%s15546_s2 + $0x18] sm:$0xff] }
 0x6b7   : > { %v9403_v20 = vpop.eup %9402 }
 0x6b8   : > { %2281 = vrot.lane.b32.xlu0 %v9403_v20, %s15693_s30  ;;  %v9405_v24 = vpop.eup %9404  ;;  %v11758_v20 = vld [vmem:[%s10360_s23 + $0x38] sm:$0xff] }
 0x6bc   : > { %2279 = vrot.lane.b32.xlu0 %v9405_v24, %s15693_s30  ;;  %v9498_v24 = vld [vmem:[%s15547_s3 + $0xe8] sm:$0xff] }
 0x71c   : > { %v2278_v40 = vpop.permute.xlu0 %2277 }
 0x71d   : > { %v2288_v52 = vmul.f32 %v2278_v40, %v2268_v44  ;;  %v9500_v40 = vld [vmem:[%s15547_s3 + $0xe0] sm:$0xff] }
 0x71f   : > { %v11684_v38 = vadd.f32 %v2288_v52, %v2264_v27  ;;  %v9501_v52 = vld [vmem:[%s15547_s3 + $0x60] sm:$0xff] }
 0x720   : > { %v2276_v62 = vpop.permute.xlu0 %2275 }
 0x721   : > { %15694 = vst [vmem:[#allocation28_spill] sm:$0xff] %v11684_v38  ;;  %v2287_v31 = vmul.f32 %v2276_v62, %v2267_v60  ;;  %2323 = vrot.lane.b32.xlu1 %v11684_v38, %s15597_s11  ;;  %v9502_v60 = vld [vmem:[%s15547_s3 + $0xd8] sm:$0xff] }
 0x722   : > { %v9503_v62 = vld [vmem:[%s15547_s3 + $0x58] sm:$0xff] }
 0x723   : > { %v11690_v22 = vadd.f32 %v2287_v31, %v2263_v19  ;;  %v9504_v31 = vld [vmem:[%s15547_s3 + $0xd0] sm:$0xff] }
 0x725   : > { %15695 = vst [vmem:[#allocation29_spill] sm:$0xff] %v11690_v22  ;;  %2321 = vrot.lane.b32.xlu0 %v11690_v22, %s15597_s11 }
 0x72a   : > { %v2282_v21 = vpop.permute.xlu0 %2281 }
 0x72b   : > { %v2290_v43 = vmul.f32 %v2282_v21, %v2270_v32  ;;  %v9505_v32 = vld [vmem:[%s15547_s3 + $0x50] sm:$0xff]  ;;  %v9506_v21 = vld [vmem:[%s15547_s3 + $0xc8] sm:$0xff] }
 0x72d   : > { %v11696_v42 = vadd.f32 %v2290_v43, %v2266_v39  ;;  %v9507_v39 = vld [vmem:[%s15547_s3 + $0x48] sm:$0xff]  ;;  %v9508_v43 = vld [vmem:[%s15547_s3 + $0x1f8] sm:$0xff] }
 0x72e   : > { %v2280_v5 = vpop.permute.xlu0 %2279 }
 0x72f   : > { %15696 = vst [vmem:[#allocation30_spill] sm:$0xff] %v11696_v42  ;;  %v2289_v29 = vmul.f32 %v2280_v5, %v2269_v35  ;;  %2327 = vrot.lane.b32.xlu1 %v11696_v42, %s15597_s11  ;;  %v9510_v35 = vld [vmem:[%s15547_s3 + $0x1f0] sm:$0xff]  ;;  %v9511_v5 = vld [vmem:[%s15547_s3 + $0xc0] sm:$0xff] }
 0x731   : > { %v11702_v57 = vadd.f32 %v2289_v29, %v2265_v36  ;;  %v9512_v36 = vld [vmem:[%s15547_s3 + $0x170] sm:$0xff]  ;;  %v9513_v29 = vld [vmem:[%s15547_s3 + $0x40] sm:$0xff] }
 0x733   : > { %15697 = vst [vmem:[#allocation31_spill] sm:$0xff] %v11702_v57  ;;  %2325 = vrot.lane.b32.xlu0 %v11702_v57, %s15597_s11 }
 0x793   : > { %v2324_v54 = vpop.permute.xlu1 %2323 }
 0x794   : > { %v11711_v25 = vsel %vm579_vm2, %v11707_v46, %v2324_v54  ;;  %v9514_v54 = vld [vmem:[%s15547_s3 + $0x1e8] sm:$0xff] }
 0x795   : > { %8689 = vmatprep.subr.mxu1 %v11711_v25 }
 0x796   : > { %8690 = vmatpush3.msra.mxu1 %v11711_v25 }
 0x797   : > { %v2322_v45 = vpop.permute.xlu0 %2321 }
 0x798   : > { %v11720_v4 = vsel %vm579_vm2, %v11715_v13, %v2322_v45  ;;  %v9515_v45 = vld [vmem:[%s15547_s3 + $0x168] sm:$0xff] }
 0x799   : > { %8691 = vmatprep.subr.mxu1 %v11720_v4 }
 0x79a   : > { %8692 = vmatpush3.msra.mxu1 %v11720_v4 }
 0x79b   : > { %8694 = vmatmul.mubr.msk.f32.vlgmr.msra.gmra.mxu1 %vm584_vm1, %v11727_v56  ;;  %7641 = vmatprep.subr.mxu1 %v9492_v23  ;;  %v9516_v23 = vld [vmem:[%s15547_s3 + $0xb8] sm:$0xff] }
 0x79c   : > { %8696 = vmatprep.mubr.msk.f32.mxu1 %vm584_vm1, %v11737_v58  ;;  %7642 = vmatpush3.msra.mxu1 %v9494_v37  ;;  %v9517_v37 = vld [vmem:[%s15547_s3 + $0x1e0] sm:$0xff] }
 0x79d   : > { %7643 = vmatprep.subr.mxu1 %v9495_v50  ;;  %v9518_v50 = vld [vmem:[%s15547_s3 + $0x38] sm:$0xff] }
 0x79e   : > { %7644 = vmatpush3.msra.mxu1 %v9496_v63  ;;  %v9519_v63 = vld [vmem:[%s15547_s3 + $0x160] sm:$0xff] }
 0x79f   : > { %8697 = vmatmul.mubr.msk.f32.gmra.mxu1 %vm584_vm1, %v11753_v41  ;;  %7645 = vmatprep.subr.mxu1 %v9498_v24  ;;  %v9520_v24 = vld [vmem:[%s15547_s3 + $0xb0] sm:$0xff] }
 0x7a0   : > { %7646 = vmatpush3.msra.mxu1 %v9499_v30  ;;  %v9521_v30 = vld [vmem:[%s15547_s3 + $0x1d8] sm:$0xff] }
 0x7a1   : > { %v2328_v44 = vpop.permute.xlu1 %2327  ;;  %7647 = vmatprep.subr.mxu1 %v9500_v40  ;;  %v9523_v40 = vld [vmem:[%s15547_s3 + $0x158] sm:$0xff] }
 0x7a2   : > { %v11771_v27 = vsel %vm579_vm2, %v11758_v20, %v2328_v44  ;;  %7648 = vmatpush3.msra.mxu1 %v9501_v52  ;;  %v9522_v44 = vld [vmem:[%s15547_s3 + $0x30] sm:$0xff]  ;;  %v9524_v52 = vld [vmem:[%s15547_s3 + $0xa8] sm:$0xff] }
 0x7a3   : > { %8699 = vmatprep.subr.mxu0 %v11771_v27  ;;  %7649 = vmatprep.subr.mxu1 %v9502_v60  ;;  %v9525_v60 = vld [vmem:[%s15547_s3 + $0x1d0] sm:$0xff] }
 0x7a4   : > { %8700 = vmatpush3.msra.mxu0 %v11771_v27  ;;  %7650 = vmatpush3.msra.mxu1 %v9503_v62  ;;  %v9526_v62 = vld [vmem:[%s15547_s3 + $0x28] sm:$0xff] }
 0x7a5   : > { %v2326_v19 = vpop.permute.xlu0 %2325  ;;  %7651 = vmatprep.subr.mxu1 %v9504_v31  ;;  %v9528_v31 = vld [vmem:[%s15547_s3 + $0xa0] sm:$0xff] }
 0x7a6   : > { %v11792_v0 = vsel %vm579_vm2, %v11778_v14, %v2326_v19  ;;  %7652 = vmatpush3.msra.mxu1 %v9505_v32  ;;  %v9527_v19 = vld [vmem:[%s15547_s3 + $0x150] sm:$0xff]  ;;  %v9529_v32 = vld [vmem:[%s15547_s3 + $0x1c8] sm:$0xff] }
 0x7a7   : > { %8701 = vmatprep.subr.mxu0 %v11792_v0  ;;  %7653 = vmatprep.subr.mxu1 %v9506_v21  ;;  %v9530_v21 = vld [vmem:[%s15547_s3 + $0x20] sm:$0xff] }
 0x7a8   : > { %8702 = vmatpush3.msra.mxu0 %v11792_v0  ;;  %7654 = vmatpush3.msra.mxu1 %v9507_v39  ;;  %v9531_v39 = vld [vmem:[%s15547_s3 + $0x148] sm:$0xff] }
 0x7a9   : > { %8704 = vmatmul.mubr.msk.f32.vlgmr.msra.gmra.mxu0 %vm584_vm1, %v11727_v56  ;;  %7685 = vmatprep.subr.mxu0 %v9508_v43  ;;  %v9532_v43 = vld [vmem:[%s15547_s3 + $0x98] sm:$0xff] }
 0x7aa   : > { %8706 = vmatprep.mubr.msk.f32.mxu0 %vm584_vm1, %v11737_v58  ;;  %7686 = vmatpush3.msra.mxu0 %v9509_v16  ;;  %v9533_v16 = vld [vmem:[%s15547_s3 + $0x1c0] sm:$0xff] }
 0x7ab   : > { %7687 = vmatprep.subr.mxu0 %v9510_v35  ;;  %7655 = vmatprep.subr.mxu1 %v9511_v5  ;;  %v9534_v35 = vld [vmem:[%s15547_s3 + $0x18] sm:$0xff]  ;;  %v9535_v5 = vld [vmem:[%s15547_s3 + $0x140] sm:$0xff] }
 0x7ac   : > { %7688 = vmatpush3.msra.mxu0 %v9512_v36  ;;  %7656 = vmatpush3.msra.mxu1 %v9513_v29  ;;  %v9536_v36 = vld [vmem:[%s15547_s3 + $0x90] sm:$0xff]  ;;  %v9537_v29 = vld [vmem:[%s15547_s3 + $0x1b8] sm:$0xff] }
 0x7ad   : > { %8707 = vmatmul.mubr.msk.f32.gmra.mxu0 %vm584_vm1, %v11753_v41  ;;  %7689 = vmatprep.subr.mxu0 %v9514_v54  ;;  %v9538_v54 = vld [vmem:[%s15547_s3 + $0x10] sm:$0xff] }
 0x7ae   : > { %7690 = vmatpush3.msra.mxu0 %v9515_v45  ;;  %7657 = vmatprep.subr.mxu1 %v9516_v23  ;;  %v9539_v45 = vld [vmem:[%s15547_s3 + $0x138] sm:$0xff]  ;;  %v9540_v23 = vld [vmem:[%s15547_s3 + $0x88] sm:$0xff] }
 0x7af   : > { %7691 = vmatprep.subr.mxu0 %v9517_v37  ;;  %7658 = vmatpush3.msra.mxu1 %v9518_v50  ;;  %v9541_v37 = vld [vmem:[%s15547_s3 + $0x1b0] sm:$0xff]  ;;  %v9542_v50 = vld [vmem:[%s15547_s3 + $0x8] sm:$0xff] }
 0x7b0   : > { %7692 = vmatpush3.msra.mxu0 %v9519_v63  ;;  %7659 = vmatprep.subr.mxu1 %v9520_v24  ;;  %v9543_v63 = vld [vmem:[%s15547_s3 + $0x130] sm:$0xff]  ;;  %v9544_v24 = vld [vmem:[%s15547_s3 + $0x80] sm:$0xff] }
 0x7b1   : > { %7693 = vmatprep.subr.mxu0 %v9521_v30  ;;  %7660 = vmatpush3.msra.mxu1 %v9522_v44  ;;  %v9545_v30 = vld [vmem:[%s15547_s3 + $0x1a8] sm:$0xff]  ;;  %v9546_v44 = vld [vmem:[%s15547_s3] sm:$0xff] }
 0x7b2   : > { %7694 = vmatpush3.msra.mxu0 %v9523_v40  ;;  %7661 = vmatprep.subr.mxu1 %v9524_v52  ;;  %v9547_v40 = vld [vmem:[%s15547_s3 + $0x128] sm:$0xff]  ;;  %v9548_v52 = vld [vmem:[%s15547_s3 + $0x2f8] sm:$0xff] }
 0x7b3   : > { %7695 = vmatprep.subr.mxu0 %v9525_v60  ;;  %7662 = vmatpush3.msra.mxu1 %v9526_v62  ;;  %v9549_v60 = vld [vmem:[%s15547_s3 + $0x1a0] sm:$0xff] }
 0x7b4   : > { %7696 = vmatpush3.msra.mxu0 %v9527_v19  ;;  %7663 = vmatprep.subr.mxu1 %v9528_v31  ;;  %v9550_v62 = vld [vmem:[%s15547_s3 + $0x120] sm:$0xff]  ;;  %v9551_v19 = vld [vmem:[%s15547_s3 + $0x198] sm:$0xff] }
 0x7b5   : > { %7697 = vmatprep.subr.mxu0 %v9529_v32  ;;  %7664 = vmatpush3.msra.mxu1 %v9530_v21  ;;  %v9552_v31 = vld [vmem:[%s15547_s3 + $0x118] sm:$0xff]  ;;  %v9553_v32 = vld [vmem:[%s15547_s3 + $0x190] sm:$0xff] }
 0x7b6   : > { %7698 = vmatpush3.msra.mxu0 %v9531_v39  ;;  %7665 = vmatprep.subr.mxu1 %v9532_v43  ;;  %v9554_v21 = vld [vmem:[%s15547_s3 + $0x110] sm:$0xff]  ;;  %v9555_v39 = vld [vmem:[%s15547_s3 + $0x188] sm:$0xff] }
 0x7b7   : > { %7699 = vmatprep.subr.mxu0 %v9533_v16  ;;  %7666 = vmatpush3.msra.mxu1 %v9534_v35  ;;  %v9556_v43 = vld [vmem:[%s15547_s3 + $0x108] sm:$0xff]  ;;  %v9557_v16 = vld [vmem:[%s15547_s3 + $0x180] sm:$0xff] }
 0x7b8   : > { %7700 = vmatpush3.msra.mxu0 %v9535_v5  ;;  %7667 = vmatprep.subr.mxu1 %v9536_v36  ;;  %v9558_v35 = vld [vmem:[%s15547_s3 + $0x100] sm:$0xff]  ;;  %v11967_v5 = vld [vmem:[%s15547_s3 + $0x358] sm:$0xff] }
 0x7b9   : > { %7701 = vmatprep.subr.mxu0 %v9537_v29  ;;  %7668 = vmatpush3.msra.mxu1 %v9538_v54 }
 0x7ba   : > { %7702 = vmatpush3.msra.mxu0 %v9539_v45  ;;  %7669 = vmatprep.subr.mxu1 %v9540_v23 }
 0x7bb   : > { %7703 = vmatprep.subr.mxu0 %v9541_v37  ;;  %7670 = vmatpush3.msra.mxu1 %v9542_v50 }
 0x7bc   : > { %7704 = vmatpush3.msra.mxu0 %v9543_v63  ;;  %7671 = vmatprep.subr.mxu1 %v9544_v24 }
 0x7bd   : > { %7705 = vmatprep.subr.mxu0 %v9545_v30  ;;  %7672 = vmatpush3.msra.mxu1 %v9546_v44 }
 0x7be   : > { %7706 = vmatpush3.msra.mxu0 %v9547_v40  ;;  %7729 = vmatprep.subr.mxu1 %v9548_v52 }
 0x7bf   : > { %7707 = vmatprep.subr.mxu0 %v9549_v60 }
 0x7c0   : > { %7708 = vmatpush3.msra.mxu0 %v9550_v62 }
 0x7c1   : > { %7709 = vmatprep.subr.mxu0 %v9551_v19 }
 0x7c2   : > { %7710 = vmatpush3.msra.mxu0 %v9552_v31 }
 0x7c3   : > { %7711 = vmatprep.subr.mxu0 %v9553_v32 }
 0x7c4   : > { %7712 = vmatpush3.msra.mxu0 %v9554_v21 }
 0x7c5   : > { %7713 = vmatprep.subr.mxu0 %v9555_v39 }
 0x7c6   : > { %7714 = vmatpush3.msra.mxu0 %v9556_v43 }
 0x7c7   : > { %7715 = vmatprep.subr.mxu0 %v9557_v16 }
 0x7c8   : > { %7716 = vmatpush3.msra.mxu0 %v9558_v35 }
 0x7c9   : > { %8709 = vmatprep.subr.mxu0 %v11967_v5 }
 0x85b   : > { %v8695_v36 = vpop.f32.mrf.mxu1 }
 0x85d   : > { %v2403_v29 = vpop.f32.mrf.mxu1 }
 0x85e   : > { %2511 = vrot.lane.b32.xlu1 %v2403_v29, %s15680_s21 }
 0x85f   : > { %v8698_v54 = vpop.f32.mrf.mxu1 }
 0x861   : > { %v2413_v45 = vpop.f32.mrf.mxu1 }
 0x862   : > { %2513 = vrot.lane.b32.xlu1 %v8695_v36, %s15680_s21  ;;  %2527 = vrot.lane.b32.xlu0 %v2413_v45, %s15681_s17 }
 0x866   : > { %2529 = vrot.lane.b32.xlu0 %v8698_v54, %s15681_s17 }
 0x869   : > { %v8705_v23 = vpop.f32.mrf.mxu0 }
 0x86b   : > { %v2488_v37 = vpop.f32.mrf.mxu0 }
 0x86c   : > { %2515 = vrot.lane.b32.xlu1 %v2488_v37, %s15680_s21 }
 0x86d   : > { %v8708_v50 = vpop.f32.mrf.mxu0 }
 0x86f   : > { %v2498_v63 = vpop.f32.mrf.mxu0 }
 0x870   : > { %2517 = vrot.lane.b32.xlu1 %v8705_v23, %s15680_s21  ;;  %2531 = vrot.lane.b32.xlu0 %v2498_v63, %s15681_s17 }
 0x874   : > { %2533 = vrot.lane.b32.xlu0 %v8708_v50, %s15681_s17 }
 0x8d0   : > { %v2512_v24 = vpop.permute.xlu1 %2511 }
 0x8d1   : > { %v2539_v30 = vsel %vm799_vm4, %v11720_v4, %v2512_v24 }
 0x8d4   : > { %v2528_v44 = vpop.permute.xlu0 %2527  ;;  %v2514_v40 = vpop.permute.xlu1 %2513 }
 0x8d5   : > { %v11981_v52 = vsel %vm804_vm3, %v2539_v30, %v2528_v44  ;;  %v2540_v19 = vsel %vm799_vm4, %v11711_v25, %v2514_v40 }
 0x8d6   : > { %v2555_v60 = vmul.f32 %v11981_v52, %v10514_v51  ;;  %v2551_v62 = vmul.f32 %v11981_v52, %v10572_v8  ;;  %v2563_v32 = vmul.f32 %v11981_v52, %v10568_v6  ;;  %v2559_v39 = vmul.f32 %v11981_v52, %v10537_v59 }
 0x8d8   : > { %2599 = vrot.lane.b32.xlu0 %v2555_v60, %s15682_s13  ;;  %2583 = vrot.lane.b32.xlu1 %v2551_v62, %s15666_s10  ;;  %v2530_v31 = vpop.permute.xlu0 %2529 }
 0x8d9   : > { %v11992_v4 = vsel %vm804_vm3, %v2540_v19, %v2530_v31  ;;  %v2571_v31 = vmul.f32 %v11981_v52, %v10747_v33 }
 0x8da   : > { %v2564_v21 = vmul.f32 %v11992_v4, %v10739_v28  ;;  %v2560_v25 = vmul.f32 %v11992_v4, %v10718_v17  ;;  %v2556_v23 = vmul.f32 %v11992_v4, %v10570_v7  ;;  %v2552_v50 = vmul.f32 %v11992_v4, %v10557_v2 }
 0x8db   : > { %v2572_v19 = vmul.f32 %v11992_v4, %v10792_v53 }
 0x8dc   : > { %v9156_v43 = vpack.i.bf16 %v2564_v21, %v2563_v32  ;;  %v9151_v16 = vpack.i.bf16 %v2560_v25, %v2559_v39  ;;  %v2567_v32 = vmul.f32 %v11981_v52, %v10749_v34  ;;  %v2576_v25 = vmul.f32 %v11992_v4, %v10794_v55 }
 0x8dd   : > { %v9176_v21 = vpack.i.bf16 %v2572_v19, %v2571_v31 }
 0x8de   : > { %v2516_v35 = vpop.permute.xlu1 %2515  ;;  %9157 = vrot.lane.b32.xlu0 %v9156_v43, %s15683_s18  ;;  %9152 = vrot.lane.b32.xlu1 %v9151_v16, %s15684_s26  ;;  %v2575_v43 = vmul.f32 %v11981_v52, %v10779_v47 }
 0x8df   : > { %v2541_v36 = vsel %vm799_vm4, %v11792_v0, %v2516_v35 }
 0x8e2   : > { %v2532_v29 = vpop.permute.xlu0 %2531  ;;  %v2518_v54 = vpop.permute.xlu1 %2517 }
 0x8e3   : > { %v12007_v45 = vsel %vm804_vm3, %v2541_v36, %v2532_v29  ;;  %v2542_v0 = vsel %vm799_vm4, %v11771_v27, %v2518_v54  ;;  %v2568_v27 = vmul.f32 %v11992_v4, %v10786_v49 }
 0x8e4   : > { %v2557_v37 = vmul.f32 %v12007_v45, %v10574_v9  ;;  %v2553_v63 = vmul.f32 %v12007_v45, %v10576_v10  ;;  %v2561_v16 = vmul.f32 %v12007_v45, %v10737_v26  ;;  %v2565_v35 = vmul.f32 %v12007_v45, %v10783_v48 }
 0x8e5   : > { %v9171_v39 = vpack.i.bf16 %v2568_v27, %v2567_v32 }
 0x8e6   : > { %v2534_v24 = vpop.permute.xlu0 %2533  ;;  %v9166_v30 = vpack.i.bf16 %v2557_v37, %v2556_v23  ;;  %v9161_v44 = vpack.i.bf16 %v2553_v63, %v2552_v50  ;;  %v2569_v23 = vmul.f32 %v12007_v45, %v10817_v3  ;;  %v2573_v37 = vmul.f32 %v12007_v45, %v10825_v12  ;;  %v15698_v63 = vld [vmem:[#allocation21_spill] sm:$0xff] }
 0x8e7   : > { %v12020_v40 = vsel %vm804_vm3, %v2542_v0, %v2534_v24  ;;  %v15699_v24 = vld [vmem:[#allocation20_spill] sm:$0xff] }
 0x8e8   : > { %9167 = vrot.lane.b32.xlu0 %v9166_v30, %s15682_s13  ;;  %9162 = vrot.lane.b32.xlu1 %v9161_v44, %s15666_s10  ;;  %v2558_v60 = vmul.f32 %v12020_v40, %v10700_v1  ;;  %v2554_v62 = vmul.f32 %v12020_v40, %v10578_v11  ;;  %v2566_v36 = vmul.f32 %v12020_v40, %v10815_v15  ;;  %v15700_v44 = vld [vmem:[#allocation22_spill] sm:$0xff] }
 0x8e9   : > { %v2562_v29 = vmul.f32 %v12020_v40, %v10807_v61  ;;  %v2570_v54 = vmul.f32 %v12020_v40, %v10831_v18  ;;  %v2574_v0 = vmul.f32 %v12020_v40, %v15698_v63  ;;  %v2577_v30 = vmul.f32 %v12007_v45, %v15699_v24 }
 0x8eb   : > { %v9181_v50 = vpack.i.bf16 %v2570_v54, %v2569_v23 }
 0x8ec   : > { %2605 = vrot.lane.b32.xlu0 %v2558_v60, %s15682_s13  ;;  %2589 = vrot.lane.b32.xlu1 %v2554_v62, %s15666_s10  ;;  %v2578_v60 = vmul.f32 %v12020_v40, %v15700_v44  ;;  %v15701_v62 = vld [vmem:[#allocation23_spill] sm:$0xff]  ;;  %v9636_v44 = vld [vmem:[%s15549_s5] sm:$0xff] }
 0x8ed   : > { %v2547_v19 = vmul.f32 %v11981_v52, %v15701_v62  ;;  %v9562_v52 = vld [vmem:[%s15547_s3 + $0x270] sm:$0xff] }
 0x8f0   : > { %9177 = vrot.lane.b32.xlu0 %v9176_v21, %s15685_s12  ;;  %9172 = vrot.lane.b32.xlu1 %v9171_v39, %s15686_s0  ;;  %v9560_v39 = vld [vmem:[%s15547_s3 + $0x278] sm:$0xff] }
 0x8f4   : > { %2681 = vrot.lane.b32.xlu0 %v2576_v25, %s15687_s19  ;;  %2679 = vrot.lane.b32.xlu1 %v2575_v43, %s15687_s19  ;;  %v9561_v25 = vld [vmem:[%s15547_s3 + $0x2f0] sm:$0xff] }
 0x8f8   : > { %2619 = vrot.lane.b32.xlu0 %v2561_v16, %s15684_s26  ;;  %2635 = vrot.lane.b32.xlu1 %v2565_v35, %s15683_s18 }
 0x8fc   : > { %2637 = vrot.lane.b32.xlu0 %v2566_v36, %s15683_s18  ;;  %2621 = vrot.lane.b32.xlu1 %v2562_v29, %s15684_s26  ;;  %v9563_v29 = vld [vmem:[%s15547_s3 + $0x2e8] sm:$0xff] }
 0x900   : > { %2667 = vrot.lane.b32.xlu0 %v2573_v37, %s15685_s12  ;;  %9182 = vrot.lane.b32.xlu1 %v9181_v50, %s15686_s0  ;;  %v9564_v37 = vld [vmem:[%s15547_s3 + $0x268] sm:$0xff]  ;;  %v9565_v50 = vld [vmem:[%s15547_s3 + $0x2e0] sm:$0xff] }
 0x904   : > { %2669 = vrot.lane.b32.xlu0 %v2574_v0, %s15685_s12  ;;  %2683 = vrot.lane.b32.xlu1 %v2577_v30, %s15687_s19 }
 0x908   : > { %2301 = vrot.lane.b32.xlu0 %v11684_v38, %s15600_s27  ;;  %2685 = vrot.lane.b32.xlu1 %v2578_v60, %s15687_s19  ;;  %v9566_v60 = vld [vmem:[%s15547_s3 + $0x260] sm:$0xff] }
 0x90c   : > { %2305 = vrot.lane.b32.xlu0 %v11696_v42, %s15600_s27  ;;  %2299 = vrot.lane.b32.xlu1 %v11690_v22, %s15600_s27 }
 0x910   : > { %2303 = vrot.lane.b32.xlu1 %v11702_v57, %s15600_s27  ;;  %s10258_s27 = smov [#allocation3]  }
 0x911   : > { %s10179_s28 = sshll.u32 %s10258_s27, 4  ;;  %s10180_s28 = int_to_ptr.vmem [resolvable:$false] %s10179_s28 }
 0x912   : > { %s10181_s22 = scalar_lea.vmem %s10180_s28, 4096  ;;  %p10182_p1 = scmp.lt.s32.totalorder %s15496_s16, %s10180_s28 }
 0x913   : > { %p10183_p2 = scmp.lt.s32.totalorder %s10181_s22, %s10175_s25 }
 0x915   : > { %p10184_p3 = por %p10183_p2, %p10182_p1 }
 0x917   : > { %p10185_p4 = pnand %p10184_p3, %p10178_p0 }
 0x94a   : > { %v2584_v27 = vpop.permute.xlu1 %2583  ;;  %v2600_v31 = vpop.permute.xlu0 %2599 }
 0x94b   : > { %v2691_v32 = vsel %vm1085_vm6, %v2547_v19, %v2584_v27  ;;  %v2695_v21 = vsel %vm1090_vm5, %v2584_v27, %v2600_v31  ;;  %v9567_v19 = vld [vmem:[%s15547_s3 + $0x2d8] sm:$0xff] }
 0x94c   : > { %2791 = vmatprep.mubr.f32.mxu1 %v2695_v21  ;;  %v9570_v21 = vld [vmem:[%s15547_s3 + $0x250] sm:$0xff] }
 0x94d   : > { %2792 = vmatmul.mubr.f32.vlgmr.msra.gmra.mxu1 %v2691_v32  ;;  %v9569_v32 = vld [vmem:[%s15547_s3 + $0x2d0] sm:$0xff] }
 0x94e   : > { %7730 = vmatpush3.msra.mxu1 %v9560_v39  ;;  %v9571_v39 = vld [vmem:[%s15547_s3 + $0x350] sm:$0xff] }
 0x94f   : > { %7731 = vmatprep.subr.mxu1 %v9561_v25  ;;  %v9572_v25 = vld [vmem:[%s15547_s3 + $0x2c8] sm:$0xff] }
 0x950   : > { %7732 = vmatpush3.msra.mxu1 %v9562_v52  ;;  %v9153_v43 = vpop.permute.xlu1 %9152  ;;  %v12096_v16 = vpop.permute.xlu0 %9157 }
 0x951   : > { %v9155_v35 = vunpack.i.h.bf16 %v9153_v43  ;;  %v9154_v36 = vunpack.i.l.bf16 %v9153_v43  ;;  %7733 = vmatprep.subr.mxu1 %v9563_v29  ;;  %v9160_v54 = vunpack.i.h.bf16 %v12096_v16  ;;  %v9159_v23 = vunpack.i.l.bf16 %v12096_v16 }
 0x952   : > { %7734 = vmatpush3.msra.mxu1 %v9564_v37  ;;  %v9575_v37 = vld [vmem:[%s15547_s3 + $0x2c0] sm:$0xff] }
 0x953   : > { %7735 = vmatprep.subr.mxu1 %v9565_v50  ;;  %v2703_v0 = vsel %vm1100_vm7, %v9154_v36, %v9159_v23  ;;  %v2699_v30 = vsel %vm1095_vm8, %v2600_v31, %v9154_v36  ;;  %v2704_v27 = vsel %vm1100_vm7, %v9155_v35, %v9160_v54  ;;  %v9568_v31 = vld [vmem:[%s15547_s3 + $0x258] sm:$0xff]  ;;  %v9574_v36 = vld [vmem:[%s15547_s3 + $0x348] sm:$0xff] }
 0x954   : > { %7736 = vmatpush3.msra.mxu1 %v9566_v60  ;;  %2876 = vmatprep.mubr.f32.mxu0 %v2703_v0  ;;  %v15702_v0 = vld [vmem:[#allocation25_spill] sm:$0xff] }
 0x955   : > { %7737 = vmatprep.subr.mxu1 %v9567_v19  ;;  %2877 = vmatmul.mubr.f32.vlgmr.msra.gmra.mxu0 %v2699_v30  ;;  %v2548_v30 = vmul.f32 %v11992_v4, %v15702_v0 }
 0x956   : > { %7738 = vmatpush3.msra.mxu1 %v9568_v31  ;;  %2881 = vmatprep.mubr.f32.mxu0 %v2704_v27  ;;  %v9576_v27 = vld [vmem:[%s15547_s3 + $0x240] sm:$0xff] }
 0x957   : > { %7739 = vmatprep.subr.mxu1 %v9569_v32  ;;  %8710 = vmatpush3.msra.mxu0 %v11967_v5  ;;  %v9573_v5 = vld [vmem:[%s15547_s3 + $0x248] sm:$0xff]  ;;  %v9577_v31 = vld [vmem:[%s15547_s3 + $0x340] sm:$0xff]  ;;  %v9578_v32 = vld [vmem:[%s15547_s3 + $0x2b8] sm:$0xff] }
 0x958   : > { %7740 = vmatpush3.msra.mxu1 %v9570_v21  ;;  %8711 = vmatprep.subr.mxu0 %v9571_v39 }
 0x959   : > { %7741 = vmatprep.subr.mxu1 %v9572_v25  ;;  %8712 = vmatpush3.msra.mxu0 %v9571_v39  ;;  %v9579_v25 = vld [vmem:[%s15547_s3 + $0x238] sm:$0xff] }
 0x95a   : > { %7742 = vmatpush3.msra.mxu1 %v9573_v5  ;;  %v9163_v52 = vpop.permute.xlu1 %9162  ;;  %v12141_v43 = vpop.permute.xlu0 %9167  ;;  %8713 = vmatprep.subr.mxu0 %v9574_v36 }
 0x95b   : > { %v9164_v29 = vunpack.i.l.bf16 %v9163_v52  ;;  %7743 = vmatprep.subr.mxu1 %v9575_v37  ;;  %v9169_v50 = vunpack.i.l.bf16 %v12141_v43  ;;  %8714 = vmatpush3.msra.mxu0 %v9574_v36  ;;  %v9165_v60 = vunpack.i.h.bf16 %v9163_v52  ;;  %v9170_v19 = vunpack.i.h.bf16 %v12141_v43  ;;  %v9580_v36 = vld [vmem:[%s15547_s3 + $0x2b0] sm:$0xff] }
 0x95c   : > { %7744 = vmatpush3.msra.mxu1 %v9576_v27  ;;  %8715 = vmatprep.subr.mxu0 %v9577_v31  ;;  %v15703_v37 = vld [vmem:[#allocation24_spill] sm:$0xff] }
 0x95d   : > { %7745 = vmatprep.subr.mxu1 %v9578_v32  ;;  %v2696_v4 = vsel %vm1090_vm5, %v9164_v29, %v9169_v50  ;;  %v2700_v21 = vsel %vm1095_vm8, %v9169_v50, %v9155_v35  ;;  %v2692_v39 = vsel %vm1085_vm6, %v2548_v30, %v9164_v29  ;;  %v2697_v35 = vsel %vm1090_vm5, %v9165_v60, %v9170_v19  ;;  %v9581_v29 = vld [vmem:[%s15547_s3 + $0x230] sm:$0xff]  ;;  %v9582_v30 = vld [vmem:[%s15547_s3 + $0x2a8] sm:$0xff] }
 0x95e   : > { %7746 = vmatpush3.msra.mxu1 %v9579_v25  ;;  %v2590_v5 = vpop.permute.xlu1 %2589  ;;  %v12168_v52 = vpop.permute.xlu0 %2605  ;;  %2796 = vmatprep.mubr.f32.mxu1 %v2696_v4  ;;  %v2549_v50 = vmul.f32 %v12007_v45, %v15703_v37  ;;  %v9584_v4 = vld [vmem:[%s15547_s3 + $0x228] sm:$0xff]  ;;  %v9585_v25 = vld [vmem:[%s15547_s3 + $0x2a0] sm:$0xff] }
 0x95f   : > { %7747 = vmatprep.subr.mxu1 %v9580_v36  ;;  %2882 = vmatmul.mubr.f32.gmra.mxu0 %v2700_v21  ;;  %v2698_v36 = vsel %vm1090_vm5, %v2590_v5, %v12168_v52 }
 0x960   : > { %2797 = vmatmul.mubr.f32.gmra.mxu1 %v2692_v39  ;;  %8716 = vmatpush3.msra.mxu0 %v9577_v31  ;;  %v9583_v31 = vld [vmem:[%s15547_s3 + $0x338] sm:$0xff]  ;;  %v2693_v39 = vsel %vm1085_vm6, %v2549_v50, %v9165_v60 }
 0x961   : > { %7748 = vmatpush3.msra.mxu1 %v9581_v29  ;;  %2801 = vmatprep.mubr.f32.mxu1 %v2697_v35  ;;  %v9586_v35 = vld [vmem:[%s15547_s3 + $0x220] sm:$0xff]  ;;  %v9587_v50 = vld [vmem:[%s15547_s3 + $0x298] sm:$0xff] }
 0x962   : > { %7749 = vmatprep.subr.mxu1 %v9582_v30  ;;  %v12184_v27 = vpop.permute.xlu1 %9172  ;;  %v9178_v32 = vpop.permute.xlu0 %9177  ;;  %8717 = vmatprep.subr.mxu0 %v9583_v31  ;;  %v15704_v29 = vld [vmem:[#allocation26_spill] sm:$0xff] }
 0x963   : > { %7750 = vmatpush3.msra.mxu1 %v9584_v4  ;;  %v9174_v45 = vunpack.i.l.bf16 %v12184_v27  ;;  %v9179_v21 = vunpack.i.l.bf16 %v9178_v32  ;;  %8718 = vmatpush3.msra.mxu0 %v9583_v31  ;;  %v2550_v30 = vmul.f32 %v12020_v40, %v15704_v29  ;;  %v9589_v40 = vld [vmem:[%s15547_s3 + $0x218] sm:$0xff] }
 0x964   : > { %7751 = vmatprep.subr.mxu1 %v9585_v25  ;;  %2802 = vmatmul.mubr.f32.gmra.mxu1 %v2693_v39  ;;  %v9588_v39 = vld [vmem:[%s15547_s3 + $0x330] sm:$0xff]  ;;  %v9175_v25 = vunpack.i.h.bf16 %v12184_v27 }
 0x965   : > { %7752 = vmatpush3.msra.mxu1 %v9586_v35  ;;  %2806 = vmatprep.mubr.f32.mxu1 %v2698_v36  ;;  %v2711_v60 = vsel %vm1110_vm9, %v9174_v45, %v9179_v21  ;;  %v9180_v36 = vunpack.i.h.bf16 %v9178_v32  ;;  %v2694_v21 = vsel %vm1085_vm6, %v2550_v30, %v2590_v5  ;;  %v9591_v27 = vld [vmem:[%s15547_s3 + $0x210] sm:$0xff]  ;;  %v9592_v5 = vld [vmem:[%s15547_s3 + $0x288] sm:$0xff] }
 0x966   : > { %7753 = vmatprep.subr.mxu1 %v9587_v50  ;;  %v12208_v31 = vpop.permute.xlu1 %2679  ;;  %v12210_v4 = vpop.permute.xlu0 %2681  ;;  %8719 = vmatprep.subr.mxu0 %v9588_v39  ;;  %v9590_v50 = vld [vmem:[%s15547_s3 + $0x290] sm:$0xff]  ;;  %v9593_v32 = vld [vmem:[%s15547_s3 + $0x328] sm:$0xff] }
 0x967   : > { %7754 = vmatpush3.msra.mxu1 %v9589_v40  ;;  %v2715_v35 = vsel %vm1115_vm10, %v2711_v60, %v12208_v31  ;;  %8720 = vmatpush3.msra.mxu0 %v9588_v39  ;;  %v9594_v39 = vld [vmem:[%s15547_s3 + $0x208] sm:$0xff] }
 0x968   : > { %7755 = vmatprep.subr.mxu1 %v9590_v50  ;;  %2807 = vmatmul.mubr.f32.gmra.mxu1 %v2694_v21  ;;  %v2712_v21 = vsel %vm1110_vm9, %v9175_v25, %v9180_v36  ;;  %v9596_v50 = vld [vmem:[%s15547_s3 + $0x320] sm:$0xff]  ;;  %v2707_v36 = vsel %vm1105_vm11, %v9159_v23, %v9174_v45  ;;  %v2708_v23 = vsel %vm1105_vm11, %v9160_v54, %v9175_v25  ;;  %v9601_v54 = vld [vmem:[%s15548_s4 + $0x78] sm:$0xff] }
 0x969   : > { %7756 = vmatpush3.msra.mxu1 %v9591_v27  ;;  %2961 = vmatprep.mubr.f32.mxu1 %v2715_v35  ;;  %v9595_v35 = vld [vmem:[%s15547_s3 + $0x280] sm:$0xff] }
 0x96a   : > { %7757 = vmatprep.subr.mxu1 %v9592_v5  ;;  %8721 = vmatprep.subr.mxu0 %v9593_v32  ;;  %v2636_v30 = vpop.permute.xlu1 %2635  ;;  %v2620_v60 = vpop.permute.xlu0 %2619  ;;  %v9597_v5 = vld [vmem:[%s15547_s3 + $0x200] sm:$0xff] }
 0x96b   : > { %7758 = vmatpush3.msra.mxu1 %v9594_v39  ;;  %8722 = vmatpush3.msra.mxu0 %v9593_v32  ;;  %v2705_v40 = vsel %vm1100_vm7, %v2620_v60, %v2636_v30  ;;  %v2701_v27 = vsel %vm1095_vm8, %v9170_v19, %v2620_v60  ;;  %v2716_v32 = vsel %vm1115_vm10, %v2712_v21, %v12210_v4  ;;  %v9598_v19 = vld [vmem:[%s15547_s3 + $0x318] sm:$0xff] }
 0x96c   : > { %7759 = vmatprep.subr.mxu1 %v9595_v35  ;;  %8723 = vmatprep.subr.mxu0 %v9596_v50  ;;  %v9599_v60 = vld [vmem:[%s15548_s4 + $0xf8] sm:$0xff] }
 0x96d   : > { %7760 = vmatpush3.msra.mxu1 %v9597_v5  ;;  %2886 = vmatprep.mubr.f32.mxu0 %v2705_v40  ;;  %v9600_v40 = vld [vmem:[%s15547_s3 + $0x310] sm:$0xff] }
 0x96e   : > { %2962 = vmatmul.mubr.f32.vlgmr.msra.gmra.mxu1 %v2707_v36  ;;  %8724 = vmatpush3.msra.mxu0 %v9596_v50  ;;  %v2622_v39 = vpop.permute.xlu1 %2621  ;;  %v2638_v35 = vpop.permute.xlu0 %2637 }
 0x96f   : > { %2887 = vmatmul.mubr.f32.gmra.mxu0 %v2701_v27  ;;  %2966 = vmatprep.mubr.f32.mxu1 %v2716_v32  ;;  %v2706_v43 = vsel %vm1100_vm7, %v2622_v39, %v2638_v35  ;;  %v2702_v45 = vsel %vm1095_vm8, %v12168_v52, %v2622_v39  ;;  %v9602_v52 = vld [vmem:[%s15547_s3 + $0x308] sm:$0xff]  ;;  %v9603_v27 = vld [vmem:[%s15547_s3 + $0x300] sm:$0xff]  ;;  %v9604_v32 = vld [vmem:[%s15548_s4 + $0xf0] sm:$0xff] }
 0x970   : > { %8725 = vmatprep.subr.mxu0 %v9598_v19  ;;  %2891 = vmatprep.mubr.f32.mxu0 %v2706_v43 }
 0x971   : > { %8726 = vmatpush3.msra.mxu0 %v9598_v19  ;;  %7801 = vmatprep.subr.mxu1 %v9599_v60 }
 0x972   : > { %8727 = vmatprep.subr.mxu0 %v9600_v40  ;;  %2967 = vmatmul.mubr.f32.gmra.mxu1 %v2708_v23  ;;  %v9183_v21 = vpop.permute.xlu1 %9182  ;;  %v2668_v50 = vpop.permute.xlu0 %2667 }
 0x973   : > { %8728 = vmatpush3.msra.mxu0 %v9600_v40  ;;  %v9184_v16 = vunpack.i.l.bf16 %v9183_v21  ;;  %7802 = vmatpush3.msra.mxu1 %v9601_v54  ;;  %v9185_v43 = vunpack.i.h.bf16 %v9183_v21  ;;  %v9606_v40 = vld [vmem:[%s15548_s4 + $0xe8] sm:$0xff] }
 0x974   : > { %2892 = vmatmul.mubr.f32.gmra.mxu0 %v2702_v45  ;;  %8729 = vmatprep.subr.mxu0 %v9602_v52 }
 0x975   : > { %v2713_v25 = vsel %vm1110_vm9, %v9184_v16, %v2668_v50  ;;  %8730 = vmatpush3.msra.mxu0 %v9602_v52  ;;  %8733 = vmatprep.mubr.msk.f32.mxu0 %vm1120_vm12, %v12208_v31  ;;  %v9605_v31 = vld [vmem:[%s15548_s4 + $0x70] sm:$0xff]  ;;  %v2709_v19 = vsel %vm1105_vm11, %v2636_v30, %v9184_v16  ;;  %v9607_v30 = vld [vmem:[%s15548_s4 + $0x68] sm:$0xff]  ;;  %v2710_v21 = vsel %vm1105_vm11, %v2638_v35, %v9185_v43  ;;  %v9608_v52 = vld [vmem:[%s15548_s4 + $0xe0] sm:$0xff] }
 0x976   : > { %8731 = vmatprep.subr.mxu0 %v9603_v27  ;;  %v2684_v5 = vpop.permute.xlu1 %2683  ;;  %v2670_v36 = vpop.permute.xlu0 %2669  ;;  %7803 = vmatprep.subr.mxu1 %v9604_v32  ;;  %v15705_v50 = vld [vmem:[#allocation27_spill] sm:$0xff]  ;;  %v9609_v35 = vld [vmem:[%s15548_s4 + $0x60] sm:$0xff]  ;;  %v9613_v32 = vld [vmem:[%s15548_s4 + $0x50] sm:$0xff] }
 0x977   : > { %8732 = vmatpush3.msra.mxu0 %v9603_v27  ;;  %v2717_v39 = vsel %vm1115_vm10, %v2713_v25, %v2684_v5  ;;  %7804 = vmatpush3.msra.mxu1 %v9605_v31  ;;  %v2714_v23 = vsel %vm1110_vm9, %v9185_v43, %v2670_v36  ;;  %v9610_v25 = vld [vmem:[%s15548_s4 + $0xd8] sm:$0xff]  ;;  %v9612_v36 = vld [vmem:[%s15548_s4 + $0xd0] sm:$0xff]  ;;  %v9615_v31 = vld [vmem:[%s15548_s4 + $0x48] sm:$0xff] }
 0x978   : > { %8734 = vmatmul.mubr.msk.f32.vlgmr.msra.gmra.mxu0 %vm1120_vm12, %v12210_v4  ;;  %2971 = vmatprep.mubr.f32.mxu1 %v2717_v39  ;;  %v9611_v27 = vld [vmem:[%s15548_s4 + $0x58] sm:$0xff]  ;;  %v9614_v39 = vld [vmem:[%s15548_s4 + $0xc8] sm:$0xff]  ;;  %v9616_v43 = vld [vmem:[%s15548_s4 + $0xc0] sm:$0xff] }
 0x979   : > { %8736 = vmatprep.mubr.msk.f32.mxu0 %vm1120_vm12, %v2684_v5  ;;  %2972 = vmatmul.mubr.f32.gmra.mxu1 %v2709_v19  ;;  %v9617_v19 = vld [vmem:[%s15548_s4 + $0x40] sm:$0xff] }
 0x97a   : > { %v2686_v45 = vpop.permute.xlu1 %2685  ;;  %v12295_v60 = vpop.permute.xlu0 %2301  ;;  %7805 = vmatprep.subr.mxu1 %v9606_v40  ;;  %v9620_v40 = vld [vmem:[%s15548_s4 + $0xb0] sm:$0xff] }
 0x97b   : > { %2313 = vst.msk [vmem:[%s10362_s24 + $0x8] sm:$0xff] %vm2311_vm13, %v12295_v60  ;;  %v2718_v4 = vsel %vm1115_vm10, %v2714_v23, %v2686_v45  ;;  %7806 = vmatpush3.msra.mxu1 %v9607_v30  ;;  %v9618_v23 = vld [vmem:[%s15548_s4 + $0xb8] sm:$0xff]  ;;  %v9622_v30 = vld [vmem:[%s15548_s4 + $0xa8] sm:$0xff] }
 0x97c   : > { %8737 = vmatmul.mubr.msk.f32.gmra.mxu0 %vm1120_vm12, %v2686_v45  ;;  %2976 = vmatprep.mubr.f32.mxu1 %v2718_v4  ;;  %v9619_v45 = vld [vmem:[%s15548_s4 + $0x38] sm:$0xff]  ;;  %v9621_v4 = vld [vmem:[%s15548_s4 + $0x30] sm:$0xff] }
 0x97d   : > { %2977 = vmatmul.mubr.f32.gmra.mxu1 %v2710_v21  ;;  %8743 = vmatprep.mubr.msk.f32.mxu0 %vm584_vm1, %v15705_v50  ;;  %v9623_v21 = vld [vmem:[%s15548_s4 + $0x28] sm:$0xff]  ;;  %v9624_v50 = vld [vmem:[%s15548_s4 + $0xa0] sm:$0xff] }
 0x97e   : > { %v12311_v16 = vpop.permute.xlu1 %2299  ;;  %v12313_v54 = vpop.permute.xlu0 %2305  ;;  %7807 = vmatprep.subr.mxu1 %v9608_v52  ;;  %v9625_v52 = vld [vmem:[%s15548_s4 + $0x20] sm:$0xff] }
 0x97f   : > { %2312 = vst.msk [vmem:[%s10362_s24] sm:$0xff] %vm2311_vm13, %v12311_v16  ;;  %2315 = vst.msk [vmem:[%s10362_s24 + $0x18] sm:$0xff] %vm2311_vm13, %v12313_v54  ;;  %7808 = vmatpush3.msra.mxu1 %v9609_v35  ;;  %v9626_v35 = vld [vmem:[%s15548_s4 + $0x98] sm:$0xff] }
 0x980   : > { %7809 = vmatprep.subr.mxu1 %v9610_v25  ;;  %v9627_v25 = vld [vmem:[%s15548_s4 + $0x18] sm:$0xff] }
 0x981   : > { %7810 = vmatpush3.msra.mxu1 %v9611_v27  ;;  %v9628_v27 = vld [vmem:[%s15548_s4 + $0x90] sm:$0xff] }
 0x982   : > { %v12333_v5 = vpop.permute.xlu1 %2303  ;;  %7811 = vmatprep.subr.mxu1 %v9612_v36  ;;  %v9629_v36 = vld [vmem:[%s15548_s4 + $0x10] sm:$0xff] }
 0x983   : > { %2314 = vst.msk [vmem:[%s10362_s24 + $0x10] sm:$0xff] %vm2311_vm13, %v12333_v5  ;;  %7812 = vmatpush3.msra.mxu1 %v9613_v32  ;;  %v9630_v32 = vld [vmem:[%s15548_s4 + $0x88] sm:$0xff] }
 0x984   : > { %7813 = vmatprep.subr.mxu1 %v9614_v39  ;;  %v9631_v39 = vld [vmem:[%s15548_s4 + $0x8] sm:$0xff] }
 0x985   : > { %7814 = vmatpush3.msra.mxu1 %v9615_v31  ;;  %v9632_v31 = vld [vmem:[%s15548_s4 + $0x80] sm:$0xff] }
 0x986   : > { %7815 = vmatprep.subr.mxu1 %v9616_v43  ;;  %v9633_v43 = vld [vmem:[%s15548_s4] sm:$0xff] }
 0x987   : > { %7816 = vmatpush3.msra.mxu1 %v9617_v19  ;;  %v9634_v19 = vld [vmem:[%s15548_s4 + $0x2f8] sm:$0xff] }
 0x988   : > { %7817 = vmatprep.subr.mxu1 %v9618_v23 }
 0x989   : > { %7818 = vmatpush3.msra.mxu1 %v9619_v45 }
 0x98a   : > { %7819 = vmatprep.subr.mxu1 %v9620_v40 }
 0x98b   : > { %7820 = vmatpush3.msra.mxu1 %v9621_v4 }
 0x98c   : > { %7821 = vmatprep.subr.mxu1 %v9622_v30 }
 0x98d   : > { %7822 = vmatpush3.msra.mxu1 %v9623_v21 }
 0x98e   : > { %7823 = vmatprep.subr.mxu1 %v9624_v50 }
 0x98f   : > { %7824 = vmatpush3.msra.mxu1 %v9625_v52 }
 0x990   : > { %7825 = vmatprep.subr.mxu1 %v9626_v35 }
 0x991   : > { %7826 = vmatpush3.msra.mxu1 %v9627_v25 }
 0x992   : > { %7827 = vmatprep.subr.mxu1 %v9628_v27 }
 0x993   : > { %7828 = vmatpush3.msra.mxu1 %v9629_v36 }
 0x994   : > { %7829 = vmatprep.subr.mxu1 %v9630_v32 }
 0x995   : > { %7830 = vmatpush3.msra.mxu1 %v9631_v39 }
 0x996   : > { %7831 = vmatprep.subr.mxu1 %v9632_v31 }
 0x997   : > { %7832 = vmatpush3.msra.mxu1 %v9633_v43 }
 0x998   : > { %7889 = vmatprep.subr.mxu1 %v9634_v19  ;;  %v9635_v19 = vld [vmem:[%s15549_s5 + $0x8] sm:$0xff] }
 0xa0d   : > { %v7673_v23 = vpop.f32.mrf.mxu1 }
 0xa0f   : > { %v7674_v45 = vpop.f32.mrf.mxu1 }
 0xa10   : > { %v7675_v42 = vadd.f32 %v7674_v45, %v7673_v23 }
 0xa15   : > { %v7717_v30 = vpop.f32.mrf.mxu0 }
 0xa17   : > { %v7718_v52 = vpop.f32.mrf.mxu0 }
 0xa18   : > { %v7719_v29 = vadd.f32 %v7718_v52, %v7717_v30  ;;  %v9637_v52 = vld [vmem:[%s15549_s5 + $0x10] sm:$0xff] }
 0xa1f   : > { %v7720_v25 = vpop.f32.mrf.mxu0 }
 0xa20   : > { %v7676_v40 = vpop.f32.mrf.mxu1 }
 0xa21   : > { %v7721_v36 = vpop.f32.mrf.mxu0 }
 0xa22   : > { %v7677_v4 = vpop.f32.mrf.mxu1  ;;  %v7722_v37 = vadd.f32 %v7721_v36, %v7720_v25 }
 0xa23   : > { %v7678_v32 = vadd.f32 %v7677_v4, %v7676_v40  ;;  %v2794_v40 = vadd.f32 %v9636_v44, %v7675_v42 }
 0xa24   : > { %v7679_v21 = vpop.f32.mrf.mxu1 }
 0xa25   : > { %v2799_v57 = vadd.f32 %v9635_v19, %v7678_v32  ;;  %v2879_v12 = vadd.f32 %v7719_v29, %v2794_v40 }
 0xa26   : > { %v7680_v50 = vpop.f32.mrf.mxu1 }
 0xa27   : > { %v2884_v63 = vadd.f32 %v7722_v37, %v2799_v57  ;;  %v7681_v23 = vadd.f32 %v7680_v50, %v7679_v21 }
 0xa28   : > { %v7682_v35 = vpop.f32.mrf.mxu1 }
 0xa29   : > { %v2804_v25 = vadd.f32 %v9637_v52, %v7681_v23 }
 0xa2a   : > { %v7683_v27 = vpop.f32.mrf.mxu1 }
 0xa2b   : > { %v7684_v36 = vadd.f32 %v7683_v27, %v7682_v35 }
 0xa2e   : > { %v7761_v39 = vpop.f32.mrf.mxu1 }
 0xa2f   : > { %v7723_v31 = vpop.f32.mrf.mxu0 }
 0xa30   : > { %v7762_v43 = vpop.f32.mrf.mxu1 }
 0xa31   : > { %v7724_v22 = vpop.f32.mrf.mxu0  ;;  %v7763_v4 = vadd.f32 %v7762_v43, %v7761_v39 }
 0xa32   : > { %v7764_v38 = vpop.f32.mrf.mxu1  ;;  %v7725_v18 = vadd.f32 %v7724_v22, %v7723_v31 }
 0xa33   : > { %v2964_v61 = vadd.f32 %v7763_v4, %v2879_v12 }
 0xa34   : > { %v7726_v0 = vpop.f32.mrf.mxu0  ;;  %v7765_v62 = vpop.f32.mrf.mxu1  ;;  %v2889_v57 = vadd.f32 %v7725_v18, %v2804_v25 }
 0xa35   : > { %v7766_v24 = vadd.f32 %v7765_v62, %v7764_v38 }
 0xa36   : > { %v7727_v45 = vpop.f32.mrf.mxu0 }
 0xa37   : > { %v2969_v3 = vadd.f32 %v7766_v24, %v2884_v63  ;;  %v7728_v62 = vadd.f32 %v7727_v45, %v7726_v0 }
 0xa38   : > { %v8735_v32 = vpop.f32.mrf.mxu0 }
 0xa39   : > { %v3054_v19 = vadd.f32 %v8735_v32, %v2969_v3  ;;  %v7767_v30 = vpop.f32.mrf.mxu1  ;;  %v9638_v3 = vld [vmem:[%s15549_s5 + $0x18] sm:$0xff] }
 0xa3a   : > { %v3048_v15 = vpop.f32.mrf.mxu0  ;;  %v2809_v12 = vadd.f32 %v9638_v3, %v7684_v36  ;;  %v9646_v3 = vld [vmem:[%s15548_s4 + $0x1e0] sm:$0xff] }
 0xa3b   : > { %v7209_v42 = vmul.f32 -1.442695, %v3054_v19  ;;  %v3049_v44 = vadd.f32 %v3048_v15, %v2964_v61  ;;  %v7768_v38 = vpop.f32.mrf.mxu1 }
 0xa3c   : > { %v7769_v37 = vadd.f32 %v7768_v38, %v7767_v30  ;;  %v8738_v29 = vpop.f32.mrf.mxu0  ;;  %v2894_v35 = vadd.f32 %v7728_v62, %v2809_v12  ;;  %v9647_v12 = vld [vmem:[%s15548_s4 + $0x160] sm:$0xff] }
 0xa3d   : > { %9406 = vpow2.f32 %v7209_v42  ;;  %v7208_v22 = vmul.f32 -1.442695, %v3049_v44  ;;  %v7770_v63 = vpop.f32.mrf.mxu1 }
 0xa3e   : > { %v2974_v24 = vadd.f32 %v7769_v37, %v2889_v57  ;;  %v3058_v21 = vpop.f32.mrf.mxu0 }
 0xa3f   : > { %9408 = vpow2.f32 %v7208_v22  ;;  %v7771_v50 = vpop.f32.mrf.mxu1  ;;  %v9642_v22 = vld [vmem:[%s15548_s4 + $0x1f0] sm:$0xff] }
 0xa40   : > { %v3059_v27 = vadd.f32 %v3058_v21, %v2974_v24  ;;  %v7772_v61 = vadd.f32 %v7771_v50, %v7770_v63  ;;  %v9645_v63 = vld [vmem:[%s15548_s4 + $0x168] sm:$0xff]  ;;  %v9649_v24 = vld [vmem:[%s15548_s4 + $0x158] sm:$0xff]  ;;  %v9650_v21 = vld [vmem:[%s15548_s4 + $0x1d0] sm:$0xff] }
 0xa41   : > { %v9651_v50 = vld [vmem:[%s15548_s4 + $0x150] sm:$0xff] }
 0xa42   : > { %v7210_v15 = vmul.f32 -1.442695, %v3059_v27  ;;  %v2979_v18 = vadd.f32 %v7772_v61, %v2894_v35  ;;  %v9652_v35 = vld [vmem:[%s15548_s4 + $0x1c8] sm:$0xff]  ;;  %v9654_v61 = vld [vmem:[%s15548_s4 + $0x1c0] sm:$0xff] }
 0xa43   : > { %v9653_v27 = vld [vmem:[%s15548_s4 + $0x148] sm:$0xff] }
 0xa44   : > { %9410 = vpow2.f32 %v7210_v15  ;;  %v3064_v0 = vadd.f32 %v8738_v29, %v2979_v18  ;;  %v9655_v15 = vld [vmem:[%s15548_s4 + $0x140] sm:$0xff]  ;;  %v9656_v18 = vld [vmem:[%s15548_s4 + $0x1b8] sm:$0xff] }
 0xa46   : > { %v7211_v39 = vmul.f32 -1.442695, %v3064_v0  ;;  %v9657_v0 = vld [vmem:[%s15548_s4 + $0x138] sm:$0xff] }
 0xa48   : > { %9412 = vpow2.f32 %v7211_v39  ;;  %v9658_v39 = vld [vmem:[%s15548_s4 + $0x1b0] sm:$0xff] }
 0xa4a   : > { %v9407_v31 = vpop.eup %9406 }
 0xa4b   : > { %v3080_v43 = vadd.f32 1.0, %v9407_v31  ;;  %v9659_v31 = vld [vmem:[%s15548_s4 + $0x130] sm:$0xff] }
 0xa4c   : > { %v9409_v40 = vpop.eup %9408 }
 0xa4d   : > { %9414 = vrcp.f32 %v3080_v43  ;;  %v3079_v4 = vadd.f32 1.0, %v9409_v40  ;;  %v9660_v43 = vld [vmem:[%s15548_s4 + $0x1a8] sm:$0xff] }
 0xa4e   : > { %v9661_v40 = vld [vmem:[%s15548_s4 + $0x128] sm:$0xff] }
 0xa4f   : > { %9416 = vrcp.f32 %v3079_v4  ;;  %v9662_v4 = vld [vmem:[%s15548_s4 + $0x1a0] sm:$0xff] }
 0xa51   : > { %v9411_v23 = vpop.eup %9410 }
 0xa52   : > { %v3081_v45 = vadd.f32 1.0, %v9411_v23  ;;  %v9663_v23 = vld [vmem:[%s15548_s4 + $0x120] sm:$0xff] }
 0xa54   : > { %9418 = vrcp.f32 %v3081_v45  ;;  %v9664_v45 = vld [vmem:[%s15548_s4 + $0x198] sm:$0xff] }
 0xa55   : > { %v9413_v32 = vpop.eup %9412 }
 0xa56   : > { %v3082_v19 = vadd.f32 1.0, %v9413_v32  ;;  %v9665_v32 = vld [vmem:[%s15548_s4 + $0x118] sm:$0xff] }
 0xa58   : > { %9420 = vrcp.f32 %v3082_v19  ;;  %v9666_v19 = vld [vmem:[%s15548_s4 + $0x190] sm:$0xff] }
 0xa5a   : > { %v12419_v30 = vpop.eup %9414 }
 0xa5b   : > { %v3092_v52 = vmul.f32 %v12419_v30, %v12295_v60 }
 0xa5c   : > { %v12423_v25 = vpop.eup %9416 }
 0xa5d   : > { %3101 = vrot.lane.b32.xlu0 %v3092_v52, %s15679_s20  ;;  %v3091_v36 = vmul.f32 %v12423_v25, %v12311_v16  ;;  %v9667_v52 = vld [vmem:[%s15548_s4 + $0x110] sm:$0xff] }
 0xa5f   : > { %3099 = vrot.lane.b32.xlu1 %v3091_v36, %s15679_s20  ;;  %v9668_v36 = vld [vmem:[%s15548_s4 + $0x188] sm:$0xff] }
 0xa61   : > { %v12429_v42 = vpop.eup %9418 }
 0xa62   : > { %v3093_v44 = vmul.f32 %v12429_v42, %v12333_v5 }
 0xa64   : > { %3103 = vrot.lane.b32.xlu1 %v3093_v44, %s15679_s20  ;;  %v9669_v44 = vld [vmem:[%s15548_s4 + $0x108] sm:$0xff] }
 0xa65   : > { %v12434_v38 = vpop.eup %9420 }
 0xa66   : > { %v3094_v60 = vmul.f32 %v12434_v38, %v12313_v54 }
 0xa68   : > { %3105 = vrot.lane.b32.xlu0 %v3094_v60, %s15679_s20  ;;  %v9670_v60 = vld [vmem:[%s15548_s4 + $0x180] sm:$0xff] }
 0xacf   : > { %v3102_v57 = vpop.permute.xlu0 %3101 }
 0xad0   : > { %v12441_v16 = vsel %vm579_vm2, %v11707_v46, %v3102_v57  ;;  %v9671_v57 = vld [vmem:[%s15548_s4 + $0x100] sm:$0xff] }
 0xad1   : > { %v3100_v62 = vpop.permute.xlu1 %3099  ;;  %8739 = vmatprep.subr.mxu0 %v12441_v16 }
 0xad2   : > { %8740 = vmatpush3.msra.mxu0 %v12441_v16  ;;  %v12447_v5 = vsel %vm579_vm2, %v11715_v13, %v3100_v62  ;;  %v12460_v13 = vld [vmem:[%s15546_s2] sm:$0xff]  ;;  %v12581_v62 = vld [vmem:[%s15548_s4 + $0x358] sm:$0xff] }
 0xad3   : > { %8741 = vmatprep.subr.mxu0 %v12447_v5 }
 0xad4   : > { %8742 = vmatpush3.msra.mxu0 %v12447_v5 }
 0xad5   : > { %8744 = vmatmul.mubr.msk.f32.vlgmr.msra.gmra.mxu0 %vm584_vm1, %v11727_v56 }
 0xad6   : > { %8746 = vmatprep.mubr.msk.f32.mxu0 %vm584_vm1, %v11737_v58  ;;  %v3104_v46 = vpop.permute.xlu1 %3103 }
 0xad7   : > { %v12472_v29 = vsel %vm579_vm2, %v11778_v14, %v3104_v46  ;;  %v9641_v14 = vld [vmem:[%s15548_s4 + $0x178] sm:$0xff] }
 0xad9   : > { %8747 = vmatmul.mubr.msk.f32.gmra.mxu0 %vm584_vm1, %v11753_v41 }
 0xada   : > { %v3106_v54 = vpop.permute.xlu0 %3105  ;;  %8753 = vmatprep.mubr.msk.f32.mxu0 %vm584_vm1, %v12460_v13 }
 0xadb   : > { %v12466_v37 = vsel %vm579_vm2, %v11758_v20, %v3106_v54  ;;  %v9640_v20 = vld [vmem:[%s15548_s4 + $0x1f8] sm:$0xff] }
 0xadc   : > { %8749 = vmatprep.subr.mxu0 %v12466_v37 }
 0xadd   : > { %8750 = vmatpush3.msra.mxu0 %v12466_v37 }
 0xade   : > { %8751 = vmatprep.subr.mxu0 %v12472_v29 }
 0xadf   : > { %8752 = vmatpush3.msra.mxu0 %v12472_v29 }
 0xae0   : > { %8754 = vmatmul.mubr.msk.f32.vlgmr.msra.gmra.mxu0 %vm584_vm1, %v11727_v56  ;;  %7845 = vmatprep.subr.mxu0 %v9640_v20  ;;  %v9643_v56 = vld [vmem:[%s15548_s4 + $0x170] sm:$0xff] }
 0xae1   : > { %8756 = vmatprep.mubr.msk.f32.mxu0 %vm584_vm1, %v11737_v58  ;;  %7846 = vmatpush3.msra.mxu0 %v9641_v14  ;;  %v9644_v58 = vld [vmem:[%s15548_s4 + $0x1e8] sm:$0xff] }
 0xae2   : > { %7847 = vmatprep.subr.mxu0 %v9642_v22 }
 0xae3   : > { %7848 = vmatpush3.msra.mxu0 %v9643_v56 }
 0xae4   : > { %8757 = vmatmul.mubr.msk.f32.gmra.mxu0 %vm584_vm1, %v11753_v41  ;;  %7849 = vmatprep.subr.mxu0 %v9644_v58  ;;  %v9648_v41 = vld [vmem:[%s15548_s4 + $0x1d8] sm:$0xff] }
 0xae5   : > { %7850 = vmatpush3.msra.mxu0 %v9645_v63 }
 0xae6   : > { %7851 = vmatprep.subr.mxu0 %v9646_v3 }
 0xae7   : > { %7852 = vmatpush3.msra.mxu0 %v9647_v12 }
 0xae8   : > { %7853 = vmatprep.subr.mxu0 %v9648_v41 }
 0xae9   : > { %7854 = vmatpush3.msra.mxu0 %v9649_v24 }
 0xaea   : > { %7855 = vmatprep.subr.mxu0 %v9650_v21 }
 0xaeb   : > { %7856 = vmatpush3.msra.mxu0 %v9651_v50 }
 0xaec   : > { %7857 = vmatprep.subr.mxu0 %v9652_v35 }
 0xaed   : > { %7858 = vmatpush3.msra.mxu0 %v9653_v27 }
 0xaee   : > { %7859 = vmatprep.subr.mxu0 %v9654_v61 }
 0xaef   : > { %7860 = vmatpush3.msra.mxu0 %v9655_v15 }
 0xaf0   : > { %7861 = vmatprep.subr.mxu0 %v9656_v18 }
 0xaf1   : > { %7862 = vmatpush3.msra.mxu0 %v9657_v0 }
 0xaf2   : > { %7863 = vmatprep.subr.mxu0 %v9658_v39 }
 0xaf3   : > { %7864 = vmatpush3.msra.mxu0 %v9659_v31 }
 0xaf4   : > { %7865 = vmatprep.subr.mxu0 %v9660_v43 }
 0xaf5   : > { %7866 = vmatpush3.msra.mxu0 %v9661_v40 }
 0xaf6   : > { %7867 = vmatprep.subr.mxu0 %v9662_v4 }
 0xaf7   : > { %7868 = vmatpush3.msra.mxu0 %v9663_v23 }
 0xaf8   : > { %7869 = vmatprep.subr.mxu0 %v9664_v45 }
 0xaf9   : > { %7870 = vmatpush3.msra.mxu0 %v9665_v32 }
 0xafa   : > { %7871 = vmatprep.subr.mxu0 %v9666_v19 }
 0xafb   : > { %7872 = vmatpush3.msra.mxu0 %v9667_v52 }
 0xafc   : > { %7873 = vmatprep.subr.mxu0 %v9668_v36 }
 0xafd   : > { %7874 = vmatpush3.msra.mxu0 %v9669_v44 }
 0xafe   : > { %7875 = vmatprep.subr.mxu0 %v9670_v60 }
 0xaff   : > { %7876 = vmatpush3.msra.mxu0 %v9671_v57 }
 0xb00   : > { %8759 = vmatprep.subr.mxu0 %v12581_v62 }
 0xb95   : > { %v8745_v46 = vpop.f32.mrf.mxu0 }
 0xb97   : > { %v3181_v54 = vpop.f32.mrf.mxu0 }
 0xb98   : > { %3289 = vrot.lane.b32.xlu0 %v3181_v54, %s15680_s21 }
 0xb99   : > { %v8748_v20 = vpop.f32.mrf.mxu0 }
 0xb9b   : > { %v3191_v14 = vpop.f32.mrf.mxu0 }
 0xb9c   : > { %3291 = vrot.lane.b32.xlu0 %v8745_v46, %s15680_s21  ;;  %3305 = vrot.lane.b32.xlu1 %v3191_v14, %s15681_s17 }
 0xba0   : > { %3307 = vrot.lane.b32.xlu1 %v8748_v20, %s15681_s17  ;;  %v8755_v22 = vpop.f32.mrf.mxu0 }
 0xba2   : > { %v3266_v56 = vpop.f32.mrf.mxu0 }
 0xba3   : > { %3293 = vrot.lane.b32.xlu0 %v3266_v56, %s15680_s21 }
 0xba4   : > { %v8758_v58 = vpop.f32.mrf.mxu0 }
 0xba6   : > { %v3276_v63 = vpop.f32.mrf.mxu0 }
 0xba7   : > { %3295 = vrot.lane.b32.xlu0 %v8755_v22, %s15680_s21  ;;  %3309 = vrot.lane.b32.xlu1 %v3276_v63, %s15681_s17 }
 0xbab   : > { %3311 = vrot.lane.b32.xlu1 %v8758_v58, %s15681_s17 }
 0xc0a   : > { %v3290_v3 = vpop.permute.xlu0 %3289 }
 0xc0b   : > { %v3317_v12 = vsel %vm799_vm4, %v12447_v5, %v3290_v3 }
 0xc0e   : > { %v3306_v41 = vpop.permute.xlu1 %3305  ;;  %v3292_v24 = vpop.permute.xlu0 %3291 }
 0xc0f   : > { %v12595_v21 = vsel %vm804_vm3, %v3317_v12, %v3306_v41  ;;  %v3318_v27 = vsel %vm799_vm4, %v12441_v16, %v3292_v24 }
 0xc10   : > { %v3333_v50 = vmul.f32 %v12595_v21, %v10514_v51  ;;  %v3329_v35 = vmul.f32 %v12595_v21, %v10572_v8  ;;  %v3341_v15 = vmul.f32 %v12595_v21, %v10568_v6  ;;  %v3337_v0 = vmul.f32 %v12595_v21, %v10537_v59 }
 0xc11   : > { %v3349_v22 = vmul.f32 %v12595_v21, %v10747_v33  ;;  %v3345_v56 = vmul.f32 %v12595_v21, %v10749_v34  ;;  %v3353_v12 = vmul.f32 %v12595_v21, %v10779_v47 }
 0xc12   : > { %3377 = vrot.lane.b32.xlu1 %v3333_v50, %s15682_s13  ;;  %3361 = vrot.lane.b32.xlu0 %v3329_v35, %s15666_s10  ;;  %v3308_v61 = vpop.permute.xlu1 %3307  ;;  %v15706_v50 = vld [vmem:[#allocation16_spill] sm:$0xff] }
 0xc13   : > { %v12606_v5 = vsel %vm804_vm3, %v3318_v27, %v3308_v61  ;;  %v15707_v27 = vld [vmem:[#allocation15_spill] sm:$0xff] }
 0xc14   : > { %v3342_v18 = vmul.f32 %v12606_v5, %v10739_v28  ;;  %v3338_v16 = vmul.f32 %v12606_v5, %v10718_v17  ;;  %v3334_v32 = vmul.f32 %v12606_v5, %v10570_v7  ;;  %v3330_v52 = vmul.f32 %v12606_v5, %v10557_v2 }
 0xc15   : > { %v3294_v39 = vpop.permute.xlu0 %3293  ;;  %v3350_v14 = vmul.f32 %v12606_v5, %v10792_v53  ;;  %v3354_v3 = vmul.f32 %v12606_v5, %v10794_v55 }
 0xc16   : > { %v9191_v31 = vpack.i.bf16 %v3342_v18, %v3341_v15  ;;  %v9186_v43 = vpack.i.bf16 %v3338_v16, %v3337_v0  ;;  %v3319_v40 = vsel %vm799_vm4, %v12472_v29, %v3294_v39  ;;  %v15708_v15 = vld [vmem:[#allocation19_spill] sm:$0xff]  ;;  %v15709_v0 = vld [vmem:[#allocation17_spill] sm:$0xff]  ;;  %v15710_v39 = vld [vmem:[#allocation18_spill] sm:$0xff] }
 0xc17   : > { %v9211_v58 = vpack.i.bf16 %v3350_v14, %v3349_v22  ;;  %v9674_v14 = vld [vmem:[%s15548_s4 + $0x2f0] sm:$0xff] }
 0xc18   : > { %9192 = vrot.lane.b32.xlu1 %v9191_v31, %s15683_s18  ;;  %9187 = vrot.lane.b32.xlu0 %v9186_v43, %s15684_s26 }
 0xc19   : > { %v3310_v4 = vpop.permute.xlu1 %3309  ;;  %v3296_v23 = vpop.permute.xlu0 %3295 }
 0xc1a   : > { %v12621_v45 = vsel %vm804_vm3, %v3319_v40, %v3310_v4  ;;  %v3320_v29 = vsel %vm799_vm4, %v12466_v37, %v3296_v23  ;;  %v3346_v37 = vmul.f32 %v12606_v5, %v10786_v49  ;;  %v15711_v40 = vld [vmem:[#allocation21_spill] sm:$0xff]  ;;  %v15712_v23 = vld [vmem:[#allocation20_spill] sm:$0xff] }
 0xc1b   : > { %v3335_v19 = vmul.f32 %v12621_v45, %v10574_v9  ;;  %v3331_v36 = vmul.f32 %v12621_v45, %v10576_v10  ;;  %v3339_v41 = vmul.f32 %v12621_v45, %v10737_v26  ;;  %v3343_v24 = vmul.f32 %v12621_v45, %v10783_v48 }
 0xc1c   : > { %v9206_v63 = vpack.i.bf16 %v3346_v37, %v3345_v56  ;;  %v3347_v16 = vmul.f32 %v12621_v45, %v15709_v0  ;;  %v3351_v31 = vmul.f32 %v12621_v45, %v15710_v39 }
 0xc1d   : > { %v3312_v44 = vpop.permute.xlu1 %3311  ;;  %v9201_v60 = vpack.i.bf16 %v3335_v19, %v3334_v32  ;;  %v9196_v57 = vpack.i.bf16 %v3331_v36, %v3330_v52  ;;  %v3355_v32 = vmul.f32 %v12621_v45, %v15712_v23  ;;  %v15713_v19 = vld [vmem:[#allocation22_spill] sm:$0xff]  ;;  %v15714_v36 = vld [vmem:[#allocation23_spill] sm:$0xff] }
 0xc1e   : > { %v12634_v46 = vsel %vm804_vm3, %v3320_v29, %v3312_v44  ;;  %v3325_v29 = vmul.f32 %v12595_v21, %v15714_v36  ;;  %v9675_v21 = vld [vmem:[%s15548_s4 + $0x270] sm:$0xff] }
 0xc1f   : > { %9202 = vrot.lane.b32.xlu1 %v9201_v60, %s15682_s13  ;;  %9197 = vrot.lane.b32.xlu0 %v9196_v57, %s15666_s10  ;;  %v3336_v54 = vmul.f32 %v12634_v46, %v10700_v1  ;;  %v3332_v20 = vmul.f32 %v12634_v46, %v10578_v11  ;;  %v3344_v35 = vmul.f32 %v12634_v46, %v15706_v50 }
 0xc20   : > { %v3340_v61 = vmul.f32 %v12634_v46, %v15707_v27  ;;  %v3348_v18 = vmul.f32 %v12634_v46, %v15708_v15  ;;  %v3352_v4 = vmul.f32 %v12634_v46, %v15711_v40  ;;  %v3356_v52 = vmul.f32 %v12634_v46, %v15713_v19 }
 0xc22   : > { %v9216_v43 = vpack.i.bf16 %v3348_v18, %v3347_v16  ;;  %v9679_v18 = vld [vmem:[%s15548_s4 + $0x260] sm:$0xff]  ;;  %v9680_v16 = vld [vmem:[%s15548_s4 + $0x2d8] sm:$0xff] }
 0xc23   : > { %3383 = vrot.lane.b32.xlu1 %v3336_v54, %s15682_s13  ;;  %3367 = vrot.lane.b32.xlu0 %v3332_v20, %s15666_s10  ;;  %v9673_v20 = vld [vmem:[%s15548_s4 + $0x278] sm:$0xff] }
 0xc27   : > { %9212 = vrot.lane.b32.xlu1 %v9211_v58, %s15685_s12  ;;  %9207 = vrot.lane.b32.xlu0 %v9206_v63, %s15686_s0  ;;  %v9676_v63 = vld [vmem:[%s15548_s4 + $0x2e8] sm:$0xff] }
 0xc2b   : > { %3459 = vrot.lane.b32.xlu1 %v3354_v3, %s15687_s19  ;;  %3457 = vrot.lane.b32.xlu0 %v3353_v12, %s15687_s19 }
 0xc2f   : > { %3397 = vrot.lane.b32.xlu1 %v3339_v41, %s15684_s26  ;;  %3413 = vrot.lane.b32.xlu0 %v3343_v24, %s15683_s18  ;;  %v9677_v41 = vld [vmem:[%s15548_s4 + $0x268] sm:$0xff]  ;;  %v9678_v24 = vld [vmem:[%s15548_s4 + $0x2e0] sm:$0xff] }
 0xc33   : > { %3415 = vrot.lane.b32.xlu1 %v3344_v35, %s15683_s18  ;;  %3399 = vrot.lane.b32.xlu0 %v3340_v61, %s15684_s26 }
 0xc37   : > { %3445 = vrot.lane.b32.xlu1 %v3351_v31, %s15685_s12  ;;  %9217 = vrot.lane.b32.xlu0 %v9216_v43, %s15686_s0  ;;  %v9681_v43 = vld [vmem:[%s15548_s4 + $0x258] sm:$0xff] }
 0xc3b   : > { %3447 = vrot.lane.b32.xlu1 %v3352_v4, %s15685_s12  ;;  %3461 = vrot.lane.b32.xlu0 %v3355_v32, %s15687_s19  ;;  %v9682_v4 = vld [vmem:[%s15548_s4 + $0x2d0] sm:$0xff] }
 0xc3f   : > { %3463 = vrot.lane.b32.xlu0 %v3356_v52, %s15687_s19 }
 0xc84   : > { %v3362_v44 = vpop.permute.xlu0 %3361  ;;  %v3378_v60 = vpop.permute.xlu1 %3377 }
 0xc85   : > { %v3469_v57 = vsel %vm1085_vm6, %v3325_v29, %v3362_v44  ;;  %v3473_v54 = vsel %vm1090_vm5, %v3362_v44, %v3378_v60  ;;  %v9683_v29 = vld [vmem:[%s15548_s4 + $0x250] sm:$0xff] }
 0xc86   : > { %3569 = vmatprep.mubr.f32.mxu1 %v3473_v54 }
 0xc87   : > { %3570 = vmatmul.mubr.f32.vlgmr.msra.gmra.mxu1 %v3469_v57  ;;  %v15715_v57 = vld [vmem:[#allocation25_spill] sm:$0xff] }
 0xc88   : > { %7890 = vmatpush3.msra.mxu1 %v9673_v20  ;;  %v3326_v54 = vmul.f32 %v12606_v5, %v15715_v57  ;;  %v9684_v20 = vld [vmem:[%s15548_s4 + $0x350] sm:$0xff] }
 0xc89   : > { %7891 = vmatprep.subr.mxu1 %v9674_v14 }
 0xc8a   : > { %7892 = vmatpush3.msra.mxu1 %v9675_v21  ;;  %v9188_v37 = vpop.permute.xlu0 %9187  ;;  %v12702_v22 = vpop.permute.xlu1 %9192 }
 0xc8b   : > { %v9190_v56 = vunpack.i.h.bf16 %v9188_v37  ;;  %v9189_v58 = vunpack.i.l.bf16 %v9188_v37  ;;  %7893 = vmatprep.subr.mxu1 %v9676_v63  ;;  %v9195_v3 = vunpack.i.h.bf16 %v12702_v22  ;;  %v9194_v12 = vunpack.i.l.bf16 %v12702_v22  ;;  %v9686_v37 = vld [vmem:[%s15548_s4 + $0x248] sm:$0xff] }
 0xc8c   : > { %7894 = vmatpush3.msra.mxu1 %v9677_v41  ;;  %v9687_v41 = vld [vmem:[%s15548_s4 + $0x2c0] sm:$0xff] }
 0xc8d   : > { %7895 = vmatprep.subr.mxu1 %v9678_v24  ;;  %v3481_v35 = vsel %vm1100_vm7, %v9189_v58, %v9194_v12  ;;  %v3477_v61 = vsel %vm1095_vm8, %v3378_v60, %v9189_v58  ;;  %v3482_v31 = vsel %vm1100_vm7, %v9190_v56, %v9195_v3 }
 0xc8e   : > { %7896 = vmatpush3.msra.mxu1 %v9679_v18  ;;  %3654 = vmatprep.mubr.f32.mxu0 %v3481_v35 }
 0xc8f   : > { %7897 = vmatprep.subr.mxu1 %v9680_v16  ;;  %3655 = vmatmul.mubr.f32.vlgmr.msra.gmra.mxu0 %v3477_v61  ;;  %v9688_v61 = vld [vmem:[%s15548_s4 + $0x240] sm:$0xff]  ;;  %v9690_v16 = vld [vmem:[%s15548_s4 + $0x238] sm:$0xff] }
 0xc90   : > { %7898 = vmatpush3.msra.mxu1 %v9681_v43  ;;  %3659 = vmatprep.mubr.f32.mxu0 %v3482_v31  ;;  %v15716_v31 = vld [vmem:[#allocation24_spill] sm:$0xff] }
 0xc91   : > { %7899 = vmatprep.subr.mxu1 %v9682_v4  ;;  %v9198_v32 = vpop.permute.xlu0 %9197  ;;  %v12734_v52 = vpop.permute.xlu1 %9202  ;;  %8760 = vmatpush3.msra.mxu0 %v12581_v62  ;;  %v9685_v62 = vld [vmem:[%s15548_s4 + $0x2c8] sm:$0xff]  ;;  %v3327_v43 = vmul.f32 %v12621_v45, %v15716_v31  ;;  %v9691_v4 = vld [vmem:[%s15548_s4 + $0x2b0] sm:$0xff] }
 0xc92   : > { %7900 = vmatpush3.msra.mxu1 %v9683_v29  ;;  %v9199_v44 = vunpack.i.l.bf16 %v9198_v32  ;;  %v9204_v60 = vunpack.i.l.bf16 %v12734_v52  ;;  %8761 = vmatprep.subr.mxu0 %v9684_v20  ;;  %v9200_v14 = vunpack.i.h.bf16 %v9198_v32  ;;  %v9205_v21 = vunpack.i.h.bf16 %v12734_v52  ;;  %v9692_v32 = vld [vmem:[%s15548_s4 + $0x348] sm:$0xff] }
 0xc93   : > { %7901 = vmatprep.subr.mxu1 %v9685_v62  ;;  %8762 = vmatpush3.msra.mxu0 %v9684_v20  ;;  %v9694_v62 = vld [vmem:[%s15548_s4 + $0x2a8] sm:$0xff] }
 0xc94   : > { %7902 = vmatpush3.msra.mxu1 %v9686_v37  ;;  %v3474_v5 = vsel %vm1090_vm5, %v9199_v44, %v9204_v60  ;;  %v3478_v58 = vsel %vm1095_vm8, %v9204_v60, %v9190_v56  ;;  %v3470_v63 = vsel %vm1085_vm6, %v3326_v54, %v9199_v44  ;;  %v9689_v56 = vld [vmem:[%s15548_s4 + $0x2b8] sm:$0xff]  ;;  %v3475_v18 = vsel %vm1090_vm5, %v9200_v14, %v9205_v21  ;;  %v9693_v60 = vld [vmem:[%s15548_s4 + $0x230] sm:$0xff]  ;;  %v9695_v37 = vld [vmem:[%s15548_s4 + $0x228] sm:$0xff] }
 0xc95   : > { %7903 = vmatprep.subr.mxu1 %v9687_v41  ;;  %v3368_v24 = vpop.permute.xlu0 %3367  ;;  %v12759_v35 = vpop.permute.xlu1 %3383  ;;  %3574 = vmatprep.mubr.f32.mxu1 %v3474_v5  ;;  %v3471_v20 = vsel %vm1085_vm6, %v3327_v43, %v9200_v14  ;;  %v9696_v5 = vld [vmem:[%s15548_s4 + $0x340] sm:$0xff]  ;;  %v9699_v43 = vld [vmem:[%s15548_s4 + $0x298] sm:$0xff] }
 0xc96   : > { %7904 = vmatpush3.msra.mxu1 %v9688_v61  ;;  %3660 = vmatmul.mubr.f32.gmra.mxu0 %v3478_v58  ;;  %v3476_v58 = vsel %vm1090_vm5, %v3368_v24, %v12759_v35  ;;  %v9697_v14 = vld [vmem:[%s15548_s4 + $0x2a0] sm:$0xff] }
 0xc97   : > { %7905 = vmatprep.subr.mxu1 %v9689_v56  ;;  %3575 = vmatmul.mubr.f32.gmra.mxu1 %v3470_v63  ;;  %v9698_v56 = vld [vmem:[%s15548_s4 + $0x220] sm:$0xff] }
 0xc98   : > { %7906 = vmatpush3.msra.mxu1 %v9690_v16  ;;  %3579 = vmatprep.mubr.f32.mxu1 %v3475_v18  ;;  %v15717_v18 = vld [vmem:[#allocation26_spill] sm:$0xff] }
 0xc99   : > { %7907 = vmatprep.subr.mxu1 %v9691_v4  ;;  %8763 = vmatprep.subr.mxu0 %v9692_v32  ;;  %v12781_v29 = vpop.permute.xlu0 %9207  ;;  %v12783_v44 = vpop.permute.xlu1 %9212  ;;  %v3328_v16 = vmul.f32 %v12634_v46, %v15717_v18  ;;  %v9700_v4 = vld [vmem:[%s15548_s4 + $0x338] sm:$0xff] }
 0xc9a   : > { %7908 = vmatpush3.msra.mxu1 %v9693_v60  ;;  %v9209_v45 = vunpack.i.l.bf16 %v12781_v29  ;;  %v9214_v54 = vunpack.i.l.bf16 %v12783_v44  ;;  %8764 = vmatpush3.msra.mxu0 %v9692_v32  ;;  %v9701_v32 = vld [vmem:[%s15548_s4 + $0x218] sm:$0xff] }
 0xc9b   : > { %7909 = vmatprep.subr.mxu1 %v9694_v62  ;;  %3580 = vmatmul.mubr.f32.gmra.mxu1 %v3471_v20  ;;  %v3472_v60 = vsel %vm1085_vm6, %v3328_v16, %v3368_v24  ;;  %v9703_v24 = vld [vmem:[%s15548_s4 + $0x330] sm:$0xff] }
 0xc9c   : > { %7910 = vmatpush3.msra.mxu1 %v9695_v37  ;;  %8765 = vmatprep.subr.mxu0 %v9696_v5  ;;  %v3489_v61 = vsel %vm1110_vm9, %v9209_v45, %v9214_v54  ;;  %v9702_v54 = vld [vmem:[%s15548_s4 + $0x290] sm:$0xff]  ;;  %v9210_v37 = vunpack.i.h.bf16 %v12781_v29 }
 0xc9d   : > { %7911 = vmatprep.subr.mxu1 %v9697_v14  ;;  %3584 = vmatprep.mubr.f32.mxu1 %v3476_v58  ;;  %v12805_v63 = vpop.permute.xlu0 %3457  ;;  %v12807_v41 = vpop.permute.xlu1 %3459  ;;  %v9704_v58 = vld [vmem:[%s15548_s4 + $0x210] sm:$0xff]  ;;  %v9705_v14 = vld [vmem:[%s15548_s4 + $0x288] sm:$0xff] }
 0xc9e   : > { %7912 = vmatpush3.msra.mxu1 %v9698_v56  ;;  %8766 = vmatpush3.msra.mxu0 %v9696_v5  ;;  %v3493_v46 = vsel %vm1115_vm10, %v3489_v61, %v12805_v63  ;;  %v9215_v5 = vunpack.i.h.bf16 %v12783_v44  ;;  %v9706_v44 = vld [vmem:[%s15548_s4 + $0x328] sm:$0xff] }
 0xc9f   : > { %7913 = vmatprep.subr.mxu1 %v9699_v43  ;;  %8767 = vmatprep.subr.mxu0 %v9700_v4  ;;  %v9707_v56 = vld [vmem:[%s15548_s4 + $0x208] sm:$0xff] }
 0xca0   : > { %7914 = vmatpush3.msra.mxu1 %v9701_v32  ;;  %8768 = vmatpush3.msra.mxu0 %v9700_v4  ;;  %v9708_v4 = vld [vmem:[%s15548_s4 + $0x280] sm:$0xff] }
 0xca1   : > { %3585 = vmatmul.mubr.f32.gmra.mxu1 %v3472_v60  ;;  %7915 = vmatprep.subr.mxu1 %v9702_v54  ;;  %v12832_v20 = vpop.permute.xlu0 %3413  ;;  %v3398_v62 = vpop.permute.xlu1 %3397  ;;  %v9709_v32 = vld [vmem:[%s15548_s4 + $0x320] sm:$0xff] }
 0xca2   : > { %8769 = vmatprep.subr.mxu0 %v9703_v24  ;;  %7916 = vmatpush3.msra.mxu1 %v9704_v58  ;;  %v3483_v61 = vsel %vm1100_vm7, %v3398_v62, %v12832_v20  ;;  %v3479_v60 = vsel %vm1095_vm8, %v9205_v21, %v3398_v62  ;;  %v9710_v54 = vld [vmem:[%s15548_s4 + $0x200] sm:$0xff]  ;;  %v9711_v21 = vld [vmem:[%s15548_s4 + $0x318] sm:$0xff] }
 0xca3   : > { %3739 = vmatprep.mubr.f32.mxu1 %v3493_v46  ;;  %8770 = vmatpush3.msra.mxu0 %v9703_v24  ;;  %v3490_v46 = vsel %vm1110_vm9, %v9210_v37, %v9215_v5  ;;  %v3485_v24 = vsel %vm1105_vm11, %v9194_v12, %v9209_v45  ;;  %v9712_v45 = vld [vmem:[%s15548_s4 + $0x310] sm:$0xff] }
 0xca4   : > { %7917 = vmatprep.subr.mxu1 %v9705_v14  ;;  %8771 = vmatprep.subr.mxu0 %v9706_v44  ;;  %v3494_v62 = vsel %vm1115_vm10, %v3490_v46, %v12807_v41  ;;  %v3486_v14 = vsel %vm1105_vm11, %v9195_v3, %v9210_v37  ;;  %v9714_v3 = vld [vmem:[%s15548_s4 + $0x300] sm:$0xff] }
 0xca5   : > { %7918 = vmatpush3.msra.mxu1 %v9707_v56  ;;  %8772 = vmatpush3.msra.mxu0 %v9706_v44  ;;  %v3400_v16 = vpop.permute.xlu0 %3399  ;;  %v3416_v43 = vpop.permute.xlu1 %3415 }
 0xca6   : > { %7919 = vmatprep.subr.mxu1 %v9708_v4  ;;  %8773 = vmatprep.subr.mxu0 %v9709_v32  ;;  %v3484_v52 = vsel %vm1100_vm7, %v3400_v16, %v3416_v43  ;;  %v3480_v12 = vsel %vm1095_vm8, %v12759_v35, %v3400_v16  ;;  %v9713_v35 = vld [vmem:[%s15548_s4 + $0x308] sm:$0xff] }
 0xca7   : > { %3664 = vmatprep.mubr.f32.mxu0 %v3483_v61  ;;  %7920 = vmatpush3.msra.mxu1 %v9710_v54 }
 0xca8   : > { %8774 = vmatpush3.msra.mxu0 %v9709_v32  ;;  %3740 = vmatmul.mubr.f32.vlgmr.msra.gmra.mxu1 %v3485_v24 }
 0xca9   : > { %3665 = vmatmul.mubr.f32.gmra.mxu0 %v3479_v60  ;;  %8775 = vmatprep.subr.mxu0 %v9711_v21  ;;  %v9218_v5 = vpop.permute.xlu0 %9217  ;;  %v3446_v58 = vpop.permute.xlu1 %3445 }
 0xcaa   : > { %3744 = vmatprep.mubr.f32.mxu1 %v3494_v62  ;;  %8776 = vmatpush3.msra.mxu0 %v9711_v21  ;;  %v9219_v29 = vunpack.i.l.bf16 %v9218_v5  ;;  %v9220_v16 = vunpack.i.h.bf16 %v9218_v5 }
 0xcab   : > { %8777 = vmatprep.subr.mxu0 %v9712_v45  ;;  %3669 = vmatprep.mubr.f32.mxu0 %v3484_v52 }
 0xcac   : > { %8778 = vmatpush3.msra.mxu0 %v9712_v45  ;;  %3745 = vmatmul.mubr.f32.gmra.mxu1 %v3486_v14  ;;  %v3491_v44 = vsel %vm1110_vm9, %v9219_v29, %v3446_v58  ;;  %v3487_v37 = vsel %vm1105_vm11, %v12832_v20, %v9219_v29  ;;  %v3488_v60 = vsel %vm1105_vm11, %v3416_v43, %v9220_v16 }
 0xcad   : > { %3670 = vmatmul.mubr.f32.gmra.mxu0 %v3480_v12  ;;  %8779 = vmatprep.subr.mxu0 %v9713_v35  ;;  %v3462_v61 = vpop.permute.xlu0 %3461  ;;  %v3448_v56 = vpop.permute.xlu1 %3447 }
 0xcae   : > { %8780 = vmatpush3.msra.mxu0 %v9713_v35  ;;  %8783 = vmatprep.mubr.msk.f32.mxu0 %vm1120_vm12, %v12805_v63  ;;  %v3495_v22 = vsel %vm1115_vm10, %v3491_v44, %v3462_v61  ;;  %v3492_v63 = vsel %vm1110_vm9, %v9220_v16, %v3448_v56 }
 0xcaf   : > { %8781 = vmatprep.subr.mxu0 %v9714_v3  ;;  %3749 = vmatprep.mubr.f32.mxu1 %v3495_v22 }
 0xcb0   : > { %8782 = vmatpush3.msra.mxu0 %v9714_v3  ;;  %3750 = vmatmul.mubr.f32.gmra.mxu1 %v3487_v37 }
 0xcb1   : > { %8784 = vmatmul.mubr.msk.f32.vlgmr.msra.gmra.mxu0 %vm1120_vm12, %v12807_v41  ;;  %v3464_v4 = vpop.permute.xlu0 %3463 }
 0xcb2   : > { %8786 = vmatprep.mubr.msk.f32.mxu0 %vm1120_vm12, %v3462_v61  ;;  %v3496_v32 = vsel %vm1115_vm10, %v3492_v63, %v3464_v4 }
 0xcb3   : > { %3754 = vmatprep.mubr.f32.mxu1 %v3496_v32 }
 0xcb4   : > { %3755 = vmatmul.mubr.f32.gmra.mxu1 %v3488_v60 }
 0xcb5   : > { %8787 = vmatmul.mubr.msk.f32.gmra.mxu0 %vm1120_vm12, %v3464_v4  ;;  %8803 = vmatprep.mubr.msk.f32.mxu1 %vm584_vm1, %v12460_v13  ;;  %v9716_v4 = vld [vmem:[%s15550_s6] sm:$0xff] }
 0xcb6   : > { %8793 = vmatprep.mubr.msk.f32.mxu0 %vm584_vm1, %v12460_v13  ;;  %v9715_v13 = vld [vmem:[%s15550_s6 + $0x8] sm:$0xff] }
 0xd47   : > { %v7833_v41 = vpop.f32.mrf.mxu1 }
 0xd49   : > { %v7834_v20 = vpop.f32.mrf.mxu1 }
 0xd4a   : > { %v7835_v44 = vadd.f32 %v7834_v20, %v7833_v41 }
 0xd4c   : > { %v3572_v32 = vadd.f32 %v9716_v4, %v7835_v44 }
 0xd4f   : > { %v7877_v52 = vpop.f32.mrf.mxu0 }
 0xd51   : > { %v7878_v62 = vpop.f32.mrf.mxu0 }
 0xd52   : > { %v7879_v22 = vadd.f32 %v7878_v62, %v7877_v52  ;;  %v9717_v52 = vld [vmem:[%s15550_s6 + $0x10] sm:$0xff] }
 0xd54   : > { %v3657_v31 = vadd.f32 %v7879_v22, %v3572_v32 }
 0xd56   : > { %v7880_v58 = vpop.f32.mrf.mxu0 }
 0xd57   : > { %v7836_v46 = vpop.f32.mrf.mxu1 }
 0xd58   : > { %v7881_v12 = vpop.f32.mrf.mxu0 }
 0xd59   : > { %v7837_v54 = vpop.f32.mrf.mxu1  ;;  %v7882_v3 = vadd.f32 %v7881_v12, %v7880_v58 }
 0xd5a   : > { %v7838_v29 = vadd.f32 %v7837_v54, %v7836_v46 }
 0xd5b   : > { %v7839_v24 = vpop.f32.mrf.mxu1 }
 0xd5c   : > { %v3577_v61 = vadd.f32 %v9715_v13, %v7838_v29 }
 0xd5d   : > { %v7840_v21 = vpop.f32.mrf.mxu1 }
 0xd5e   : > { %v7841_v37 = vadd.f32 %v7840_v21, %v7839_v24  ;;  %v3662_v18 = vadd.f32 %v7882_v3, %v3577_v61  ;;  %v9718_v61 = vld [vmem:[%s15550_s6 + $0x18] sm:$0xff] }
 0xd60   : > { %v3582_v62 = vadd.f32 %v9717_v52, %v7841_v37  ;;  %v3853_v52 = vsub.f32 1.0, %v12423_v25 }
 0xd61   : > { %v7842_v5 = vpop.f32.mrf.mxu1 }
 0xd63   : > { %v7843_v43 = vpop.f32.mrf.mxu1 }
 0xd64   : > { %v7844_v24 = vadd.f32 %v7843_v43, %v7842_v5 }
 0xd66   : > { %v3587_v22 = vadd.f32 %v9718_v61, %v7844_v24 }
 0xd68   : > { %v7921_v45 = vpop.f32.mrf.mxu1 }
 0xd69   : > { %v7883_v14 = vpop.f32.mrf.mxu0 }
 0xd6a   : > { %v7922_v35 = vpop.f32.mrf.mxu1 }
 0xd6b   : > { %v7884_v56 = vpop.f32.mrf.mxu0  ;;  %v7923_v60 = vadd.f32 %v7922_v35, %v7921_v45 }
 0xd6c   : > { %v7924_v16 = vpop.f32.mrf.mxu1  ;;  %v7885_v41 = vadd.f32 %v7884_v56, %v7883_v14 }
 0xd6d   : > { %v7886_v63 = vpop.f32.mrf.mxu0  ;;  %v3742_v12 = vadd.f32 %v7923_v60, %v3657_v31 }
 0xd6e   : > { %v7925_v46 = vpop.f32.mrf.mxu1  ;;  %v3667_v13 = vadd.f32 %v7885_v41, %v3582_v62  ;;  %v15718_v62 = vld [vmem:[#allocation28_spill] sm:$0xff] }
 0xd6f   : > { %v7887_v20 = vpop.f32.mrf.mxu0  ;;  %v7926_v54 = vadd.f32 %v7925_v46, %v7924_v16  ;;  %v3850_v24 = vmul.f32 %v12419_v30, %v15718_v62  ;;  %v9723_v62 = vld [vmem:[%s15547_s3 + $0xf0] sm:$0xff] }
 0xd70   : > { %v7927_v57 = vpop.f32.mrf.mxu1  ;;  %v7888_v44 = vadd.f32 %v7887_v20, %v7886_v63  ;;  %v3854_v20 = vsub.f32 1.0, %v12419_v30  ;;  %v15723_v30 = vld [vmem:[#allocation31_spill] sm:$0xff] }
 0xd71   : > { %v3747_v21 = vadd.f32 %v7926_v54, %v3662_v18  ;;  %v8785_v58 = vpop.f32.mrf.mxu0 }
 0xd72   : > { %v7928_v29 = vpop.f32.mrf.mxu1  ;;  %v3672_v5 = vadd.f32 %v7888_v44, %v3587_v22 }
 0xd73   : > { %v3832_v45 = vadd.f32 %v8785_v58, %v3747_v21  ;;  %v3826_v35 = vpop.f32.mrf.mxu0  ;;  %v7929_v14 = vadd.f32 %v7928_v29, %v7927_v57 }
 0xd74   : > { %v3827_v56 = vadd.f32 %v3826_v35, %v3742_v12  ;;  %v7930_v16 = vpop.f32.mrf.mxu1  ;;  %v15719_v12 = vld [vmem:[#allocation29_spill] sm:$0xff]  ;;  %v3855_v35 = vsub.f32 1.0, %v12429_v42 }
 0xd75   : > { %9422 = vtanh.f32 %v3832_v45  ;;  %v8788_v3 = vpop.f32.mrf.mxu0  ;;  %v3752_v37 = vadd.f32 %v7929_v14, %v3667_v13  ;;  %v3849_v29 = vmul.f32 %v12423_v25, %v15719_v12 }
 0xd76   : > { %9424 = vtanh.f32 %v3827_v56  ;;  %v7931_v18 = vpop.f32.mrf.mxu1  ;;  %v3851_v56 = vmul.f32 %v12429_v42, %v15723_v30  ;;  %v12953_v42 = vld [vmem:[%s10360_s23 + $0x48] sm:$0xff]  ;;  %v9730_v30 = vld [vmem:[%s15547_s3 + $0xd8] sm:$0xff] }
 0xd77   : > { %v3836_v31 = vpop.f32.mrf.mxu0  ;;  %v7932_v43 = vadd.f32 %v7931_v18, %v7930_v16  ;;  %v3856_v16 = vsub.f32 1.0, %v12434_v38 }
 0xd78   : > { %v3837_v4 = vadd.f32 %v3836_v31, %v3752_v37 }
 0xd79   : > { %v3757_v63 = vadd.f32 %v7932_v43, %v3672_v5  ;;  %v12956_v43 = vld [vmem:[%s10360_s23 + $0x40] sm:$0xff] }
 0xd7a   : > { %9426 = vtanh.f32 %v3837_v4 }
 0xd7b   : > { %v3842_v32 = vadd.f32 %v8788_v3, %v3757_v63  ;;  %v15725_v3 = vld [vmem:[#allocation30_spill] sm:$0xff] }
 0xd7c   : > { %v3852_v37 = vmul.f32 %v12434_v38, %v15725_v3  ;;  %v9735_v3 = vld [vmem:[%s15547_s3 + $0x50] sm:$0xff] }
 0xd7d   : > { %9428 = vtanh.f32 %v3842_v32  ;;  %v12973_v32 = vld [vmem:[%s15546_s2 + $0x8] sm:$0xff] }
 0xd82   : > { %v9423_v57 = vpop.eup %9422 }
 0xd83   : > { %v9425_v60 = vpop.eup %9424  ;;  %3863 = vrot.lane.b32.xlu1 %v9423_v57, %s15693_s30  ;;  %v12978_v57 = vld [vmem:[%s10360_s23 + $0x58] sm:$0xff] }
 0xd84   : > { %3861 = vrot.lane.b32.xlu0 %v9425_v60, %s15693_s30  ;;  %v9720_v60 = vld [vmem:[%s15547_s3 + $0xf8] sm:$0xff] }
 0xd87   : > { %v9427_v46 = vpop.eup %9426 }
 0xd88   : > { %3865 = vrot.lane.b32.xlu0 %v9427_v46, %s15693_s30  ;;  %v12986_v46 = vld [vmem:[%s15546_s2 + $0x10] sm:$0xff] }
 0xd8a   : > { %v9429_v41 = vpop.eup %9428 }
 0xd8b   : > { %3867 = vrot.lane.b32.xlu1 %v9429_v41, %s15693_s30  ;;  %v9722_v41 = vld [vmem:[%s15547_s3 + $0x78] sm:$0xff] }
 0xdf5   : > { %v3864_v54 = vpop.permute.xlu1 %3863 }
 0xdf6   : > { %v3874_v21 = vmul.f32 %v3864_v54, %v3854_v20  ;;  %v3862_v58 = vpop.permute.xlu0 %3861 }
 0xdf7   : > { %v3873_v13 = vmul.f32 %v3862_v58, %v3853_v52  ;;  %v12994_v52 = vld [vmem:[%s10360_s23 + $0x50] sm:$0xff]  ;;  %v13009_v58 = vld [vmem:[%s15546_s2 + $0x18] sm:$0xff] }
 0xdf8   : > { %v12930_v44 = vadd.f32 %v3874_v21, %v3850_v24  ;;  %v9724_v21 = vld [vmem:[%s15547_s3 + $0x70] sm:$0xff] }
 0xdf9   : > { %v12932_v45 = vadd.f32 %v3873_v13, %v3849_v29  ;;  %v9726_v29 = vld [vmem:[%s15547_s3 + $0xe8] sm:$0xff] }
 0xdfa   : > { %15720 = vst [vmem:[#allocation27_spill] sm:$0xff] %v12930_v44  ;;  %3909 = vrot.lane.b32.xlu1 %v12930_v44, %s15722_s29  ;;  %v3866_v14 = vpop.permute.xlu0 %3865  ;;  %v9727_v13 = vld [vmem:[%s15547_s3 + $0x68] sm:$0xff] }
 0xdfb   : > { %15721 = vst [vmem:[#allocation28_spill] sm:$0xff] %v12932_v45  ;;  %3907 = vrot.lane.b32.xlu0 %v12932_v45, %s15722_s29  ;;  %v3875_v25 = vmul.f32 %v3866_v14, %v3855_v35  ;;  %v9728_v35 = vld [vmem:[%s15547_s3 + $0xe0] sm:$0xff] }
 0xdfc   : > { %v9729_v14 = vld [vmem:[%s15547_s3 + $0x60] sm:$0xff] }
 0xdfd   : > { %v12942_v61 = vadd.f32 %v3875_v25, %v3851_v56  ;;  %v3868_v22 = vpop.permute.xlu1 %3867  ;;  %v9731_v56 = vld [vmem:[%s15547_s3 + $0x58] sm:$0xff] }
 0xdfe   : > { %v3876_v18 = vmul.f32 %v3868_v22, %v3856_v16  ;;  %v9732_v25 = vld [vmem:[%s15547_s3 + $0x1f8] sm:$0xff]  ;;  %v9733_v16 = vld [vmem:[%s15547_s3 + $0xd0] sm:$0xff] }
 0xdff   : > { %15724 = vst [vmem:[#allocation29_spill] sm:$0xff] %v12942_v61  ;;  %3911 = vrot.lane.b32.xlu0 %v12942_v61, %s15722_s29  ;;  %v9734_v22 = vld [vmem:[%s15547_s3 + $0x178] sm:$0xff] }
 0xe00   : > { %v12948_v5 = vadd.f32 %v3876_v18, %v3852_v37  ;;  %v9736_v37 = vld [vmem:[%s15547_s3 + $0x1f0] sm:$0xff]  ;;  %v9737_v18 = vld [vmem:[%s15547_s3 + $0xc8] sm:$0xff] }
 0xe02   : > { %15726 = vst [vmem:[#allocation31_spill] sm:$0xff] %v12948_v5  ;;  %3913 = vrot.lane.b32.xlu1 %v12948_v5, %s15722_s29 }
 0xe6c   : > { %v3910_v31 = vpop.permute.xlu1 %3909 }
 0xe6d   : > { %v3908_v4 = vpop.permute.xlu0 %3907  ;;  %v12960_v63 = vsel %vm579_vm2, %v12953_v42, %v3910_v31  ;;  %v9738_v31 = vld [vmem:[%s15547_s3 + $0x170] sm:$0xff] }
 0xe6e   : > { %8789 = vmatprep.subr.mxu0 %v12960_v63  ;;  %v12966_v38 = vsel %vm579_vm2, %v12956_v43, %v3908_v4  ;;  %v9739_v4 = vld [vmem:[%s15547_s3 + $0x48] sm:$0xff] }
 0xe6f   : > { %8790 = vmatpush3.msra.mxu0 %v12960_v63 }
 0xe70   : > { %8791 = vmatprep.subr.mxu0 %v12966_v38 }
 0xe71   : > { %8792 = vmatpush3.msra.mxu0 %v12966_v38  ;;  %v3912_v20 = vpop.permute.xlu0 %3911 }
 0xe72   : > { %8794 = vmatmul.mubr.msk.f32.vlgmr.msra.gmra.mxu0 %vm584_vm1, %v12973_v32  ;;  %7961 = vmatprep.subr.mxu0 %v9720_v60  ;;  %v13017_v12 = vsel %vm579_vm2, %v12994_v52, %v3912_v20  ;;  %v9740_v60 = vld [vmem:[%s15547_s3 + $0x1e8] sm:$0xff] }
 0xe73   : > { %8796 = vmatprep.mubr.msk.f32.mxu0 %vm584_vm1, %v12986_v46  ;;  %7962 = vmatpush3.msra.mxu0 %v9722_v41  ;;  %v9741_v41 = vld [vmem:[%s15547_s3 + $0xc0] sm:$0xff]  ;;  %v9742_v20 = vld [vmem:[%s15547_s3 + $0x168] sm:$0xff] }
 0xe74   : > { %v3914_v54 = vpop.permute.xlu1 %3913  ;;  %7963 = vmatprep.subr.mxu0 %v9723_v62  ;;  %v9744_v62 = vld [vmem:[%s15547_s3 + $0x1e0] sm:$0xff] }
 0xe75   : > { %v13001_v24 = vsel %vm579_vm2, %v12978_v57, %v3914_v54  ;;  %7964 = vmatpush3.msra.mxu0 %v9724_v21  ;;  %v9743_v54 = vld [vmem:[%s15547_s3 + $0x40] sm:$0xff]  ;;  %v9745_v21 = vld [vmem:[%s15547_s3 + $0xb8] sm:$0xff] }
 0xe76   : > { %8797 = vmatmul.mubr.msk.f32.gmra.mxu0 %vm584_vm1, %v13009_v58  ;;  %8799 = vmatprep.subr.mxu1 %v13001_v24 }
 0xe77   : > { %8800 = vmatpush3.msra.mxu1 %v13001_v24  ;;  %7965 = vmatprep.subr.mxu0 %v9726_v29  ;;  %v9746_v29 = vld [vmem:[%s15547_s3 + $0x160] sm:$0xff] }
 0xe78   : > { %8801 = vmatprep.subr.mxu1 %v13017_v12  ;;  %7966 = vmatpush3.msra.mxu0 %v9727_v13  ;;  %v9747_v13 = vld [vmem:[%s15547_s3 + $0x38] sm:$0xff] }
 0xe79   : > { %8802 = vmatpush3.msra.mxu1 %v13017_v12  ;;  %7967 = vmatprep.subr.mxu0 %v9728_v35  ;;  %v9748_v35 = vld [vmem:[%s15547_s3 + $0x1d8] sm:$0xff] }
 0xe7a   : > { %8804 = vmatmul.mubr.msk.f32.vlgmr.msra.gmra.mxu1 %vm584_vm1, %v12973_v32  ;;  %7968 = vmatpush3.msra.mxu0 %v9729_v14  ;;  %v9749_v14 = vld [vmem:[%s15547_s3 + $0xb0] sm:$0xff] }
 0xe7b   : > { %8806 = vmatprep.mubr.msk.f32.mxu1 %vm584_vm1, %v12986_v46  ;;  %7969 = vmatprep.subr.mxu0 %v9730_v30  ;;  %v9750_v30 = vld [vmem:[%s15547_s3 + $0x158] sm:$0xff] }
 0xe7c   : > { %7970 = vmatpush3.msra.mxu0 %v9731_v56  ;;  %8005 = vmatprep.subr.mxu1 %v9732_v25  ;;  %v9751_v56 = vld [vmem:[%s15547_s3 + $0x30] sm:$0xff] }
 0xe7d   : > { %7971 = vmatprep.subr.mxu0 %v9733_v16  ;;  %8006 = vmatpush3.msra.mxu1 %v9734_v22  ;;  %v9752_v25 = vld [vmem:[%s15547_s3 + $0x1d0] sm:$0xff]  ;;  %v9753_v16 = vld [vmem:[%s15547_s3 + $0xa8] sm:$0xff] }
 0xe7e   : > { %8807 = vmatmul.mubr.msk.f32.gmra.mxu1 %vm584_vm1, %v13009_v58  ;;  %7972 = vmatpush3.msra.mxu0 %v9735_v3  ;;  %v9754_v22 = vld [vmem:[%s15547_s3 + $0x150] sm:$0xff]  ;;  %v9755_v3 = vld [vmem:[%s15547_s3 + $0x28] sm:$0xff] }
 0xe7f   : > { %8007 = vmatprep.subr.mxu1 %v9736_v37  ;;  %7973 = vmatprep.subr.mxu0 %v9737_v18  ;;  %v9756_v37 = vld [vmem:[%s15547_s3 + $0x1c8] sm:$0xff]  ;;  %v9757_v18 = vld [vmem:[%s15547_s3 + $0xa0] sm:$0xff] }
 0xe80   : > { %8008 = vmatpush3.msra.mxu1 %v9738_v31  ;;  %7974 = vmatpush3.msra.mxu0 %v9739_v4  ;;  %v9758_v31 = vld [vmem:[%s15547_s3 + $0x148] sm:$0xff]  ;;  %v9759_v4 = vld [vmem:[%s15547_s3 + $0x20] sm:$0xff] }
 0xe81   : > { %8009 = vmatprep.subr.mxu1 %v9740_v60  ;;  %7975 = vmatprep.subr.mxu0 %v9741_v41  ;;  %v9760_v60 = vld [vmem:[%s15547_s3 + $0x1c0] sm:$0xff]  ;;  %v9761_v41 = vld [vmem:[%s15547_s3 + $0x98] sm:$0xff] }
 0xe82   : > { %8010 = vmatpush3.msra.mxu1 %v9742_v20  ;;  %7976 = vmatpush3.msra.mxu0 %v9743_v54  ;;  %v9762_v20 = vld [vmem:[%s15547_s3 + $0x140] sm:$0xff]  ;;  %v9763_v54 = vld [vmem:[%s15547_s3 + $0x18] sm:$0xff] }
 0xe83   : > { %8011 = vmatprep.subr.mxu1 %v9744_v62  ;;  %7977 = vmatprep.subr.mxu0 %v9745_v21  ;;  %v9764_v62 = vld [vmem:[%s15547_s3 + $0x1b8] sm:$0xff]  ;;  %v9765_v21 = vld [vmem:[%s15547_s3 + $0x90] sm:$0xff] }
 0xe84   : > { %8012 = vmatpush3.msra.mxu1 %v9746_v29  ;;  %7978 = vmatpush3.msra.mxu0 %v9747_v13  ;;  %v9766_v29 = vld [vmem:[%s15547_s3 + $0x138] sm:$0xff]  ;;  %v9767_v13 = vld [vmem:[%s15547_s3 + $0x10] sm:$0xff] }
 0xe85   : > { %8013 = vmatprep.subr.mxu1 %v9748_v35  ;;  %7979 = vmatprep.subr.mxu0 %v9749_v14  ;;  %v9768_v35 = vld [vmem:[%s15547_s3 + $0x1b0] sm:$0xff]  ;;  %v9769_v14 = vld [vmem:[%s15547_s3 + $0x88] sm:$0xff] }
 0xe86   : > { %8014 = vmatpush3.msra.mxu1 %v9750_v30  ;;  %7980 = vmatpush3.msra.mxu0 %v9751_v56  ;;  %v9770_v30 = vld [vmem:[%s15547_s3 + $0x130] sm:$0xff]  ;;  %v9771_v56 = vld [vmem:[%s15547_s3 + $0x8] sm:$0xff] }
 0xe87   : > { %8015 = vmatprep.subr.mxu1 %v9752_v25  ;;  %7981 = vmatprep.subr.mxu0 %v9753_v16  ;;  %v9772_v25 = vld [vmem:[%s15547_s3 + $0x1a8] sm:$0xff]  ;;  %v9773_v16 = vld [vmem:[%s15547_s3 + $0x80] sm:$0xff] }
 0xe88   : > { %8016 = vmatpush3.msra.mxu1 %v9754_v22  ;;  %7982 = vmatpush3.msra.mxu0 %v9755_v3  ;;  %v9774_v22 = vld [vmem:[%s15547_s3 + $0x128] sm:$0xff]  ;;  %v9775_v3 = vld [vmem:[%s15547_s3] sm:$0xff] }
 0xe89   : > { %8017 = vmatprep.subr.mxu1 %v9756_v37  ;;  %7983 = vmatprep.subr.mxu0 %v9757_v18  ;;  %v9776_v37 = vld [vmem:[%s15547_s3 + $0x1a0] sm:$0xff]  ;;  %v9777_v18 = vld [vmem:[%s15547_s3 + $0x2f8] sm:$0xff] }
 0xe8a   : > { %8018 = vmatpush3.msra.mxu1 %v9758_v31  ;;  %7984 = vmatpush3.msra.mxu0 %v9759_v4  ;;  %v9778_v31 = vld [vmem:[%s15547_s3 + $0x120] sm:$0xff]  ;;  %v9779_v4 = vld [vmem:[%s15547_s3 + $0x198] sm:$0xff] }
 0xe8b   : > { %8019 = vmatprep.subr.mxu1 %v9760_v60  ;;  %7985 = vmatprep.subr.mxu0 %v9761_v41  ;;  %v9780_v60 = vld [vmem:[%s15547_s3 + $0x118] sm:$0xff]  ;;  %v9781_v41 = vld [vmem:[%s15547_s3 + $0x190] sm:$0xff] }
 0xe8c   : > { %8020 = vmatpush3.msra.mxu1 %v9762_v20  ;;  %7986 = vmatpush3.msra.mxu0 %v9763_v54  ;;  %v9782_v20 = vld [vmem:[%s15547_s3 + $0x110] sm:$0xff]  ;;  %v9783_v54 = vld [vmem:[%s15547_s3 + $0x188] sm:$0xff] }
 0xe8d   : > { %8021 = vmatprep.subr.mxu1 %v9764_v62  ;;  %7987 = vmatprep.subr.mxu0 %v9765_v21  ;;  %v9784_v62 = vld [vmem:[%s15547_s3 + $0x108] sm:$0xff]  ;;  %v9785_v21 = vld [vmem:[%s15547_s3 + $0x180] sm:$0xff] }
 0xe8e   : > { %8022 = vmatpush3.msra.mxu1 %v9766_v29  ;;  %7988 = vmatpush3.msra.mxu0 %v9767_v13  ;;  %v9786_v29 = vld [vmem:[%s15547_s3 + $0x100] sm:$0xff]  ;;  %v13213_v13 = vld [vmem:[%s15547_s3 + $0x358] sm:$0xff] }
 0xe8f   : > { %8023 = vmatprep.subr.mxu1 %v9768_v35  ;;  %7989 = vmatprep.subr.mxu0 %v9769_v14 }
 0xe90   : > { %8024 = vmatpush3.msra.mxu1 %v9770_v30  ;;  %7990 = vmatpush3.msra.mxu0 %v9771_v56 }
 0xe91   : > { %8025 = vmatprep.subr.mxu1 %v9772_v25  ;;  %7991 = vmatprep.subr.mxu0 %v9773_v16 }
 0xe92   : > { %8026 = vmatpush3.msra.mxu1 %v9774_v22  ;;  %7992 = vmatpush3.msra.mxu0 %v9775_v3 }
 0xe93   : > { %8027 = vmatprep.subr.mxu1 %v9776_v37  ;;  %8049 = vmatprep.subr.mxu0 %v9777_v18 }
 0xe94   : > { %8028 = vmatpush3.msra.mxu1 %v9778_v31 }
 0xe95   : > { %8029 = vmatprep.subr.mxu1 %v9779_v4 }
 0xe96   : > { %8030 = vmatpush3.msra.mxu1 %v9780_v60 }
 0xe97   : > { %8031 = vmatprep.subr.mxu1 %v9781_v41 }
 0xe98   : > { %8032 = vmatpush3.msra.mxu1 %v9782_v20 }
 0xe99   : > { %8033 = vmatprep.subr.mxu1 %v9783_v54 }
 0xe9a   : > { %8034 = vmatpush3.msra.mxu1 %v9784_v62 }
 0xe9b   : > { %8035 = vmatprep.subr.mxu1 %v9785_v21 }
 0xe9c   : > { %8036 = vmatpush3.msra.mxu1 %v9786_v29 }
 0xe9d   : > { %8809 = vmatprep.subr.mxu1 %v13213_v13 }
 0xf32   : > { %v8795_v35 = vpop.f32.mrf.mxu0 }
 0xf34   : > { %v3989_v14 = vpop.f32.mrf.mxu0 }
 0xf35   : > { %4097 = vrot.lane.b32.xlu1 %v3989_v14, %s15680_s21 }
 0xf36   : > { %v8798_v30 = vpop.f32.mrf.mxu0 }
 0xf38   : > { %v3999_v56 = vpop.f32.mrf.mxu0 }
 0xf39   : > { %4099 = vrot.lane.b32.xlu1 %v8795_v35, %s15680_s21  ;;  %4113 = vrot.lane.b32.xlu0 %v3999_v56, %s15681_s17 }
 0xf3a   : > { %v8805_v25 = vpop.f32.mrf.mxu1 }
 0xf3c   : > { %v4074_v16 = vpop.f32.mrf.mxu1 }
 0xf3d   : > { %4115 = vrot.lane.b32.xlu0 %v8798_v30, %s15681_s17  ;;  %4101 = vrot.lane.b32.xlu1 %v4074_v16, %s15680_s21 }
 0xf3e   : > { %v8808_v22 = vpop.f32.mrf.mxu1 }
 0xf40   : > { %v4084_v3 = vpop.f32.mrf.mxu1 }
 0xf41   : > { %4103 = vrot.lane.b32.xlu1 %v8805_v25, %s15680_s21  ;;  %4117 = vrot.lane.b32.xlu0 %v4084_v3, %s15681_s17 }
 0xf45   : > { %4119 = vrot.lane.b32.xlu0 %v8808_v22, %s15681_s17 }
 0xfa7   : > { %v4098_v37 = vpop.permute.xlu1 %4097 }
 0xfa8   : > { %v4125_v18 = vsel %vm799_vm4, %v12966_v38, %v4098_v37 }
 0xfab   : > { %v4100_v31 = vpop.permute.xlu1 %4099  ;;  %v4114_v4 = vpop.permute.xlu0 %4113 }
 0xfac   : > { %v13227_v60 = vsel %vm804_vm3, %v4125_v18, %v4114_v4  ;;  %v4126_v54 = vsel %vm799_vm4, %v12960_v63, %v4100_v31 }
 0xfad   : > { %v4141_v41 = vmul.f32 %v13227_v60, %v10514_v51  ;;  %v4137_v20 = vmul.f32 %v13227_v60, %v10572_v8  ;;  %v4149_v29 = vmul.f32 %v13227_v60, %v10568_v6  ;;  %v4145_v14 = vmul.f32 %v13227_v60, %v10537_v59 }
 0xfaf   : > { %4185 = vrot.lane.b32.xlu0 %v4141_v41, %s15682_s13  ;;  %4169 = vrot.lane.b32.xlu1 %v4137_v20, %s15666_s10  ;;  %v4116_v62 = vpop.permute.xlu0 %4115  ;;  %v4102_v38 = vpop.permute.xlu1 %4101 }
 0xfb0   : > { %v13238_v21 = vsel %vm804_vm3, %v4126_v54, %v4116_v62  ;;  %v4127_v30 = vsel %vm799_vm4, %v13017_v12, %v4102_v38 }
 0xfb1   : > { %v4150_v35 = vmul.f32 %v13238_v21, %v10739_v28  ;;  %v4146_v63 = vmul.f32 %v13238_v21, %v10718_v17  ;;  %v4142_v37 = vmul.f32 %v13238_v21, %v10570_v7  ;;  %v4138_v12 = vmul.f32 %v13238_v21, %v10557_v2 }
 0xfb3   : > { %v9226_v56 = vpack.i.bf16 %v4150_v35, %v4149_v29  ;;  %v9221_v25 = vpack.i.bf16 %v4146_v63, %v4145_v14  ;;  %v4118_v16 = vpop.permute.xlu0 %4117  ;;  %v4104_v22 = vpop.permute.xlu1 %4103  ;;  %v4158_v35 = vmul.f32 %v13238_v21, %v10792_v53  ;;  %v4157_v14 = vmul.f32 %v13227_v60, %v10747_v33 }
 0xfb4   : > { %v13251_v3 = vsel %vm804_vm3, %v4127_v30, %v4118_v16  ;;  %v4128_v4 = vsel %vm799_vm4, %v13001_v24, %v4104_v22  ;;  %v4154_v24 = vmul.f32 %v13238_v21, %v10786_v49  ;;  %v4153_v63 = vmul.f32 %v13227_v60, %v10749_v34 }
 0xfb5   : > { %9227 = vrot.lane.b32.xlu0 %v9226_v56, %s15683_s18  ;;  %9222 = vrot.lane.b32.xlu1 %v9221_v25, %s15684_s26  ;;  %v4143_v18 = vmul.f32 %v13251_v3, %v10574_v9  ;;  %v4139_v31 = vmul.f32 %v13251_v3, %v10576_v10  ;;  %v9246_v30 = vpack.i.bf16 %v4158_v35, %v4157_v14 }
 0xfb6   : > { %v9241_v56 = vpack.i.bf16 %v4154_v24, %v4153_v63  ;;  %v4162_v25 = vmul.f32 %v13238_v21, %v10794_v55  ;;  %v4161_v16 = vmul.f32 %v13227_v60, %v10779_v47  ;;  %v4147_v22 = vmul.f32 %v13251_v3, %v10737_v26 }
 0xfb7   : > { %v4120_v41 = vpop.permute.xlu0 %4119  ;;  %v9236_v20 = vpack.i.bf16 %v4143_v18, %v4142_v37  ;;  %v9231_v54 = vpack.i.bf16 %v4139_v31, %v4138_v12  ;;  %v4151_v37 = vmul.f32 %v13251_v3, %v10783_v48  ;;  %v4133_v35 = vmul.f32 %v13227_v60, %v15714_v36  ;;  %v9790_v60 = vld [vmem:[%s15547_s3 + $0x270] sm:$0xff] }
 0xfb8   : > { %v13266_v62 = vsel %vm804_vm3, %v4128_v4, %v4120_v41  ;;  %v4155_v4 = vmul.f32 %v13251_v3, %v15709_v0  ;;  %v4159_v41 = vmul.f32 %v13251_v3, %v15710_v39 }
 0xfb9   : > { %9237 = vrot.lane.b32.xlu0 %v9236_v20, %s15682_s13  ;;  %9232 = vrot.lane.b32.xlu1 %v9231_v54, %s15666_s10  ;;  %v4144_v38 = vmul.f32 %v13266_v62, %v10700_v1  ;;  %v4140_v29 = vmul.f32 %v13266_v62, %v10578_v11  ;;  %v4152_v18 = vmul.f32 %v13266_v62, %v15706_v50 }
 0xfba   : > { %v4148_v12 = vmul.f32 %v13266_v62, %v15707_v27  ;;  %v4156_v31 = vmul.f32 %v13266_v62, %v15708_v15  ;;  %v4160_v54 = vmul.f32 %v13266_v62, %v15711_v40 }
 0xfbc   : > { %v9251_v20 = vpack.i.bf16 %v4156_v31, %v4155_v4 }
 0xfbd   : > { %4191 = vrot.lane.b32.xlu0 %v4144_v38, %s15682_s13  ;;  %4175 = vrot.lane.b32.xlu1 %v4140_v29, %s15666_s10  ;;  %v4163_v38 = vmul.f32 %v13251_v3, %v15712_v23  ;;  %v4164_v29 = vmul.f32 %v13266_v62, %v15713_v19 }
 0xfc1   : > { %9247 = vrot.lane.b32.xlu0 %v9246_v30, %s15685_s12  ;;  %9242 = vrot.lane.b32.xlu1 %v9241_v56, %s15686_s0  ;;  %v9788_v56 = vld [vmem:[%s15547_s3 + $0x278] sm:$0xff] }
 0xfc5   : > { %4267 = vrot.lane.b32.xlu0 %v4162_v25, %s15687_s19  ;;  %4265 = vrot.lane.b32.xlu1 %v4161_v16, %s15687_s19  ;;  %v9789_v25 = vld [vmem:[%s15547_s3 + $0x2f0] sm:$0xff] }
 0xfc9   : > { %4205 = vrot.lane.b32.xlu0 %v4147_v22, %s15684_s26  ;;  %4221 = vrot.lane.b32.xlu1 %v4151_v37, %s15683_s18 }
 0xfcd   : > { %4223 = vrot.lane.b32.xlu0 %v4152_v18, %s15683_s18  ;;  %4207 = vrot.lane.b32.xlu1 %v4148_v12, %s15684_s26  ;;  %v9791_v12 = vld [vmem:[%s15547_s3 + $0x2e8] sm:$0xff] }
 0xfd1   : > { %4253 = vrot.lane.b32.xlu0 %v4159_v41, %s15685_s12  ;;  %9252 = vrot.lane.b32.xlu1 %v9251_v20, %s15686_s0  ;;  %v9792_v41 = vld [vmem:[%s15547_s3 + $0x268] sm:$0xff]  ;;  %v9793_v20 = vld [vmem:[%s15547_s3 + $0x2e0] sm:$0xff] }
 0xfd5   : > { %4255 = vrot.lane.b32.xlu0 %v4160_v54, %s15685_s12  ;;  %4269 = vrot.lane.b32.xlu1 %v4163_v38, %s15687_s19 }
 0xfd9   : > { %3887 = vrot.lane.b32.xlu0 %v12930_v44, %s15727_s15  ;;  %4271 = vrot.lane.b32.xlu1 %v4164_v29, %s15687_s19  ;;  %v9794_v29 = vld [vmem:[%s15547_s3 + $0x260] sm:$0xff] }
 0xfdd   : > { %3891 = vrot.lane.b32.xlu0 %v12948_v5, %s15727_s15  ;;  %3885 = vrot.lane.b32.xlu1 %v12932_v45, %s15727_s15 }
 0xfe1   : > { %3889 = vrot.lane.b32.xlu1 %v12942_v61, %s15727_s15 }
0x1021   : > { %v4170_v24 = vpop.permute.xlu1 %4169  ;;  %v4186_v14 = vpop.permute.xlu0 %4185 }
0x1022   : > { %v4277_v63 = vsel %vm1085_vm6, %v4133_v35, %v4170_v24  ;;  %v4281_v30 = vsel %vm1090_vm5, %v4170_v24, %v4186_v14 }
0x1023   : > { %4377 = vmatprep.mubr.f32.mxu0 %v4281_v30 }
0x1024   : > { %4378 = vmatmul.mubr.f32.vlgmr.msra.gmra.mxu0 %v4277_v63  ;;  %v9795_v63 = vld [vmem:[%s15547_s3 + $0x2d8] sm:$0xff] }
0x1025   : > { %8050 = vmatpush3.msra.mxu0 %v9788_v56 }
0x1026   : > { %8051 = vmatprep.subr.mxu0 %v9789_v25  ;;  %v9796_v25 = vld [vmem:[%s15547_s3 + $0x258] sm:$0xff] }
0x1027   : > { %8052 = vmatpush3.msra.mxu0 %v9790_v60  ;;  %v9223_v16 = vpop.permute.xlu1 %9222  ;;  %v13342_v22 = vpop.permute.xlu0 %9227  ;;  %v15728_v60 = vld [vmem:[#allocation25_spill] sm:$0xff] }
0x1028   : > { %v9225_v37 = vunpack.i.h.bf16 %v9223_v16  ;;  %v9224_v18 = vunpack.i.l.bf16 %v9223_v16  ;;  %8053 = vmatprep.subr.mxu0 %v9791_v12  ;;  %v15618_v31 = vunpack.i.h.bf16 %v13342_v22  ;;  %v15619_v4 = vunpack.i.l.bf16 %v13342_v22 }
0x1029   : > { %8054 = vmatpush3.msra.mxu0 %v9792_v41  ;;  %v4134_v16 = vmul.f32 %v13238_v21, %v15728_v60  ;;  %v9865_v60 = vld [vmem:[%s15549_s5] sm:$0xff] }
0x102a   : > { %8055 = vmatprep.subr.mxu0 %v9793_v20  ;;  %v4289_v54 = vsel %vm1100_vm7, %v9224_v18, %v15619_v4  ;;  %v4285_v38 = vsel %vm1095_vm8, %v4186_v14, %v9224_v18  ;;  %v4290_v30 = vsel %vm1100_vm7, %v9225_v37, %v15618_v31  ;;  %v9797_v18 = vld [vmem:[%s15547_s3 + $0x2d0] sm:$0xff] }
0x102b   : > { %8056 = vmatpush3.msra.mxu0 %v9794_v29  ;;  %4462 = vmatprep.mubr.f32.mxu1 %v4289_v54  ;;  %v9233_v35 = vpop.permute.xlu1 %9232  ;;  %v13362_v24 = vpop.permute.xlu0 %9237 }
0x102c   : > { %8057 = vmatprep.subr.mxu0 %v9795_v63  ;;  %4463 = vmatmul.mubr.f32.vlgmr.msra.gmra.mxu1 %v4285_v38  ;;  %v9234_v14 = vunpack.i.l.bf16 %v9233_v35  ;;  %v9239_v56 = vunpack.i.l.bf16 %v13362_v24  ;;  %v9235_v12 = vunpack.i.h.bf16 %v9233_v35  ;;  %v9240_v41 = vunpack.i.h.bf16 %v13362_v24  ;;  %v9798_v38 = vld [vmem:[%s15547_s3 + $0x250] sm:$0xff]  ;;  %v9799_v63 = vld [vmem:[%s15547_s3 + $0x2c8] sm:$0xff]  ;;  %v9826_v24 = vld [vmem:[%s15547_s3 + $0x318] sm:$0xff] }
0x102d   : > { %8058 = vmatpush3.msra.mxu0 %v9796_v25  ;;  %4467 = vmatprep.mubr.f32.mxu1 %v4290_v30  ;;  %v9802_v30 = vld [vmem:[%s15547_s3 + $0x2c0] sm:$0xff] }
0x102e   : > { %8059 = vmatprep.subr.mxu0 %v9797_v18  ;;  %v4282_v20 = vsel %vm1090_vm5, %v9234_v14, %v9239_v56  ;;  %v4286_v54 = vsel %vm1095_vm8, %v9239_v56, %v9225_v37  ;;  %8810 = vmatpush3.msra.mxu1 %v13213_v13  ;;  %v4278_v35 = vsel %vm1085_vm6, %v4134_v16, %v9234_v14  ;;  %v9800_v13 = vld [vmem:[%s15547_s3 + $0x248] sm:$0xff]  ;;  %v9801_v37 = vld [vmem:[%s15547_s3 + $0x350] sm:$0xff]  ;;  %v9803_v56 = vld [vmem:[%s15547_s3 + $0x240] sm:$0xff] }
0x102f   : > { %8060 = vmatpush3.msra.mxu0 %v9798_v38  ;;  %v13386_v21 = vpop.permute.xlu1 %4175  ;;  %v13388_v29 = vpop.permute.xlu0 %4191  ;;  %4382 = vmatprep.mubr.f32.mxu0 %v4282_v20  ;;  %v4283_v14 = vsel %vm1090_vm5, %v9235_v12, %v9240_v41  ;;  %v9804_v18 = vld [vmem:[%s15547_s3 + $0x2b8] sm:$0xff] }
0x1030   : > { %8061 = vmatprep.subr.mxu0 %v9799_v63  ;;  %4468 = vmatmul.mubr.f32.gmra.mxu1 %v4286_v54  ;;  %v9805_v38 = vld [vmem:[%s15547_s3 + $0x238] sm:$0xff]  ;;  %v15729_v63 = vld [vmem:[#allocation24_spill] sm:$0xff] }
0x1031   : > { %8062 = vmatpush3.msra.mxu0 %v9800_v13  ;;  %8811 = vmatprep.subr.mxu1 %v9801_v37  ;;  %v4135_v13 = vmul.f32 %v13251_v3, %v15729_v63 }
0x1032   : > { %8063 = vmatprep.subr.mxu0 %v9802_v30  ;;  %4383 = vmatmul.mubr.f32.gmra.mxu0 %v4278_v35  ;;  %v9806_v35 = vld [vmem:[%s15547_s3 + $0x348] sm:$0xff]  ;;  %v9808_v30 = vld [vmem:[%s15547_s3 + $0x230] sm:$0xff] }
0x1033   : > { %8064 = vmatpush3.msra.mxu0 %v9803_v56  ;;  %4387 = vmatprep.mubr.f32.mxu0 %v4283_v14  ;;  %v13409_v25 = vpop.permute.xlu1 %9242  ;;  %v13411_v16 = vpop.permute.xlu0 %9247  ;;  %v4279_v14 = vsel %vm1085_vm6, %v4135_v13, %v9235_v12  ;;  %v9809_v56 = vld [vmem:[%s15547_s3 + $0x340] sm:$0xff]  ;;  %v9811_v13 = vld [vmem:[%s15547_s3 + $0x228] sm:$0xff] }
0x1034   : > { %8065 = vmatprep.subr.mxu0 %v9804_v18  ;;  %8812 = vmatpush3.msra.mxu1 %v9801_v37  ;;  %v15620_v20 = vunpack.i.l.bf16 %v13409_v25  ;;  %v9249_v54 = vunpack.i.l.bf16 %v13411_v16  ;;  %v9807_v37 = vld [vmem:[%s15547_s3 + $0x2b0] sm:$0xff]  ;;  %v9245_v31 = vunpack.i.h.bf16 %v13409_v25 }
0x1035   : > { %8066 = vmatpush3.msra.mxu0 %v9805_v38  ;;  %8813 = vmatprep.subr.mxu1 %v9806_v35  ;;  %v9810_v38 = vld [vmem:[%s15547_s3 + $0x2a8] sm:$0xff] }
0x1036   : > { %8067 = vmatprep.subr.mxu0 %v9807_v37  ;;  %8814 = vmatpush3.msra.mxu1 %v9806_v35  ;;  %v4284_v35 = vsel %vm1090_vm5, %v13386_v21, %v13388_v29  ;;  %v4297_v12 = vsel %vm1110_vm9, %v15620_v20, %v9249_v54  ;;  %v9812_v37 = vld [vmem:[%s15547_s3 + $0x2a0] sm:$0xff]  ;;  %v9814_v54 = vld [vmem:[%s15547_s3 + $0x338] sm:$0xff] }
0x1037   : > { %8068 = vmatpush3.msra.mxu0 %v9808_v30  ;;  %8815 = vmatprep.subr.mxu1 %v9809_v56  ;;  %v13436_v18 = vpop.permute.xlu1 %4265  ;;  %v13438_v3 = vpop.permute.xlu0 %4267  ;;  %v15730_v30 = vld [vmem:[#allocation26_spill] sm:$0xff] }
0x1038   : > { %8069 = vmatprep.subr.mxu0 %v9810_v38  ;;  %4388 = vmatmul.mubr.f32.gmra.mxu0 %v4279_v14  ;;  %v4136_v14 = vmul.f32 %v13266_v62, %v15730_v30  ;;  %v9813_v38 = vld [vmem:[%s15547_s3 + $0x220] sm:$0xff]  ;;  %v9815_v62 = vld [vmem:[%s15547_s3 + $0x298] sm:$0xff] }
0x1039   : > { %8070 = vmatpush3.msra.mxu0 %v9811_v13  ;;  %4392 = vmatprep.mubr.f32.mxu0 %v4284_v35  ;;  %v4301_v35 = vsel %vm1115_vm10, %v4297_v12, %v13436_v18  ;;  %v9817_v12 = vld [vmem:[%s15547_s3 + $0x218] sm:$0xff] }
0x103a   : > { %8071 = vmatprep.subr.mxu0 %v9812_v37  ;;  %8816 = vmatpush3.msra.mxu1 %v9809_v56  ;;  %v4280_v56 = vsel %vm1085_vm6, %v4136_v14, %v13386_v21  ;;  %v9818_v21 = vld [vmem:[%s15547_s3 + $0x290] sm:$0xff] }
0x103b   : > { %8072 = vmatpush3.msra.mxu0 %v9813_v38  ;;  %8817 = vmatprep.subr.mxu1 %v9814_v54  ;;  %v13465_v13 = vpop.permute.xlu1 %4221  ;;  %v4206_v37 = vpop.permute.xlu0 %4205  ;;  %v9816_v38 = vld [vmem:[%s15547_s3 + $0x330] sm:$0xff] }
0x103c   : > { %8073 = vmatprep.subr.mxu0 %v9815_v62  ;;  %8818 = vmatpush3.msra.mxu1 %v9814_v54  ;;  %v9250_v62 = vunpack.i.h.bf16 %v13411_v16  ;;  %v4291_v16 = vsel %vm1100_vm7, %v4206_v37, %v13465_v13 }
0x103d   : > { %4393 = vmatmul.mubr.f32.gmra.mxu0 %v4280_v56  ;;  %8819 = vmatprep.subr.mxu1 %v9816_v38  ;;  %v9819_v56 = vld [vmem:[%s15547_s3 + $0x210] sm:$0xff] }
0x103e   : > { %8074 = vmatpush3.msra.mxu0 %v9817_v12  ;;  %4547 = vmatprep.mubr.f32.mxu0 %v4301_v35  ;;  %v9820_v35 = vld [vmem:[%s15547_s3 + $0x328] sm:$0xff] }
0x103f   : > { %8075 = vmatprep.subr.mxu0 %v9818_v21  ;;  %8820 = vmatpush3.msra.mxu1 %v9816_v38  ;;  %v4208_v14 = vpop.permute.xlu1 %4207  ;;  %v13483_v54 = vpop.permute.xlu0 %4223  ;;  %v9821_v38 = vld [vmem:[%s15547_s3 + $0x288] sm:$0xff]  ;;  %v9823_v21 = vld [vmem:[%s15547_s3 + $0x320] sm:$0xff] }
0x1040   : > { %8076 = vmatpush3.msra.mxu0 %v9819_v56  ;;  %8821 = vmatprep.subr.mxu1 %v9820_v35  ;;  %v9822_v12 = vld [vmem:[%s15547_s3 + $0x208] sm:$0xff]  ;;  %v4287_v56 = vsel %vm1095_vm8, %v9240_v41, %v4206_v37  ;;  %v15731_v41 = vunpack.i.l.bf16 %v13409_v25  ;;  %v15732_v37 = vunpack.i.l.bf16 %v13342_v22  ;;  %v9827_v25 = vld [vmem:[%s15547_s3 + $0x310] sm:$0xff] }
0x1041   : > { %8077 = vmatprep.subr.mxu0 %v9821_v38  ;;  %8822 = vmatpush3.msra.mxu1 %v9820_v35  ;;  %v9824_v38 = vld [vmem:[%s15547_s3 + $0x280] sm:$0xff]  ;;  %v4298_v35 = vsel %vm1110_vm9, %v9245_v31, %v9250_v62 }
0x1042   : > { %8078 = vmatpush3.msra.mxu0 %v9822_v12  ;;  %8823 = vmatprep.subr.mxu1 %v9823_v21  ;;  %v9825_v12 = vld [vmem:[%s15547_s3 + $0x200] sm:$0xff]  ;;  %v4293_v62 = vsel %vm1105_vm11, %v15732_v37, %v15731_v41 }
0x1043   : > { %4472 = vmatprep.mubr.f32.mxu1 %v4291_v16  ;;  %8079 = vmatprep.subr.mxu0 %v9824_v38  ;;  %v9253_v4 = vpop.permute.xlu1 %9252  ;;  %v4254_v20 = vpop.permute.xlu0 %4253  ;;  %v4292_v16 = vsel %vm1100_vm7, %v4208_v14, %v13483_v54  ;;  %v9829_v37 = vld [vmem:[%s15547_s3 + $0x300] sm:$0xff] }
0x1044   : > { %8824 = vmatpush3.msra.mxu1 %v9823_v21  ;;  %8080 = vmatpush3.msra.mxu0 %v9825_v12  ;;  %v9254_v5 = vunpack.i.l.bf16 %v9253_v4  ;;  %v4302_v21 = vsel %vm1115_vm10, %v4298_v35, %v13438_v3  ;;  %v9828_v35 = vld [vmem:[%s15547_s3 + $0x308] sm:$0xff] }
0x1045   : > { %4473 = vmatmul.mubr.f32.gmra.mxu1 %v4287_v56  ;;  %8825 = vmatprep.subr.mxu1 %v9826_v24  ;;  %v4288_v56 = vsel %vm1095_vm8, %v13388_v29, %v4208_v14  ;;  %v9255_v29 = vunpack.i.h.bf16 %v9253_v4 }
0x1046   : > { %4548 = vmatmul.mubr.f32.vlgmr.msra.gmra.mxu0 %v4293_v62  ;;  %8826 = vmatpush3.msra.mxu1 %v9826_v24  ;;  %v4299_v38 = vsel %vm1110_vm9, %v9254_v5, %v4254_v20  ;;  %v15733_v20 = vunpack.i.h.bf16 %v13342_v22 }
0x1047   : > { %4552 = vmatprep.mubr.f32.mxu0 %v4302_v21  ;;  %8827 = vmatprep.subr.mxu1 %v9827_v25  ;;  %v4270_v12 = vpop.permute.xlu1 %4269  ;;  %v4256_v41 = vpop.permute.xlu0 %4255 }
0x1048   : > { %4477 = vmatprep.mubr.f32.mxu1 %v4292_v16  ;;  %8828 = vmatpush3.msra.mxu1 %v9827_v25  ;;  %v4294_v14 = vsel %vm1105_vm11, %v15733_v20, %v9245_v31  ;;  %v4303_v24 = vsel %vm1115_vm10, %v4299_v38, %v4270_v12  ;;  %v4300_v62 = vsel %vm1110_vm9, %v9255_v29, %v4256_v41  ;;  %v9833_v38 = vld [vmem:[%s15548_s4 + $0x70] sm:$0xff]  ;;  %v13582_v25 = vld [vmem:[%s15546_s2] sm:$0xff]  ;;  %v9836_v41 = vld [vmem:[%s15548_s4 + $0x68] sm:$0xff] }
0x1049   : > { %4478 = vmatmul.mubr.f32.gmra.mxu1 %v4288_v56  ;;  %8829 = vmatprep.subr.mxu1 %v9828_v35  ;;  %v4295_v31 = vsel %vm1105_vm11, %v13465_v13, %v9254_v5  ;;  %v9832_v5 = vld [vmem:[%s15548_s4 + $0xf0] sm:$0xff]  ;;  %v4296_v13 = vsel %vm1105_vm11, %v13483_v54, %v9255_v29  ;;  %v9835_v54 = vld [vmem:[%s15548_s4 + $0xe8] sm:$0xff]  ;;  %v9838_v29 = vld [vmem:[%s15548_s4 + $0x60] sm:$0xff] }
0x104a   : > { %4553 = vmatmul.mubr.f32.gmra.mxu0 %v4294_v14  ;;  %8830 = vmatpush3.msra.mxu1 %v9828_v35  ;;  %v9837_v35 = vld [vmem:[%s15548_s4 + $0xe0] sm:$0xff]  ;;  %v9839_v20 = vld [vmem:[%s15548_s4 + $0xd8] sm:$0xff] }
0x104b   : > { %8833 = vmatprep.mubr.msk.f32.mxu1 %vm1120_vm12, %v13436_v18  ;;  %8831 = vmatprep.subr.mxu1 %v9829_v37  ;;  %v4272_v16 = vpop.permute.xlu1 %4271  ;;  %v13543_v4 = vpop.permute.xlu0 %3887  ;;  %v9830_v18 = vld [vmem:[%s15548_s4 + $0xf8] sm:$0xff] }
0x104c   : > { %8832 = vmatpush3.msra.mxu1 %v9829_v37  ;;  %4557 = vmatprep.mubr.f32.mxu0 %v4303_v24  ;;  %7225 = vst.msk [vmem:[%s10362_s24 + $0x28] sm:$0xff] %vm2311_vm13, %v13543_v4  ;;  %v4304_v22 = vsel %vm1115_vm10, %v4300_v62, %v4272_v16  ;;  %v9840_v14 = vld [vmem:[%s15548_s4 + $0x58] sm:$0xff]  ;;  %v9841_v24 = vld [vmem:[%s15548_s4 + $0xd0] sm:$0xff]  ;;  %v9843_v62 = vld [vmem:[%s15548_s4 + $0xc8] sm:$0xff] }
0x104d   : > { %8834 = vmatmul.mubr.msk.f32.vlgmr.msra.gmra.mxu1 %vm1120_vm12, %v13438_v3  ;;  %8121 = vmatprep.subr.mxu0 %v9830_v18  ;;  %v9831_v3 = vld [vmem:[%s15548_s4 + $0x78] sm:$0xff]  ;;  %v9842_v37 = vld [vmem:[%s15548_s4 + $0x50] sm:$0xff] }
0x104e   : > { %8836 = vmatprep.mubr.msk.f32.mxu1 %vm1120_vm12, %v4270_v12  ;;  %4558 = vmatmul.mubr.f32.gmra.mxu0 %v4295_v31  ;;  %v9846_v31 = vld [vmem:[%s15548_s4 + $0x40] sm:$0xff]  ;;  %v9847_v18 = vld [vmem:[%s15548_s4 + $0xb8] sm:$0xff] }
0x104f   : > { %4562 = vmatprep.mubr.f32.mxu0 %v4304_v22  ;;  %v13557_v21 = vpop.permute.xlu1 %3885  ;;  %v13559_v56 = vpop.permute.xlu0 %3891  ;;  %8122 = vmatpush3.msra.mxu0 %v9831_v3  ;;  %v9845_v22 = vld [vmem:[%s15548_s4 + $0xc0] sm:$0xff]  ;;  %v9848_v3 = vld [vmem:[%s15548_s4 + $0x38] sm:$0xff] }
0x1050   : > { %7224 = vst.msk [vmem:[%s10362_s24 + $0x20] sm:$0xff] %vm2311_vm13, %v13557_v21  ;;  %7227 = vst.msk [vmem:[%s10362_s24 + $0x38] sm:$0xff] %vm2311_vm13, %v13559_v56  ;;  %8123 = vmatprep.subr.mxu0 %v9832_v5  ;;  %v9849_v5 = vld [vmem:[%s15548_s4 + $0xb0] sm:$0xff] }
0x1051   : > { %8837 = vmatmul.mubr.msk.f32.gmra.mxu1 %vm1120_vm12, %v4272_v16  ;;  %8124 = vmatpush3.msra.mxu0 %v9833_v38  ;;  %v9844_v16 = vld [vmem:[%s15548_s4 + $0x48] sm:$0xff] }
0x1052   : > { %4563 = vmatmul.mubr.f32.gmra.mxu0 %v4296_v13  ;;  %8843 = vmatprep.mubr.msk.f32.mxu1 %vm584_vm1, %v13582_v25  ;;  %v9850_v13 = vld [vmem:[%s15548_s4 + $0x30] sm:$0xff]  ;;  %v9851_v38 = vld [vmem:[%s15548_s4 + $0xa8] sm:$0xff] }
0x1053   : > { %v13586_v12 = vpop.permute.xlu1 %3889  ;;  %8125 = vmatprep.subr.mxu0 %v9835_v54  ;;  %v9852_v54 = vld [vmem:[%s15548_s4 + $0x28] sm:$0xff] }
0x1054   : > { %7226 = vst.msk [vmem:[%s10362_s24 + $0x30] sm:$0xff] %vm2311_vm13, %v13586_v12  ;;  %8126 = vmatpush3.msra.mxu0 %v9836_v41  ;;  %v9853_v41 = vld [vmem:[%s15548_s4 + $0xa0] sm:$0xff] }
0x1055   : > { %8127 = vmatprep.subr.mxu0 %v9837_v35  ;;  %v9854_v35 = vld [vmem:[%s15548_s4 + $0x20] sm:$0xff] }
0x1056   : > { %8128 = vmatpush3.msra.mxu0 %v9838_v29  ;;  %v9855_v29 = vld [vmem:[%s15548_s4 + $0x98] sm:$0xff] }
0x1057   : > { %8129 = vmatprep.subr.mxu0 %v9839_v20  ;;  %v9856_v20 = vld [vmem:[%s15548_s4 + $0x18] sm:$0xff] }
0x1058   : > { %8130 = vmatpush3.msra.mxu0 %v9840_v14  ;;  %v9857_v14 = vld [vmem:[%s15548_s4 + $0x90] sm:$0xff] }
0x1059   : > { %8131 = vmatprep.subr.mxu0 %v9841_v24  ;;  %v9858_v24 = vld [vmem:[%s15548_s4 + $0x10] sm:$0xff] }
0x105a   : > { %8132 = vmatpush3.msra.mxu0 %v9842_v37  ;;  %v9859_v37 = vld [vmem:[%s15548_s4 + $0x88] sm:$0xff] }
0x105b   : > { %8133 = vmatprep.subr.mxu0 %v9843_v62  ;;  %v9860_v62 = vld [vmem:[%s15548_s4 + $0x8] sm:$0xff] }
0x105c   : > { %8134 = vmatpush3.msra.mxu0 %v9844_v16  ;;  %v9861_v16 = vld [vmem:[%s15548_s4 + $0x80] sm:$0xff] }
0x105d   : > { %8135 = vmatprep.subr.mxu0 %v9845_v22  ;;  %v9862_v22 = vld [vmem:[%s15548_s4] sm:$0xff] }
0x105e   : > { %8136 = vmatpush3.msra.mxu0 %v9846_v31  ;;  %v9863_v31 = vld [vmem:[%s15548_s4 + $0x2f8] sm:$0xff] }
0x105f   : > { %8137 = vmatprep.subr.mxu0 %v9847_v18 }
0x1060   : > { %8138 = vmatpush3.msra.mxu0 %v9848_v3 }
0x1061   : > { %8139 = vmatprep.subr.mxu0 %v9849_v5 }
0x1062   : > { %8140 = vmatpush3.msra.mxu0 %v9850_v13 }
0x1063   : > { %8141 = vmatprep.subr.mxu0 %v9851_v38 }
0x1064   : > { %8142 = vmatpush3.msra.mxu0 %v9852_v54 }
0x1065   : > { %8143 = vmatprep.subr.mxu0 %v9853_v41 }
0x1066   : > { %8144 = vmatpush3.msra.mxu0 %v9854_v35 }
0x1067   : > { %8145 = vmatprep.subr.mxu0 %v9855_v29 }
0x1068   : > { %8146 = vmatpush3.msra.mxu0 %v9856_v20 }
0x1069   : > { %8147 = vmatprep.subr.mxu0 %v9857_v14 }
0x106a   : > { %8148 = vmatpush3.msra.mxu0 %v9858_v24 }
0x106b   : > { %8149 = vmatprep.subr.mxu0 %v9859_v37 }
0x106c   : > { %8150 = vmatpush3.msra.mxu0 %v9860_v62 }
0x106d   : > { %8151 = vmatprep.subr.mxu0 %v9861_v16 }
0x106e   : > { %8152 = vmatpush3.msra.mxu0 %v9862_v22 }
0x106f   : > { %8209 = vmatprep.subr.mxu0 %v9863_v31  ;;  %v9864_v31 = vld [vmem:[%s15549_s5 + $0x8] sm:$0xff] }
0x10e4   : > { %v7993_v18 = vpop.f32.mrf.mxu0 }
0x10e6   : > { %v7994_v3 = vpop.f32.mrf.mxu0 }
0x10e7   : > { %v7995_v16 = vadd.f32 %v7994_v3, %v7993_v18 }
0x10e9   : > { %v4380_v36 = vadd.f32 %v9865_v60, %v7995_v16 }
0x10ec   : > { %v8037_v54 = vpop.f32.mrf.mxu1 }
0x10ee   : > { %v8038_v35 = vpop.f32.mrf.mxu1 }
0x10ef   : > { %v8039_v44 = vadd.f32 %v8038_v35, %v8037_v54 }
0x10f0   : > { %v8040_v29 = vpop.f32.mrf.mxu1 }
0x10f1   : > { %v4465_v3 = vadd.f32 %v8039_v44, %v4380_v36 }
0x10f2   : > { %v7996_v5 = vpop.f32.mrf.mxu0  ;;  %v8041_v14 = vpop.f32.mrf.mxu1 }
0x10f4   : > { %v7997_v13 = vpop.f32.mrf.mxu0 }
0x10f5   : > { %v7998_v37 = vadd.f32 %v7997_v13, %v7996_v5  ;;  %v8042_v5 = vadd.f32 %v8041_v14, %v8040_v29 }
0x10f7   : > { %v4385_v30 = vadd.f32 %v9864_v31, %v7998_v37  ;;  %v9866_v37 = vld [vmem:[%s15549_s5 + $0x10] sm:$0xff] }
0x10f8   : > { %v7999_v38 = vpop.f32.mrf.mxu0 }
0x10f9   : > { %v4470_v39 = vadd.f32 %v8042_v5, %v4385_v30 }
0x10fa   : > { %v8000_v41 = vpop.f32.mrf.mxu0 }
0x10fb   : > { %v8001_v13 = vadd.f32 %v8000_v41, %v7999_v38 }
0x10fd   : > { %v8002_v20 = vpop.f32.mrf.mxu0  ;;  %v4390_v31 = vadd.f32 %v9866_v37, %v8001_v13 }
0x10ff   : > { %v8003_v24 = vpop.f32.mrf.mxu0 }
0x1100   : > { %v8004_v50 = vadd.f32 %v8003_v24, %v8002_v20 }
0x1105   : > { %v8043_v62 = vpop.f32.mrf.mxu1 }
0x1106   : > { %v8081_v22 = vpop.f32.mrf.mxu0 }
0x1107   : > { %v8044_v61 = vpop.f32.mrf.mxu1 }
0x1108   : > { %v8082_v45 = vpop.f32.mrf.mxu0  ;;  %v8045_v54 = vadd.f32 %v8044_v61, %v8043_v62 }
0x1109   : > { %v8046_v63 = vpop.f32.mrf.mxu1  ;;  %v8083_v19 = vadd.f32 %v8082_v45, %v8081_v22 }
0x110a   : > { %v8084_v23 = vpop.f32.mrf.mxu0  ;;  %v4475_v38 = vadd.f32 %v8045_v54, %v4390_v31 }
0x110b   : > { %v8047_v18 = vpop.f32.mrf.mxu1  ;;  %v4550_v15 = vadd.f32 %v8083_v19, %v4465_v3  ;;  %v9867_v19 = vld [vmem:[%s15549_s5 + $0x18] sm:$0xff] }
0x110c   : > { %v8085_v40 = vpop.f32.mrf.mxu0  ;;  %v8048_v41 = vadd.f32 %v8047_v18, %v8046_v63  ;;  %v4395_v30 = vadd.f32 %v9867_v19, %v8004_v50  ;;  %v9873_v19 = vld [vmem:[%s15548_s4 + $0x168] sm:$0xff] }
0x110d   : > { %v8086_v35 = vadd.f32 %v8085_v40, %v8084_v23  ;;  %v8835_v0 = vpop.f32.mrf.mxu1 }
0x110e   : > { %v8087_v27 = vpop.f32.mrf.mxu0  ;;  %v4480_v24 = vadd.f32 %v8048_v41, %v4395_v30  ;;  %v9874_v30 = vld [vmem:[%s15548_s4 + $0x1e0] sm:$0xff] }
0x110f   : > { %v4555_v60 = vadd.f32 %v8086_v35, %v4470_v39  ;;  %v4634_v45 = vpop.f32.mrf.mxu1 }
0x1110   : > { %v4635_v16 = vadd.f32 %v4634_v45, %v4550_v15  ;;  %v8088_v29 = vpop.f32.mrf.mxu0 }
0x1111   : > { %v4640_v36 = vadd.f32 %v8835_v0, %v4555_v60  ;;  %v8089_v44 = vadd.f32 %v8088_v29, %v8087_v27  ;;  %v8838_v61 = vpop.f32.mrf.mxu1 }
0x1112   : > { %v7244_v40 = vmul.f32 -1.442695, %v4635_v16  ;;  %v8090_v23 = vpop.f32.mrf.mxu0 }
0x1113   : > { %v7245_v14 = vmul.f32 -1.442695, %v4640_v36  ;;  %v4560_v62 = vadd.f32 %v8089_v44, %v4475_v38  ;;  %v4644_v20 = vpop.f32.mrf.mxu1 }
0x1114   : > { %9430 = vpow2.f32 %v7244_v40  ;;  %v8091_v39 = vpop.f32.mrf.mxu0 }
0x1115   : > { %9432 = vpow2.f32 %v7245_v14  ;;  %v4645_v15 = vadd.f32 %v4644_v20, %v4560_v62  ;;  %v8092_v22 = vadd.f32 %v8091_v39, %v8090_v23  ;;  %v9870_v23 = vld [vmem:[%s15548_s4 + $0x1f0] sm:$0xff]  ;;  %v9875_v14 = vld [vmem:[%s15548_s4 + $0x160] sm:$0xff]  ;;  %v9877_v62 = vld [vmem:[%s15548_s4 + $0x158] sm:$0xff] }
0x1116   : > { %v9878_v20 = vld [vmem:[%s15548_s4 + $0x1d0] sm:$0xff] }
0x1117   : > { %v7246_v63 = vmul.f32 -1.442695, %v4645_v15  ;;  %v4565_v0 = vadd.f32 %v8092_v22, %v4480_v24  ;;  %v9879_v39 = vld [vmem:[%s15548_s4 + $0x150] sm:$0xff]  ;;  %v9880_v24 = vld [vmem:[%s15548_s4 + $0x1c8] sm:$0xff]  ;;  %v9882_v22 = vld [vmem:[%s15548_s4 + $0x1c0] sm:$0xff] }
0x1118   : > { %v9881_v15 = vld [vmem:[%s15548_s4 + $0x148] sm:$0xff] }
0x1119   : > { %9434 = vpow2.f32 %v7246_v63  ;;  %v4650_v27 = vadd.f32 %v8838_v61, %v4565_v0  ;;  %v9883_v63 = vld [vmem:[%s15548_s4 + $0x140] sm:$0xff]  ;;  %v9884_v0 = vld [vmem:[%s15548_s4 + $0x1b8] sm:$0xff] }
0x111b   : > { %v7247_v5 = vmul.f32 -1.442695, %v4650_v27  ;;  %v9885_v27 = vld [vmem:[%s15548_s4 + $0x138] sm:$0xff] }
0x111d   : > { %9436 = vpow2.f32 %v7247_v5  ;;  %v9886_v5 = vld [vmem:[%s15548_s4 + $0x1b0] sm:$0xff] }
0x1121   : > { %v9431_v13 = vpop.eup %9430 }
0x1122   : > { %v9433_v18 = vpop.eup %9432  ;;  %v4665_v3 = vadd.f32 1.0, %v9431_v13  ;;  %v9887_v13 = vld [vmem:[%s15548_s4 + $0x130] sm:$0xff] }
0x1123   : > { %v4666_v54 = vadd.f32 1.0, %v9433_v18  ;;  %v9888_v18 = vld [vmem:[%s15548_s4 + $0x1a8] sm:$0xff] }
0x1124   : > { %9438 = vrcp.f32 %v4665_v3  ;;  %v9889_v3 = vld [vmem:[%s15548_s4 + $0x128] sm:$0xff] }
0x1125   : > { %9440 = vrcp.f32 %v4666_v54  ;;  %v9890_v54 = vld [vmem:[%s15548_s4 + $0x1a0] sm:$0xff] }
0x1126   : > { %v9435_v50 = vpop.eup %9434 }
0x1127   : > { %v4667_v35 = vadd.f32 1.0, %v9435_v50  ;;  %v9891_v50 = vld [vmem:[%s15548_s4 + $0x120] sm:$0xff] }
0x1129   : > { %9442 = vrcp.f32 %v4667_v35  ;;  %v9892_v35 = vld [vmem:[%s15548_s4 + $0x198] sm:$0xff] }
0x112a   : > { %v9437_v37 = vpop.eup %9436 }
0x112b   : > { %v4668_v31 = vadd.f32 1.0, %v9437_v37  ;;  %v9893_v37 = vld [vmem:[%s15548_s4 + $0x118] sm:$0xff] }
0x112d   : > { %9444 = vrcp.f32 %v4668_v31  ;;  %v9894_v31 = vld [vmem:[%s15548_s4 + $0x190] sm:$0xff] }
0x1131   : > { %v13690_v60 = vpop.eup %9438 }
0x1132   : > { %v13692_v45 = vpop.eup %9440  ;;  %v4677_v16 = vmul.f32 %v13690_v60, %v13557_v21 }
0x1133   : > { %v4678_v29 = vmul.f32 %v13692_v45, %v13543_v4 }
0x1134   : > { %4685 = vrot.lane.b32.xlu1 %v4677_v16, %s15679_s20  ;;  %v9895_v16 = vld [vmem:[%s15548_s4 + $0x110] sm:$0xff] }
0x1135   : > { %4687 = vrot.lane.b32.xlu0 %v4678_v29, %s15679_s20  ;;  %v9896_v29 = vld [vmem:[%s15548_s4 + $0x188] sm:$0xff] }
0x1136   : > { %v13700_v38 = vpop.eup %9442 }
0x1137   : > { %v4679_v41 = vmul.f32 %v13700_v38, %v13586_v12 }
0x1139   : > { %4689 = vrot.lane.b32.xlu1 %v4679_v41, %s15679_s20  ;;  %v9897_v41 = vld [vmem:[%s15548_s4 + $0x108] sm:$0xff] }
0x113a   : > { %v13705_v36 = vpop.eup %9444 }
0x113b   : > { %v4680_v44 = vmul.f32 %v13705_v36, %v13559_v56 }
0x113d   : > { %4691 = vrot.lane.b32.xlu0 %v4680_v44, %s15679_s20  ;;  %v9898_v44 = vld [vmem:[%s15548_s4 + $0x180] sm:$0xff] }
0x11a6   : > { %v4686_v21 = vpop.permute.xlu1 %4685 }
0x11a7   : > { %v4688_v4 = vpop.permute.xlu0 %4687  ;;  %v13718_v12 = vsel %vm579_vm2, %v12956_v43, %v4686_v21  ;;  %v9899_v21 = vld [vmem:[%s15548_s4 + $0x100] sm:$0xff] }
0x11a8   : > { %v13712_v61 = vsel %vm579_vm2, %v12953_v42, %v4688_v4  ;;  %v13847_v4 = vld [vmem:[%s15548_s4 + $0x358] sm:$0xff] }
0x11a9   : > { %8839 = vmatprep.subr.mxu1 %v13712_v61 }
0x11aa   : > { %8840 = vmatpush3.msra.mxu1 %v13712_v61 }
0x11ab   : > { %8841 = vmatprep.subr.mxu1 %v13718_v12  ;;  %v4690_v42 = vpop.permute.xlu1 %4689 }
0x11ac   : > { %8842 = vmatpush3.msra.mxu1 %v13718_v12  ;;  %v13736_v43 = vsel %vm579_vm2, %v12994_v52, %v4690_v42  ;;  %v9869_v52 = vld [vmem:[%s15548_s4 + $0x178] sm:$0xff] }
0x11ad   : > { %8844 = vmatmul.mubr.msk.f32.vlgmr.msra.gmra.mxu1 %vm584_vm1, %v12973_v32 }
0x11ae   : > { %8846 = vmatprep.mubr.msk.f32.mxu1 %vm584_vm1, %v12986_v46 }
0x11af   : > { %v4692_v56 = vpop.permute.xlu0 %4691 }
0x11b0   : > { %v13728_v40 = vsel %vm579_vm2, %v12978_v57, %v4692_v56  ;;  %v9868_v57 = vld [vmem:[%s15548_s4 + $0x1f8] sm:$0xff] }
0x11b1   : > { %8847 = vmatmul.mubr.msk.f32.gmra.mxu1 %vm584_vm1, %v13009_v58  ;;  %8849 = vmatprep.subr.mxu1 %v13728_v40 }
0x11b2   : > { %8850 = vmatpush3.msra.mxu1 %v13728_v40  ;;  %8853 = vmatprep.mubr.msk.f32.mxu1 %vm584_vm1, %v13582_v25 }
0x11b3   : > { %8851 = vmatprep.subr.mxu1 %v13736_v43 }
0x11b4   : > { %8852 = vmatpush3.msra.mxu1 %v13736_v43 }
0x11b5   : > { %8854 = vmatmul.mubr.msk.f32.vlgmr.msra.gmra.mxu1 %vm584_vm1, %v12973_v32  ;;  %8165 = vmatprep.subr.mxu1 %v9868_v57  ;;  %v9871_v32 = vld [vmem:[%s15548_s4 + $0x170] sm:$0xff] }
0x11b6   : > { %8856 = vmatprep.mubr.msk.f32.mxu1 %vm584_vm1, %v12986_v46  ;;  %8166 = vmatpush3.msra.mxu1 %v9869_v52  ;;  %v9872_v46 = vld [vmem:[%s15548_s4 + $0x1e8] sm:$0xff] }
0x11b7   : > { %8167 = vmatprep.subr.mxu1 %v9870_v23 }
0x11b8   : > { %8168 = vmatpush3.msra.mxu1 %v9871_v32 }
0x11b9   : > { %8857 = vmatmul.mubr.msk.f32.gmra.mxu1 %vm584_vm1, %v13009_v58  ;;  %8169 = vmatprep.subr.mxu1 %v9872_v46  ;;  %v9876_v58 = vld [vmem:[%s15548_s4 + $0x1d8] sm:$0xff] }
0x11ba   : > { %8170 = vmatpush3.msra.mxu1 %v9873_v19 }
0x11bb   : > { %8171 = vmatprep.subr.mxu1 %v9874_v30 }
0x11bc   : > { %8172 = vmatpush3.msra.mxu1 %v9875_v14 }
0x11bd   : > { %8173 = vmatprep.subr.mxu1 %v9876_v58 }
0x11be   : > { %8174 = vmatpush3.msra.mxu1 %v9877_v62 }
0x11bf   : > { %8175 = vmatprep.subr.mxu1 %v9878_v20 }
0x11c0   : > { %8176 = vmatpush3.msra.mxu1 %v9879_v39 }
0x11c1   : > { %8177 = vmatprep.subr.mxu1 %v9880_v24 }
0x11c2   : > { %8178 = vmatpush3.msra.mxu1 %v9881_v15 }
0x11c3   : > { %8179 = vmatprep.subr.mxu1 %v9882_v22 }
0x11c4   : > { %8180 = vmatpush3.msra.mxu1 %v9883_v63 }
0x11c5   : > { %8181 = vmatprep.subr.mxu1 %v9884_v0 }
0x11c6   : > { %8182 = vmatpush3.msra.mxu1 %v9885_v27 }
0x11c7   : > { %8183 = vmatprep.subr.mxu1 %v9886_v5 }
0x11c8   : > { %8184 = vmatpush3.msra.mxu1 %v9887_v13 }
0x11c9   : > { %8185 = vmatprep.subr.mxu1 %v9888_v18 }
0x11ca   : > { %8186 = vmatpush3.msra.mxu1 %v9889_v3 }
0x11cb   : > { %8187 = vmatprep.subr.mxu1 %v9890_v54 }
0x11cc   : > { %8188 = vmatpush3.msra.mxu1 %v9891_v50 }
0x11cd   : > { %8189 = vmatprep.subr.mxu1 %v9892_v35 }
0x11ce   : > { %8190 = vmatpush3.msra.mxu1 %v9893_v37 }
0x11cf   : > { %8191 = vmatprep.subr.mxu1 %v9894_v31 }
0x11d0   : > { %8192 = vmatpush3.msra.mxu1 %v9895_v16 }
0x11d1   : > { %8193 = vmatprep.subr.mxu1 %v9896_v29 }
0x11d2   : > { %8194 = vmatpush3.msra.mxu1 %v9897_v41 }
0x11d3   : > { %8195 = vmatprep.subr.mxu1 %v9898_v44 }
0x11d4   : > { %8196 = vmatpush3.msra.mxu1 %v9899_v21 }
0x11d5   : > { %8859 = vmatprep.subr.mxu1 %v13847_v4 }
0x126d   : > { %v8845_v42 = vpop.f32.mrf.mxu1 }
0x126f   : > { %v4767_v56 = vpop.f32.mrf.mxu1 }
0x1270   : > { %4875 = vrot.lane.b32.xlu0 %v4767_v56, %s15680_s21 }
0x1271   : > { %v8848_v57 = vpop.f32.mrf.mxu1 }
0x1273   : > { %v4777_v52 = vpop.f32.mrf.mxu1 }
0x1274   : > { %4877 = vrot.lane.b32.xlu0 %v8845_v42, %s15680_s21  ;;  %4891 = vrot.lane.b32.xlu1 %v4777_v52, %s15681_s17 }
0x1275   : > { %v8855_v23 = vpop.f32.mrf.mxu1 }
0x1277   : > { %v4852_v32 = vpop.f32.mrf.mxu1 }
0x1278   : > { %4893 = vrot.lane.b32.xlu1 %v8848_v57, %s15681_s17  ;;  %4879 = vrot.lane.b32.xlu0 %v4852_v32, %s15680_s21 }
0x1279   : > { %v8858_v46 = vpop.f32.mrf.mxu1 }
0x127b   : > { %v4862_v19 = vpop.f32.mrf.mxu1 }
0x127c   : > { %4881 = vrot.lane.b32.xlu0 %v8855_v23, %s15680_s21  ;;  %4895 = vrot.lane.b32.xlu1 %v4862_v19, %s15681_s17 }
0x1280   : > { %4897 = vrot.lane.b32.xlu1 %v8858_v46, %s15681_s17 }
0x12e2   : > { %v4876_v30 = vpop.permute.xlu0 %4875 }
0x12e3   : > { %v4903_v14 = vsel %vm799_vm4, %v13718_v12, %v4876_v30 }
0x12e6   : > { %v4878_v58 = vpop.permute.xlu0 %4877  ;;  %v4892_v62 = vpop.permute.xlu1 %4891 }
0x12e7   : > { %v13861_v20 = vsel %vm804_vm3, %v4903_v14, %v4892_v62  ;;  %v4904_v15 = vsel %vm799_vm4, %v13712_v61, %v4878_v58 }
0x12e8   : > { %v4919_v39 = vmul.f32 %v13861_v20, %v10514_v51  ;;  %v4915_v24 = vmul.f32 %v13861_v20, %v10572_v8  ;;  %v4927_v0 = vmul.f32 %v13861_v20, %v10568_v6  ;;  %v4923_v5 = vmul.f32 %v13861_v20, %v10537_v59 }
0x12e9   : > { %v4935_v23 = vmul.f32 %v13861_v20, %v10747_v33  ;;  %v4931_v32 = vmul.f32 %v13861_v20, %v10749_v34  ;;  %v4939_v14 = vmul.f32 %v13861_v20, %v10779_v47 }
0x12ea   : > { %4963 = vrot.lane.b32.xlu1 %v4919_v39, %s15682_s13  ;;  %4947 = vrot.lane.b32.xlu0 %v4915_v24, %s15666_s10  ;;  %v4894_v22 = vpop.permute.xlu1 %4893  ;;  %v4880_v12 = vpop.permute.xlu0 %4879  ;;  %v15734_v39 = vld [vmem:[#allocation16_spill] sm:$0xff] }
0x12eb   : > { %v13872_v63 = vsel %vm804_vm3, %v4904_v15, %v4894_v22  ;;  %v4905_v13 = vsel %vm799_vm4, %v13736_v43, %v4880_v12  ;;  %v15735_v15 = vld [vmem:[#allocation15_spill] sm:$0xff] }
0x12ec   : > { %v4928_v27 = vmul.f32 %v13872_v63, %v10739_v28  ;;  %v4924_v61 = vmul.f32 %v13872_v63, %v10718_v17  ;;  %v4920_v37 = vmul.f32 %v13872_v63, %v10570_v7  ;;  %v4916_v43 = vmul.f32 %v13872_v63, %v10557_v2  ;;  %v15736_v12 = vld [vmem:[#allocation19_spill] sm:$0xff] }
0x12ed   : > { %v4936_v52 = vmul.f32 %v13872_v63, %v10792_v53  ;;  %v4940_v30 = vmul.f32 %v13872_v63, %v10794_v55 }
0x12ee   : > { %v9261_v18 = vpack.i.bf16 %v4928_v27, %v4927_v0  ;;  %v9256_v3 = vpack.i.bf16 %v4924_v61, %v4923_v5  ;;  %v4896_v54 = vpop.permute.xlu1 %4895  ;;  %v4882_v50 = vpop.permute.xlu0 %4881  ;;  %v15737_v27 = vld [vmem:[#allocation17_spill] sm:$0xff]  ;;  %v15738_v61 = vld [vmem:[#allocation18_spill] sm:$0xff] }
0x12ef   : > { %v13885_v35 = vsel %vm804_vm3, %v4905_v13, %v4896_v54  ;;  %v4906_v29 = vsel %vm799_vm4, %v13728_v40, %v4882_v50  ;;  %v4932_v40 = vmul.f32 %v13872_v63, %v10786_v49  ;;  %v9281_v46 = vpack.i.bf16 %v4936_v52, %v4935_v23  ;;  %v15740_v50 = vld [vmem:[#allocation20_spill] sm:$0xff] }
0x12f0   : > { %9262 = vrot.lane.b32.xlu1 %v9261_v18, %s15683_s18  ;;  %9257 = vrot.lane.b32.xlu0 %v9256_v3, %s15684_s26  ;;  %v4921_v31 = vmul.f32 %v13885_v35, %v10574_v9  ;;  %v4917_v16 = vmul.f32 %v13885_v35, %v10576_v10  ;;  %v4925_v58 = vmul.f32 %v13885_v35, %v10737_v26  ;;  %v15739_v3 = vld [vmem:[#allocation21_spill] sm:$0xff]  ;;  %v9902_v52 = vld [vmem:[%s15548_s4 + $0x2f0] sm:$0xff] }
0x12f1   : > { %v9276_v19 = vpack.i.bf16 %v4932_v40, %v4931_v32  ;;  %v4929_v62 = vmul.f32 %v13885_v35, %v10783_v48  ;;  %v4933_v5 = vmul.f32 %v13885_v35, %v15737_v27  ;;  %v4937_v13 = vmul.f32 %v13885_v35, %v15738_v61 }
0x12f2   : > { %v4898_v41 = vpop.permute.xlu1 %4897  ;;  %v9271_v44 = vpack.i.bf16 %v4921_v31, %v4920_v37  ;;  %v9266_v21 = vpack.i.bf16 %v4917_v16, %v4916_v43  ;;  %v4941_v37 = vmul.f32 %v13885_v35, %v15740_v50  ;;  %v15741_v31 = vld [vmem:[#allocation22_spill] sm:$0xff]  ;;  %v15742_v16 = vld [vmem:[#allocation23_spill] sm:$0xff] }
0x12f3   : > { %v13900_v42 = vsel %vm804_vm3, %v4906_v29, %v4898_v41  ;;  %v4911_v29 = vmul.f32 %v13861_v20, %v15742_v16  ;;  %v9903_v20 = vld [vmem:[%s15548_s4 + $0x270] sm:$0xff] }
0x12f4   : > { %9272 = vrot.lane.b32.xlu1 %v9271_v44, %s15682_s13  ;;  %9267 = vrot.lane.b32.xlu0 %v9266_v21, %s15666_s10  ;;  %v4922_v56 = vmul.f32 %v13900_v42, %v10700_v1  ;;  %v4918_v57 = vmul.f32 %v13900_v42, %v10578_v11  ;;  %v4930_v24 = vmul.f32 %v13900_v42, %v15734_v39 }
0x12f5   : > { %v4926_v22 = vmul.f32 %v13900_v42, %v15735_v15  ;;  %v4934_v0 = vmul.f32 %v13900_v42, %v15736_v12  ;;  %v4938_v54 = vmul.f32 %v13900_v42, %v15739_v3  ;;  %v4942_v43 = vmul.f32 %v13900_v42, %v15741_v31 }
0x12f7   : > { %v9286_v18 = vpack.i.bf16 %v4934_v0, %v4933_v5  ;;  %v9907_v0 = vld [vmem:[%s15548_s4 + $0x260] sm:$0xff] }
0x12f8   : > { %4969 = vrot.lane.b32.xlu1 %v4922_v56, %s15682_s13  ;;  %4953 = vrot.lane.b32.xlu0 %v4918_v57, %s15666_s10  ;;  %v9901_v57 = vld [vmem:[%s15548_s4 + $0x278] sm:$0xff] }
0x12fc   : > { %9282 = vrot.lane.b32.xlu1 %v9281_v46, %s15685_s12  ;;  %9277 = vrot.lane.b32.xlu0 %v9276_v19, %s15686_s0  ;;  %v9904_v19 = vld [vmem:[%s15548_s4 + $0x2e8] sm:$0xff] }
0x1300   : > { %5045 = vrot.lane.b32.xlu1 %v4940_v30, %s15687_s19  ;;  %5043 = vrot.lane.b32.xlu0 %v4939_v14, %s15687_s19 }
0x1304   : > { %4983 = vrot.lane.b32.xlu1 %v4925_v58, %s15684_s26  ;;  %4999 = vrot.lane.b32.xlu0 %v4929_v62, %s15683_s18  ;;  %v9905_v58 = vld [vmem:[%s15548_s4 + $0x268] sm:$0xff]  ;;  %v9906_v62 = vld [vmem:[%s15548_s4 + $0x2e0] sm:$0xff] }
0x1308   : > { %5001 = vrot.lane.b32.xlu1 %v4930_v24, %s15683_s18  ;;  %4985 = vrot.lane.b32.xlu0 %v4926_v22, %s15684_s26 }
0x130c   : > { %5031 = vrot.lane.b32.xlu1 %v4937_v13, %s15685_s12  ;;  %9287 = vrot.lane.b32.xlu0 %v9286_v18, %s15686_s0  ;;  %v9908_v18 = vld [vmem:[%s15548_s4 + $0x2d8] sm:$0xff] }
0x1310   : > { %5033 = vrot.lane.b32.xlu1 %v4938_v54, %s15685_s12  ;;  %5047 = vrot.lane.b32.xlu0 %v4941_v37, %s15687_s19 }
0x1314   : > { %5049 = vrot.lane.b32.xlu0 %v4942_v43, %s15687_s19 }
0x135c   : > { %v4948_v41 = vpop.permute.xlu0 %4947  ;;  %v4964_v44 = vpop.permute.xlu1 %4963 }
0x135d   : > { %v5055_v21 = vsel %vm1085_vm6, %v4911_v29, %v4948_v41  ;;  %v5059_v56 = vsel %vm1090_vm5, %v4948_v41, %v4964_v44  ;;  %v9909_v29 = vld [vmem:[%s15548_s4 + $0x258] sm:$0xff] }
0x135e   : > { %5155 = vmatprep.mubr.f32.mxu0 %v5059_v56  ;;  %v15743_v41 = vld [vmem:[#allocation25_spill] sm:$0xff] }
0x135f   : > { %5156 = vmatmul.mubr.f32.vlgmr.msra.gmra.mxu0 %v5055_v21  ;;  %v9910_v21 = vld [vmem:[%s15548_s4 + $0x2d0] sm:$0xff] }
0x1360   : > { %8210 = vmatpush3.msra.mxu0 %v9901_v57 }
0x1361   : > { %8211 = vmatprep.subr.mxu0 %v9902_v52 }
0x1362   : > { %8212 = vmatpush3.msra.mxu0 %v9903_v20  ;;  %v9258_v40 = vpop.permute.xlu0 %9257  ;;  %v13968_v23 = vpop.permute.xlu1 %9262 }
0x1363   : > { %v9260_v32 = vunpack.i.h.bf16 %v9258_v40  ;;  %v9259_v46 = vunpack.i.l.bf16 %v9258_v40  ;;  %8213 = vmatprep.subr.mxu0 %v9904_v19  ;;  %v9265_v30 = vunpack.i.h.bf16 %v13968_v23  ;;  %v9264_v14 = vunpack.i.l.bf16 %v13968_v23  ;;  %v9911_v40 = vld [vmem:[%s15548_s4 + $0x250] sm:$0xff] }
0x1364   : > { %8214 = vmatpush3.msra.mxu0 %v9905_v58  ;;  %v9912_v58 = vld [vmem:[%s15548_s4 + $0x2c8] sm:$0xff] }
0x1365   : > { %8215 = vmatprep.subr.mxu0 %v9906_v62  ;;  %v5067_v24 = vsel %vm1100_vm7, %v9259_v46, %v9264_v14  ;;  %v5063_v22 = vsel %vm1095_vm8, %v4964_v44, %v9259_v46  ;;  %v5068_v54 = vsel %vm1100_vm7, %v9260_v32, %v9265_v30  ;;  %v4912_v44 = vmul.f32 %v13872_v63, %v15743_v41  ;;  %v9915_v62 = vld [vmem:[%s15548_s4 + $0x2c0] sm:$0xff] }
0x1366   : > { %8216 = vmatpush3.msra.mxu0 %v9907_v0  ;;  %5240 = vmatprep.mubr.f32.mxu1 %v5067_v24  ;;  %v9268_v5 = vpop.permute.xlu0 %9267  ;;  %v13988_v13 = vpop.permute.xlu1 %9272 }
0x1367   : > { %8217 = vmatprep.subr.mxu0 %v9908_v18  ;;  %5241 = vmatmul.mubr.f32.vlgmr.msra.gmra.mxu1 %v5063_v22  ;;  %v9269_v37 = vunpack.i.l.bf16 %v9268_v5  ;;  %v9274_v43 = vunpack.i.l.bf16 %v13988_v13  ;;  %v9270_v56 = vunpack.i.h.bf16 %v9268_v5  ;;  %v9275_v57 = vunpack.i.h.bf16 %v13988_v13  ;;  %v9916_v22 = vld [vmem:[%s15548_s4 + $0x240] sm:$0xff]  ;;  %v9917_v18 = vld [vmem:[%s15548_s4 + $0x2b8] sm:$0xff] }
0x1368   : > { %8218 = vmatpush3.msra.mxu0 %v9909_v29  ;;  %5245 = vmatprep.mubr.f32.mxu1 %v5068_v54  ;;  %v9919_v29 = vld [vmem:[%s15548_s4 + $0x348] sm:$0xff]  ;;  %v9937_v13 = vld [vmem:[%s15548_s4 + $0x280] sm:$0xff] }
0x1369   : > { %8219 = vmatprep.subr.mxu0 %v9910_v21  ;;  %v5060_v52 = vsel %vm1090_vm5, %v9269_v37, %v9274_v43  ;;  %v5064_v20 = vsel %vm1095_vm8, %v9274_v43, %v9260_v32  ;;  %8860 = vmatpush3.msra.mxu1 %v13847_v4  ;;  %v5056_v19 = vsel %vm1085_vm6, %v4912_v44, %v9269_v37  ;;  %v9913_v4 = vld [vmem:[%s15548_s4 + $0x248] sm:$0xff]  ;;  %v9914_v32 = vld [vmem:[%s15548_s4 + $0x350] sm:$0xff]  ;;  %v9918_v43 = vld [vmem:[%s15548_s4 + $0x238] sm:$0xff] }
0x136a   : > { %8220 = vmatpush3.msra.mxu0 %v9911_v40  ;;  %v4954_v63 = vpop.permute.xlu0 %4953  ;;  %v14012_v46 = vpop.permute.xlu1 %4969  ;;  %5160 = vmatprep.mubr.f32.mxu0 %v5060_v52  ;;  %v5061_v24 = vsel %vm1090_vm5, %v9270_v56, %v9275_v57  ;;  %v15744_v44 = vld [vmem:[#allocation24_spill] sm:$0xff] }
0x136b   : > { %8221 = vmatprep.subr.mxu0 %v9912_v58  ;;  %5246 = vmatmul.mubr.f32.gmra.mxu1 %v5064_v20  ;;  %v4913_v21 = vmul.f32 %v13885_v35, %v15744_v44  ;;  %v9920_v52 = vld [vmem:[%s15548_s4 + $0x2b0] sm:$0xff] }
0x136c   : > { %8222 = vmatpush3.msra.mxu0 %v9913_v4  ;;  %8861 = vmatprep.subr.mxu1 %v9914_v32  ;;  %v9921_v20 = vld [vmem:[%s15548_s4 + $0x230] sm:$0xff]  ;;  %v9923_v4 = vld [vmem:[%s15548_s4 + $0x2a8] sm:$0xff] }
0x136d   : > { %8223 = vmatprep.subr.mxu0 %v9915_v62  ;;  %5161 = vmatmul.mubr.f32.gmra.mxu0 %v5056_v19  ;;  %v5057_v40 = vsel %vm1085_vm6, %v4913_v21, %v9270_v56  ;;  %v9922_v19 = vld [vmem:[%s15548_s4 + $0x340] sm:$0xff]  ;;  %v9924_v62 = vld [vmem:[%s15548_s4 + $0x228] sm:$0xff] }
0x136e   : > { %8224 = vmatpush3.msra.mxu0 %v9916_v22  ;;  %5165 = vmatprep.mubr.f32.mxu0 %v5061_v24  ;;  %v14033_v0 = vpop.permute.xlu0 %9277  ;;  %v14035_v5 = vpop.permute.xlu1 %9282  ;;  %v15745_v24 = vld [vmem:[#allocation26_spill] sm:$0xff] }
0x136f   : > { %8225 = vmatprep.subr.mxu0 %v9917_v18  ;;  %8862 = vmatpush3.msra.mxu1 %v9914_v32  ;;  %v9279_v54 = vunpack.i.l.bf16 %v14033_v0  ;;  %v9284_v37 = vunpack.i.l.bf16 %v14035_v5  ;;  %v5062_v32 = vsel %vm1090_vm5, %v4954_v63, %v14012_v46  ;;  %v4914_v22 = vmul.f32 %v13900_v42, %v15745_v24  ;;  %v9925_v18 = vld [vmem:[%s15548_s4 + $0x2a0] sm:$0xff] }
0x1370   : > { %8226 = vmatpush3.msra.mxu0 %v9918_v43  ;;  %8863 = vmatprep.subr.mxu1 %v9919_v29  ;;  %v9926_v43 = vld [vmem:[%s15548_s4 + $0x338] sm:$0xff] }
0x1371   : > { %8227 = vmatprep.subr.mxu0 %v9920_v52  ;;  %8864 = vmatpush3.msra.mxu1 %v9919_v29  ;;  %v5075_v56 = vsel %vm1110_vm9, %v9279_v54, %v9284_v37  ;;  %v9927_v37 = vld [vmem:[%s15548_s4 + $0x220] sm:$0xff]  ;;  %v5058_v29 = vsel %vm1085_vm6, %v4914_v22, %v4954_v63  ;;  %v9930_v63 = vld [vmem:[%s15548_s4 + $0x218] sm:$0xff]  ;;  %v9285_v22 = vunpack.i.h.bf16 %v14035_v5 }
0x1372   : > { %8228 = vmatpush3.msra.mxu0 %v9921_v20  ;;  %8865 = vmatprep.subr.mxu1 %v9922_v19  ;;  %v14060_v58 = vpop.permute.xlu0 %5043  ;;  %v14062_v35 = vpop.permute.xlu1 %5045  ;;  %v9928_v20 = vld [vmem:[%s15548_s4 + $0x298] sm:$0xff] }
0x1373   : > { %5166 = vmatmul.mubr.f32.gmra.mxu0 %v5057_v40  ;;  %8229 = vmatprep.subr.mxu0 %v9923_v4  ;;  %v5079_v42 = vsel %vm1115_vm10, %v5075_v56, %v14060_v58  ;;  %v9929_v40 = vld [vmem:[%s15548_s4 + $0x330] sm:$0xff] }
0x1374   : > { %5170 = vmatprep.mubr.f32.mxu0 %v5062_v32  ;;  %8230 = vmatpush3.msra.mxu0 %v9924_v62  ;;  %v9280_v62 = vunpack.i.h.bf16 %v14033_v0 }
0x1375   : > { %8866 = vmatpush3.msra.mxu1 %v9922_v19  ;;  %8231 = vmatprep.subr.mxu0 %v9925_v18  ;;  %v9931_v19 = vld [vmem:[%s15548_s4 + $0x290] sm:$0xff]  ;;  %v9932_v18 = vld [vmem:[%s15548_s4 + $0x328] sm:$0xff] }
0x1376   : > { %8867 = vmatprep.subr.mxu1 %v9926_v43  ;;  %8232 = vmatpush3.msra.mxu0 %v9927_v37  ;;  %v14089_v21 = vpop.permute.xlu0 %4999  ;;  %v4984_v52 = vpop.permute.xlu1 %4983  ;;  %v9934_v37 = vld [vmem:[%s15548_s4 + $0x288] sm:$0xff] }
0x1377   : > { %8868 = vmatpush3.msra.mxu1 %v9926_v43  ;;  %5171 = vmatmul.mubr.f32.gmra.mxu0 %v5058_v29  ;;  %v5069_v4 = vsel %vm1100_vm7, %v4984_v52, %v14089_v21  ;;  %v9933_v43 = vld [vmem:[%s15548_s4 + $0x210] sm:$0xff]  ;;  %v5065_v5 = vsel %vm1095_vm8, %v9275_v57, %v4984_v52  ;;  %v9935_v29 = vld [vmem:[%s15548_s4 + $0x320] sm:$0xff]  ;;  %v5076_v52 = vsel %vm1110_vm9, %v9280_v62, %v9285_v22 }
0x1378   : > { %8233 = vmatprep.subr.mxu0 %v9928_v20  ;;  %8869 = vmatprep.subr.mxu1 %v9929_v40  ;;  %v5080_v0 = vsel %vm1115_vm10, %v5076_v52, %v14062_v35 }
0x1379   : > { %8234 = vmatpush3.msra.mxu0 %v9930_v63  ;;  %5325 = vmatprep.mubr.f32.mxu0 %v5079_v42  ;;  %v9936_v42 = vld [vmem:[%s15548_s4 + $0x208] sm:$0xff] }
0x137a   : > { %8870 = vmatpush3.msra.mxu1 %v9929_v40  ;;  %8235 = vmatprep.subr.mxu0 %v9931_v19  ;;  %v4986_v32 = vpop.permute.xlu0 %4985  ;;  %v14105_v56 = vpop.permute.xlu1 %5001  ;;  %v9938_v19 = vld [vmem:[%s15548_s4 + $0x318] sm:$0xff] }
0x137b   : > { %8871 = vmatprep.subr.mxu1 %v9932_v18  ;;  %8236 = vmatpush3.msra.mxu0 %v9933_v43  ;;  %v5070_v57 = vsel %vm1100_vm7, %v4986_v32, %v14105_v56  ;;  %v5066_v22 = vsel %vm1095_vm8, %v14012_v46, %v4986_v32 }
0x137c   : > { %8872 = vmatpush3.msra.mxu1 %v9932_v18  ;;  %8237 = vmatprep.subr.mxu0 %v9934_v37  ;;  %v5071_v18 = vsel %vm1105_vm11, %v9264_v14, %v9279_v54  ;;  %v9940_v37 = vld [vmem:[%s15548_s4 + $0x310] sm:$0xff]  ;;  %v9941_v14 = vld [vmem:[%s15548_s4 + $0x308] sm:$0xff] }
0x137d   : > { %8873 = vmatprep.subr.mxu1 %v9935_v29  ;;  %5250 = vmatprep.mubr.f32.mxu1 %v5069_v4  ;;  %v9939_v4 = vld [vmem:[%s15548_s4 + $0x200] sm:$0xff] }
0x137e   : > { %8238 = vmatpush3.msra.mxu0 %v9936_v42  ;;  %8874 = vmatpush3.msra.mxu1 %v9935_v29  ;;  %v9288_v20 = vpop.permute.xlu0 %9287  ;;  %v5032_v40 = vpop.permute.xlu1 %5031  ;;  %v5072_v29 = vsel %vm1105_vm11, %v9265_v30, %v9280_v62  ;;  %v9942_v42 = vld [vmem:[%s15548_s4 + $0x300] sm:$0xff] }
0x137f   : > { %5251 = vmatmul.mubr.f32.gmra.mxu1 %v5065_v5  ;;  %8239 = vmatprep.subr.mxu0 %v9937_v13  ;;  %v9289_v63 = vunpack.i.l.bf16 %v9288_v20  ;;  %v9290_v32 = vunpack.i.h.bf16 %v9288_v20 }
0x1380   : > { %8875 = vmatprep.subr.mxu1 %v9938_v19  ;;  %8240 = vmatpush3.msra.mxu0 %v9939_v4 }
0x1381   : > { %8876 = vmatpush3.msra.mxu1 %v9938_v19  ;;  %5326 = vmatmul.mubr.f32.vlgmr.msra.gmra.mxu0 %v5071_v18  ;;  %v5077_v43 = vsel %vm1110_vm9, %v9289_v63, %v5032_v40  ;;  %v5073_v23 = vsel %vm1105_vm11, %v14089_v21, %v9289_v63  ;;  %v5074_v30 = vsel %vm1105_vm11, %v14105_v56, %v9290_v32 }
0x1382   : > { %8877 = vmatprep.subr.mxu1 %v9940_v37  ;;  %5255 = vmatprep.mubr.f32.mxu1 %v5070_v57  ;;  %v5048_v5 = vpop.permute.xlu0 %5047  ;;  %v5034_v46 = vpop.permute.xlu1 %5033 }
0x1383   : > { %5330 = vmatprep.mubr.f32.mxu0 %v5080_v0  ;;  %8878 = vmatpush3.msra.mxu1 %v9940_v37  ;;  %v5081_v54 = vsel %vm1115_vm10, %v5077_v43, %v5048_v5  ;;  %v5078_v13 = vsel %vm1110_vm9, %v9290_v32, %v5034_v46  ;;  %v9943_v32 = vld [vmem:[%s15550_s6] sm:$0xff] }
0x1384   : > { %5256 = vmatmul.mubr.f32.gmra.mxu1 %v5066_v22  ;;  %8879 = vmatprep.subr.mxu1 %v9941_v14 }
0x1385   : > { %8880 = vmatpush3.msra.mxu1 %v9941_v14  ;;  %8883 = vmatprep.mubr.msk.f32.mxu1 %vm1120_vm12, %v14060_v58 }
0x1386   : > { %5331 = vmatmul.mubr.f32.gmra.mxu0 %v5072_v29  ;;  %8881 = vmatprep.subr.mxu1 %v9942_v42  ;;  %v5050_v40 = vpop.permute.xlu0 %5049 }
0x1387   : > { %8882 = vmatpush3.msra.mxu1 %v9942_v42  ;;  %5335 = vmatprep.mubr.f32.mxu0 %v5081_v54  ;;  %v5082_v58 = vsel %vm1115_vm10, %v5078_v13, %v5050_v40  ;;  %v9944_v42 = vld [vmem:[%s15550_s6 + $0x8] sm:$0xff] }
0x1388   : > { %8884 = vmatmul.mubr.msk.f32.vlgmr.msra.gmra.mxu1 %vm1120_vm12, %v14062_v35 }
0x1389   : > { %8886 = vmatprep.mubr.msk.f32.mxu1 %vm1120_vm12, %v5048_v5 }
0x138a   : > { %5336 = vmatmul.mubr.f32.gmra.mxu0 %v5073_v23 }
0x138b   : > { %5340 = vmatprep.mubr.f32.mxu0 %v5082_v58 }
0x138c   : > { %8887 = vmatmul.mubr.msk.f32.gmra.mxu1 %vm1120_vm12, %v5050_v40 }
0x138d   : > { %8893 = vmatprep.mubr.msk.f32.mxu1 %vm584_vm1, %v13582_v25 }
0x138e   : > { %5341 = vmatmul.mubr.f32.gmra.mxu0 %v5074_v30 }
0x138f   : > { %8903 = vmatprep.mubr.msk.f32.mxu0 %vm584_vm1, %v13582_v25 }
0x141f   : > { %v8153_v35 = vpop.f32.mrf.mxu0 }
0x1421   : > { %v8154_v62 = vpop.f32.mrf.mxu0 }
0x1422   : > { %v8155_v37 = vadd.f32 %v8154_v62, %v8153_v35 }
0x1424   : > { %v5158_v29 = vadd.f32 %v9943_v32, %v8155_v37  ;;  %v9945_v37 = vld [vmem:[%s15550_s6 + $0x10] sm:$0xff] }
0x1427   : > { %v8197_v52 = vpop.f32.mrf.mxu1 }
0x1429   : > { %v8198_v63 = vpop.f32.mrf.mxu1 }
0x142a   : > { %v8199_v46 = vadd.f32 %v8198_v63, %v8197_v52 }
0x142b   : > { %v8200_v4 = vpop.f32.mrf.mxu1 }
0x142c   : > { %v5243_v35 = vadd.f32 %v8199_v46, %v5158_v29  ;;  %v9946_v29 = vld [vmem:[%s15550_s6 + $0x18] sm:$0xff] }
0x142d   : > { %v8156_v20 = vpop.f32.mrf.mxu0  ;;  %v8201_v22 = vpop.f32.mrf.mxu1 }
0x142e   : > { %v8202_v62 = vadd.f32 %v8201_v22, %v8200_v4 }
0x142f   : > { %v8157_v57 = vpop.f32.mrf.mxu0 }
0x1430   : > { %v8158_v0 = vadd.f32 %v8157_v57, %v8156_v20 }
0x1432   : > { %v5163_v40 = vadd.f32 %v9944_v42, %v8158_v0 }
0x1433   : > { %v8159_v21 = vpop.f32.mrf.mxu0 }
0x1434   : > { %v5248_v24 = vadd.f32 %v8202_v62, %v5163_v40 }
0x1435   : > { %v8160_v19 = vpop.f32.mrf.mxu0 }
0x1436   : > { %v8161_v58 = vadd.f32 %v8160_v19, %v8159_v21 }
0x1437   : > { %v8162_v18 = vpop.f32.mrf.mxu0 }
0x1438   : > { %v5168_v32 = vadd.f32 %v9945_v37, %v8161_v58 }
0x1439   : > { %v8163_v43 = vpop.f32.mrf.mxu0 }
0x143a   : > { %v8164_v0 = vadd.f32 %v8163_v43, %v8162_v18 }
0x143c   : > { %v5173_v42 = vadd.f32 %v9946_v29, %v8164_v0  ;;  %v15748_v0 = vld [vmem:[#allocation27_spill] sm:$0xff] }
0x143d   : > { %v15752_v29 = vld [vmem:[#allocation31_spill] sm:$0xff] }
0x143f   : > { %v8203_v56 = vpop.f32.mrf.mxu1 }
0x1441   : > { %v8204_v5 = vpop.f32.mrf.mxu1  ;;  %v8241_v14 = vpop.f32.mrf.mxu0 }
0x1442   : > { %v8205_v20 = vadd.f32 %v8204_v5, %v8203_v56 }
0x1443   : > { %v8242_v54 = vpop.f32.mrf.mxu0 }
0x1444   : > { %v8206_v25 = vpop.f32.mrf.mxu1  ;;  %v8243_v13 = vadd.f32 %v8242_v54, %v8241_v14  ;;  %v5253_v19 = vadd.f32 %v8205_v20, %v5168_v32  ;;  %v15746_v20 = vld [vmem:[#allocation28_spill] sm:$0xff] }
0x1446   : > { %v8207_v23 = vpop.f32.mrf.mxu1  ;;  %v8244_v30 = vpop.f32.mrf.mxu0  ;;  %v5328_v44 = vadd.f32 %v8243_v13, %v5243_v35  ;;  %v5439_v35 = vsub.f32 1.0, %v13690_v60 }
0x1447   : > { %v8208_v4 = vadd.f32 %v8207_v23, %v8206_v25 }
0x1448   : > { %v8245_v57 = vpop.f32.mrf.mxu0  ;;  %v8885_v52 = vpop.f32.mrf.mxu1 }
0x1449   : > { %v8246_v63 = vadd.f32 %v8245_v57, %v8244_v30  ;;  %v5258_v18 = vadd.f32 %v8208_v4, %v5173_v42  ;;  %v5435_v57 = vmul.f32 %v13690_v60, %v15746_v20  ;;  %v5438_v42 = vmul.f32 %v13705_v36, %v15752_v29  ;;  %v9951_v20 = vld [vmem:[%s15547_s3 + $0xf0] sm:$0xff] }
0x144a   : > { %v5412_v41 = vpop.f32.mrf.mxu1  ;;  %v8247_v16 = vpop.f32.mrf.mxu0  ;;  %v9964_v29 = vld [vmem:[%s15547_s3 + $0x1f0] sm:$0xff] }
0x144b   : > { %v5333_v14 = vadd.f32 %v8246_v63, %v5248_v24  ;;  %v5413_v21 = vadd.f32 %v5412_v41, %v5328_v44  ;;  %v5440_v63 = vsub.f32 1.0, %v13692_v45 }
0x144c   : > { %v8248_v54 = vpop.f32.mrf.mxu0  ;;  %v8888_v46 = vpop.f32.mrf.mxu1 }
0x144d   : > { %v5418_v22 = vadd.f32 %v8885_v52, %v5333_v14  ;;  %9446 = vtanh.f32 %v5413_v21  ;;  %v8249_v56 = vadd.f32 %v8248_v54, %v8247_v16  ;;  %v5436_v14 = vmul.f32 %v13692_v45, %v15748_v0  ;;  %v9954_v0 = vld [vmem:[%s15547_s3 + $0xe8] sm:$0xff] }
0x144e   : > { %v8250_v5 = vpop.f32.mrf.mxu0  ;;  %v5422_v13 = vpop.f32.mrf.mxu1  ;;  %v5441_v54 = vsub.f32 1.0, %v13700_v38  ;;  %v5442_v45 = vsub.f32 1.0, %v13705_v36 }
0x144f   : > { %9448 = vtanh.f32 %v5418_v22  ;;  %v5338_v40 = vadd.f32 %v8249_v56, %v5253_v19 }
0x1450   : > { %v8251_v58 = vpop.f32.mrf.mxu0 }
0x1451   : > { %v5423_v24 = vadd.f32 %v5422_v13, %v5338_v40  ;;  %v8252_v41 = vadd.f32 %v8251_v58, %v8250_v5 }
0x1453   : > { %9450 = vtanh.f32 %v5423_v24  ;;  %v5343_v44 = vadd.f32 %v8252_v41, %v5258_v18  ;;  %v14226_v24 = vld [vmem:[%s10360_s23 + $0x60] sm:$0xff] }
0x1455   : > { %v5428_v43 = vadd.f32 %v8888_v46, %v5343_v44  ;;  %v15750_v46 = vld [vmem:[#allocation29_spill] sm:$0xff]  ;;  %v14243_v44 = vld [vmem:[%s15546_s2 + $0x8] sm:$0xff] }
0x1456   : > { %v5437_v4 = vmul.f32 %v13700_v38, %v15750_v46  ;;  %v14223_v38 = vld [vmem:[%s10360_s23 + $0x68] sm:$0xff]  ;;  %v9959_v46 = vld [vmem:[%s15547_s3 + $0x58] sm:$0xff] }
0x1457   : > { %9452 = vtanh.f32 %v5428_v43  ;;  %v14248_v43 = vld [vmem:[%s10360_s23 + $0x78] sm:$0xff] }
0x145a   : > { %v9447_v25 = vpop.eup %9446 }
0x145b   : > { %5447 = vrot.lane.b32.xlu0 %v9447_v25, %s15693_s30  ;;  %v9948_v25 = vld [vmem:[%s15547_s3 + $0xf8] sm:$0xff] }
0x145c   : > { %v9449_v16 = vpop.eup %9448 }
0x145d   : > { %5449 = vrot.lane.b32.xlu1 %v9449_v16, %s15693_s30  ;;  %v14256_v16 = vld [vmem:[%s15546_s2 + $0x10] sm:$0xff] }
0x1460   : > { %v9451_v23 = vpop.eup %9450 }
0x1461   : > { %5451 = vrot.lane.b32.xlu0 %v9451_v23, %s15693_s30  ;;  %v9950_v23 = vld [vmem:[%s15547_s3 + $0x78] sm:$0xff] }
0x1464   : > { %v9453_v30 = vpop.eup %9452 }
0x1465   : > { %5453 = vrot.lane.b32.xlu1 %v9453_v30, %s15693_s30 }
0x14cd   : > { %v5448_v62 = vpop.permute.xlu0 %5447 }
0x14ce   : > { %v5459_v52 = vmul.f32 %v5448_v62, %v5439_v35  ;;  %v14264_v62 = vld [vmem:[%s10360_s23 + $0x70] sm:$0xff]  ;;  %s15777_s23 = sld [smem:[#allocation35_spill]] }
0x14cf   : > { %v5450_v37 = vpop.permute.xlu1 %5449 }
0x14d0   : > { %v14198_v32 = vadd.f32 %v5459_v52, %v5435_v57  ;;  %v5460_v21 = vmul.f32 %v5450_v37, %v5440_v63  ;;  %v9952_v52 = vld [vmem:[%s15547_s3 + $0x70] sm:$0xff]  ;;  %v14279_v63 = vld [vmem:[%s15546_s2 + $0x18] sm:$0xff] }
0x14d2   : > { %15747 = vst [vmem:[#allocation30_spill] sm:$0xff] %v14198_v32  ;;  %v14202_v19 = vadd.f32 %v5460_v21, %v5436_v14  ;;  %5493 = vrot.lane.b32.xlu0 %v14198_v32, %s15722_s29  ;;  %v9955_v14 = vld [vmem:[%s15547_s3 + $0x68] sm:$0xff]  ;;  %v9956_v21 = vld [vmem:[%s15547_s3 + $0xe0] sm:$0xff] }
0x14d3   : > { %v5452_v60 = vpop.permute.xlu0 %5451 }
0x14d4   : > { %15749 = vst [vmem:[#allocation16_spill] sm:$0xff] %v14202_v19  ;;  %5495 = vrot.lane.b32.xlu1 %v14202_v19, %s15722_s29  ;;  %v5461_v22 = vmul.f32 %v5452_v60, %v5441_v54  ;;  %v9957_v54 = vld [vmem:[%s15547_s3 + $0x60] sm:$0xff]  ;;  %v9958_v60 = vld [vmem:[%s15547_s3 + $0xd8] sm:$0xff] }
0x14d6   : > { %v14211_v56 = vadd.f32 %v5461_v22, %v5437_v4  ;;  %v9960_v4 = vld [vmem:[%s15547_s3 + $0x1f8] sm:$0xff]  ;;  %v9961_v22 = vld [vmem:[%s15547_s3 + $0xd0] sm:$0xff] }
0x14d7   : > { %v5454_v5 = vpop.permute.xlu1 %5453 }
0x14d8   : > { %15751 = vst [vmem:[#allocation15_spill] sm:$0xff] %v14211_v56  ;;  %v5462_v40 = vmul.f32 %v5454_v5, %v5442_v45  ;;  %5497 = vrot.lane.b32.xlu0 %v14211_v56, %s15722_s29  ;;  %v9962_v45 = vld [vmem:[%s15547_s3 + $0x178] sm:$0xff]  ;;  %v9963_v5 = vld [vmem:[%s15547_s3 + $0x50] sm:$0xff] }
0x14da   : > { %v14218_v13 = vadd.f32 %v5462_v40, %v5438_v42  ;;  %v9965_v42 = vld [vmem:[%s15547_s3 + $0xc8] sm:$0xff]  ;;  %v9966_v40 = vld [vmem:[%s15547_s3 + $0x170] sm:$0xff] }
0x14dc   : > { %15753 = vst [vmem:[#allocation28_spill] sm:$0xff] %v14218_v13  ;;  %5499 = vrot.lane.b32.xlu1 %v14218_v13, %s15722_s29  ;;  %s7308_s29 = sshll.u32 %s10326_s9, 11 }
0x14dd   : > { %s15494_s8 = scalar_lea.hbm %s15777_s23, %s7308_s29 }
0x1544   : > { %v5494_v58 = vpop.permute.xlu0 %5493 }
0x1545   : > { %v14236_v36 = vsel %vm579_vm2, %v14226_v24, %v5494_v58  ;;  %v9967_v58 = vld [vmem:[%s15547_s3 + $0x48] sm:$0xff] }
0x1546   : > { %v5496_v18 = vpop.permute.xlu1 %5495 }
0x1547   : > { %v14230_v41 = vsel %vm579_vm2, %v14223_v38, %v5496_v18  ;;  %v9968_v18 = vld [vmem:[%s15547_s3 + $0x1e8] sm:$0xff] }
0x1548   : > { %8889 = vmatprep.subr.mxu1 %v14230_v41 }
0x1549   : > { %8890 = vmatpush3.msra.mxu1 %v14230_v41 }
0x154a   : > { %8891 = vmatprep.subr.mxu1 %v14236_v36  ;;  %v5498_v30 = vpop.permute.xlu0 %5497 }
0x154b   : > { %8892 = vmatpush3.msra.mxu1 %v14236_v36  ;;  %v14287_v37 = vsel %vm579_vm2, %v14264_v62, %v5498_v30  ;;  %v9971_v30 = vld [vmem:[%s15547_s3 + $0x40] sm:$0xff] }
0x154c   : > { %8894 = vmatmul.mubr.msk.f32.vlgmr.msra.gmra.mxu1 %vm584_vm1, %v14243_v44  ;;  %8281 = vmatprep.subr.mxu1 %v9948_v25  ;;  %v9969_v25 = vld [vmem:[%s15547_s3 + $0xc0] sm:$0xff] }
0x154d   : > { %8896 = vmatprep.mubr.msk.f32.mxu1 %vm584_vm1, %v14256_v16  ;;  %8282 = vmatpush3.msra.mxu1 %v9950_v23  ;;  %v9970_v23 = vld [vmem:[%s15547_s3 + $0x168] sm:$0xff] }
0x154e   : > { %v5500_v35 = vpop.permute.xlu1 %5499  ;;  %8283 = vmatprep.subr.mxu1 %v9951_v20  ;;  %v9973_v20 = vld [vmem:[%s15547_s3 + $0xb8] sm:$0xff] }
0x154f   : > { %v14271_v57 = vsel %vm579_vm2, %v14248_v43, %v5500_v35  ;;  %8284 = vmatpush3.msra.mxu1 %v9952_v52  ;;  %v9972_v35 = vld [vmem:[%s15547_s3 + $0x1e0] sm:$0xff] }
0x1550   : > { %8897 = vmatmul.mubr.msk.f32.gmra.mxu1 %vm584_vm1, %v14279_v63  ;;  %8899 = vmatprep.subr.mxu0 %v14271_v57  ;;  %v9974_v52 = vld [vmem:[%s15547_s3 + $0x160] sm:$0xff] }
0x1551   : > { %8900 = vmatpush3.msra.mxu0 %v14271_v57  ;;  %8285 = vmatprep.subr.mxu1 %v9954_v0  ;;  %v9975_v0 = vld [vmem:[%s15547_s3 + $0x38] sm:$0xff] }
0x1552   : > { %8901 = vmatprep.subr.mxu0 %v14287_v37  ;;  %8286 = vmatpush3.msra.mxu1 %v9955_v14  ;;  %v9976_v14 = vld [vmem:[%s15547_s3 + $0x1d8] sm:$0xff] }
0x1553   : > { %8902 = vmatpush3.msra.mxu0 %v14287_v37  ;;  %8287 = vmatprep.subr.mxu1 %v9956_v21  ;;  %v9977_v21 = vld [vmem:[%s15547_s3 + $0xb0] sm:$0xff] }
0x1554   : > { %8904 = vmatmul.mubr.msk.f32.vlgmr.msra.gmra.mxu0 %vm584_vm1, %v14243_v44  ;;  %8288 = vmatpush3.msra.mxu1 %v9957_v54  ;;  %v9978_v54 = vld [vmem:[%s15547_s3 + $0x158] sm:$0xff] }
0x1555   : > { %8906 = vmatprep.mubr.msk.f32.mxu0 %vm584_vm1, %v14256_v16  ;;  %8289 = vmatprep.subr.mxu1 %v9958_v60  ;;  %v9979_v60 = vld [vmem:[%s15547_s3 + $0x30] sm:$0xff] }
0x1556   : > { %8290 = vmatpush3.msra.mxu1 %v9959_v46  ;;  %8325 = vmatprep.subr.mxu0 %v9960_v4  ;;  %v9980_v46 = vld [vmem:[%s15547_s3 + $0x1d0] sm:$0xff]  ;;  %v9981_v4 = vld [vmem:[%s15547_s3 + $0xa8] sm:$0xff] }
0x1557   : > { %8291 = vmatprep.subr.mxu1 %v9961_v22  ;;  %8326 = vmatpush3.msra.mxu0 %v9962_v45  ;;  %v9982_v22 = vld [vmem:[%s15547_s3 + $0x150] sm:$0xff]  ;;  %v9983_v45 = vld [vmem:[%s15547_s3 + $0x28] sm:$0xff] }
0x1558   : > { %8907 = vmatmul.mubr.msk.f32.gmra.mxu0 %vm584_vm1, %v14279_v63  ;;  %8292 = vmatpush3.msra.mxu1 %v9963_v5  ;;  %v9984_v5 = vld [vmem:[%s15547_s3 + $0x1c8] sm:$0xff] }
0x1559   : > { %8327 = vmatprep.subr.mxu0 %v9964_v29  ;;  %8293 = vmatprep.subr.mxu1 %v9965_v42  ;;  %v9985_v29 = vld [vmem:[%s15547_s3 + $0xa0] sm:$0xff]  ;;  %v9986_v42 = vld [vmem:[%s15547_s3 + $0x148] sm:$0xff] }
0x155a   : > { %8328 = vmatpush3.msra.mxu0 %v9966_v40  ;;  %8294 = vmatpush3.msra.mxu1 %v9967_v58  ;;  %v9987_v40 = vld [vmem:[%s15547_s3 + $0x20] sm:$0xff] }
0x155b   : > { %8329 = vmatprep.subr.mxu0 %v9968_v18  ;;  %8295 = vmatprep.subr.mxu1 %v9969_v25  ;;  %v9988_v58 = vld [vmem:[%s15547_s3 + $0x1c0] sm:$0xff]  ;;  %v9989_v18 = vld [vmem:[%s15547_s3 + $0x98] sm:$0xff] }
0x155c   : > { %8330 = vmatpush3.msra.mxu0 %v9970_v23  ;;  %8296 = vmatpush3.msra.mxu1 %v9971_v30  ;;  %v9990_v25 = vld [vmem:[%s15547_s3 + $0x140] sm:$0xff]  ;;  %v9991_v23 = vld [vmem:[%s15547_s3 + $0x18] sm:$0xff] }
0x155d   : > { %8331 = vmatprep.subr.mxu0 %v9972_v35  ;;  %8297 = vmatprep.subr.mxu1 %v9973_v20  ;;  %v9992_v30 = vld [vmem:[%s15547_s3 + $0x1b8] sm:$0xff]  ;;  %v9993_v35 = vld [vmem:[%s15547_s3 + $0x90] sm:$0xff] }
0x155e   : > { %8332 = vmatpush3.msra.mxu0 %v9974_v52  ;;  %8298 = vmatpush3.msra.mxu1 %v9975_v0  ;;  %v9994_v20 = vld [vmem:[%s15547_s3 + $0x138] sm:$0xff]  ;;  %v9995_v52 = vld [vmem:[%s15547_s3 + $0x10] sm:$0xff] }
0x155f   : > { %8333 = vmatprep.subr.mxu0 %v9976_v14  ;;  %8299 = vmatprep.subr.mxu1 %v9977_v21  ;;  %v9996_v0 = vld [vmem:[%s15547_s3 + $0x1b0] sm:$0xff]  ;;  %v9997_v14 = vld [vmem:[%s15547_s3 + $0x88] sm:$0xff] }
0x1560   : > { %8334 = vmatpush3.msra.mxu0 %v9978_v54  ;;  %8300 = vmatpush3.msra.mxu1 %v9979_v60  ;;  %v9998_v21 = vld [vmem:[%s15547_s3 + $0x130] sm:$0xff]  ;;  %v9999_v54 = vld [vmem:[%s15547_s3 + $0x8] sm:$0xff] }
0x1561   : > { %8335 = vmatprep.subr.mxu0 %v9980_v46  ;;  %8301 = vmatprep.subr.mxu1 %v9981_v4  ;;  %v10000_v60 = vld [vmem:[%s15547_s3 + $0x1a8] sm:$0xff]  ;;  %v10001_v46 = vld [vmem:[%s15547_s3 + $0x80] sm:$0xff] }
0x1562   : > { %8336 = vmatpush3.msra.mxu0 %v9982_v22  ;;  %8302 = vmatpush3.msra.mxu1 %v9983_v45  ;;  %v10002_v4 = vld [vmem:[%s15547_s3 + $0x128] sm:$0xff]  ;;  %v10003_v22 = vld [vmem:[%s15547_s3] sm:$0xff] }
0x1563   : > { %8337 = vmatprep.subr.mxu0 %v9984_v5  ;;  %8303 = vmatprep.subr.mxu1 %v9985_v29  ;;  %v10004_v45 = vld [vmem:[%s15547_s3 + $0x1a0] sm:$0xff]  ;;  %v10005_v5 = vld [vmem:[%s15547_s3 + $0x2f8] sm:$0xff] }
0x1564   : > { %8338 = vmatpush3.msra.mxu0 %v9986_v42  ;;  %8304 = vmatpush3.msra.mxu1 %v9987_v40  ;;  %v10006_v29 = vld [vmem:[%s15547_s3 + $0x120] sm:$0xff]  ;;  %v10007_v42 = vld [vmem:[%s15547_s3 + $0x198] sm:$0xff] }
0x1565   : > { %8339 = vmatprep.subr.mxu0 %v9988_v58  ;;  %8305 = vmatprep.subr.mxu1 %v9989_v18  ;;  %v10008_v40 = vld [vmem:[%s15547_s3 + $0x118] sm:$0xff]  ;;  %v10009_v58 = vld [vmem:[%s15547_s3 + $0x190] sm:$0xff] }
0x1566   : > { %8340 = vmatpush3.msra.mxu0 %v9990_v25  ;;  %8306 = vmatpush3.msra.mxu1 %v9991_v23  ;;  %v10010_v18 = vld [vmem:[%s15547_s3 + $0x110] sm:$0xff]  ;;  %v10011_v25 = vld [vmem:[%s15547_s3 + $0x188] sm:$0xff] }
0x1567   : > { %8341 = vmatprep.subr.mxu0 %v9992_v30  ;;  %8307 = vmatprep.subr.mxu1 %v9993_v35  ;;  %v10012_v23 = vld [vmem:[%s15547_s3 + $0x108] sm:$0xff]  ;;  %v10013_v30 = vld [vmem:[%s15547_s3 + $0x180] sm:$0xff] }
0x1568   : > { %8342 = vmatpush3.msra.mxu0 %v9994_v20  ;;  %8308 = vmatpush3.msra.mxu1 %v9995_v52  ;;  %v10014_v35 = vld [vmem:[%s15547_s3 + $0x100] sm:$0xff]  ;;  %v14483_v20 = vld [vmem:[%s15547_s3 + $0x358] sm:$0xff] }
0x1569   : > { %8343 = vmatprep.subr.mxu0 %v9996_v0  ;;  %8309 = vmatprep.subr.mxu1 %v9997_v14 }
0x156a   : > { %8344 = vmatpush3.msra.mxu0 %v9998_v21  ;;  %8310 = vmatpush3.msra.mxu1 %v9999_v54 }
0x156b   : > { %8345 = vmatprep.subr.mxu0 %v10000_v60  ;;  %8311 = vmatprep.subr.mxu1 %v10001_v46 }
0x156c   : > { %8346 = vmatpush3.msra.mxu0 %v10002_v4  ;;  %8312 = vmatpush3.msra.mxu1 %v10003_v22 }
0x156d   : > { %8347 = vmatprep.subr.mxu0 %v10004_v45  ;;  %8369 = vmatprep.subr.mxu1 %v10005_v5 }
0x156e   : > { %8348 = vmatpush3.msra.mxu0 %v10006_v29 }
0x156f   : > { %8349 = vmatprep.subr.mxu0 %v10007_v42 }
0x1570   : > { %8350 = vmatpush3.msra.mxu0 %v10008_v40 }
0x1571   : > { %8351 = vmatprep.subr.mxu0 %v10009_v58 }
0x1572   : > { %8352 = vmatpush3.msra.mxu0 %v10010_v18 }
0x1573   : > { %8353 = vmatprep.subr.mxu0 %v10011_v25 }
0x1574   : > { %8354 = vmatpush3.msra.mxu0 %v10012_v23 }
0x1575   : > { %8355 = vmatprep.subr.mxu0 %v10013_v30 }
0x1576   : > { %8356 = vmatpush3.msra.mxu0 %v10014_v35 }
0x1577   : > { %8909 = vmatprep.subr.mxu0 %v14483_v20 }
0x160c   : > { %v8895_v52 = vpop.f32.mrf.mxu1 }
0x160e   : > { %v5575_v0 = vpop.f32.mrf.mxu1 }
0x160f   : > { %5683 = vrot.lane.b32.xlu1 %v5575_v0, %s15680_s21 }
0x1610   : > { %v8898_v14 = vpop.f32.mrf.mxu1 }
0x1612   : > { %v5585_v21 = vpop.f32.mrf.mxu1 }
0x1613   : > { %5685 = vrot.lane.b32.xlu1 %v8895_v52, %s15680_s21  ;;  %5699 = vrot.lane.b32.xlu0 %v5585_v21, %s15681_s17 }
0x1614   : > { %v8905_v54 = vpop.f32.mrf.mxu0 }
0x1616   : > { %v5660_v60 = vpop.f32.mrf.mxu0 }
0x1617   : > { %5701 = vrot.lane.b32.xlu0 %v8898_v14, %s15681_s17  ;;  %5687 = vrot.lane.b32.xlu1 %v5660_v60, %s15680_s21 }
0x1618   : > { %v8908_v46 = vpop.f32.mrf.mxu0 }
0x161a   : > { %v5670_v4 = vpop.f32.mrf.mxu0 }
0x161b   : > { %5689 = vrot.lane.b32.xlu1 %v8905_v54, %s15680_s21  ;;  %5703 = vrot.lane.b32.xlu0 %v5670_v4, %s15681_s17 }
0x161f   : > { %5705 = vrot.lane.b32.xlu0 %v8908_v46, %s15681_s17 }
0x1681   : > { %v5684_v22 = vpop.permute.xlu1 %5683 }
0x1682   : > { %v5711_v45 = vsel %vm799_vm4, %v14236_v36, %v5684_v22 }
0x1685   : > { %v5686_v5 = vpop.permute.xlu1 %5685  ;;  %v5700_v29 = vpop.permute.xlu0 %5699 }
0x1686   : > { %v14497_v42 = vsel %vm804_vm3, %v5711_v45, %v5700_v29  ;;  %v5712_v18 = vsel %vm799_vm4, %v14230_v41, %v5686_v5 }
0x1687   : > { %v5727_v40 = vmul.f32 %v14497_v42, %v10514_v51  ;;  %v5723_v58 = vmul.f32 %v14497_v42, %v10572_v8  ;;  %v5735_v30 = vmul.f32 %v14497_v42, %v10568_v6  ;;  %v5731_v52 = vmul.f32 %v14497_v42, %v10537_v59 }
0x1689   : > { %5771 = vrot.lane.b32.xlu0 %v5727_v40, %s15682_s13  ;;  %5755 = vrot.lane.b32.xlu1 %v5723_v58, %s15666_s10  ;;  %v5702_v25 = vpop.permute.xlu0 %5701  ;;  %v5688_v36 = vpop.permute.xlu1 %5687 }
0x168a   : > { %v14508_v23 = vsel %vm804_vm3, %v5712_v18, %v5702_v25  ;;  %v5713_v0 = vsel %vm799_vm4, %v14287_v37, %v5688_v36 }
0x168b   : > { %v5736_v35 = vmul.f32 %v14508_v23, %v10739_v28  ;;  %v5732_v41 = vmul.f32 %v14508_v23, %v10718_v17  ;;  %v5728_v4 = vmul.f32 %v14508_v23, %v10570_v7  ;;  %v5724_v37 = vmul.f32 %v14508_v23, %v10557_v2 }
0x168d   : > { %v9296_v14 = vpack.i.bf16 %v5736_v35, %v5735_v30  ;;  %v9291_v21 = vpack.i.bf16 %v5732_v41, %v5731_v52  ;;  %v5704_v54 = vpop.permute.xlu0 %5703  ;;  %v5690_v60 = vpop.permute.xlu1 %5689  ;;  %v5744_v30 = vmul.f32 %v14508_v23, %v10792_v53  ;;  %v5743_v35 = vmul.f32 %v14497_v42, %v10747_v33 }
0x168e   : > { %v14521_v46 = vsel %vm804_vm3, %v5713_v0, %v5704_v54  ;;  %v5714_v5 = vsel %vm799_vm4, %v14271_v57, %v5690_v60  ;;  %v5740_v57 = vmul.f32 %v14508_v23, %v10786_v49  ;;  %v5739_v52 = vmul.f32 %v14497_v42, %v10749_v34 }
0x168f   : > { %9297 = vrot.lane.b32.xlu0 %v9296_v14, %s15683_s18  ;;  %9292 = vrot.lane.b32.xlu1 %v9291_v21, %s15684_s26  ;;  %v5729_v22 = vmul.f32 %v14521_v46, %v10574_v9  ;;  %v5725_v45 = vmul.f32 %v14521_v46, %v10576_v10  ;;  %v9316_v41 = vpack.i.bf16 %v5744_v30, %v5743_v35 }
0x1690   : > { %v9311_v0 = vpack.i.bf16 %v5740_v57, %v5739_v52  ;;  %v5748_v14 = vmul.f32 %v14508_v23, %v10794_v55  ;;  %v5747_v21 = vmul.f32 %v14497_v42, %v10779_v47  ;;  %v5733_v54 = vmul.f32 %v14521_v46, %v10737_v26 }
0x1691   : > { %v5706_v29 = vpop.permute.xlu0 %5705  ;;  %v9306_v40 = vpack.i.bf16 %v5729_v22, %v5728_v4  ;;  %v9301_v58 = vpack.i.bf16 %v5725_v45, %v5724_v37  ;;  %v5737_v60 = vmul.f32 %v14521_v46, %v10783_v48  ;;  %v5741_v45 = vmul.f32 %v14521_v46, %v15737_v27 }
0x1692   : > { %v14536_v18 = vsel %vm804_vm3, %v5714_v5, %v5706_v29  ;;  %v5745_v5 = vmul.f32 %v14521_v46, %v15738_v61 }
0x1693   : > { %9307 = vrot.lane.b32.xlu0 %v9306_v40, %s15682_s13  ;;  %9302 = vrot.lane.b32.xlu1 %v9301_v58, %s15666_s10  ;;  %v5730_v25 = vmul.f32 %v14536_v18, %v10700_v1  ;;  %v5726_v36 = vmul.f32 %v14536_v18, %v10578_v11  ;;  %v5738_v4 = vmul.f32 %v14536_v18, %v15734_v39 }
0x1694   : > { %v5734_v22 = vmul.f32 %v14536_v18, %v15735_v15  ;;  %v5742_v37 = vmul.f32 %v14536_v18, %v15736_v12  ;;  %v5746_v40 = vmul.f32 %v14536_v18, %v15739_v3  ;;  %v5749_v58 = vmul.f32 %v14521_v46, %v15740_v50 }
0x1696   : > { %v9321_v29 = vpack.i.bf16 %v5742_v37, %v5741_v45 }
0x1697   : > { %5777 = vrot.lane.b32.xlu0 %v5730_v25, %s15682_s13  ;;  %5761 = vrot.lane.b32.xlu1 %v5726_v36, %s15666_s10  ;;  %v5750_v25 = vmul.f32 %v14536_v18, %v15741_v31  ;;  %v15754_v36 = vld [vmem:[#allocation23_spill] sm:$0xff] }
0x1698   : > { %v5719_v30 = vmul.f32 %v14497_v42, %v15754_v36  ;;  %v10018_v42 = vld [vmem:[%s15547_s3 + $0x270] sm:$0xff]  ;;  %v10093_v36 = vld [vmem:[%s15549_s5 + $0x8] sm:$0xff] }
0x169b   : > { %9317 = vrot.lane.b32.xlu0 %v9316_v41, %s15685_s12  ;;  %9312 = vrot.lane.b32.xlu1 %v9311_v0, %s15686_s0  ;;  %v10016_v0 = vld [vmem:[%s15547_s3 + $0x278] sm:$0xff] }
0x169f   : > { %5853 = vrot.lane.b32.xlu0 %v5748_v14, %s15687_s19  ;;  %5851 = vrot.lane.b32.xlu1 %v5747_v21, %s15687_s19  ;;  %v10017_v14 = vld [vmem:[%s15547_s3 + $0x2f0] sm:$0xff] }
0x16a3   : > { %5791 = vrot.lane.b32.xlu0 %v5733_v54, %s15684_s26  ;;  %5807 = vrot.lane.b32.xlu1 %v5737_v60, %s15683_s18 }
0x16a7   : > { %5809 = vrot.lane.b32.xlu0 %v5738_v4, %s15683_s18  ;;  %5793 = vrot.lane.b32.xlu1 %v5734_v22, %s15684_s26  ;;  %v10019_v22 = vld [vmem:[%s15547_s3 + $0x2e8] sm:$0xff] }
0x16ab   : > { %5839 = vrot.lane.b32.xlu0 %v5745_v5, %s15685_s12  ;;  %9322 = vrot.lane.b32.xlu1 %v9321_v29, %s15686_s0  ;;  %v10020_v5 = vld [vmem:[%s15547_s3 + $0x268] sm:$0xff] }
0x16af   : > { %5841 = vrot.lane.b32.xlu0 %v5746_v40, %s15685_s12  ;;  %5855 = vrot.lane.b32.xlu1 %v5749_v58, %s15687_s19  ;;  %v10021_v40 = vld [vmem:[%s15547_s3 + $0x2e0] sm:$0xff] }
0x16b3   : > { %5473 = vrot.lane.b32.xlu0 %v14202_v19, %s15727_s15  ;;  %5857 = vrot.lane.b32.xlu1 %v5750_v25, %s15687_s19  ;;  %v10022_v25 = vld [vmem:[%s15547_s3 + $0x260] sm:$0xff] }
0x16b7   : > { %5477 = vrot.lane.b32.xlu0 %v14218_v13, %s15727_s15  ;;  %5471 = vrot.lane.b32.xlu1 %v14198_v32, %s15727_s15  ;;  %v10055_v13 = vld [vmem:[%s15547_s3 + $0x310] sm:$0xff] }
0x16bb   : > { %5475 = vrot.lane.b32.xlu1 %v14211_v56, %s15727_s15 }
0x16fb   : > { %v5756_v57 = vpop.permute.xlu1 %5755  ;;  %v5772_v35 = vpop.permute.xlu0 %5771 }
0x16fc   : > { %v5863_v52 = vsel %vm1085_vm6, %v5719_v30, %v5756_v57  ;;  %v5867_v41 = vsel %vm1090_vm5, %v5756_v57, %v5772_v35 }
0x16fd   : > { %5963 = vmatprep.mubr.f32.mxu1 %v5867_v41 }
0x16fe   : > { %5964 = vmatmul.mubr.f32.vlgmr.msra.gmra.mxu1 %v5863_v52 }
0x16ff   : > { %8370 = vmatpush3.msra.mxu1 %v10016_v0 }
0x1700   : > { %8371 = vmatprep.subr.mxu1 %v10017_v14  ;;  %v10024_v14 = vld [vmem:[%s15547_s3 + $0x258] sm:$0xff] }
0x1701   : > { %8372 = vmatpush3.msra.mxu1 %v10018_v42  ;;  %v9293_v21 = vpop.permute.xlu1 %9292  ;;  %v14612_v54 = vpop.permute.xlu0 %9297  ;;  %v15755_v42 = vld [vmem:[#allocation25_spill] sm:$0xff] }
0x1702   : > { %v9295_v60 = vunpack.i.h.bf16 %v9293_v21  ;;  %v9294_v4 = vunpack.i.l.bf16 %v9293_v21  ;;  %8373 = vmatprep.subr.mxu1 %v10019_v22  ;;  %v15635_v37 = vunpack.i.h.bf16 %v14612_v54  ;;  %v15636_v45 = vunpack.i.l.bf16 %v14612_v54  ;;  %v10025_v22 = vld [vmem:[%s15547_s3 + $0x2d0] sm:$0xff] }
0x1703   : > { %8374 = vmatpush3.msra.mxu1 %v10020_v5  ;;  %v5720_v21 = vmul.f32 %v14508_v23, %v15755_v42 }
0x1704   : > { %v5871_v29 = vsel %vm1095_vm8, %v5772_v35, %v9294_v4  ;;  %8375 = vmatprep.subr.mxu1 %v10021_v40  ;;  %v5875_v58 = vsel %vm1100_vm7, %v9294_v4, %v15636_v45  ;;  %v10023_v35 = vld [vmem:[%s15547_s3 + $0x2d8] sm:$0xff]  ;;  %v5876_v0 = vsel %vm1100_vm7, %v9295_v60, %v15635_v37  ;;  %v10048_v37 = vld [vmem:[%s15547_s3 + $0x210] sm:$0xff]  ;;  %v10049_v45 = vld [vmem:[%s15547_s3 + $0x320] sm:$0xff] }
0x1705   : > { %8376 = vmatpush3.msra.mxu1 %v10022_v25  ;;  %6048 = vmatprep.mubr.f32.mxu0 %v5875_v58  ;;  %v9303_v30 = vpop.permute.xlu1 %9302  ;;  %v14632_v57 = vpop.permute.xlu0 %9307  ;;  %v10026_v58 = vld [vmem:[%s15547_s3 + $0x250] sm:$0xff] }
0x1706   : > { %8377 = vmatprep.subr.mxu1 %v10023_v35  ;;  %6049 = vmatmul.mubr.f32.vlgmr.msra.gmra.mxu0 %v5871_v29  ;;  %v9304_v52 = vunpack.i.l.bf16 %v9303_v30  ;;  %v9309_v41 = vunpack.i.l.bf16 %v14632_v57  ;;  %v9305_v4 = vunpack.i.h.bf16 %v9303_v30  ;;  %v9310_v5 = vunpack.i.h.bf16 %v14632_v57  ;;  %v10027_v35 = vld [vmem:[%s15547_s3 + $0x2c8] sm:$0xff] }
0x1707   : > { %8378 = vmatpush3.msra.mxu1 %v10024_v14  ;;  %6053 = vmatprep.mubr.f32.mxu0 %v5876_v0  ;;  %v10031_v0 = vld [vmem:[%s15547_s3 + $0x240] sm:$0xff]  ;;  %v10051_v57 = vld [vmem:[%s15547_s3 + $0x208] sm:$0xff] }
0x1708   : > { %8379 = vmatprep.subr.mxu1 %v10025_v22  ;;  %v5868_v29 = vsel %vm1090_vm5, %v9304_v52, %v9309_v41  ;;  %v5872_v40 = vsel %vm1095_vm8, %v9309_v41, %v9295_v60  ;;  %8910 = vmatpush3.msra.mxu0 %v14483_v20  ;;  %v5864_v30 = vsel %vm1085_vm6, %v5720_v21, %v9304_v52  ;;  %v10028_v20 = vld [vmem:[%s15547_s3 + $0x248] sm:$0xff]  ;;  %v10029_v60 = vld [vmem:[%s15547_s3 + $0x350] sm:$0xff]  ;;  %v10030_v52 = vld [vmem:[%s15547_s3 + $0x2c0] sm:$0xff] }
0x1709   : > { %8380 = vmatpush3.msra.mxu1 %v10026_v58  ;;  %v5762_v23 = vpop.permute.xlu1 %5761  ;;  %v14656_v25 = vpop.permute.xlu0 %5777  ;;  %5968 = vmatprep.mubr.f32.mxu1 %v5868_v29  ;;  %v5869_v41 = vsel %vm1090_vm5, %v9305_v4, %v9310_v5  ;;  %v10032_v22 = vld [vmem:[%s15547_s3 + $0x2b8] sm:$0xff]  ;;  %v15756_v58 = vld [vmem:[#allocation24_spill] sm:$0xff] }
0x170a   : > { %8381 = vmatprep.subr.mxu1 %v10027_v35  ;;  %6054 = vmatmul.mubr.f32.gmra.mxu0 %v5872_v40  ;;  %v10033_v35 = vld [vmem:[%s15547_s3 + $0x238] sm:$0xff] }
0x170b   : > { %8382 = vmatpush3.msra.mxu1 %v10028_v20  ;;  %8911 = vmatprep.subr.mxu0 %v10029_v60  ;;  %v10034_v20 = vld [vmem:[%s15547_s3 + $0x348] sm:$0xff] }
0x170c   : > { %8383 = vmatprep.subr.mxu1 %v10030_v52  ;;  %5969 = vmatmul.mubr.f32.gmra.mxu1 %v5864_v30  ;;  %v5721_v30 = vmul.f32 %v14521_v46, %v15756_v58  ;;  %v10036_v46 = vld [vmem:[%s15547_s3 + $0x340] sm:$0xff] }
0x170d   : > { %8384 = vmatpush3.msra.mxu1 %v10031_v0  ;;  %5973 = vmatprep.mubr.f32.mxu1 %v5869_v41  ;;  %v14677_v14 = vpop.permute.xlu1 %9312  ;;  %v14679_v21 = vpop.permute.xlu0 %9317  ;;  %v5870_v41 = vsel %vm1090_vm5, %v5762_v23, %v14656_v25 }
0x170e   : > { %8385 = vmatprep.subr.mxu1 %v10032_v22  ;;  %8912 = vmatpush3.msra.mxu0 %v10029_v60  ;;  %v9314_v29 = vunpack.i.l.bf16 %v14677_v14  ;;  %v9319_v40 = vunpack.i.l.bf16 %v14679_v21  ;;  %v10035_v60 = vld [vmem:[%s15547_s3 + $0x2b0] sm:$0xff]  ;;  %v5865_v52 = vsel %vm1085_vm6, %v5721_v30, %v9305_v4  ;;  %v15757_v30 = vld [vmem:[#allocation26_spill] sm:$0xff] }
0x170f   : > { %8386 = vmatpush3.msra.mxu1 %v10033_v35  ;;  %8913 = vmatprep.subr.mxu0 %v10034_v20  ;;  %v10037_v4 = vld [vmem:[%s15547_s3 + $0x230] sm:$0xff] }
0x1710   : > { %8387 = vmatprep.subr.mxu1 %v10035_v60  ;;  %8914 = vmatpush3.msra.mxu0 %v10034_v20  ;;  %v5883_v35 = vsel %vm1110_vm9, %v9314_v29, %v9319_v40  ;;  %v5722_v20 = vmul.f32 %v14536_v18, %v15757_v30  ;;  %v10038_v60 = vld [vmem:[%s15547_s3 + $0x2a8] sm:$0xff]  ;;  %v10040_v40 = vld [vmem:[%s15547_s3 + $0x338] sm:$0xff] }
0x1711   : > { %5974 = vmatmul.mubr.f32.gmra.mxu1 %v5865_v52  ;;  %8915 = vmatprep.subr.mxu0 %v10036_v46  ;;  %v14703_v0 = vpop.permute.xlu1 %5851  ;;  %v14705_v22 = vpop.permute.xlu0 %5853  ;;  %v10039_v52 = vld [vmem:[%s15547_s3 + $0x228] sm:$0xff] }
0x1712   : > { %8388 = vmatpush3.msra.mxu1 %v10037_v4  ;;  %5978 = vmatprep.mubr.f32.mxu1 %v5870_v41  ;;  %v5887_v41 = vsel %vm1115_vm10, %v5883_v35, %v14703_v0  ;;  %v5866_v18 = vsel %vm1085_vm6, %v5722_v20, %v5762_v23  ;;  %v10041_v4 = vld [vmem:[%s15547_s3 + $0x2a0] sm:$0xff]  ;;  %v10044_v23 = vld [vmem:[%s15547_s3 + $0x298] sm:$0xff] }
0x1713   : > { %8389 = vmatprep.subr.mxu1 %v10038_v60  ;;  %8916 = vmatpush3.msra.mxu0 %v10036_v46  ;;  %v10043_v35 = vld [vmem:[%s15547_s3 + $0x220] sm:$0xff]  ;;  %v10045_v20 = vld [vmem:[%s15547_s3 + $0x218] sm:$0xff] }
0x1714   : > { %8390 = vmatpush3.msra.mxu1 %v10039_v52  ;;  %8917 = vmatprep.subr.mxu0 %v10040_v40  ;;  %v10042_v52 = vld [vmem:[%s15547_s3 + $0x330] sm:$0xff] }
0x1715   : > { %8391 = vmatprep.subr.mxu1 %v10041_v4  ;;  %8918 = vmatpush3.msra.mxu0 %v10040_v40  ;;  %v14730_v46 = vpop.permute.xlu1 %5807  ;;  %v5792_v60 = vpop.permute.xlu0 %5791  ;;  %v10046_v40 = vld [vmem:[%s15547_s3 + $0x328] sm:$0xff] }
0x1716   : > { %5979 = vmatmul.mubr.f32.gmra.mxu1 %v5866_v18  ;;  %8919 = vmatprep.subr.mxu0 %v10042_v52  ;;  %v5877_v18 = vsel %vm1100_vm7, %v5792_v60, %v14730_v46 }
0x1717   : > { %8392 = vmatpush3.msra.mxu1 %v10043_v35  ;;  %6133 = vmatprep.mubr.f32.mxu1 %v5887_v41  ;;  %v9315_v35 = vunpack.i.h.bf16 %v14677_v14 }
0x1718   : > { %8393 = vmatprep.subr.mxu1 %v10044_v23  ;;  %8920 = vmatpush3.msra.mxu0 %v10042_v52  ;;  %v9320_v52 = vunpack.i.h.bf16 %v14679_v21  ;;  %v10047_v23 = vld [vmem:[%s15547_s3 + $0x290] sm:$0xff]  ;;  %v10050_v21 = vld [vmem:[%s15547_s3 + $0x288] sm:$0xff] }
0x1719   : > { %8394 = vmatpush3.msra.mxu1 %v10045_v20  ;;  %8921 = vmatprep.subr.mxu0 %v10046_v40  ;;  %v5794_v41 = vpop.permute.xlu1 %5793  ;;  %v14749_v4 = vpop.permute.xlu0 %5809  ;;  %v5873_v20 = vsel %vm1095_vm8, %v9310_v5, %v5792_v60  ;;  %v10052_v60 = vld [vmem:[%s15547_s3 + $0x318] sm:$0xff] }
0x171a   : > { %8395 = vmatprep.subr.mxu1 %v10047_v23  ;;  %8922 = vmatpush3.msra.mxu0 %v10046_v40  ;;  %v5878_v40 = vsel %vm1100_vm7, %v5794_v41, %v14749_v4  ;;  %v10053_v23 = vld [vmem:[%s15547_s3 + $0x280] sm:$0xff] }
0x171b   : > { %8396 = vmatpush3.msra.mxu1 %v10048_v37  ;;  %8923 = vmatprep.subr.mxu0 %v10049_v45 }
0x171c   : > { %6058 = vmatprep.mubr.f32.mxu0 %v5877_v18  ;;  %8397 = vmatprep.subr.mxu1 %v10050_v21  ;;  %v5884_v18 = vsel %vm1110_vm9, %v9315_v35, %v9320_v52  ;;  %v10054_v52 = vld [vmem:[%s15547_s3 + $0x200] sm:$0xff] }
0x171d   : > { %8924 = vmatpush3.msra.mxu0 %v10049_v45  ;;  %8398 = vmatpush3.msra.mxu1 %v10051_v57  ;;  %v14771_v5 = vpop.permute.xlu1 %9322  ;;  %v5840_v37 = vpop.permute.xlu0 %5839  ;;  %v5874_v57 = vsel %vm1095_vm8, %v14656_v25, %v5794_v41  ;;  %v5888_v14 = vsel %vm1115_vm10, %v5884_v18, %v14705_v22  ;;  %v10056_v25 = vld [vmem:[%s15547_s3 + $0x308] sm:$0xff]  ;;  %v10057_v18 = vld [vmem:[%s15547_s3 + $0x300] sm:$0xff] }
0x171e   : > { %6059 = vmatmul.mubr.f32.gmra.mxu0 %v5873_v20  ;;  %8925 = vmatprep.subr.mxu0 %v10052_v60  ;;  %v9324_v45 = vunpack.i.l.bf16 %v14771_v5  ;;  %v15758_v20 = vunpack.i.l.bf16 %v14612_v54 }
0x171f   : > { %8399 = vmatprep.subr.mxu1 %v10053_v23  ;;  %8926 = vmatpush3.msra.mxu0 %v10052_v60 }
0x1720   : > { %v5879_v21 = vsel %vm1105_vm11, %v15758_v20, %v9314_v29  ;;  %8400 = vmatpush3.msra.mxu1 %v10054_v52  ;;  %8927 = vmatprep.subr.mxu0 %v10055_v13  ;;  %v5885_v60 = vsel %vm1110_vm9, %v9324_v45, %v5840_v37  ;;  %v9325_v37 = vunpack.i.h.bf16 %v14771_v5 }
0x1721   : > { %6063 = vmatprep.mubr.f32.mxu0 %v5878_v40  ;;  %6134 = vmatmul.mubr.f32.vlgmr.msra.gmra.mxu1 %v5879_v21  ;;  %v5856_v29 = vpop.permute.xlu1 %5855  ;;  %v5842_v23 = vpop.permute.xlu0 %5841  ;;  %v15759_v40 = vunpack.i.h.bf16 %v14612_v54 }
0x1722   : > { %8928 = vmatpush3.msra.mxu0 %v10055_v13  ;;  %6138 = vmatprep.mubr.f32.mxu1 %v5888_v14  ;;  %v5889_v41 = vsel %vm1115_vm10, %v5885_v60, %v5856_v29  ;;  %v5886_v5 = vsel %vm1110_vm9, %v9325_v37, %v5842_v23  ;;  %v10060_v60 = vld [vmem:[%s15548_s4 + $0xf0] sm:$0xff]  ;;  %v5882_v14 = vsel %vm1105_vm11, %v14749_v4, %v9325_v37  ;;  %v10064_v23 = vld [vmem:[%s15548_s4 + $0x68] sm:$0xff]  ;;  %v10065_v4 = vld [vmem:[%s15548_s4 + $0xe0] sm:$0xff] }
0x1723   : > { %6064 = vmatmul.mubr.f32.gmra.mxu0 %v5874_v57  ;;  %8929 = vmatprep.subr.mxu0 %v10056_v25  ;;  %v5880_v13 = vsel %vm1105_vm11, %v15759_v40, %v9315_v35  ;;  %v5881_v35 = vsel %vm1105_vm11, %v14730_v46, %v9324_v45  ;;  %v10059_v57 = vld [vmem:[%s15548_s4 + $0x78] sm:$0xff]  ;;  %v10061_v46 = vld [vmem:[%s15548_s4 + $0x70] sm:$0xff]  ;;  %v10062_v45 = vld [vmem:[%s15548_s4 + $0xe8] sm:$0xff] }
0x1724   : > { %8930 = vmatpush3.msra.mxu0 %v10056_v25  ;;  %8933 = vmatprep.mubr.msk.f32.mxu0 %vm1120_vm12, %v14703_v0  ;;  %v10058_v0 = vld [vmem:[%s15548_s4 + $0xf8] sm:$0xff] }
0x1725   : > { %8931 = vmatprep.subr.mxu0 %v10057_v18  ;;  %6139 = vmatmul.mubr.f32.gmra.mxu1 %v5880_v13  ;;  %v5858_v20 = vpop.permute.xlu1 %5857  ;;  %v14812_v21 = vpop.permute.xlu0 %5473  ;;  %v10067_v37 = vld [vmem:[%s15548_s4 + $0xd8] sm:$0xff]  ;;  %v10069_v13 = vld [vmem:[%s15548_s4 + $0xd0] sm:$0xff] }
0x1726   : > { %8932 = vmatpush3.msra.mxu0 %v10057_v18  ;;  %6143 = vmatprep.mubr.f32.mxu1 %v5889_v41  ;;  %7261 = vst.msk [vmem:[%s10362_s24 + $0x48] sm:$0xff] %vm2311_vm13, %v14812_v21  ;;  %v5890_v54 = vsel %vm1115_vm10, %v5886_v5, %v5858_v20  ;;  %v10066_v41 = vld [vmem:[%s15548_s4 + $0x60] sm:$0xff]  ;;  %v10068_v40 = vld [vmem:[%s15548_s4 + $0x58] sm:$0xff]  ;;  %v10070_v18 = vld [vmem:[%s15548_s4 + $0x50] sm:$0xff] }
0x1727   : > { %8934 = vmatmul.mubr.msk.f32.vlgmr.msra.gmra.mxu0 %vm1120_vm12, %v14705_v22  ;;  %8441 = vmatprep.subr.mxu1 %v10058_v0  ;;  %v10072_v5 = vld [vmem:[%s15548_s4 + $0x48] sm:$0xff]  ;;  %v10074_v0 = vld [vmem:[%s15548_s4 + $0x40] sm:$0xff] }
0x1728   : > { %8936 = vmatprep.mubr.msk.f32.mxu0 %vm1120_vm12, %v5856_v29  ;;  %8442 = vmatpush3.msra.mxu1 %v10059_v57  ;;  %v14855_v29 = vld [vmem:[%s15546_s2] sm:$0xff]  ;;  %v10076_v57 = vld [vmem:[%s15548_s4 + $0x38] sm:$0xff] }
0x1729   : > { %6144 = vmatmul.mubr.f32.gmra.mxu1 %v5881_v35  ;;  %v14830_v52 = vpop.permute.xlu1 %5471  ;;  %v14832_v22 = vpop.permute.xlu0 %5477  ;;  %8443 = vmatprep.subr.mxu1 %v10060_v60  ;;  %v10075_v35 = vld [vmem:[%s15548_s4 + $0xb8] sm:$0xff]  ;;  %v10077_v60 = vld [vmem:[%s15548_s4 + $0xb0] sm:$0xff] }
0x172a   : > { %6148 = vmatprep.mubr.f32.mxu1 %v5890_v54  ;;  %7260 = vst.msk [vmem:[%s10362_s24 + $0x40] sm:$0xff] %vm2311_vm13, %v14830_v52  ;;  %7263 = vst.msk [vmem:[%s10362_s24 + $0x58] sm:$0xff] %vm2311_vm13, %v14832_v22  ;;  %8444 = vmatpush3.msra.mxu1 %v10061_v46  ;;  %v10073_v54 = vld [vmem:[%s15548_s4 + $0xc0] sm:$0xff]  ;;  %v10078_v46 = vld [vmem:[%s15548_s4 + $0x30] sm:$0xff] }
0x172b   : > { %8937 = vmatmul.mubr.msk.f32.gmra.mxu0 %vm1120_vm12, %v5858_v20  ;;  %8445 = vmatprep.subr.mxu1 %v10062_v45  ;;  %v10071_v20 = vld [vmem:[%s15548_s4 + $0xc8] sm:$0xff] }
0x172c   : > { %8943 = vmatprep.mubr.msk.f32.mxu0 %vm584_vm1, %v14855_v29  ;;  %8446 = vmatpush3.msra.mxu1 %v10064_v23  ;;  %v10079_v45 = vld [vmem:[%s15548_s4 + $0xa8] sm:$0xff]  ;;  %v10081_v23 = vld [vmem:[%s15548_s4 + $0xa0] sm:$0xff] }
0x172d   : > { %6149 = vmatmul.mubr.f32.gmra.mxu1 %v5882_v14  ;;  %v14862_v25 = vpop.permute.xlu1 %5475  ;;  %8447 = vmatprep.subr.mxu1 %v10065_v4  ;;  %v10080_v14 = vld [vmem:[%s15548_s4 + $0x28] sm:$0xff]  ;;  %v10082_v4 = vld [vmem:[%s15548_s4 + $0x20] sm:$0xff] }
0x172e   : > { %7262 = vst.msk [vmem:[%s10362_s24 + $0x50] sm:$0xff] %vm2311_vm13, %v14862_v25  ;;  %8448 = vmatpush3.msra.mxu1 %v10066_v41  ;;  %v10083_v41 = vld [vmem:[%s15548_s4 + $0x98] sm:$0xff] }
0x172f   : > { %8449 = vmatprep.subr.mxu1 %v10067_v37  ;;  %v10084_v37 = vld [vmem:[%s15548_s4 + $0x18] sm:$0xff] }
0x1730   : > { %8450 = vmatpush3.msra.mxu1 %v10068_v40  ;;  %v10085_v40 = vld [vmem:[%s15548_s4 + $0x90] sm:$0xff] }
0x1731   : > { %8451 = vmatprep.subr.mxu1 %v10069_v13  ;;  %v10086_v13 = vld [vmem:[%s15548_s4 + $0x10] sm:$0xff] }
0x1732   : > { %8452 = vmatpush3.msra.mxu1 %v10070_v18  ;;  %v10087_v18 = vld [vmem:[%s15548_s4 + $0x88] sm:$0xff] }
0x1733   : > { %8453 = vmatprep.subr.mxu1 %v10071_v20  ;;  %v10088_v20 = vld [vmem:[%s15548_s4 + $0x8] sm:$0xff] }
0x1734   : > { %8454 = vmatpush3.msra.mxu1 %v10072_v5  ;;  %v10089_v5 = vld [vmem:[%s15548_s4 + $0x80] sm:$0xff] }
0x1735   : > { %8455 = vmatprep.subr.mxu1 %v10073_v54  ;;  %v10090_v54 = vld [vmem:[%s15548_s4] sm:$0xff] }
0x1736   : > { %8456 = vmatpush3.msra.mxu1 %v10074_v0  ;;  %v10091_v0 = vld [vmem:[%s15548_s4 + $0x2f8] sm:$0xff] }
0x1737   : > { %8457 = vmatprep.subr.mxu1 %v10075_v35 }
0x1738   : > { %8458 = vmatpush3.msra.mxu1 %v10076_v57 }
0x1739   : > { %8459 = vmatprep.subr.mxu1 %v10077_v60 }
0x173a   : > { %8460 = vmatpush3.msra.mxu1 %v10078_v46 }
0x173b   : > { %8461 = vmatprep.subr.mxu1 %v10079_v45 }
0x173c   : > { %8462 = vmatpush3.msra.mxu1 %v10080_v14 }
0x173d   : > { %8463 = vmatprep.subr.mxu1 %v10081_v23 }
0x173e   : > { %8464 = vmatpush3.msra.mxu1 %v10082_v4 }
0x173f   : > { %8465 = vmatprep.subr.mxu1 %v10083_v41 }
0x1740   : > { %8466 = vmatpush3.msra.mxu1 %v10084_v37 }
0x1741   : > { %8467 = vmatprep.subr.mxu1 %v10085_v40 }
0x1742   : > { %8468 = vmatpush3.msra.mxu1 %v10086_v13 }
0x1743   : > { %8469 = vmatprep.subr.mxu1 %v10087_v18 }
0x1744   : > { %8470 = vmatpush3.msra.mxu1 %v10088_v20 }
0x1745   : > { %8471 = vmatprep.subr.mxu1 %v10089_v5 }
0x1746   : > { %8472 = vmatpush3.msra.mxu1 %v10090_v54 }
0x1747   : > { %8529 = vmatprep.subr.mxu1 %v10091_v0  ;;  %v10092_v0 = vld [vmem:[%s15549_s5] sm:$0xff] }
0x17be   : > { %v8313_v35 = vpop.f32.mrf.mxu1 }
0x17c0   : > { %v8314_v57 = vpop.f32.mrf.mxu1 }
0x17c1   : > { %v8315_v13 = vadd.f32 %v8314_v57, %v8313_v35 }
0x17c3   : > { %v5966_v32 = vadd.f32 %v10092_v0, %v8315_v13 }
0x17c6   : > { %v8357_v45 = vpop.f32.mrf.mxu0 }
0x17c8   : > { %v8358_v23 = vpop.f32.mrf.mxu0 }
0x17c9   : > { %v8359_v5 = vadd.f32 %v8358_v23, %v8357_v45 }
0x17ca   : > { %v8360_v41 = vpop.f32.mrf.mxu0 }
0x17cb   : > { %v6051_v42 = vadd.f32 %v8359_v5, %v5966_v32  ;;  %v10094_v32 = vld [vmem:[%s15549_s5 + $0x10] sm:$0xff] }
0x17cc   : > { %v8316_v60 = vpop.f32.mrf.mxu1  ;;  %v8361_v40 = vpop.f32.mrf.mxu0 }
0x17ce   : > { %v8317_v46 = vpop.f32.mrf.mxu1 }
0x17cf   : > { %v8318_v54 = vadd.f32 %v8317_v46, %v8316_v60  ;;  %v8362_v60 = vadd.f32 %v8361_v40, %v8360_v41 }
0x17d1   : > { %v8319_v14 = vpop.f32.mrf.mxu1  ;;  %v5971_v31 = vadd.f32 %v10093_v36, %v8318_v54 }
0x17d3   : > { %v8320_v4 = vpop.f32.mrf.mxu1  ;;  %v6056_v27 = vadd.f32 %v8362_v60, %v5971_v31 }
0x17d4   : > { %v8321_v57 = vadd.f32 %v8320_v4, %v8319_v14 }
0x17d6   : > { %v8322_v37 = vpop.f32.mrf.mxu1  ;;  %v5976_v13 = vadd.f32 %v10094_v32, %v8321_v57 }
0x17d8   : > { %v8323_v20 = vpop.f32.mrf.mxu1 }
0x17d9   : > { %v8324_v26 = vadd.f32 %v8323_v20, %v8322_v37 }
0x17de   : > { %v8363_v18 = vpop.f32.mrf.mxu0 }
0x17e0   : > { %v8364_v56 = vpop.f32.mrf.mxu0 }
0x17e1   : > { %v8401_v19 = vpop.f32.mrf.mxu1  ;;  %v8365_v23 = vadd.f32 %v8364_v56, %v8363_v18 }
0x17e3   : > { %v8366_v30 = vpop.f32.mrf.mxu0  ;;  %v8402_v58 = vpop.f32.mrf.mxu1 }
0x17e4   : > { %v8403_v35 = vadd.f32 %v8402_v58, %v8401_v19  ;;  %v6061_v58 = vadd.f32 %v8365_v23, %v5976_v13 }
0x17e5   : > { %v8367_v3 = vpop.f32.mrf.mxu0  ;;  %v8404_v45 = vpop.f32.mrf.mxu1 }
0x17e6   : > { %v6136_v46 = vadd.f32 %v8403_v35, %v6051_v42  ;;  %v8368_v41 = vadd.f32 %v8367_v3, %v8366_v30 }
0x17e7   : > { %v8935_v50 = vpop.f32.mrf.mxu0  ;;  %v8405_v61 = vpop.f32.mrf.mxu1 }
0x17e8   : > { %v8406_v12 = vadd.f32 %v8405_v61, %v8404_v45  ;;  %v10095_v61 = vld [vmem:[%s15549_s5 + $0x18] sm:$0xff] }
0x17e9   : > { %v6220_v5 = vpop.f32.mrf.mxu0  ;;  %v8407_v0 = vpop.f32.mrf.mxu1  ;;  %v5981_v31 = vadd.f32 %v10095_v61, %v8324_v26  ;;  %v10101_v61 = vld [vmem:[%s15548_s4 + $0x168] sm:$0xff] }
0x17ea   : > { %v6141_v36 = vadd.f32 %v8406_v12, %v6056_v27  ;;  %v6221_v19 = vadd.f32 %v6220_v5, %v6136_v46 }
0x17eb   : > { %v8408_v14 = vpop.f32.mrf.mxu1  ;;  %v8938_v4 = vpop.f32.mrf.mxu0  ;;  %v6066_v12 = vadd.f32 %v8368_v41, %v5981_v31  ;;  %v10102_v31 = vld [vmem:[%s15548_s4 + $0x1e0] sm:$0xff] }
0x17ec   : > { %v6226_v42 = vadd.f32 %v8935_v50, %v6141_v36  ;;  %v7280_v56 = vmul.f32 -1.442695, %v6221_v19  ;;  %v8409_v40 = vadd.f32 %v8408_v14, %v8407_v0 }
0x17ed   : > { %v8410_v18 = vpop.f32.mrf.mxu1  ;;  %v6230_v57 = vpop.f32.mrf.mxu0 }
0x17ee   : > { %v7281_v54 = vmul.f32 -1.442695, %v6226_v42  ;;  %9454 = vpow2.f32 %v7280_v56  ;;  %v6146_v35 = vadd.f32 %v8409_v40, %v6061_v58 }
0x17ef   : > { %v8411_v37 = vpop.f32.mrf.mxu1 }
0x17f0   : > { %9456 = vpow2.f32 %v7281_v54  ;;  %v6231_v27 = vadd.f32 %v6230_v57, %v6146_v35  ;;  %v8412_v20 = vadd.f32 %v8411_v37, %v8410_v18  ;;  %v10103_v54 = vld [vmem:[%s15548_s4 + $0x160] sm:$0xff]  ;;  %v10105_v35 = vld [vmem:[%s15548_s4 + $0x158] sm:$0xff]  ;;  %v10106_v57 = vld [vmem:[%s15548_s4 + $0x1d0] sm:$0xff] }
0x17f1   : > { %v10107_v37 = vld [vmem:[%s15548_s4 + $0x150] sm:$0xff] }
0x17f2   : > { %v7282_v45 = vmul.f32 -1.442695, %v6231_v27  ;;  %v6151_v3 = vadd.f32 %v8412_v20, %v6066_v12  ;;  %v10108_v12 = vld [vmem:[%s15548_s4 + $0x1c8] sm:$0xff]  ;;  %v10110_v20 = vld [vmem:[%s15548_s4 + $0x1c0] sm:$0xff] }
0x17f3   : > { %v10109_v27 = vld [vmem:[%s15548_s4 + $0x148] sm:$0xff] }
0x17f4   : > { %9458 = vpow2.f32 %v7282_v45  ;;  %v6236_v50 = vadd.f32 %v8938_v4, %v6151_v3  ;;  %v10111_v45 = vld [vmem:[%s15548_s4 + $0x140] sm:$0xff]  ;;  %v10112_v3 = vld [vmem:[%s15548_s4 + $0x1b8] sm:$0xff] }
0x17f6   : > { %v7283_v30 = vmul.f32 -1.442695, %v6236_v50  ;;  %v10113_v50 = vld [vmem:[%s15548_s4 + $0x138] sm:$0xff] }
0x17f8   : > { %9460 = vpow2.f32 %v7283_v30  ;;  %v10114_v30 = vld [vmem:[%s15548_s4 + $0x1b0] sm:$0xff] }
0x17fb   : > { %v9455_v60 = vpop.eup %9454 }
0x17fc   : > { %v6251_v46 = vadd.f32 1.0, %v9455_v60  ;;  %v10115_v60 = vld [vmem:[%s15548_s4 + $0x130] sm:$0xff] }
0x17fd   : > { %v9457_v23 = vpop.eup %9456 }
0x17fe   : > { %v6252_v32 = vadd.f32 1.0, %v9457_v23  ;;  %9462 = vrcp.f32 %v6251_v46  ;;  %v10116_v46 = vld [vmem:[%s15548_s4 + $0x1a8] sm:$0xff] }
0x17ff   : > { %v10117_v23 = vld [vmem:[%s15548_s4 + $0x128] sm:$0xff] }
0x1800   : > { %9464 = vrcp.f32 %v6252_v32  ;;  %v10118_v32 = vld [vmem:[%s15548_s4 + $0x1a0] sm:$0xff] }
0x1801   : > { %v9459_v26 = vpop.eup %9458 }
0x1802   : > { %v6253_v13 = vadd.f32 1.0, %v9459_v26  ;;  %v10119_v26 = vld [vmem:[%s15548_s4 + $0x120] sm:$0xff] }
0x1804   : > { %9466 = vrcp.f32 %v6253_v13  ;;  %v10120_v13 = vld [vmem:[%s15548_s4 + $0x198] sm:$0xff] }
0x1805   : > { %v9461_v5 = vpop.eup %9460 }
0x1806   : > { %v6254_v0 = vadd.f32 1.0, %v9461_v5  ;;  %v10121_v5 = vld [vmem:[%s15548_s4 + $0x118] sm:$0xff] }
0x1808   : > { %9468 = vrcp.f32 %v6254_v0  ;;  %v10122_v0 = vld [vmem:[%s15548_s4 + $0x190] sm:$0xff] }
0x180b   : > { %v14960_v36 = vpop.eup %9462 }
0x180c   : > { %v6263_v19 = vmul.f32 %v14960_v36, %v14830_v52 }
0x180d   : > { %v14964_v58 = vpop.eup %9464 }
0x180e   : > { %6271 = vrot.lane.b32.xlu1 %v6263_v19, %s15679_s20  ;;  %v6264_v14 = vmul.f32 %v14964_v58, %v14812_v21  ;;  %v10123_v19 = vld [vmem:[%s15548_s4 + $0x110] sm:$0xff] }
0x1810   : > { %6273 = vrot.lane.b32.xlu0 %v6264_v14, %s15679_s20  ;;  %v10124_v14 = vld [vmem:[%s15548_s4 + $0x188] sm:$0xff] }
0x1811   : > { %v14970_v4 = vpop.eup %9466 }
0x1812   : > { %v6265_v41 = vmul.f32 %v14970_v4, %v14862_v25 }
0x1814   : > { %6275 = vrot.lane.b32.xlu1 %v6265_v41, %s15679_s20  ;;  %v10125_v41 = vld [vmem:[%s15548_s4 + $0x108] sm:$0xff] }
0x1815   : > { %v14975_v42 = vpop.eup %9468 }
0x1816   : > { %v6266_v52 = vmul.f32 %v14975_v42, %v14832_v22 }
0x1818   : > { %6277 = vrot.lane.b32.xlu0 %v6266_v52, %s15679_s20  ;;  %v10126_v52 = vld [vmem:[%s15548_s4 + $0x180] sm:$0xff] }
0x1880   : > { %v6272_v56 = vpop.permute.xlu1 %6271 }
0x1881   : > { %v14988_v25 = vsel %vm579_vm2, %v14226_v24, %v6272_v56  ;;  %v10127_v56 = vld [vmem:[%s15548_s4 + $0x100] sm:$0xff] }
0x1882   : > { %v6274_v40 = vpop.permute.xlu0 %6273 }
0x1883   : > { %v14982_v21 = vsel %vm579_vm2, %v14223_v38, %v6274_v40  ;;  %v15117_v40 = vld [vmem:[%s15548_s4 + $0x358] sm:$0xff] }
0x1884   : > { %8939 = vmatprep.subr.mxu0 %v14982_v21 }
0x1885   : > { %8940 = vmatpush3.msra.mxu0 %v14982_v21 }
0x1886   : > { %8941 = vmatprep.subr.mxu0 %v14988_v25  ;;  %v6276_v38 = vpop.permute.xlu1 %6275 }
0x1887   : > { %8942 = vmatpush3.msra.mxu0 %v14988_v25  ;;  %v15006_v24 = vsel %vm579_vm2, %v14264_v62, %v6276_v38  ;;  %v10097_v62 = vld [vmem:[%s15548_s4 + $0x178] sm:$0xff] }
0x1888   : > { %8944 = vmatmul.mubr.msk.f32.vlgmr.msra.gmra.mxu0 %vm584_vm1, %v14243_v44 }
0x1889   : > { %8946 = vmatprep.mubr.msk.f32.mxu0 %vm584_vm1, %v14256_v16 }
0x188a   : > { %v6278_v22 = vpop.permute.xlu0 %6277 }
0x188b   : > { %v14998_v18 = vsel %vm579_vm2, %v14248_v43, %v6278_v22  ;;  %v10096_v43 = vld [vmem:[%s15548_s4 + $0x1f8] sm:$0xff] }
0x188c   : > { %8947 = vmatmul.mubr.msk.f32.gmra.mxu0 %vm584_vm1, %v14279_v63  ;;  %8949 = vmatprep.subr.mxu0 %v14998_v18 }
0x188d   : > { %8950 = vmatpush3.msra.mxu0 %v14998_v18  ;;  %8953 = vmatprep.mubr.msk.f32.mxu0 %vm584_vm1, %v14855_v29  ;;  %v10098_v29 = vld [vmem:[%s15548_s4 + $0x1f0] sm:$0xff] }
0x188e   : > { %8951 = vmatprep.subr.mxu0 %v15006_v24 }
0x188f   : > { %8952 = vmatpush3.msra.mxu0 %v15006_v24 }
0x1890   : > { %8954 = vmatmul.mubr.msk.f32.vlgmr.msra.gmra.mxu0 %vm584_vm1, %v14243_v44  ;;  %8485 = vmatprep.subr.mxu0 %v10096_v43  ;;  %v10099_v44 = vld [vmem:[%s15548_s4 + $0x170] sm:$0xff] }
0x1891   : > { %8956 = vmatprep.mubr.msk.f32.mxu0 %vm584_vm1, %v14256_v16  ;;  %8486 = vmatpush3.msra.mxu0 %v10097_v62  ;;  %v10100_v16 = vld [vmem:[%s15548_s4 + $0x1e8] sm:$0xff] }
0x1892   : > { %8487 = vmatprep.subr.mxu0 %v10098_v29 }
0x1893   : > { %8488 = vmatpush3.msra.mxu0 %v10099_v44 }
0x1894   : > { %8957 = vmatmul.mubr.msk.f32.gmra.mxu0 %vm584_vm1, %v14279_v63  ;;  %8489 = vmatprep.subr.mxu0 %v10100_v16  ;;  %v10104_v63 = vld [vmem:[%s15548_s4 + $0x1d8] sm:$0xff] }
0x1895   : > { %8490 = vmatpush3.msra.mxu0 %v10101_v61 }
0x1896   : > { %8491 = vmatprep.subr.mxu0 %v10102_v31 }
0x1897   : > { %8492 = vmatpush3.msra.mxu0 %v10103_v54 }
0x1898   : > { %8493 = vmatprep.subr.mxu0 %v10104_v63 }
0x1899   : > { %8494 = vmatpush3.msra.mxu0 %v10105_v35 }
0x189a   : > { %8495 = vmatprep.subr.mxu0 %v10106_v57 }
0x189b   : > { %8496 = vmatpush3.msra.mxu0 %v10107_v37 }
0x189c   : > { %8497 = vmatprep.subr.mxu0 %v10108_v12 }
0x189d   : > { %8498 = vmatpush3.msra.mxu0 %v10109_v27 }
0x189e   : > { %8499 = vmatprep.subr.mxu0 %v10110_v20 }
0x189f   : > { %8500 = vmatpush3.msra.mxu0 %v10111_v45 }
0x18a0   : > { %8501 = vmatprep.subr.mxu0 %v10112_v3 }
0x18a1   : > { %8502 = vmatpush3.msra.mxu0 %v10113_v50 }
0x18a2   : > { %8503 = vmatprep.subr.mxu0 %v10114_v30 }
0x18a3   : > { %8504 = vmatpush3.msra.mxu0 %v10115_v60 }
0x18a4   : > { %8505 = vmatprep.subr.mxu0 %v10116_v46 }
0x18a5   : > { %8506 = vmatpush3.msra.mxu0 %v10117_v23 }
0x18a6   : > { %8507 = vmatprep.subr.mxu0 %v10118_v32 }
0x18a7   : > { %8508 = vmatpush3.msra.mxu0 %v10119_v26 }
0x18a8   : > { %8509 = vmatprep.subr.mxu0 %v10120_v13 }
0x18a9   : > { %8510 = vmatpush3.msra.mxu0 %v10121_v5 }
0x18aa   : > { %8511 = vmatprep.subr.mxu0 %v10122_v0 }
0x18ab   : > { %8512 = vmatpush3.msra.mxu0 %v10123_v19 }
0x18ac   : > { %8513 = vmatprep.subr.mxu0 %v10124_v14 }
0x18ad   : > { %8514 = vmatpush3.msra.mxu0 %v10125_v41 }
0x18ae   : > { %8515 = vmatprep.subr.mxu0 %v10126_v52 }
0x18af   : > { %8516 = vmatpush3.msra.mxu0 %v10127_v56  ;;  %v15760_v56 = vld [vmem:[#allocation14_spill] sm:$0xff] }
0x18b0   : > { %8959 = vmatprep.subr.mxu0 %v15117_v40 }
0x1948   : > { %v8945_v38 = vpop.f32.mrf.mxu0 }
0x194a   : > { %v6353_v22 = vpop.f32.mrf.mxu0 }
0x194b   : > { %6461 = vrot.lane.b32.xlu0 %v6353_v22, %s15680_s21 }
0x194c   : > { %v8948_v43 = vpop.f32.mrf.mxu0 }
0x194e   : > { %v6363_v62 = vpop.f32.mrf.mxu0 }
0x194f   : > { %6463 = vrot.lane.b32.xlu0 %v8945_v38, %s15680_s21  ;;  %6477 = vrot.lane.b32.xlu1 %v6363_v62, %s15681_s17 }
0x1950   : > { %v8955_v29 = vpop.f32.mrf.mxu0 }
0x1952   : > { %v6438_v44 = vpop.f32.mrf.mxu0 }
0x1953   : > { %6479 = vrot.lane.b32.xlu1 %v8948_v43, %s15681_s17  ;;  %6465 = vrot.lane.b32.xlu0 %v6438_v44, %s15680_s21  ;;  %v15761_v43 = vld [vmem:[#allocation19_spill] sm:$0xff] }
0x1954   : > { %v8958_v16 = vpop.f32.mrf.mxu0 }
0x1956   : > { %v6448_v61 = vpop.f32.mrf.mxu0 }
0x1957   : > { %6467 = vrot.lane.b32.xlu0 %v8955_v29, %s15680_s21  ;;  %6481 = vrot.lane.b32.xlu1 %v6448_v61, %s15681_s17  ;;  %v15763_v29 = vld [vmem:[#allocation18_spill] sm:$0xff]  ;;  %v15765_v61 = vld [vmem:[#allocation21_spill] sm:$0xff] }
0x195b   : > { %6483 = vrot.lane.b32.xlu1 %v8958_v16, %s15681_s17 }
0x19bd   : > { %v6462_v31 = vpop.permute.xlu0 %6461 }
0x19be   : > { %v6489_v35 = vsel %vm799_vm4, %v14988_v25, %v6462_v31 }
0x19c1   : > { %v6464_v54 = vpop.permute.xlu0 %6463  ;;  %v6478_v63 = vpop.permute.xlu1 %6477 }
0x19c2   : > { %v15131_v57 = vsel %vm804_vm3, %v6489_v35, %v6478_v63  ;;  %v6490_v37 = vsel %vm799_vm4, %v14982_v21, %v6464_v54  ;;  %v15766_v54 = vld [vmem:[#allocation22_spill] sm:$0xff]  ;;  %v15767_v35 = vld [vmem:[#allocation23_spill] sm:$0xff] }
0x19c3   : > { %v6505_v45 = vmul.f32 %v15131_v57, %v10514_v51  ;;  %v6501_v25 = vmul.f32 %v15131_v57, %v10572_v8 }
0x19c5   : > { %v6480_v12 = vpop.permute.xlu1 %6479  ;;  %v6466_v27 = vpop.permute.xlu0 %6465 }
0x19c6   : > { %v15136_v20 = vsel %vm804_vm3, %v6490_v37, %v6480_v12  ;;  %v6491_v51 = vsel %vm799_vm4, %v15006_v24, %v6466_v27  ;;  %v6497_v37 = vmul.f32 %v15131_v57, %v15767_v35  ;;  %v10145_v35 = vld [vmem:[%s15548_s4 + $0x2c0] sm:$0xff] }
0x19c7   : > { %v6506_v3 = vmul.f32 %v15136_v20, %v10570_v7  ;;  %v6502_v50 = vmul.f32 %v15136_v20, %v10557_v2  ;;  %v6514_v46 = vmul.f32 %v15136_v20, %v10739_v28  ;;  %v6510_v23 = vmul.f32 %v15136_v20, %v10718_v17 }
0x19c8   : > { %v6513_v2 = vmul.f32 %v15131_v57, %v10568_v6  ;;  %v6509_v7 = vmul.f32 %v15131_v57, %v10537_v59  ;;  %v6518_v24 = vmul.f32 %v15136_v20, %v10786_v49  ;;  %v6517_v59 = vmul.f32 %v15131_v57, %v10749_v34 }
0x19c9   : > { %v6482_v30 = vpop.permute.xlu1 %6481  ;;  %v9331_v60 = vpack.i.bf16 %v6506_v3, %v6505_v45  ;;  %v9326_v21 = vpack.i.bf16 %v6502_v50, %v6501_v25  ;;  %v6468_v32 = vpop.permute.xlu0 %6467  ;;  %v6522_v14 = vmul.f32 %v15136_v20, %v10792_v53  ;;  %v6526_v53 = vmul.f32 %v15136_v20, %v10794_v55 }
0x19ca   : > { %v15159_v8 = vsel %vm804_vm3, %v6491_v51, %v6482_v30  ;;  %v6492_v17 = vsel %vm799_vm4, %v14998_v18, %v6468_v32  ;;  %v9341_v26 = vpack.i.bf16 %v6514_v46, %v6513_v2  ;;  %v9336_v13 = vpack.i.bf16 %v6510_v23, %v6509_v7  ;;  %v10129_v7 = vld [vmem:[%s15548_s4 + $0x278] sm:$0xff] }
0x19cb   : > { %9332 = vrot.lane.b32.xlu1 %v9331_v60, %s15682_s13  ;;  %9327 = vrot.lane.b32.xlu0 %v9326_v21, %s15666_s10  ;;  %v6507_v6 = vmul.f32 %v15159_v8, %v10574_v9  ;;  %v9346_v0 = vpack.i.bf16 %v6518_v24, %v6517_v59  ;;  %v6503_v34 = vmul.f32 %v15159_v8, %v10576_v10  ;;  %v10131_v59 = vld [vmem:[%s15548_s4 + $0x270] sm:$0xff] }
0x19cc   : > { %v6521_v9 = vmul.f32 %v15131_v57, %v10747_v33  ;;  %v6515_v33 = vmul.f32 %v15159_v8, %v10783_v48  ;;  %v6511_v38 = vmul.f32 %v15159_v8, %v15760_v56  ;;  %v6523_v44 = vmul.f32 %v15159_v8, %v15763_v29  ;;  %v15764_v48 = vld [vmem:[#allocation20_spill] sm:$0xff] }
0x19cd   : > { %v6484_v28 = vpop.permute.xlu1 %6483  ;;  %v6527_v16 = vmul.f32 %v15159_v8, %v15764_v48  ;;  %v10143_v48 = vld [vmem:[%s15548_s4 + $0x340] sm:$0xff] }
0x19ce   : > { %v15166_v5 = vsel %vm804_vm3, %v6492_v17, %v6484_v28  ;;  %v15768_v17 = vld [vmem:[#allocation25_spill] sm:$0xff] }
0x19cf   : > { %9342 = vrot.lane.b32.xlu1 %v9341_v26, %s15683_s18  ;;  %9337 = vrot.lane.b32.xlu0 %v9336_v13, %s15684_s26  ;;  %v6508_v18 = vmul.f32 %v15166_v5, %v10700_v1  ;;  %v6504_v49 = vmul.f32 %v15166_v5, %v10578_v11  ;;  %v9361_v1 = vpack.i.bf16 %v6522_v14, %v6521_v9  ;;  %v10130_v13 = vld [vmem:[%s15548_s4 + $0x2f0] sm:$0xff]  ;;  %v10134_v14 = vld [vmem:[%s15548_s4 + $0x2e0] sm:$0xff] }
0x19d0   : > { %v6525_v11 = vmul.f32 %v15131_v57, %v10779_v47  ;;  %v6516_v52 = vmul.f32 %v15166_v5, %v15734_v39  ;;  %v6512_v10 = vmul.f32 %v15166_v5, %v15735_v15  ;;  %v6520_v55 = vmul.f32 %v15166_v5, %v15761_v43  ;;  %v15762_v39 = vld [vmem:[#allocation17_spill] sm:$0xff]  ;;  %v10140_v43 = vld [vmem:[%s15548_s4 + $0x348] sm:$0xff] }
0x19d1   : > { %v9356_v19 = vpack.i.bf16 %v6508_v18, %v6507_v6  ;;  %v9351_v41 = vpack.i.bf16 %v6504_v49, %v6503_v34  ;;  %v6519_v15 = vmul.f32 %v15159_v8, %v15762_v39  ;;  %v6524_v31 = vmul.f32 %v15166_v5, %v15765_v61  ;;  %v10135_v34 = vld [vmem:[%s15548_s4 + $0x260] sm:$0xff] }
0x19d2   : > { %v9371_v47 = vpack.i.bf16 %v6516_v52, %v6515_v33  ;;  %v9366_v22 = vpack.i.bf16 %v6512_v10, %v6511_v38  ;;  %v6528_v63 = vmul.f32 %v15166_v5, %v15766_v54  ;;  %v6498_v28 = vmul.f32 %v15136_v20, %v15768_v17  ;;  %v10137_v52 = vld [vmem:[%s15548_s4 + $0x350] sm:$0xff] }
0x19d3   : > { %9347 = vrot.lane.b32.xlu0 %v9346_v0, %s15686_s0  ;;  %9357 = vrot.lane.b32.xlu1 %v9356_v19, %s15682_s13  ;;  %v9376_v62 = vpack.i.bf16 %v6520_v55, %v6519_v15  ;;  %v10132_v0 = vld [vmem:[%s15548_s4 + $0x2e8] sm:$0xff]  ;;  %v15769_v33 = vld [vmem:[#allocation24_spill] sm:$0xff] }
0x19d4   : > { %v10133_v19 = vld [vmem:[%s15548_s4 + $0x268] sm:$0xff]  ;;  %v6499_v56 = vmul.f32 %v15159_v8, %v15769_v33  ;;  %v10141_v8 = vld [vmem:[%s15548_s4 + $0x250] sm:$0xff] }
0x19d7   : > { %9352 = vrot.lane.b32.xlu0 %v9351_v41, %s15666_s10  ;;  %9362 = vrot.lane.b32.xlu1 %v9361_v1, %s15685_s12 }
0x19db   : > { %6629 = vrot.lane.b32.xlu0 %v6525_v11, %s15687_s19  ;;  %6631 = vrot.lane.b32.xlu1 %v6526_v53, %s15687_s19  ;;  %v10136_v53 = vld [vmem:[%s15548_s4 + $0x2d8] sm:$0xff] }
0x19df   : > { %9372 = vrot.lane.b32.xlu0 %v9371_v47, %s15683_s18  ;;  %9367 = vrot.lane.b32.xlu1 %v9366_v22, %s15684_s26  ;;  %v10139_v47 = vld [vmem:[%s15548_s4 + $0x2d0] sm:$0xff] }
0x19e3   : > { %9377 = vrot.lane.b32.xlu0 %v9376_v62, %s15686_s0  ;;  %6617 = vrot.lane.b32.xlu1 %v6523_v44, %s15685_s12  ;;  %v10142_v44 = vld [vmem:[%s15548_s4 + $0x2c8] sm:$0xff] }
0x19e7   : > { %6633 = vrot.lane.b32.xlu0 %v6527_v16, %s15687_s19  ;;  %6619 = vrot.lane.b32.xlu1 %v6524_v31, %s15685_s12  ;;  %v10144_v31 = vld [vmem:[%s15548_s4 + $0x248] sm:$0xff] }
0x19eb   : > { %6635 = vrot.lane.b32.xlu0 %v6528_v63, %s15687_s19 }
0x1a3d   : > { %v9328_v12 = vpop.permute.xlu0 %9327  ;;  %v9333_v27 = vpop.permute.xlu1 %9332 }
0x1a3e   : > { %v9330_v45 = vunpack.i.h.bf16 %v9328_v12  ;;  %v9329_v3 = vunpack.i.l.bf16 %v9328_v12  ;;  %v9335_v25 = vunpack.i.h.bf16 %v9333_v27  ;;  %v9334_v50 = vunpack.i.l.bf16 %v9333_v27  ;;  %v15770_v12 = vld [vmem:[#allocation26_spill] sm:$0xff] }
0x1a3f   : > { %v6500_v27 = vmul.f32 %v15166_v5, %v15770_v12  ;;  %v10149_v5 = vld [vmem:[%s15548_s4 + $0x330] sm:$0xff] }
0x1a40   : > { %v6641_v30 = vsel %vm1085_vm6, %v6497_v37, %v9329_v3  ;;  %v6645_v60 = vsel %vm1090_vm5, %v9329_v3, %v9334_v50  ;;  %v6646_v57 = vsel %vm1090_vm5, %v9330_v45, %v9335_v25  ;;  %v6642_v18 = vsel %vm1085_vm6, %v6498_v28, %v9330_v45  ;;  %v10146_v37 = vld [vmem:[%s15548_s4 + $0x338] sm:$0xff]  ;;  %v10147_v3 = vld [vmem:[%s15548_s4 + $0x240] sm:$0xff] }
0x1a41   : > { %v9338_v21 = vpop.permute.xlu0 %9337  ;;  %v15225_v46 = vpop.permute.xlu1 %9342  ;;  %6741 = vmatprep.mubr.f32.mxu1 %v6645_v60 }
0x1a42   : > { %v9339_v23 = vunpack.i.l.bf16 %v9338_v21  ;;  %v9344_v32 = vunpack.i.l.bf16 %v15225_v46  ;;  %6742 = vmatmul.mubr.f32.vlgmr.msra.gmra.mxu1 %v6641_v30  ;;  %v9340_v51 = vunpack.i.h.bf16 %v9338_v21  ;;  %v9345_v2 = vunpack.i.h.bf16 %v15225_v46  ;;  %v10148_v30 = vld [vmem:[%s15548_s4 + $0x2b8] sm:$0xff] }
0x1a43   : > { %8530 = vmatpush3.msra.mxu1 %v10129_v7  ;;  %6746 = vmatprep.mubr.f32.mxu1 %v6646_v57  ;;  %v10151_v57 = vld [vmem:[%s15548_s4 + $0x2b0] sm:$0xff] }
0x1a44   : > { %v6649_v26 = vsel %vm1095_vm8, %v9334_v50, %v9339_v23  ;;  %8531 = vmatprep.subr.mxu1 %v10130_v13  ;;  %v6653_v24 = vsel %vm1100_vm7, %v9339_v23, %v9344_v32  ;;  %v6654_v49 = vsel %vm1100_vm7, %v9340_v51, %v9345_v2  ;;  %v6650_v10 = vsel %vm1095_vm8, %v9335_v25, %v9340_v51  ;;  %v10150_v23 = vld [vmem:[%s15548_s4 + $0x238] sm:$0xff]  ;;  %v10152_v51 = vld [vmem:[%s15548_s4 + $0x328] sm:$0xff] }
0x1a45   : > { %8532 = vmatpush3.msra.mxu1 %v10131_v59  ;;  %v15245_v6 = vpop.permute.xlu0 %9347  ;;  %6826 = vmatprep.mubr.f32.mxu0 %v6653_v24  ;;  %v15247_v20 = vpop.permute.xlu1 %9357  ;;  %v10154_v13 = vld [vmem:[%s15548_s4 + $0x2a8] sm:$0xff]  ;;  %v10155_v24 = vld [vmem:[%s15548_s4 + $0x320] sm:$0xff] }
0x1a46   : > { %8533 = vmatprep.subr.mxu1 %v10132_v0  ;;  %6747 = vmatmul.mubr.f32.gmra.mxu1 %v6642_v18  ;;  %v9359_v1 = vunpack.i.l.bf16 %v15247_v20  ;;  %v9360_v62 = vunpack.i.h.bf16 %v15247_v20  ;;  %v9349_v16 = vunpack.i.l.bf16 %v15245_v6  ;;  %v10156_v18 = vld [vmem:[%s15548_s4 + $0x228] sm:$0xff]  ;;  %v10157_v0 = vld [vmem:[%s15548_s4 + $0x2a0] sm:$0xff]  ;;  %v9350_v33 = vunpack.i.h.bf16 %v15245_v6 }
0x1a47   : > { %6827 = vmatmul.mubr.f32.vlgmr.msra.gmra.mxu0 %v6649_v26  ;;  %8534 = vmatpush3.msra.mxu1 %v10133_v19  ;;  %v10153_v26 = vld [vmem:[%s15548_s4 + $0x230] sm:$0xff]  ;;  %v10158_v19 = vld [vmem:[%s15548_s4 + $0x318] sm:$0xff] }
0x1a48   : > { %6831 = vmatprep.mubr.f32.mxu0 %v6654_v49  ;;  %8535 = vmatprep.subr.mxu1 %v10134_v14 }
0x1a49   : > { %8536 = vmatpush3.msra.mxu1 %v10135_v34  ;;  %8960 = vmatpush3.msra.mxu0 %v15117_v40  ;;  %v9353_v9 = vpop.permute.xlu0 %9352  ;;  %v15266_v41 = vpop.permute.xlu1 %9362  ;;  %v10138_v40 = vld [vmem:[%s15548_s4 + $0x258] sm:$0xff]  ;;  %v10159_v34 = vld [vmem:[%s15548_s4 + $0x220] sm:$0xff] }
0x1a4a   : > { %v9354_v11 = vunpack.i.l.bf16 %v9353_v9  ;;  %8537 = vmatprep.subr.mxu1 %v10136_v53  ;;  %8961 = vmatprep.subr.mxu0 %v10137_v52  ;;  %v9355_v38 = vunpack.i.h.bf16 %v9353_v9  ;;  %v9364_v29 = vunpack.i.l.bf16 %v15266_v41  ;;  %v10160_v9 = vld [vmem:[%s15548_s4 + $0x298] sm:$0xff]  ;;  %v9365_v53 = vunpack.i.h.bf16 %v15266_v41  ;;  %v10165_v41 = vld [vmem:[%s15548_s4 + $0x210] sm:$0xff] }
0x1a4b   : > { %6832 = vmatmul.mubr.f32.gmra.mxu0 %v6650_v10  ;;  %8538 = vmatpush3.msra.mxu1 %v10138_v40  ;;  %v10163_v10 = vld [vmem:[%s15548_s4 + $0x290] sm:$0xff]  ;;  %v10164_v40 = vld [vmem:[%s15548_s4 + $0x308] sm:$0xff] }
0x1a4c   : > { %8962 = vmatpush3.msra.mxu0 %v10137_v52  ;;  %8539 = vmatprep.subr.mxu1 %v10139_v47  ;;  %v6647_v22 = vsel %vm1090_vm5, %v9354_v11, %v9359_v1  ;;  %v6643_v15 = vsel %vm1085_vm6, %v6499_v56, %v9354_v11  ;;  %v6648_v61 = vsel %vm1090_vm5, %v9355_v38, %v9360_v62  ;;  %v10162_v11 = vld [vmem:[%s15548_s4 + $0x218] sm:$0xff]  ;;  %v10166_v56 = vld [vmem:[%s15548_s4 + $0x288] sm:$0xff]  ;;  %v10167_v47 = vld [vmem:[%s15548_s4 + $0x300] sm:$0xff] }
0x1a4d   : > { %8963 = vmatprep.subr.mxu0 %v10140_v43  ;;  %8540 = vmatpush3.msra.mxu1 %v10141_v8  ;;  %v15293_v55 = vpop.permute.xlu0 %6629  ;;  %v15295_v39 = vpop.permute.xlu1 %6631  ;;  %v6661_v45 = vsel %vm1110_vm9, %v9349_v16, %v9364_v29  ;;  %v6644_v60 = vsel %vm1085_vm6, %v6500_v27, %v9355_v38 }
0x1a4e   : > { %8964 = vmatpush3.msra.mxu0 %v10140_v43  ;;  %6751 = vmatprep.mubr.f32.mxu1 %v6647_v22  ;;  %v6665_v21 = vsel %vm1115_vm10, %v6661_v45, %v15293_v55  ;;  %v10168_v22 = vld [vmem:[%s15548_s4 + $0x208] sm:$0xff]  ;;  %v6662_v43 = vsel %vm1110_vm9, %v9350_v33, %v9365_v53 }
0x1a4f   : > { %8541 = vmatprep.subr.mxu1 %v10142_v44  ;;  %8965 = vmatprep.subr.mxu0 %v10143_v48  ;;  %v6666_v29 = vsel %vm1115_vm10, %v6662_v43, %v15295_v39 }
0x1a50   : > { %6752 = vmatmul.mubr.f32.gmra.mxu1 %v6643_v15  ;;  %8966 = vmatpush3.msra.mxu0 %v10143_v48  ;;  %v6657_v15 = vsel %vm1105_vm11, %v9344_v32, %v9349_v16  ;;  %v6658_v32 = vsel %vm1105_vm11, %v9345_v2, %v9350_v33 }
0x1a51   : > { %8542 = vmatpush3.msra.mxu1 %v10144_v31  ;;  %6756 = vmatprep.mubr.f32.mxu1 %v6648_v61  ;;  %v15313_v54 = vpop.permute.xlu0 %9372  ;;  %v15315_v63 = vpop.permute.xlu1 %9367 }
0x1a52   : > { %8543 = vmatprep.subr.mxu1 %v10145_v35  ;;  %8967 = vmatprep.subr.mxu0 %v10146_v37  ;;  %v9374_v25 = vunpack.i.l.bf16 %v15313_v54  ;;  %v9369_v50 = vunpack.i.l.bf16 %v15315_v63  ;;  %v9375_v17 = vunpack.i.h.bf16 %v15313_v54  ;;  %v9370_v28 = vunpack.i.h.bf16 %v15315_v63 }
0x1a53   : > { %8544 = vmatpush3.msra.mxu1 %v10147_v3  ;;  %8968 = vmatpush3.msra.mxu0 %v10146_v37 }
0x1a54   : > { %8545 = vmatprep.subr.mxu1 %v10148_v30  ;;  %8969 = vmatprep.subr.mxu0 %v10149_v5  ;;  %v6655_v7 = vsel %vm1100_vm7, %v9369_v50, %v9374_v25  ;;  %v6651_v59 = vsel %vm1095_vm8, %v9359_v1, %v9369_v50  ;;  %v6656_v49 = vsel %vm1100_vm7, %v9370_v28, %v9375_v17  ;;  %v10161_v1 = vld [vmem:[%s15548_s4 + $0x310] sm:$0xff] }
0x1a55   : > { %6757 = vmatmul.mubr.f32.gmra.mxu1 %v6644_v60  ;;  %8970 = vmatpush3.msra.mxu0 %v10149_v5  ;;  %v9378_v14 = vpop.permute.xlu0 %9377  ;;  %v6652_v52 = vsel %vm1095_vm8, %v9360_v62, %v9370_v28  ;;  %v6618_v8 = vpop.permute.xlu1 %6617  ;;  %v10170_v62 = vld [vmem:[%s15548_s4 + $0x200] sm:$0xff] }
0x1a56   : > { %8546 = vmatpush3.msra.mxu1 %v10150_v23  ;;  %6911 = vmatprep.mubr.f32.mxu1 %v6665_v21  ;;  %v9379_v38 = vunpack.i.l.bf16 %v9378_v14  ;;  %v9380_v61 = vunpack.i.h.bf16 %v9378_v14  ;;  %v10171_v28 = vld [vmem:[%s15550_s6] sm:$0xff]  ;;  %v10172_v14 = vld [vmem:[%s15550_s6 + $0x8] sm:$0xff] }
0x1a57   : > { %8547 = vmatprep.subr.mxu1 %v10151_v57  ;;  %8971 = vmatprep.subr.mxu0 %v10152_v51 }
0x1a58   : > { %8548 = vmatpush3.msra.mxu1 %v10153_v26  ;;  %8972 = vmatpush3.msra.mxu0 %v10152_v51  ;;  %v6663_v6 = vsel %vm1110_vm9, %v9379_v38, %v6618_v8  ;;  %v6660_v46 = vsel %vm1105_vm11, %v9375_v17, %v9380_v61 }
0x1a59   : > { %8549 = vmatprep.subr.mxu1 %v10154_v13  ;;  %8973 = vmatprep.subr.mxu0 %v10155_v24  ;;  %v6634_v20 = vpop.permute.xlu0 %6633  ;;  %v6620_v48 = vpop.permute.xlu1 %6619 }
0x1a5a   : > { %6836 = vmatprep.mubr.f32.mxu0 %v6655_v7  ;;  %8550 = vmatpush3.msra.mxu1 %v10156_v18  ;;  %v6667_v16 = vsel %vm1115_vm10, %v6663_v6, %v6634_v20  ;;  %v6664_v31 = vsel %vm1110_vm9, %v9380_v61, %v6620_v48  ;;  %v10174_v6 = vld [vmem:[%s15550_s6 + $0x18] sm:$0xff] }
0x1a5b   : > { %8974 = vmatpush3.msra.mxu0 %v10155_v24  ;;  %8551 = vmatprep.subr.mxu1 %v10157_v0 }
0x1a5c   : > { %6837 = vmatmul.mubr.f32.gmra.mxu0 %v6651_v59  ;;  %8975 = vmatprep.subr.mxu0 %v10158_v19 }
0x1a5d   : > { %6841 = vmatprep.mubr.f32.mxu0 %v6656_v49  ;;  %8552 = vmatpush3.msra.mxu1 %v10159_v34  ;;  %v6636_v44 = vpop.permute.xlu0 %6635 }
0x1a5e   : > { %8976 = vmatpush3.msra.mxu0 %v10158_v19  ;;  %8553 = vmatprep.subr.mxu1 %v10160_v9  ;;  %v6668_v63 = vsel %vm1115_vm10, %v6664_v31, %v6636_v44 }
0x1a5f   : > { %8977 = vmatprep.subr.mxu0 %v10161_v1  ;;  %8554 = vmatpush3.msra.mxu1 %v10162_v11 }
0x1a60   : > { %8978 = vmatpush3.msra.mxu0 %v10161_v1  ;;  %8555 = vmatprep.subr.mxu1 %v10163_v10 }
0x1a61   : > { %6842 = vmatmul.mubr.f32.gmra.mxu0 %v6652_v52  ;;  %8979 = vmatprep.subr.mxu0 %v10164_v40 }
0x1a62   : > { %8556 = vmatpush3.msra.mxu1 %v10165_v41  ;;  %8980 = vmatpush3.msra.mxu0 %v10164_v40 }
0x1a63   : > { %8983 = vmatprep.mubr.msk.f32.mxu0 %vm1120_vm12, %v15293_v55  ;;  %8557 = vmatprep.subr.mxu1 %v10166_v56  ;;  %v10169_v55 = vld [vmem:[%s15548_s4 + $0x280] sm:$0xff] }
0x1a64   : > { %8981 = vmatprep.subr.mxu0 %v10167_v47  ;;  %8558 = vmatpush3.msra.mxu1 %v10168_v22 }
0x1a65   : > { %8982 = vmatpush3.msra.mxu0 %v10167_v47  ;;  %8559 = vmatprep.subr.mxu1 %v10169_v55 }
0x1a66   : > { %8984 = vmatmul.mubr.msk.f32.vlgmr.msra.gmra.mxu0 %vm1120_vm12, %v15295_v39  ;;  %8560 = vmatpush3.msra.mxu1 %v10170_v62  ;;  %v6659_v39 = vsel %vm1105_vm11, %v9374_v25, %v9379_v38 }
0x1a67   : > { %8986 = vmatprep.mubr.msk.f32.mxu0 %vm1120_vm12, %v6634_v20  ;;  %6912 = vmatmul.mubr.f32.vlgmr.msra.gmra.mxu1 %v6657_v15  ;;  %v10173_v20 = vld [vmem:[%s15550_s6 + $0x10] sm:$0xff] }
0x1a68   : > { %6916 = vmatprep.mubr.f32.mxu1 %v6666_v29 }
0x1a6a   : > { %8987 = vmatmul.mubr.msk.f32.gmra.mxu0 %vm1120_vm12, %v6636_v44 }
0x1a6b   : > { %6917 = vmatmul.mubr.f32.gmra.mxu1 %v6658_v32 }
0x1a6c   : > { %6921 = vmatprep.mubr.f32.mxu1 %v6667_v16 }
0x1a6f   : > { %6922 = vmatmul.mubr.f32.gmra.mxu1 %v6659_v39 }
0x1a70   : > { %6926 = vmatprep.mubr.f32.mxu1 %v6668_v63 }
0x1a73   : > { %6927 = vmatmul.mubr.f32.gmra.mxu1 %v6660_v46 }
0x1b02   : > { %v8473_v2 = vpop.f32.mrf.mxu1 }
0x1b04   : > { %v8474_v37 = vpop.f32.mrf.mxu1 }
0x1b05   : > { %v8475_v57 = vadd.f32 %v8474_v37, %v8473_v2 }
0x1b06   : > { %v8476_v27 = vpop.f32.mrf.mxu1 }
0x1b07   : > { %v8517_v35 = vpop.f32.mrf.mxu0  ;;  %v6744_v26 = vadd.f32 %v10171_v28, %v8475_v57 }
0x1b08   : > { %v8477_v3 = vpop.f32.mrf.mxu1 }
0x1b09   : > { %v8518_v12 = vpop.f32.mrf.mxu0  ;;  %v8478_v13 = vadd.f32 %v8477_v3, %v8476_v27  ;;  %v7025_v27 = vsub.f32 1.0, %v14960_v36  ;;  %v15771_v3 = vld [vmem:[#allocation30_spill] sm:$0xff] }
0x1b0a   : > { %v8519_v7 = vadd.f32 %v8518_v12, %v8517_v35 }
0x1b0b   : > { %v8520_v45 = vpop.f32.mrf.mxu0  ;;  %v6749_v34 = vadd.f32 %v10172_v14, %v8478_v13 }
0x1b0c   : > { %v6829_v18 = vadd.f32 %v8519_v7, %v6744_v26 }
0x1b0d   : > { %v8521_v30 = vpop.f32.mrf.mxu0 }
0x1b0e   : > { %v8522_v0 = vadd.f32 %v8521_v30, %v8520_v45 }
0x1b10   : > { %v8479_v50 = vpop.f32.mrf.mxu1  ;;  %v6834_v52 = vadd.f32 %v8522_v0, %v6749_v34 }
0x1b12   : > { %v8480_v25 = vpop.f32.mrf.mxu1 }
0x1b13   : > { %v8481_v9 = vadd.f32 %v8480_v25, %v8479_v50  ;;  %v7021_v50 = vmul.f32 %v14960_v36, %v15771_v3  ;;  %v7026_v25 = vsub.f32 1.0, %v14964_v58 }
0x1b15   : > { %v8482_v21 = vpop.f32.mrf.mxu1  ;;  %v6754_v56 = vadd.f32 %v10173_v20, %v8481_v9 }
0x1b17   : > { %v8483_v51 = vpop.f32.mrf.mxu1 }
0x1b18   : > { %v8484_v38 = vadd.f32 %v8483_v51, %v8482_v21  ;;  %v15772_v21 = vld [vmem:[#allocation16_spill] sm:$0xff] }
0x1b1a   : > { %v6759_v44 = vadd.f32 %v10174_v6, %v8484_v38 }
0x1b1c   : > { %v8523_v5 = vpop.f32.mrf.mxu0 }
0x1b1e   : > { %v8524_v60 = vpop.f32.mrf.mxu0 }
0x1b1f   : > { %v8525_v10 = vadd.f32 %v8524_v60, %v8523_v5 }
0x1b21   : > { %v8526_v23 = vpop.f32.mrf.mxu0  ;;  %v6839_v8 = vadd.f32 %v8525_v10, %v6754_v56 }
0x1b23   : > { %v8527_v54 = vpop.f32.mrf.mxu0 }
0x1b24   : > { %v8528_v55 = vadd.f32 %v8527_v54, %v8526_v23  ;;  %v7022_v23 = vmul.f32 %v14964_v58, %v15772_v21  ;;  %v7027_v54 = vsub.f32 1.0, %v14970_v4  ;;  %v7028_v58 = vsub.f32 1.0, %v14975_v42 }
0x1b26   : > { %v8985_v24 = vpop.f32.mrf.mxu0  ;;  %v6844_v61 = vadd.f32 %v8528_v55, %v6759_v44 }
0x1b27   : > { %v8561_v17 = vpop.f32.mrf.mxu1 }
0x1b28   : > { %v6998_v11 = vpop.f32.mrf.mxu0 }
0x1b29   : > { %v8562_v59 = vpop.f32.mrf.mxu1 }
0x1b2a   : > { %v8563_v19 = vadd.f32 %v8562_v59, %v8561_v17  ;;  %v8988_v22 = vpop.f32.mrf.mxu0  ;;  %v15773_v17 = vld [vmem:[#allocation15_spill] sm:$0xff] }
0x1b2b   : > { %v8564_v49 = vpop.f32.mrf.mxu1  ;;  %v7023_v36 = vmul.f32 %v14970_v4, %v15773_v17 }
0x1b2c   : > { %v6914_v1 = vadd.f32 %v8563_v19, %v6829_v18  ;;  %v7008_v48 = vpop.f32.mrf.mxu0 }
0x1b2d   : > { %v8565_v53 = vpop.f32.mrf.mxu1 }
0x1b2e   : > { %v6999_v40 = vadd.f32 %v6998_v11, %v6914_v1  ;;  %v8566_v33 = vadd.f32 %v8565_v53, %v8564_v49 }
0x1b2f   : > { %v8567_v41 = vpop.f32.mrf.mxu1 }
0x1b30   : > { %9470 = vtanh.f32 %v6999_v40  ;;  %v6919_v47 = vadd.f32 %v8566_v33, %v6834_v52 }
0x1b31   : > { %v8568_v43 = vpop.f32.mrf.mxu1 }
0x1b32   : > { %v7004_v15 = vadd.f32 %v8985_v24, %v6919_v47  ;;  %v8569_v62 = vadd.f32 %v8568_v43, %v8567_v41  ;;  %v15774_v24 = vld [vmem:[#allocation28_spill] sm:$0xff] }
0x1b33   : > { %v8570_v29 = vpop.f32.mrf.mxu1  ;;  %v7024_v59 = vmul.f32 %v14975_v42, %v15774_v24 }
0x1b34   : > { %9472 = vtanh.f32 %v7004_v15  ;;  %v6924_v32 = vadd.f32 %v8569_v62, %v6839_v8 }
0x1b35   : > { %v8571_v16 = vpop.f32.mrf.mxu1 }
0x1b36   : > { %v7009_v31 = vadd.f32 %v7008_v48, %v6924_v32  ;;  %v8572_v39 = vadd.f32 %v8571_v16, %v8570_v29 }
0x1b38   : > { %9474 = vtanh.f32 %v7009_v31  ;;  %v6929_v63 = vadd.f32 %v8572_v39, %v6844_v61 }
0x1b3a   : > { %v7014_v46 = vadd.f32 %v8988_v22, %v6929_v63 }
0x1b3c   : > { %9476 = vtanh.f32 %v7014_v46 }
0x1b3d   : > { %v9471_v2 = vpop.eup %9470 }
0x1b3e   : > { %7033 = vrot.lane.b32.xlu1 %v9471_v2, %s15693_s30 }
0x1b41   : > { %v9473_v35 = vpop.eup %9472 }
0x1b42   : > { %7035 = vrot.lane.b32.xlu0 %v9473_v35, %s15693_s30 }
0x1b45   : > { %v9475_v37 = vpop.eup %9474 }
0x1b46   : > { %7037 = vrot.lane.b32.xlu1 %v9475_v37, %s15693_s30 }
0x1b49   : > { %v9477_v12 = vpop.eup %9476 }
0x1b4a   : > { %7039 = vrot.lane.b32.xlu0 %v9477_v12, %s15693_s30  ;;  %s15775_s30 = sld [smem:[#allocation7_spill]] }
0x1b50   : > { %s15778_s9 = sand.u32 1, %s15775_s30  }
0x1b51   : > { %s15503_s11 = scalar_lea.sflag [#allocation4], %s15778_s9 }
0x1bb0   : > { %v7034_v45 = vpop.permute.xlu1 %7033 }
0x1bb1   : > { %v7045_v30 = vmul.f32 %v7034_v45, %v7025_v27 }
0x1bb3   : > { %v7049_v5 = vadd.f32 %v7045_v30, %v7021_v50 }
0x1bb4   : > { %v7036_v60 = vpop.permute.xlu0 %7035 }
0x1bb5   : > { %v7046_v57 = vmul.f32 %v7036_v60, %v7026_v25  ;;  %7057 = vrot.lane.b32.xlu1 %v7049_v5, %s15727_s15 }
0x1bb7   : > { %v7050_v51 = vadd.f32 %v7046_v57, %v7022_v23 }
0x1bb8   : > { %v7038_v7 = vpop.permute.xlu1 %7037 }
0x1bb9   : > { %v7047_v28 = vmul.f32 %v7038_v7, %v7027_v54  ;;  %7059 = vrot.lane.b32.xlu0 %v7050_v51, %s15727_s15 }
0x1bbb   : > { %v7051_v26 = vadd.f32 %v7047_v28, %v7023_v36 }
0x1bbc   : > { %v7040_v13 = vpop.permute.xlu0 %7039 }
0x1bbd   : > { %v7048_v18 = vmul.f32 %v7040_v13, %v7028_v58  ;;  %7061 = vrot.lane.b32.xlu1 %v7051_v26, %s15727_s15 }
0x1bbf   : > { %v7052_v0 = vadd.f32 %v7048_v18, %v7024_v59 }
0x1bc1   : > { %7063 = vrot.lane.b32.xlu0 %v7052_v0, %s15727_s15 }
0x1c27   : > { %v7058_v4 = vpop.permute.xlu1 %7057 }
0x1c28   : > { %7296 = vst.msk [vmem:[%s10362_s24 + $0x60] sm:$0xff] %vm2311_vm13, %v7058_v4  ;;  %7074 = vst.msk [vmem:[#allocation2] sm:$0xff] %vm2311_vm13, %v7058_v4 }
0x1c2b   : > { %v7060_v19 = vpop.permute.xlu0 %7059 }
0x1c2c   : > { %7297 = vst.msk [vmem:[%s10362_s24 + $0x68] sm:$0xff] %vm2311_vm13, %v7060_v19  ;;  %7075 = vst.msk [vmem:[#allocation2 + $0x8] sm:$0xff] %vm2311_vm13, %v7060_v19 }
0x1c2f   : > { %v7062_v42 = vpop.permute.xlu1 %7061 }
0x1c30   : > { %7298 = vst.msk [vmem:[%s10362_s24 + $0x70] sm:$0xff] %vm2311_vm13, %v7062_v42  ;;  %7076 = vst.msk [vmem:[#allocation2 + $0x10] sm:$0xff] %vm2311_vm13, %v7062_v42 }
0x1c33   : > { %v7064_v49 = vpop.permute.xlu0 %7063 }
0x1c34   : > { %7299 = vst.msk [vmem:[%s10362_s24 + $0x78] sm:$0xff] %vm2311_vm13, %v7064_v49  ;;  %7077 = vst.msk [vmem:[#allocation2 + $0x18] sm:$0xff] %vm2311_vm13, %v7064_v49 }
0x1c35   : > { %10188 = shalt.err (!%p10185_p4)
}
0x1c36   : > { %s10189_s24 = scalar_lea.hbm %s15494_s8, 2048  ;;  %s10193_s10 = scalar_lea.hbm %s15777_s23, 4096 }
0x1c37   : > { %p10190_p7 = scmp.ne.s32.totalorder %s15494_s8, %s10189_s24  ;;  %p10194_p10 = scmp.lt.s32.totalorder %s15494_s8, %s15777_s23 }
0x1c38   : > { %p10195_p11 = scmp.lt.s32.totalorder %s10193_s10, %s10189_s24 }
0x1c39   : > { %p10191_p8 = pnand %p10190_p7, %p10343_p5 }
0x1c3a   : > { %p10196_p12 = por %p10195_p11, %p10194_p10 }
0x1c3b   : > { %p10192_p9 = pneg %p10191_p8 }
0x1c3d   : > { %p10197_p13 = pnand %p10196_p12, %p10192_p9 }
0x1c3f   : > { %10200 = shalt.err (!%p10197_p13)
}
0x1c40   : > { %s10259_s13 = smov 128  }
0x1c41   : > { %8989 = dma.vmem_to_hbm [thread:$0]  (%p10343_p5), %s15496_s16, 2048, %s15494_s8, %s15503_s11, %s10259_s13, %s10259_s13, %s15685_s12  }
0x1c42 PF: > { %s15779_s18 = sld [smem:[#allocation9_spill]] }
0x1c43   : > { %s15780_s26 = sld [smem:[#allocation6_spill]] }
0x1c48   : > { %p8995_p0 = scmp.ge.s32.totalorder %s15779_s18, 2 }
0x1c49   : > { %s7108_s19 = sand.u32 1, %s15780_s26  }
0x1c4a   : > { %p8992_p1 = pnand %p8995_p0, %p10347_p6  ;;  %s7109_s30 = scalar_lea.sflag [#allocation4], %s7108_s19 }
0x1c4c   : > { %p8993_p2 = pneg %p8992_p1 }
0x1c4e   : > { %10218 = dma.done.wait (%p8993_p2), %s7109_s30, 2048  }
0x1c4f   : > { %10220 = vsyncadd (%p8993_p2), %s7109_s30, 4294965248  ;;  %s15782_s30 = sld [smem:[#allocation10_spill]] }
0x1c50   : > { %s15783_s27 = sld [smem:[#allocation7_spill]] }
0x1c51   : > { %s15784_s28 = sld [smem:[#allocation8_spill]] }
0x1c52   : > { %s15785_s29 = sld [smem:[#allocation11_spill]] }
0x1c55   : > { %p18_p3 = scmp.ge.s32.totalorder %s15782_s30, 4  }
0x1c57   :  { %20 = sbr.rel (!%p18_p3) target bundleno = 8 (0x8), region = 97 }
0x1c5c   :  { %7114 = vsyncpa [#allocation4], 1 }
0x1c5d   :  { %7116 = vsyncpa [#allocation4 + $0x1], 1 }

</bundles_post_ra>
